<compile_context>
chip_gen: v7x
topology: tpu7x:2x2x1
jax: 0.10.0
libtpu: 0.0.40
codegen_flags: <defaults>
</compile_context>

<pallas_src>
import functools

import jax
import jax.numpy as jnp
from jax.experimental import pallas as pl
from jax.experimental.pallas import tpu as pltpu


# ----------------------------------------------------------------------------
# Pallas helpers
# ----------------------------------------------------------------------------
def _vmem_spec():
    return pl.BlockSpec(memory_space=pltpu.MemorySpace.VMEM)


def _vspecs(n):
    return [_vmem_spec() for _ in range(n)]


def _mm(a, w):
    # 2-D MXU matmul; `w` is pre-cast to bf16 on the host, f32 accumulation.
    return jnp.dot(a.astype(jnp.bfloat16), w, preferred_element_type=jnp.float32)


def _mm3(a, w):
    # [B, T, C] x [C, D] -> [B, T, D] (one MXU matmul over B*T rows).
    return jnp.einsum("btc,cd->btd", a.astype(jnp.bfloat16), w,
                      preferred_element_type=jnp.float32)


def _gru_gates(gi, gh, h, H):
    # PyTorch GRU convention (r, z, n); gi/gh already include their biases.
    r = jax.nn.sigmoid(gi[:, 0:H] + gh[:, 0:H])
    z = jax.nn.sigmoid(gi[:, H:2 * H] + gh[:, H:2 * H])
    n = jnp.tanh(gi[:, 2 * H:3 * H] + r * gh[:, 2 * H:3 * H])
    return (1.0 - z) * n + z * h


def _pad_time(y, left, right, value):
    # Pad along time (axis=1) inside the kernel via concat.
    B, _, C = y.shape
    parts = []
    if left > 0:
        parts.append(jnp.full((B, left, C), value, y.dtype))
    parts.append(y)
    if right > 0:
        parts.append(jnp.full((B, right, C), value, y.dtype))
    return jnp.concatenate(parts, axis=1) if len(parts) > 1 else y


# ----------------------------------------------------------------------------
# Kernel 1 & 3: fused (prenet) + CBHG front + bidirectional GRU (+ out-proj)
# ----------------------------------------------------------------------------
def _cbhg_stack_kernel(*refs, has_prenet, has_outproj, K, T, P, pool_w,
                       n_highway, proj_k, rnn_layers, H):
    i = 0
    x_ref = refs[i]; i += 1
    if has_prenet:
        pre1w_ref, pre1b_ref, pre2w_ref, pre2b_ref = refs[i:i + 4]; i += 4
    bankw_ref, bankb_ref = refs[i:i + 2]; i += 2
    p1w_ref, p1b_ref, p2w_ref, p2b_ref = refs[i:i + 4]; i += 4
    hww_ref, hwb_ref = refs[i:i + 2]; i += 2
    rnn_refs = []
    for _ in range(rnn_layers):
        rnn_refs.append(refs[i:i + 6]); i += 6
    if has_outproj:
        ow_ref, ob_ref = refs[i:i + 2]; i += 2
    o_ref = refs[i]

    x = x_ref[...]                                      # [B, T, Cin] f32
    B = x.shape[0]

    # --- (optional) prenet, fused into the same kernel ------------------------
    if has_prenet:
        x = jnp.maximum(_mm3(x, pre1w_ref[...]) + pre1b_ref[...], 0.0)
        x = jnp.maximum(_mm3(x, pre2w_ref[...]) + pre2b_ref[...], 0.0)
        # TODO(synk): prenet dropout omitted (inference-mode forward).
    D = x.shape[-1]

    # --- conv bank: all K branches as ONE im2col matmul -----------------------
    xp = _pad_time(x, P, P, 0.0)                        # [B, T+2P, D]
    cols = jnp.concatenate([xp[:, tau:tau + T, :] for tau in range(K)], axis=-1)
    y = jnp.maximum(_mm3(cols, bankw_ref[...]) + bankb_ref[...], 0.0)
    # TODO(synk): CBHG batch-norm layers treated as identity (inference stand-in).

    # --- maxpool along time (stride 1, PyTorch pad-then-trim convention) ------
    yp = _pad_time(y, pool_w // 2, pool_w // 2, -jnp.inf)
    m = yp[:, 0:T, :]
    for tap in range(1, pool_w):
        m = jnp.maximum(m, yp[:, tap:tap + T, :])

    # --- projection convs (im2col) + residual ---------------------------------
    pad = (proj_k - 1) // 2
    mp = _pad_time(m, pad, pad, 0.0)
    cols = jnp.concatenate([mp[:, tau:tau + T, :] for tau in range(proj_k)],
                           axis=-1)
    h = jnp.maximum(_mm3(cols, p1w_ref[...]) + p1b_ref[...], 0.0)
    hp = _pad_time(h, pad, pad, 0.0)
    cols = jnp.concatenate([hp[:, tau:tau + T, :] for tau in range(proj_k)],
                           axis=-1)
    h = _mm3(cols, p2w_ref[...]) + p2b_ref[...] + x

    # --- highway stack (H & T weights fused along N: one matmul per layer) ----
    hww, hwb = hww_ref[...], hwb_ref[...]               # [NH, D, 2D], [NH, 1, 2D]
    for l in range(n_highway):
        ht = _mm3(h, hww[l]) + hwb[l]                   # [B, T, 2D]
        hh = jnp.maximum(ht[..., 0:D], 0.0)
        tg = jax.nn.sigmoid(ht[..., D:2 * D])
        h = hh * tg + h * (1.0 - tg)

    # --- bidirectional GRU stack; input projections hoisted out of the loop ---
    seq = h
    for (wx_ref, bx_ref, whf_ref, bhf_ref, whb_ref, bhb_ref) in rnn_refs:
        whf, bhf = whf_ref[...], bhf_ref[...]
        whb, bhb = whb_ref[...], bhb_ref[...]
        # One wide matmul for the fwd+bwd input projections of ALL time steps.
        gi = _mm3(seq, wx_ref[...]) + bx_ref[...]       # [B, T, 6H]
        hf = jnp.zeros((B, H), jnp.float32)
        hb = jnp.zeros((B, H), jnp.float32)
        fw_out = [None] * T
        bw_out = [None] * T
        # TODO(synk): fully unrolled (static) time loop; switch to lax.fori_loop
        # with partial unroll + scratch refs for realistic sequence lengths.
        for t in range(T):
            hf = _gru_gates(gi[:, t, 0:3 * H], _mm(hf, whf) + bhf, hf, H)
            fw_out[t] = hf[:, None, :]
            j = T - 1 - t
            hb = _gru_gates(gi[:, j, 3 * H:6 * H], _mm(hb, whb) + bhb, hb, H)
            bw_out[j] = hb[:, None, :]
        seq = jnp.concatenate(
            [jnp.concatenate(fw_out, axis=1), jnp.concatenate(bw_out, axis=1)],
            axis=-1)                                    # [B, T, 2H]

    # --- (optional) fused output projection, single full store ----------------
    if has_outproj:
        seq = _mm3(seq, ow_ref[...]) + ob_ref[...]
    o_ref[...] = seq.astype(o_ref.dtype)


def _flat_conv(p):
    kk, ci, co = p["w"].shape
    return (p["w"].reshape(kk * ci, co).astype(jnp.bfloat16),
            p["b"].reshape(1, co))


def _cbhg_fused_args(params):
    bank = params["bank"]
    K = len(bank)
    P = K // 2
    _, cin, ns = bank[0]["w"].shape
    # Zero-pad every branch's taps to K and stack along N -> one bank weight.
    wb = jnp.zeros((K, cin, K * ns), jnp.float32)
    for idx, p in enumerate(bank):
        k = idx + 1
        tau0 = P - k // 2
        wb = wb.at[tau0:tau0 + k, :, idx * ns:(idx + 1) * ns].set(p["w"])
    bankw = wb.reshape(K * cin, K * ns).astype(jnp.bfloat16)
    bankb = jnp.concatenate([p["b"] for p in bank]).reshape(1, K * ns)

    p1w, p1b = _flat_conv(params["proj1"])
    p2w, p2b = _flat_conv(params["proj2"])

    hww = jnp.stack([jnp.concatenate([hw["h"]["w"], hw["t"]["w"]], axis=1)
                     for hw in params["highways"]]).astype(jnp.bfloat16)
    hwb = jnp.stack([jnp.concatenate([hw["h"]["b"], hw["t"]["b"]]).reshape(1, -1)
                     for hw in params["highways"]])

    rnn = []
    for fw, bw in zip(params["rnn_fw"], params["rnn_bw"]):
        rnn += [
            jnp.concatenate([fw["wx"], bw["wx"]], axis=1).astype(jnp.bfloat16),
            jnp.concatenate([fw["bx"], bw["bx"]]).reshape(1, -1),
            fw["wh"].astype(jnp.bfloat16), fw["bh"].reshape(1, -1),
            bw["wh"].astype(jnp.bfloat16), bw["bh"].reshape(1, -1),
        ]
    return [bankw, bankb, p1w, p1b, p2w, p2b, hww, hwb] + rnn, K, P


def cbhg_stack(params, x, *, pool_w, prenet=None, out_proj=None,
               out_dtype=jnp.float32):
    """One fused pallas_call: (prenet) + CBHG + bi-GRU (+ output projection)."""
    B, T, _ = x.shape
    H = params["rnn_fw"][0]["wh"].shape[0]
    fused, K, P = _cbhg_fused_args(params)
    args = [x]
    if prenet is not None:
        p1, p2 = prenet
        args += [p1["w"].astype(jnp.bfloat16), p1["b"].reshape(1, -1),
                 p2["w"].astype(jnp.bfloat16), p2["b"].reshape(1, -1)]
    args += fused
    if out_proj is not None:
        args += [out_proj["w"].astype(jnp.bfloat16),
                 out_proj["b"].reshape(1, -1)]
        out_dim = out_proj["w"].shape[1]
    else:
        out_dim = 2 * H
    kernel = functools.partial(
        _cbhg_stack_kernel,
        has_prenet=prenet is not None, has_outproj=out_proj is not None,
        K=K, T=T, P=P, pool_w=pool_w, n_highway=len(params["highways"]),
        proj_k=3, rnn_layers=len(params["rnn_fw"]), H=H)
    return pl.pallas_call(
        kernel,
        out_shape=jax.ShapeDtypeStruct((B, T, out_dim), out_dtype),
        in_specs=_vspecs(len(args)),
        out_specs=_vmem_spec(),
    )(*args)


# ----------------------------------------------------------------------------
# Kernel 2: fused autoregressive decoder loop
# ----------------------------------------------------------------------------
def _decoder_kernel(enc_ref, pre1w_ref, pre1b_ref, pre2w_ref, pre2b_ref,
                    awx_ref, awh_ref, abx_ref, abh_ref,
                    pdw_ref, pdb_ref,
                    dwx_ref, dwh_ref, dbx_ref, dbh_ref,
                    mw_ref, mb_ref,
                    inp0_ref, attn0_ref, dech0_ref,
                    o_ref, *, max_len, n_layers, h_attn, h_main):
    # Load everything ONCE (weights + encoder memory are bf16 already), so no
    # f32->bf16 packing is re-emitted inside the unrolled decode loop.
    enc = enc_ref[...]                                  # [B, Tenc, Denc] bf16
    pre1w, pre1b = pre1w_ref[...], pre1b_ref[...]
    pre2w, pre2b = pre2w_ref[...], pre2b_ref[...]
    awx, awh, abx, abh = awx_ref[...], awh_ref[...], abx_ref[...], abh_ref[...]
    pdw, pdb = pdw_ref[...], pdb_ref[...]
    dwx, dwh, dbx, dbh = dwx_ref[...], dwh_ref[...], dbx_ref[...], dbh_ref[...]
    mw, mb = mw_ref[...], mb_ref[...]

    inp = inp0_ref[...]
    attn_h = attn0_ref[...]
    dec_h = [dech0_ref[l] for l in range(n_layers)]

    mel_frames = []
    # TODO(synk): fully unrolled autoregressive loop; use lax.fori_loop with
    # partial unroll + chunked HBM writeback for realistic max_len.
    for _ in range(max_len):
        # decoder prenet (dropout omitted: inference forward)
        h = jnp.maximum(_mm(inp, pre1w) + pre1b, 0.0)
        h = jnp.maximum(_mm(h, pre2w) + pre2b, 0.0)
        # attention GRU cell
        attn_h = _gru_gates(_mm(h, awx) + abx, _mm(attn_h, awh) + abh,
                            attn_h, h_attn)
        # dot-product attention over the bf16 encoder memory (MXU einsums).
        # TODO(synk): canonical Tacotron-1 uses Bahdanau attention; reference
        # Decoder source was not provided, dot-product stand-in kept.
        q = attn_h.astype(jnp.bfloat16)[:, None, :]                  # [B, 1, D]
        s = jnp.einsum("bqd,btd->bqt", q, enc,
                       preferred_element_type=jnp.float32)           # [B, 1, T]
        s = s - jnp.max(s, axis=-1, keepdims=True)
        p = jnp.exp(s)
        wgt = p * pl.reciprocal(jnp.sum(p, axis=-1, keepdims=True), approx=True)
        ctx = jnp.einsum("bqt,btd->bqd", wgt.astype(jnp.bfloat16), enc,
                         preferred_element_type=jnp.float32)[:, 0, :]
        # project [attn_h ; ctx] to the residual decoder-stack input
        x_l = _mm(jnp.concatenate([attn_h, ctx], axis=-1), pdw) + pdb
        for layer in range(n_layers):                   # residual GRU stack
            hl = _gru_gates(_mm(x_l, dwx[layer]) + dbx[layer],
                            _mm(dec_h[layer], dwh[layer]) + dbh[layer],
                            dec_h[layer], h_main)
            dec_h[layer] = hl
            x_l = x_l + hl
        mel_frames.append((_mm(x_l, mw) + mb)[:, None, :])           # [B,1,R*nc]
        inp = x_l
        # TODO(synk): reference Decoder feeds an unknown quantity back to the
        # prenet (source not given); the decoder-stack output is used, which is
        # consistent with start_token having main_rnn_size features.

    o_ref[...] = jnp.concatenate(mel_frames, axis=1)    # single full store


# ----------------------------------------------------------------------------
# Parameter construction (deterministic, in-script)
# ----------------------------------------------------------------------------
def _init(key, shape, scale=0.08):
    return scale * jax.random.normal(key, shape, dtype=jnp.float32)


def make_linear_params(key, in_dim, out_dim):
    k1, k2 = jax.random.split(key)
    return {"w": _init(k1, (in_dim, out_dim)), "b": _init(k2, (out_dim,))}


def make_gru_params(key, in_dim, hidden):
    k1, k2, k3, k4 = jax.random.split(key, 4)
    return {"wx": _init(k1, (in_dim, 3 * hidden)),
            "wh": _init(k2, (hidden, 3 * hidden)),
            "bx": _init(k3, (3 * hidden,)),
            "bh": _init(k4, (3 * hidden,))}


def make_conv_params(key, k, cin, cout):
    k1, k2 = jax.random.split(key)
    return {"w": _init(k1, (k, cin, cout)), "b": _init(k2, (cout,))}


def make_cbhg_params(key, in_dim, K, bank_ch, proj_size, rnn_size, rnn_layers,
                     n_highway=4):
    ks = iter(jax.random.split(key, 128))
    bank = [make_conv_params(next(ks), k, in_dim, bank_ch) for k in range(1, K + 1)]
    proj1 = make_conv_params(next(ks), 3, K * bank_ch, proj_size)
    proj2 = make_conv_params(next(ks), 3, proj_size, in_dim)
    highways = [{"h": make_linear_params(next(ks), in_dim, in_dim),
                 "t": make_linear_params(next(ks), in_dim, in_dim)}
                for _ in range(n_highway)]
    rnn_fw, rnn_bw = [], []
    d = in_dim
    for _ in range(rnn_layers):
        rnn_fw.append(make_gru_params(next(ks), d, rnn_size))
        rnn_bw.append(make_gru_params(next(ks), d, rnn_size))
        d = 2 * rnn_size
    return {"bank": bank, "proj1": proj1, "proj2": proj2, "highways": highways,
            "rnn_fw": rnn_fw, "rnn_bw": rnn_bw}


def make_encoder_params(key, cfg):
    ks = iter(jax.random.split(key, 8))
    pu = cfg["enc_prenet_units"]
    return {
        "pre1": make_linear_params(next(ks), cfg["n_channels"], pu[0]),
        "pre2": make_linear_params(next(ks), pu[0], pu[1]),
        "cbhg": make_cbhg_params(next(ks), pu[1], cfg["enc_k"], cfg["ns"],
                                 cfg["enc_proj_size"], cfg["enc_rnn_size"],
                                 cfg["enc_rnn_layers"]),
    }


def make_decoder_params(key, cfg):
    ks = iter(jax.random.split(key, 32))
    ctx_dim = 2 * cfg["enc_rnn_size"]
    pu = cfg["dec_prenet_units"]
    return {
        "pre1": make_linear_params(next(ks), cfg["main_rnn_size"], pu[0]),
        "pre2": make_linear_params(next(ks), pu[0], pu[1]),
        "attn_rnn": make_gru_params(next(ks), pu[1], ctx_dim),
        "proj_dec": make_linear_params(next(ks), 2 * ctx_dim, cfg["main_rnn_size"]),
        "dec_rnn": [make_gru_params(next(ks), cfg["main_rnn_size"],
                                    cfg["main_rnn_size"])
                    for _ in range(cfg["main_rnn_layers"])],
        "mel_proj": make_linear_params(next(ks), cfg["main_rnn_size"],
                                       cfg["r"] * cfg["n_channels"]),
        "post_cbhg": make_cbhg_params(next(ks), cfg["n_channels"], cfg["dec_k"],
                                      cfg["ns"], cfg["dec_proj_size"],
                                      cfg["dec_rnn_size"], cfg["dec_rnn_layers"]),
        "out_proj": make_linear_params(next(ks), 2 * cfg["dec_rnn_size"],
                                       cfg["n_channels"]),
    }


def make_tacotron_params(key, cfg):
    k1, k2 = jax.random.split(key)
    return {"enc": make_encoder_params(k1, cfg), "dec": make_decoder_params(k2, cfg)}


# ----------------------------------------------------------------------------
# Forward passes (3 pallas_calls total)
# ----------------------------------------------------------------------------
def encoder_forward(params, x, maxpool):
    # [B, T, nc] -> bf16 encoder memory [B, T, 2*enc_rnn_size]
    # TODO(synk): encoder final GRU state is not returned (unused downstream).
    return cbhg_stack(params["cbhg"], x, pool_w=maxpool,
                      prenet=(params["pre1"], params["pre2"]),
                      out_dtype=jnp.bfloat16)


def decoder_forward(params, encoded, start_token, starting_states, max_len, cfg):
    B = encoded.shape[0]
    nc, R = cfg["n_channels"], cfg["r"]
    L = cfg["main_rnn_layers"]
    h_attn = 2 * cfg["enc_rnn_size"]
    h_main = cfg["main_rnn_size"]
    bf = jnp.bfloat16

    dwx = jnp.stack([p["wx"] for p in params["dec_rnn"]]).astype(bf)
    dwh = jnp.stack([p["wh"] for p in params["dec_rnn"]]).astype(bf)
    dbx = jnp.stack([p["bx"].reshape(1, -1) for p in params["dec_rnn"]])
    dbh = jnp.stack([p["bh"].reshape(1, -1) for p in params["dec_rnn"]])

    mel = pl.pallas_call(
        functools.partial(_decoder_kernel, max_len=max_len, n_layers=L,
                          h_attn=h_attn, h_main=h_main),
        out_shape=jax.ShapeDtypeStruct((B, max_len, R * nc), jnp.float32),
        in_specs=_vspecs(20),
        out_specs=_vmem_spec(),
    )(encoded,
      params["pre1"]["w"].astype(bf), params["pre1"]["b"].reshape(1, -1),
      params["pre2"]["w"].astype(bf), params["pre2"]["b"].reshape(1, -1),
      params["attn_rnn"]["wx"].astype(bf), params["attn_rnn"]["wh"].astype(bf),
      params["attn_rnn"]["bx"].reshape(1, -1),
      params["attn_rnn"]["bh"].reshape(1, -1),
      params["proj_dec"]["w"].astype(bf), params["proj_dec"]["b"].reshape(1, -1),
      dwx, dwh, dbx, dbh,
      params["mel_proj"]["w"].astype(bf), params["mel_proj"]["b"].reshape(1, -1),
      start_token[0], starting_states[0], starting_states[1])

    # contiguous regrouping [B, max_len, R*nc] -> [B, max_len*R, nc]
    mel_seq = mel.reshape(B, max_len * R, nc)

    # post-CBHG + final linear projection fused into one kernel.
    post = cbhg_stack(params["post_cbhg"], mel_seq,
                      pool_w=cfg["dec_cbhg_maxpool"],
                      out_proj=params["out_proj"], out_dtype=jnp.float32)
    return post                                          # [B, T_dec, n_channels]


def tacotron_forward(params, x, max_len, cfg, start_token=None,
                     starting_states=None):
    B = x.shape[0]
    if start_token is None:
        start_token = jnp.zeros((1, B, cfg["main_rnn_size"]), jnp.float32)
    if starting_states is None:
        starting_states = [
            jnp.zeros((B, 2 * cfg["enc_rnn_size"]), jnp.float32),
            jnp.zeros((cfg["main_rnn_layers"], B, cfg["main_rnn_size"]),
                      jnp.float32),
        ]
    encoded = encoder_forward(params["enc"], x, cfg["enc_cbhg_maxpool"])
    decoded = decoder_forward(params["dec"], encoded, start_token,
                              starting_states, max_len, cfg)
    return jnp.transpose(decoded, (0, 2, 1))             # [B, n_channels, T_dec]


# ----------------------------------------------------------------------------
# Main
# ----------------------------------------------------------------------------
CONFIG = dict(
    n_channels=8, r=2, ns=16,
    enc_prenet_units=(32, 16), enc_proj_size=16, enc_rnn_size=16,
    enc_rnn_layers=1, enc_k=4,
    dec_prenet_units=(32, 16), dec_proj_size=16, dec_rnn_size=16,
    dec_rnn_layers=1, dec_k=4,
    main_rnn_size=32, main_rnn_layers=2,
    enc_cbhg_maxpool=2, dec_cbhg_maxpool=2,
)


@functools.partial(jax.jit, static_argnames=("max_len",))
def run(params, x, max_len):
    return tacotron_forward(params, x, max_len, CONFIG)


if __name__ == "__main__":
    key = jax.random.PRNGKey(0)
    kp, kx = jax.random.split(key)
    params = make_tacotron_params(kp, CONFIG)
    # x: [batch, time, n_channels]
    x = jax.random.normal(kx, (2, 8, CONFIG["n_channels"]), dtype=jnp.float32)
    max_len = 3
    out = run(params, x, max_len)
    out = jax.block_until_ready(out)
    assert out.shape == (2, CONFIG["n_channels"], max_len * CONFIG["r"])
    print("KERNEL_OK")
</pallas_src>

<mosaic_0001>
module attributes {stable_mosaic.version = 11 : i64} {
  func.func @_cbhg_stack_kernel(%arg0: memref<2x8x8xf32, #tpu.memory_space<vmem>>, %arg1: memref<8x32xbf16, #tpu.memory_space<vmem>>, %arg2: memref<1x32xf32, #tpu.memory_space<vmem>>, %arg3: memref<32x16xbf16, #tpu.memory_space<vmem>>, %arg4: memref<1x16xf32, #tpu.memory_space<vmem>>, %arg5: memref<64x64xbf16, #tpu.memory_space<vmem>>, %arg6: memref<1x64xf32, #tpu.memory_space<vmem>>, %arg7: memref<192x16xbf16, #tpu.memory_space<vmem>>, %arg8: memref<1x16xf32, #tpu.memory_space<vmem>>, %arg9: memref<48x16xbf16, #tpu.memory_space<vmem>>, %arg10: memref<1x16xf32, #tpu.memory_space<vmem>>, %arg11: memref<4x16x32xbf16, #tpu.memory_space<vmem>>, %arg12: memref<4x1x32xf32, #tpu.memory_space<vmem>>, %arg13: memref<16x96xbf16, #tpu.memory_space<vmem>>, %arg14: memref<1x96xf32, #tpu.memory_space<vmem>>, %arg15: memref<16x48xbf16, #tpu.memory_space<vmem>>, %arg16: memref<1x48xf32, #tpu.memory_space<vmem>>, %arg17: memref<16x48xbf16, #tpu.memory_space<vmem>>, %arg18: memref<1x48xf32, #tpu.memory_space<vmem>>, %arg19: memref<2x8x32xbf16, #tpu.memory_space<vmem>>) attributes {dimension_semantics = [], scalar_prefetch = 0 : i64, scratch_operands = 0 : i64, tpu.core_type = #tpu.core_type<tc>} {
    %c0 = arith.constant 0 : index
    %c0_0 = arith.constant 0 : index
    %c0_1 = arith.constant 0 : index
    %0 = vector.load %arg0[%c0, %c0_0, %c0_1] : memref<2x8x8xf32, #tpu.memory_space<vmem>>, vector<2x8x8xf32>
    %c0_2 = arith.constant 0 : index
    %c0_3 = arith.constant 0 : index
    %1 = vector.load %arg1[%c0_2, %c0_3] : memref<8x32xbf16, #tpu.memory_space<vmem>>, vector<8x32xbf16>
    %2 = arith.truncf %0 : vector<2x8x8xf32> to vector<2x8x8xbf16>
    "tpu.trace_start"() <{level = 10 : i32, message = "btc,cd->btd"}> : () -> ()
    %cst = arith.constant dense<0.000000e+00> : vector<2x8x32xf32>
    %3 = tpu.matmul %2, %1, %cst {dimension_numbers = #tpu.dot_dimension_numbers<[2], [0], [0, 1], [1], [0, 0, 0, 1, 1, 1], [], []>} : vector<2x8x8xbf16>, vector<8x32xbf16>, vector<2x8x32xf32> -> vector<2x8x32xf32>
    "tpu.trace_stop"() : () -> ()
    %c0_4 = arith.constant 0 : index
    %c0_5 = arith.constant 0 : index
    %4 = vector.load %arg2[%c0_4, %c0_5] : memref<1x32xf32, #tpu.memory_space<vmem>>, vector<1x32xf32>
    %5 = vector.shape_cast %4 : vector<1x32xf32> to vector<1x1x32xf32>
    %6 = vector.broadcast %5 : vector<1x1x32xf32> to vector<2x8x32xf32>
    %7 = arith.addf %3, %6 : vector<2x8x32xf32>
    %cst_6 = arith.constant 0.000000e+00 : f32
    %8 = vector.broadcast %cst_6 : f32 to vector<2x8x32xf32>
    %9 = arith.maximumf %7, %8 : vector<2x8x32xf32>
    %c0_7 = arith.constant 0 : index
    %c0_8 = arith.constant 0 : index
    %10 = vector.load %arg3[%c0_7, %c0_8] : memref<32x16xbf16, #tpu.memory_space<vmem>>, vector<32x16xbf16>
    %11 = arith.truncf %9 : vector<2x8x32xf32> to vector<2x8x32xbf16>
    "tpu.trace_start"() <{level = 10 : i32, message = "btc,cd->btd"}> : () -> ()
    %cst_9 = arith.constant dense<0.000000e+00> : vector<2x8x16xf32>
    %12 = tpu.matmul %11, %10, %cst_9 {dimension_numbers = #tpu.dot_dimension_numbers<[2], [0], [0, 1], [1], [0, 0, 0, 1, 1, 1], [], []>} : vector<2x8x32xbf16>, vector<32x16xbf16>, vector<2x8x16xf32> -> vector<2x8x16xf32>
    "tpu.trace_stop"() : () -> ()
    %c0_10 = arith.constant 0 : index
    %c0_11 = arith.constant 0 : index
    %13 = vector.load %arg4[%c0_10, %c0_11] : memref<1x16xf32, #tpu.memory_space<vmem>>, vector<1x16xf32>
    %14 = vector.shape_cast %13 : vector<1x16xf32> to vector<1x1x16xf32>
    %15 = vector.broadcast %14 : vector<1x1x16xf32> to vector<2x8x16xf32>
    %16 = arith.addf %12, %15 : vector<2x8x16xf32>
    %cst_12 = arith.constant 0.000000e+00 : f32
    %17 = vector.broadcast %cst_12 : f32 to vector<2x8x16xf32>
    %18 = arith.maximumf %16, %17 : vector<2x8x16xf32>
    %cst_13 = arith.constant 0.000000e+00 : f32
    %19 = vector.broadcast %cst_13 : f32 to vector<2x2x16xf32>
    %cst_14 = arith.constant 0.000000e+00 : f32
    %20 = vector.broadcast %cst_14 : f32 to vector<2x2x16xf32>
    %21 = tpu.concatenate %19, %18, %20 in 1 : vector<2x2x16xf32>, vector<2x8x16xf32>, vector<2x2x16xf32> -> vector<2x12x16xf32>
    %22 = vector.extract_strided_slice %21 {offsets = [0, 0, 0], sizes = [2, 8, 16], strides = [1, 1, 1]} : vector<2x12x16xf32> to vector<2x8x16xf32>
    %23 = vector.extract_strided_slice %21 {offsets = [0, 1, 0], sizes = [2, 8, 16], strides = [1, 1, 1]} : vector<2x12x16xf32> to vector<2x8x16xf32>
    %24 = vector.extract_strided_slice %21 {offsets = [0, 2, 0], sizes = [2, 8, 16], strides = [1, 1, 1]} : vector<2x12x16xf32> to vector<2x8x16xf32>
    %25 = vector.extract_strided_slice %21 {offsets = [0, 3, 0], sizes = [2, 8, 16], strides = [1, 1, 1]} : vector<2x12x16xf32> to vector<2x8x16xf32>
    %26 = tpu.concatenate %22, %23, %24, %25 in 2 : vector<2x8x16xf32>, vector<2x8x16xf32>, vector<2x8x16xf32>, vector<2x8x16xf32> -> vector<2x8x64xf32>
    %c0_15 = arith.constant 0 : index
    %c0_16 = arith.constant 0 : index
    %27 = vector.load %arg5[%c0_15, %c0_16] : memref<64x64xbf16, #tpu.memory_space<vmem>>, vector<64x64xbf16>
    %28 = arith.truncf %26 : vector<2x8x64xf32> to vector<2x8x64xbf16>
    "tpu.trace_start"() <{level = 10 : i32, message = "btc,cd->btd"}> : () -> ()
    %cst_17 = arith.constant dense<0.000000e+00> : vector<2x8x64xf32>
    %29 = tpu.matmul %28, %27, %cst_17 {dimension_numbers = #tpu.dot_dimension_numbers<[2], [0], [0, 1], [1], [0, 0, 0, 1, 1, 1], [], []>} : vector<2x8x64xbf16>, vector<64x64xbf16>, vector<2x8x64xf32> -> vector<2x8x64xf32>
    "tpu.trace_stop"() : () -> ()
    %c0_18 = arith.constant 0 : index
    %c0_19 = arith.constant 0 : index
    %30 = vector.load %arg6[%c0_18, %c0_19] : memref<1x64xf32, #tpu.memory_space<vmem>>, vector<1x64xf32>
    %31 = vector.shape_cast %30 : vector<1x64xf32> to vector<1x1x64xf32>
    %32 = vector.broadcast %31 : vector<1x1x64xf32> to vector<2x8x64xf32>
    %33 = arith.addf %29, %32 : vector<2x8x64xf32>
    %cst_20 = arith.constant 0.000000e+00 : f32
    %34 = vector.broadcast %cst_20 : f32 to vector<2x8x64xf32>
    %35 = arith.maximumf %33, %34 : vector<2x8x64xf32>
    %cst_21 = arith.constant 0xFF800000 : f32
    %36 = vector.broadcast %cst_21 : f32 to vector<2x1x64xf32>
    %cst_22 = arith.constant 0xFF800000 : f32
    %37 = vector.broadcast %cst_22 : f32 to vector<2x1x64xf32>
    %38 = tpu.concatenate %36, %35, %37 in 1 : vector<2x1x64xf32>, vector<2x8x64xf32>, vector<2x1x64xf32> -> vector<2x10x64xf32>
    %39 = vector.extract_strided_slice %38 {offsets = [0, 0, 0], sizes = [2, 8, 64], strides = [1, 1, 1]} : vector<2x10x64xf32> to vector<2x8x64xf32>
    %40 = vector.extract_strided_slice %38 {offsets = [0, 1, 0], sizes = [2, 8, 64], strides = [1, 1, 1]} : vector<2x10x64xf32> to vector<2x8x64xf32>
    %41 = arith.maximumf %39, %40 : vector<2x8x64xf32>
    %cst_23 = arith.constant 0.000000e+00 : f32
    %42 = vector.broadcast %cst_23 : f32 to vector<2x1x64xf32>
    %cst_24 = arith.constant 0.000000e+00 : f32
    %43 = vector.broadcast %cst_24 : f32 to vector<2x1x64xf32>
    %44 = tpu.concatenate %42, %41, %43 in 1 : vector<2x1x64xf32>, vector<2x8x64xf32>, vector<2x1x64xf32> -> vector<2x10x64xf32>
    %45 = vector.extract_strided_slice %44 {offsets = [0, 0, 0], sizes = [2, 8, 64], strides = [1, 1, 1]} : vector<2x10x64xf32> to vector<2x8x64xf32>
    %46 = vector.extract_strided_slice %44 {offsets = [0, 1, 0], sizes = [2, 8, 64], strides = [1, 1, 1]} : vector<2x10x64xf32> to vector<2x8x64xf32>
    %47 = vector.extract_strided_slice %44 {offsets = [0, 2, 0], sizes = [2, 8, 64], strides = [1, 1, 1]} : vector<2x10x64xf32> to vector<2x8x64xf32>
    %48 = tpu.concatenate %45, %46, %47 in 2 : vector<2x8x64xf32>, vector<2x8x64xf32>, vector<2x8x64xf32> -> vector<2x8x192xf32>
    %c0_25 = arith.constant 0 : index
    %c0_26 = arith.constant 0 : index
    %49 = vector.load %arg7[%c0_25, %c0_26] : memref<192x16xbf16, #tpu.memory_space<vmem>>, vector<192x16xbf16>
    %50 = arith.truncf %48 : vector<2x8x192xf32> to vector<2x8x192xbf16>
    "tpu.trace_start"() <{level = 10 : i32, message = "btc,cd->btd"}> : () -> ()
    %cst_27 = arith.constant dense<0.000000e+00> : vector<2x8x16xf32>
    %51 = tpu.matmul %50, %49, %cst_27 {dimension_numbers = #tpu.dot_dimension_numbers<[2], [0], [0, 1], [1], [0, 0, 0, 1, 1, 1], [], []>} : vector<2x8x192xbf16>, vector<192x16xbf16>, vector<2x8x16xf32> -> vector<2x8x16xf32>
    "tpu.trace_stop"() : () -> ()
    %c0_28 = arith.constant 0 : index
    %c0_29 = arith.constant 0 : index
    %52 = vector.load %arg8[%c0_28, %c0_29] : memref<1x16xf32, #tpu.memory_space<vmem>>, vector<1x16xf32>
    %53 = vector.shape_cast %52 : vector<1x16xf32> to vector<1x1x16xf32>
    %54 = vector.broadcast %53 : vector<1x1x16xf32> to vector<2x8x16xf32>
    %55 = arith.addf %51, %54 : vector<2x8x16xf32>
    %cst_30 = arith.constant 0.000000e+00 : f32
    %56 = vector.broadcast %cst_30 : f32 to vector<2x8x16xf32>
    %57 = arith.maximumf %55, %56 : vector<2x8x16xf32>
    %cst_31 = arith.constant 0.000000e+00 : f32
    %58 = vector.broadcast %cst_31 : f32 to vector<2x1x16xf32>
    %cst_32 = arith.constant 0.000000e+00 : f32
    %59 = vector.broadcast %cst_32 : f32 to vector<2x1x16xf32>
    %60 = tpu.concatenate %58, %57, %59 in 1 : vector<2x1x16xf32>, vector<2x8x16xf32>, vector<2x1x16xf32> -> vector<2x10x16xf32>
    %61 = vector.extract_strided_slice %60 {offsets = [0, 0, 0], sizes = [2, 8, 16], strides = [1, 1, 1]} : vector<2x10x16xf32> to vector<2x8x16xf32>
    %62 = vector.extract_strided_slice %60 {offsets = [0, 1, 0], sizes = [2, 8, 16], strides = [1, 1, 1]} : vector<2x10x16xf32> to vector<2x8x16xf32>
    %63 = vector.extract_strided_slice %60 {offsets = [0, 2, 0], sizes = [2, 8, 16], strides = [1, 1, 1]} : vector<2x10x16xf32> to vector<2x8x16xf32>
    %64 = tpu.concatenate %61, %62, %63 in 2 : vector<2x8x16xf32>, vector<2x8x16xf32>, vector<2x8x16xf32> -> vector<2x8x48xf32>
    %c0_33 = arith.constant 0 : index
    %c0_34 = arith.constant 0 : index
    %65 = vector.load %arg9[%c0_33, %c0_34] : memref<48x16xbf16, #tpu.memory_space<vmem>>, vector<48x16xbf16>
    %66 = arith.truncf %64 : vector<2x8x48xf32> to vector<2x8x48xbf16>
    "tpu.trace_start"() <{level = 10 : i32, message = "btc,cd->btd"}> : () -> ()
    %cst_35 = arith.constant dense<0.000000e+00> : vector<2x8x16xf32>
    %67 = tpu.matmul %66, %65, %cst_35 {dimension_numbers = #tpu.dot_dimension_numbers<[2], [0], [0, 1], [1], [0, 0, 0, 1, 1, 1], [], []>} : vector<2x8x48xbf16>, vector<48x16xbf16>, vector<2x8x16xf32> -> vector<2x8x16xf32>
    "tpu.trace_stop"() : () -> ()
    %c0_36 = arith.constant 0 : index
    %c0_37 = arith.constant 0 : index
    %68 = vector.load %arg10[%c0_36, %c0_37] : memref<1x16xf32, #tpu.memory_space<vmem>>, vector<1x16xf32>
    %69 = vector.shape_cast %68 : vector<1x16xf32> to vector<1x1x16xf32>
    %70 = vector.broadcast %69 : vector<1x1x16xf32> to vector<2x8x16xf32>
    %71 = arith.addf %67, %70 : vector<2x8x16xf32>
    %72 = arith.addf %71, %18 : vector<2x8x16xf32>
    %c0_38 = arith.constant 0 : index
    %c0_39 = arith.constant 0 : index
    %c0_40 = arith.constant 0 : index
    %73 = vector.load %arg11[%c0_38, %c0_39, %c0_40] : memref<4x16x32xbf16, #tpu.memory_space<vmem>>, vector<4x16x32xbf16>
    %c0_41 = arith.constant 0 : index
    %c0_42 = arith.constant 0 : index
    %c0_43 = arith.constant 0 : index
    %74 = vector.load %arg12[%c0_41, %c0_42, %c0_43] : memref<4x1x32xf32, #tpu.memory_space<vmem>>, vector<4x1x32xf32>
    %75 = vector.extract_strided_slice %73 {offsets = [0, 0, 0], sizes = [1, 16, 32], strides = [1, 1, 1]} : vector<4x16x32xbf16> to vector<1x16x32xbf16>
    %76 = vector.shape_cast %75 : vector<1x16x32xbf16> to vector<16x32xbf16>
    %77 = arith.truncf %72 : vector<2x8x16xf32> to vector<2x8x16xbf16>
    "tpu.trace_start"() <{level = 10 : i32, message = "btc,cd->btd"}> : () -> ()
    %cst_44 = arith.constant dense<0.000000e+00> : vector<2x8x32xf32>
    %78 = tpu.matmul %77, %76, %cst_44 {dimension_numbers = #tpu.dot_dimension_numbers<[2], [0], [0, 1], [1], [0, 0, 0, 1, 1, 1], [], []>} : vector<2x8x16xbf16>, vector<16x32xbf16>, vector<2x8x32xf32> -> vector<2x8x32xf32>
    "tpu.trace_stop"() : () -> ()
    %79 = vector.extract_strided_slice %74 {offsets = [0, 0, 0], sizes = [1, 1, 32], strides = [1, 1, 1]} : vector<4x1x32xf32> to vector<1x1x32xf32>
    %80 = vector.shape_cast %79 : vector<1x1x32xf32> to vector<1x32xf32>
    %81 = vector.shape_cast %80 : vector<1x32xf32> to vector<1x1x32xf32>
    %82 = vector.broadcast %81 : vector<1x1x32xf32> to vector<2x8x32xf32>
    %83 = arith.addf %78, %82 : vector<2x8x32xf32>
    %84 = vector.extract_strided_slice %83 {offsets = [0, 0, 0], sizes = [2, 8, 16], strides = [1, 1, 1]} : vector<2x8x32xf32> to vector<2x8x16xf32>
    %cst_45 = arith.constant 0.000000e+00 : f32
    %85 = vector.broadcast %cst_45 : f32 to vector<2x8x16xf32>
    %86 = arith.maximumf %84, %85 : vector<2x8x16xf32>
    %87 = vector.extract_strided_slice %83 {offsets = [0, 0, 16], sizes = [2, 8, 16], strides = [1, 1, 1]} : vector<2x8x32xf32> to vector<2x8x16xf32>
    %88 = arith.negf %87 : vector<2x8x16xf32>
    %89 = math.exp %88 : vector<2x8x16xf32>
    %cst_46 = arith.constant 1.000000e+00 : f32
    %90 = vector.broadcast %cst_46 : f32 to vector<2x8x16xf32>
    %91 = arith.addf %90, %89 : vector<2x8x16xf32>
    %92 = arith.divf %90, %91 : vector<2x8x16xf32>
    %93 = arith.mulf %86, %92 : vector<2x8x16xf32>
    %cst_47 = arith.constant 1.000000e+00 : f32
    %94 = vector.broadcast %cst_47 : f32 to vector<2x8x16xf32>
    %95 = arith.subf %94, %92 : vector<2x8x16xf32>
    %96 = arith.mulf %72, %95 : vector<2x8x16xf32>
    %97 = arith.addf %93, %96 : vector<2x8x16xf32>
    %98 = vector.extract_strided_slice %73 {offsets = [1, 0, 0], sizes = [1, 16, 32], strides = [1, 1, 1]} : vector<4x16x32xbf16> to vector<1x16x32xbf16>
    %99 = vector.shape_cast %98 : vector<1x16x32xbf16> to vector<16x32xbf16>
    %100 = arith.truncf %97 : vector<2x8x16xf32> to vector<2x8x16xbf16>
    "tpu.trace_start"() <{level = 10 : i32, message = "btc,cd->btd"}> : () -> ()
    %cst_48 = arith.constant dense<0.000000e+00> : vector<2x8x32xf32>
    %101 = tpu.matmul %100, %99, %cst_48 {dimension_numbers = #tpu.dot_dimension_numbers<[2], [0], [0, 1], [1], [0, 0, 0, 1, 1, 1], [], []>} : vector<2x8x16xbf16>, vector<16x32xbf16>, vector<2x8x32xf32> -> vector<2x8x32xf32>
    "tpu.trace_stop"() : () -> ()
    %102 = vector.extract_strided_slice %74 {offsets = [1, 0, 0], sizes = [1, 1, 32], strides = [1, 1, 1]} : vector<4x1x32xf32> to vector<1x1x32xf32>
    %103 = vector.shape_cast %102 : vector<1x1x32xf32> to vector<1x32xf32>
    %104 = vector.shape_cast %103 : vector<1x32xf32> to vector<1x1x32xf32>
    %105 = vector.broadcast %104 : vector<1x1x32xf32> to vector<2x8x32xf32>
    %106 = arith.addf %101, %105 : vector<2x8x32xf32>
    %107 = vector.extract_strided_slice %106 {offsets = [0, 0, 0], sizes = [2, 8, 16], strides = [1, 1, 1]} : vector<2x8x32xf32> to vector<2x8x16xf32>
    %cst_49 = arith.constant 0.000000e+00 : f32
    %108 = vector.broadcast %cst_49 : f32 to vector<2x8x16xf32>
    %109 = arith.maximumf %107, %108 : vector<2x8x16xf32>
    %110 = vector.extract_strided_slice %106 {offsets = [0, 0, 16], sizes = [2, 8, 16], strides = [1, 1, 1]} : vector<2x8x32xf32> to vector<2x8x16xf32>
    %111 = arith.negf %110 : vector<2x8x16xf32>
    %112 = math.exp %111 : vector<2x8x16xf32>
    %cst_50 = arith.constant 1.000000e+00 : f32
    %113 = vector.broadcast %cst_50 : f32 to vector<2x8x16xf32>
    %114 = arith.addf %113, %112 : vector<2x8x16xf32>
    %115 = arith.divf %113, %114 : vector<2x8x16xf32>
    %116 = arith.mulf %109, %115 : vector<2x8x16xf32>
    %cst_51 = arith.constant 1.000000e+00 : f32
    %117 = vector.broadcast %cst_51 : f32 to vector<2x8x16xf32>
    %118 = arith.subf %117, %115 : vector<2x8x16xf32>
    %119 = arith.mulf %97, %118 : vector<2x8x16xf32>
    %120 = arith.addf %116, %119 : vector<2x8x16xf32>
    %121 = vector.extract_strided_slice %73 {offsets = [2, 0, 0], sizes = [1, 16, 32], strides = [1, 1, 1]} : vector<4x16x32xbf16> to vector<1x16x32xbf16>
    %122 = vector.shape_cast %121 : vector<1x16x32xbf16> to vector<16x32xbf16>
    %123 = arith.truncf %120 : vector<2x8x16xf32> to vector<2x8x16xbf16>
    "tpu.trace_start"() <{level = 10 : i32, message = "btc,cd->btd"}> : () -> ()
    %cst_52 = arith.constant dense<0.000000e+00> : vector<2x8x32xf32>
    %124 = tpu.matmul %123, %122, %cst_52 {dimension_numbers = #tpu.dot_dimension_numbers<[2], [0], [0, 1], [1], [0, 0, 0, 1, 1, 1], [], []>} : vector<2x8x16xbf16>, vector<16x32xbf16>, vector<2x8x32xf32> -> vector<2x8x32xf32>
    "tpu.trace_stop"() : () -> ()
    %125 = vector.extract_strided_slice %74 {offsets = [2, 0, 0], sizes = [1, 1, 32], strides = [1, 1, 1]} : vector<4x1x32xf32> to vector<1x1x32xf32>
    %126 = vector.shape_cast %125 : vector<1x1x32xf32> to vector<1x32xf32>
    %127 = vector.shape_cast %126 : vector<1x32xf32> to vector<1x1x32xf32>
    %128 = vector.broadcast %127 : vector<1x1x32xf32> to vector<2x8x32xf32>
    %129 = arith.addf %124, %128 : vector<2x8x32xf32>
    %130 = vector.extract_strided_slice %129 {offsets = [0, 0, 0], sizes = [2, 8, 16], strides = [1, 1, 1]} : vector<2x8x32xf32> to vector<2x8x16xf32>
    %cst_53 = arith.constant 0.000000e+00 : f32
    %131 = vector.broadcast %cst_53 : f32 to vector<2x8x16xf32>
    %132 = arith.maximumf %130, %131 : vector<2x8x16xf32>
    %133 = vector.extract_strided_slice %129 {offsets = [0, 0, 16], sizes = [2, 8, 16], strides = [1, 1, 1]} : vector<2x8x32xf32> to vector<2x8x16xf32>
    %134 = arith.negf %133 : vector<2x8x16xf32>
    %135 = math.exp %134 : vector<2x8x16xf32>
    %cst_54 = arith.constant 1.000000e+00 : f32
    %136 = vector.broadcast %cst_54 : f32 to vector<2x8x16xf32>
    %137 = arith.addf %136, %135 : vector<2x8x16xf32>
    %138 = arith.divf %136, %137 : vector<2x8x16xf32>
    %139 = arith.mulf %132, %138 : vector<2x8x16xf32>
    %cst_55 = arith.constant 1.000000e+00 : f32
    %140 = vector.broadcast %cst_55 : f32 to vector<2x8x16xf32>
    %141 = arith.subf %140, %138 : vector<2x8x16xf32>
    %142 = arith.mulf %120, %141 : vector<2x8x16xf32>
    %143 = arith.addf %139, %142 : vector<2x8x16xf32>
    %144 = vector.extract_strided_slice %73 {offsets = [3, 0, 0], sizes = [1, 16, 32], strides = [1, 1, 1]} : vector<4x16x32xbf16> to vector<1x16x32xbf16>
    %145 = vector.shape_cast %144 : vector<1x16x32xbf16> to vector<16x32xbf16>
    %146 = arith.truncf %143 : vector<2x8x16xf32> to vector<2x8x16xbf16>
    "tpu.trace_start"() <{level = 10 : i32, message = "btc,cd->btd"}> : () -> ()
    %cst_56 = arith.constant dense<0.000000e+00> : vector<2x8x32xf32>
    %147 = tpu.matmul %146, %145, %cst_56 {dimension_numbers = #tpu.dot_dimension_numbers<[2], [0], [0, 1], [1], [0, 0, 0, 1, 1, 1], [], []>} : vector<2x8x16xbf16>, vector<16x32xbf16>, vector<2x8x32xf32> -> vector<2x8x32xf32>
    "tpu.trace_stop"() : () -> ()
    %148 = vector.extract_strided_slice %74 {offsets = [3, 0, 0], sizes = [1, 1, 32], strides = [1, 1, 1]} : vector<4x1x32xf32> to vector<1x1x32xf32>
    %149 = vector.shape_cast %148 : vector<1x1x32xf32> to vector<1x32xf32>
    %150 = vector.shape_cast %149 : vector<1x32xf32> to vector<1x1x32xf32>
    %151 = vector.broadcast %150 : vector<1x1x32xf32> to vector<2x8x32xf32>
    %152 = arith.addf %147, %151 : vector<2x8x32xf32>
    %153 = vector.extract_strided_slice %152 {offsets = [0, 0, 0], sizes = [2, 8, 16], strides = [1, 1, 1]} : vector<2x8x32xf32> to vector<2x8x16xf32>
    %cst_57 = arith.constant 0.000000e+00 : f32
    %154 = vector.broadcast %cst_57 : f32 to vector<2x8x16xf32>
    %155 = arith.maximumf %153, %154 : vector<2x8x16xf32>
    %156 = vector.extract_strided_slice %152 {offsets = [0, 0, 16], sizes = [2, 8, 16], strides = [1, 1, 1]} : vector<2x8x32xf32> to vector<2x8x16xf32>
    %157 = arith.negf %156 : vector<2x8x16xf32>
    %158 = math.exp %157 : vector<2x8x16xf32>
    %cst_58 = arith.constant 1.000000e+00 : f32
    %159 = vector.broadcast %cst_58 : f32 to vector<2x8x16xf32>
    %160 = arith.addf %159, %158 : vector<2x8x16xf32>
    %161 = arith.divf %159, %160 : vector<2x8x16xf32>
    %162 = arith.mulf %155, %161 : vector<2x8x16xf32>
    %cst_59 = arith.constant 1.000000e+00 : f32
    %163 = vector.broadcast %cst_59 : f32 to vector<2x8x16xf32>
    %164 = arith.subf %163, %161 : vector<2x8x16xf32>
    %165 = arith.mulf %143, %164 : vector<2x8x16xf32>
    %166 = arith.addf %162, %165 : vector<2x8x16xf32>
    %c0_60 = arith.constant 0 : index
    %c0_61 = arith.constant 0 : index
    %167 = vector.load %arg15[%c0_60, %c0_61] : memref<16x48xbf16, #tpu.memory_space<vmem>>, vector<16x48xbf16>
    %c0_62 = arith.constant 0 : index
    %c0_63 = arith.constant 0 : index
    %168 = vector.load %arg16[%c0_62, %c0_63] : memref<1x48xf32, #tpu.memory_space<vmem>>, vector<1x48xf32>
    %c0_64 = arith.constant 0 : index
    %c0_65 = arith.constant 0 : index
    %169 = vector.load %arg17[%c0_64, %c0_65] : memref<16x48xbf16, #tpu.memory_space<vmem>>, vector<16x48xbf16>
    %c0_66 = arith.constant 0 : index
    %c0_67 = arith.constant 0 : index
    %170 = vector.load %arg18[%c0_66, %c0_67] : memref<1x48xf32, #tpu.memory_space<vmem>>, vector<1x48xf32>
    %c0_68 = arith.constant 0 : index
    %c0_69 = arith.constant 0 : index
    %171 = vector.load %arg13[%c0_68, %c0_69] : memref<16x96xbf16, #tpu.memory_space<vmem>>, vector<16x96xbf16>
    %172 = arith.truncf %166 : vector<2x8x16xf32> to vector<2x8x16xbf16>
    "tpu.trace_start"() <{level = 10 : i32, message = "btc,cd->btd"}> : () -> ()
    %cst_70 = arith.constant dense<0.000000e+00> : vector<2x8x96xf32>
    %173 = tpu.matmul %172, %171, %cst_70 {dimension_numbers = #tpu.dot_dimension_numbers<[2], [0], [0, 1], [1], [0, 0, 0, 1, 1, 1], [], []>} : vector<2x8x16xbf16>, vector<16x96xbf16>, vector<2x8x96xf32> -> vector<2x8x96xf32>
    "tpu.trace_stop"() : () -> ()
    %c0_71 = arith.constant 0 : index
    %c0_72 = arith.constant 0 : index
    %174 = vector.load %arg14[%c0_71, %c0_72] : memref<1x96xf32, #tpu.memory_space<vmem>>, vector<1x96xf32>
    %175 = vector.shape_cast %174 : vector<1x96xf32> to vector<1x1x96xf32>
    %176 = vector.broadcast %175 : vector<1x1x96xf32> to vector<2x8x96xf32>
    %177 = arith.addf %173, %176 : vector<2x8x96xf32>
    %cst_73 = arith.constant 0.000000e+00 : f32
    %178 = vector.broadcast %cst_73 : f32 to vector<2x16xf32>
    %cst_74 = arith.constant 0.000000e+00 : f32
    %179 = vector.broadcast %cst_74 : f32 to vector<2x16xf32>
    %180 = vector.extract_strided_slice %177 {offsets = [0, 0, 0], sizes = [2, 1, 48], strides = [1, 1, 1]} : vector<2x8x96xf32> to vector<2x1x48xf32>
    %181 = vector.shape_cast %180 : vector<2x1x48xf32> to vector<2x48xf32>
    %182 = arith.truncf %178 : vector<2x16xf32> to vector<2x16xbf16>
    %cst_75 = arith.constant dense<0.000000e+00> : vector<2x48xf32>
    %183 = tpu.matmul %182, %167, %cst_75 {dimension_numbers = #tpu.dot_dimension_numbers<[1], [0], [0], [1], [0, 0, 1, 1], [], []>} : vector<2x16xbf16>, vector<16x48xbf16>, vector<2x48xf32> -> vector<2x48xf32>
    %184 = vector.broadcast %168 : vector<1x48xf32> to vector<2x48xf32>
    %185 = arith.addf %183, %184 : vector<2x48xf32>
    %186 = vector.extract_strided_slice %181 {offsets = [0, 0], sizes = [2, 16], strides = [1, 1]} : vector<2x48xf32> to vector<2x16xf32>
    %187 = vector.extract_strided_slice %185 {offsets = [0, 0], sizes = [2, 16], strides = [1, 1]} : vector<2x48xf32> to vector<2x16xf32>
    %188 = arith.addf %186, %187 : vector<2x16xf32>
    %189 = arith.negf %188 : vector<2x16xf32>
    %190 = math.exp %189 : vector<2x16xf32>
    %cst_76 = arith.constant 1.000000e+00 : f32
    %191 = vector.broadcast %cst_76 : f32 to vector<2x16xf32>
    %192 = arith.addf %191, %190 : vector<2x16xf32>
    %193 = arith.divf %191, %192 : vector<2x16xf32>
    %194 = vector.extract_strided_slice %181 {offsets = [0, 16], sizes = [2, 16], strides = [1, 1]} : vector<2x48xf32> to vector<2x16xf32>
    %195 = vector.extract_strided_slice %185 {offsets = [0, 16], sizes = [2, 16], strides = [1, 1]} : vector<2x48xf32> to vector<2x16xf32>
    %196 = arith.addf %194, %195 : vector<2x16xf32>
    %197 = arith.negf %196 : vector<2x16xf32>
    %198 = math.exp %197 : vector<2x16xf32>
    %cst_77 = arith.constant 1.000000e+00 : f32
    %199 = vector.broadcast %cst_77 : f32 to vector<2x16xf32>
    %200 = arith.addf %199, %198 : vector<2x16xf32>
    %201 = arith.divf %199, %200 : vector<2x16xf32>
    %202 = vector.extract_strided_slice %181 {offsets = [0, 32], sizes = [2, 16], strides = [1, 1]} : vector<2x48xf32> to vector<2x16xf32>
    %203 = vector.extract_strided_slice %185 {offsets = [0, 32], sizes = [2, 16], strides = [1, 1]} : vector<2x48xf32> to vector<2x16xf32>
    %204 = arith.mulf %193, %203 : vector<2x16xf32>
    %205 = arith.addf %202, %204 : vector<2x16xf32>
    %206 = math.tanh %205 : vector<2x16xf32>
    %cst_78 = arith.constant 1.000000e+00 : f32
    %207 = vector.broadcast %cst_78 : f32 to vector<2x16xf32>
    %208 = arith.subf %207, %201 : vector<2x16xf32>
    %209 = arith.mulf %208, %206 : vector<2x16xf32>
    %210 = arith.mulf %201, %178 : vector<2x16xf32>
    %211 = arith.addf %209, %210 : vector<2x16xf32>
    %212 = vector.shape_cast %211 : vector<2x16xf32> to vector<2x1x16xf32>
    %213 = vector.extract_strided_slice %177 {offsets = [0, 7, 48], sizes = [2, 1, 48], strides = [1, 1, 1]} : vector<2x8x96xf32> to vector<2x1x48xf32>
    %214 = vector.shape_cast %213 : vector<2x1x48xf32> to vector<2x48xf32>
    %215 = arith.truncf %179 : vector<2x16xf32> to vector<2x16xbf16>
    %cst_79 = arith.constant dense<0.000000e+00> : vector<2x48xf32>
    %216 = tpu.matmul %215, %169, %cst_79 {dimension_numbers = #tpu.dot_dimension_numbers<[1], [0], [0], [1], [0, 0, 1, 1], [], []>} : vector<2x16xbf16>, vector<16x48xbf16>, vector<2x48xf32> -> vector<2x48xf32>
    %217 = vector.broadcast %170 : vector<1x48xf32> to vector<2x48xf32>
    %218 = arith.addf %216, %217 : vector<2x48xf32>
    %219 = vector.extract_strided_slice %214 {offsets = [0, 0], sizes = [2, 16], strides = [1, 1]} : vector<2x48xf32> to vector<2x16xf32>
    %220 = vector.extract_strided_slice %218 {offsets = [0, 0], sizes = [2, 16], strides = [1, 1]} : vector<2x48xf32> to vector<2x16xf32>
    %221 = arith.addf %219, %220 : vector<2x16xf32>
    %222 = arith.negf %221 : vector<2x16xf32>
    %223 = math.exp %222 : vector<2x16xf32>
    %cst_80 = arith.constant 1.000000e+00 : f32
    %224 = vector.broadcast %cst_80 : f32 to vector<2x16xf32>
    %225 = arith.addf %224, %223 : vector<2x16xf32>
    %226 = arith.divf %224, %225 : vector<2x16xf32>
    %227 = vector.extract_strided_slice %214 {offsets = [0, 16], sizes = [2, 16], strides = [1, 1]} : vector<2x48xf32> to vector<2x16xf32>
    %228 = vector.extract_strided_slice %218 {offsets = [0, 16], sizes = [2, 16], strides = [1, 1]} : vector<2x48xf32> to vector<2x16xf32>
    %229 = arith.addf %227, %228 : vector<2x16xf32>
    %230 = arith.negf %229 : vector<2x16xf32>
    %231 = math.exp %230 : vector<2x16xf32>
    %cst_81 = arith.constant 1.000000e+00 : f32
    %232 = vector.broadcast %cst_81 : f32 to vector<2x16xf32>
    %233 = arith.addf %232, %231 : vector<2x16xf32>
    %234 = arith.divf %232, %233 : vector<2x16xf32>
    %235 = vector.extract_strided_slice %214 {offsets = [0, 32], sizes = [2, 16], strides = [1, 1]} : vector<2x48xf32> to vector<2x16xf32>
    %236 = vector.extract_strided_slice %218 {offsets = [0, 32], sizes = [2, 16], strides = [1, 1]} : vector<2x48xf32> to vector<2x16xf32>
    %237 = arith.mulf %226, %236 : vector<2x16xf32>
    %238 = arith.addf %235, %237 : vector<2x16xf32>
    %239 = math.tanh %238 : vector<2x16xf32>
    %cst_82 = arith.constant 1.000000e+00 : f32
    %240 = vector.broadcast %cst_82 : f32 to vector<2x16xf32>
    %241 = arith.subf %240, %234 : vector<2x16xf32>
    %242 = arith.mulf %241, %239 : vector<2x16xf32>
    %243 = arith.mulf %234, %179 : vector<2x16xf32>
    %244 = arith.addf %242, %243 : vector<2x16xf32>
    %245 = vector.shape_cast %244 : vector<2x16xf32> to vector<2x1x16xf32>
    %246 = vector.extract_strided_slice %177 {offsets = [0, 1, 0], sizes = [2, 1, 48], strides = [1, 1, 1]} : vector<2x8x96xf32> to vector<2x1x48xf32>
    %247 = vector.shape_cast %246 : vector<2x1x48xf32> to vector<2x48xf32>
    %248 = arith.truncf %211 : vector<2x16xf32> to vector<2x16xbf16>
    %cst_83 = arith.constant dense<0.000000e+00> : vector<2x48xf32>
    %249 = tpu.matmul %248, %167, %cst_83 {dimension_numbers = #tpu.dot_dimension_numbers<[1], [0], [0], [1], [0, 0, 1, 1], [], []>} : vector<2x16xbf16>, vector<16x48xbf16>, vector<2x48xf32> -> vector<2x48xf32>
    %250 = vector.broadcast %168 : vector<1x48xf32> to vector<2x48xf32>
    %251 = arith.addf %249, %250 : vector<2x48xf32>
    %252 = vector.extract_strided_slice %247 {offsets = [0, 0], sizes = [2, 16], strides = [1, 1]} : vector<2x48xf32> to vector<2x16xf32>
    %253 = vector.extract_strided_slice %251 {offsets = [0, 0], sizes = [2, 16], strides = [1, 1]} : vector<2x48xf32> to vector<2x16xf32>
    %254 = arith.addf %252, %253 : vector<2x16xf32>
    %255 = arith.negf %254 : vector<2x16xf32>
    %256 = math.exp %255 : vector<2x16xf32>
    %cst_84 = arith.constant 1.000000e+00 : f32
    %257 = vector.broadcast %cst_84 : f32 to vector<2x16xf32>
    %258 = arith.addf %257, %256 : vector<2x16xf32>
    %259 = arith.divf %257, %258 : vector<2x16xf32>
    %260 = vector.extract_strided_slice %247 {offsets = [0, 16], sizes = [2, 16], strides = [1, 1]} : vector<2x48xf32> to vector<2x16xf32>
    %261 = vector.extract_strided_slice %251 {offsets = [0, 16], sizes = [2, 16], strides = [1, 1]} : vector<2x48xf32> to vector<2x16xf32>
    %262 = arith.addf %260, %261 : vector<2x16xf32>
    %263 = arith.negf %262 : vector<2x16xf32>
    %264 = math.exp %263 : vector<2x16xf32>
    %cst_85 = arith.constant 1.000000e+00 : f32
    %265 = vector.broadcast %cst_85 : f32 to vector<2x16xf32>
    %266 = arith.addf %265, %264 : vector<2x16xf32>
    %267 = arith.divf %265, %266 : vector<2x16xf32>
    %268 = vector.extract_strided_slice %247 {offsets = [0, 32], sizes = [2, 16], strides = [1, 1]} : vector<2x48xf32> to vector<2x16xf32>
    %269 = vector.extract_strided_slice %251 {offsets = [0, 32], sizes = [2, 16], strides = [1, 1]} : vector<2x48xf32> to vector<2x16xf32>
    %270 = arith.mulf %259, %269 : vector<2x16xf32>
    %271 = arith.addf %268, %270 : vector<2x16xf32>
    %272 = math.tanh %271 : vector<2x16xf32>
    %cst_86 = arith.constant 1.000000e+00 : f32
    %273 = vector.broadcast %cst_86 : f32 to vector<2x16xf32>
    %274 = arith.subf %273, %267 : vector<2x16xf32>
    %275 = arith.mulf %274, %272 : vector<2x16xf32>
    %276 = arith.mulf %267, %211 : vector<2x16xf32>
    %277 = arith.addf %275, %276 : vector<2x16xf32>
    %278 = vector.shape_cast %277 : vector<2x16xf32> to vector<2x1x16xf32>
    %279 = vector.extract_strided_slice %177 {offsets = [0, 6, 48], sizes = [2, 1, 48], strides = [1, 1, 1]} : vector<2x8x96xf32> to vector<2x1x48xf32>
    %280 = vector.shape_cast %279 : vector<2x1x48xf32> to vector<2x48xf32>
    %281 = arith.truncf %244 : vector<2x16xf32> to vector<2x16xbf16>
    %cst_87 = arith.constant dense<0.000000e+00> : vector<2x48xf32>
    %282 = tpu.matmul %281, %169, %cst_87 {dimension_numbers = #tpu.dot_dimension_numbers<[1], [0], [0], [1], [0, 0, 1, 1], [], []>} : vector<2x16xbf16>, vector<16x48xbf16>, vector<2x48xf32> -> vector<2x48xf32>
    %283 = vector.broadcast %170 : vector<1x48xf32> to vector<2x48xf32>
    %284 = arith.addf %282, %283 : vector<2x48xf32>
    %285 = vector.extract_strided_slice %280 {offsets = [0, 0], sizes = [2, 16], strides = [1, 1]} : vector<2x48xf32> to vector<2x16xf32>
    %286 = vector.extract_strided_slice %284 {offsets = [0, 0], sizes = [2, 16], strides = [1, 1]} : vector<2x48xf32> to vector<2x16xf32>
    %287 = arith.addf %285, %286 : vector<2x16xf32>
    %288 = arith.negf %287 : vector<2x16xf32>
    %289 = math.exp %288 : vector<2x16xf32>
    %cst_88 = arith.constant 1.000000e+00 : f32
    %290 = vector.broadcast %cst_88 : f32 to vector<2x16xf32>
    %291 = arith.addf %290, %289 : vector<2x16xf32>
    %292 = arith.divf %290, %291 : vector<2x16xf32>
    %293 = vector.extract_strided_slice %280 {offsets = [0, 16], sizes = [2, 16], strides = [1, 1]} : vector<2x48xf32> to vector<2x16xf32>
    %294 = vector.extract_strided_slice %284 {offsets = [0, 16], sizes = [2, 16], strides = [1, 1]} : vector<2x48xf32> to vector<2x16xf32>
    %295 = arith.addf %293, %294 : vector<2x16xf32>
    %296 = arith.negf %295 : vector<2x16xf32>
    %297 = math.exp %296 : vector<2x16xf32>
    %cst_89 = arith.constant 1.000000e+00 : f32
    %298 = vector.broadcast %cst_89 : f32 to vector<2x16xf32>
    %299 = arith.addf %298, %297 : vector<2x16xf32>
    %300 = arith.divf %298, %299 : vector<2x16xf32>
    %301 = vector.extract_strided_slice %280 {offsets = [0, 32], sizes = [2, 16], strides = [1, 1]} : vector<2x48xf32> to vector<2x16xf32>
    %302 = vector.extract_strided_slice %284 {offsets = [0, 32], sizes = [2, 16], strides = [1, 1]} : vector<2x48xf32> to vector<2x16xf32>
    %303 = arith.mulf %292, %302 : vector<2x16xf32>
    %304 = arith.addf %301, %303 : vector<2x16xf32>
    %305 = math.tanh %304 : vector<2x16xf32>
    %cst_90 = arith.constant 1.000000e+00 : f32
    %306 = vector.broadcast %cst_90 : f32 to vector<2x16xf32>
    %307 = arith.subf %306, %300 : vector<2x16xf32>
    %308 = arith.mulf %307, %305 : vector<2x16xf32>
    %309 = arith.mulf %300, %244 : vector<2x16xf32>
    %310 = arith.addf %308, %309 : vector<2x16xf32>
    %311 = vector.shape_cast %310 : vector<2x16xf32> to vector<2x1x16xf32>
    %312 = vector.extract_strided_slice %177 {offsets = [0, 2, 0], sizes = [2, 1, 48], strides = [1, 1, 1]} : vector<2x8x96xf32> to vector<2x1x48xf32>
    %313 = vector.shape_cast %312 : vector<2x1x48xf32> to vector<2x48xf32>
    %314 = arith.truncf %277 : vector<2x16xf32> to vector<2x16xbf16>
    %cst_91 = arith.constant dense<0.000000e+00> : vector<2x48xf32>
    %315 = tpu.matmul %314, %167, %cst_91 {dimension_numbers = #tpu.dot_dimension_numbers<[1], [0], [0], [1], [0, 0, 1, 1], [], []>} : vector<2x16xbf16>, vector<16x48xbf16>, vector<2x48xf32> -> vector<2x48xf32>
    %316 = vector.broadcast %168 : vector<1x48xf32> to vector<2x48xf32>
    %317 = arith.addf %315, %316 : vector<2x48xf32>
    %318 = vector.extract_strided_slice %313 {offsets = [0, 0], sizes = [2, 16], strides = [1, 1]} : vector<2x48xf32> to vector<2x16xf32>
    %319 = vector.extract_strided_slice %317 {offsets = [0, 0], sizes = [2, 16], strides = [1, 1]} : vector<2x48xf32> to vector<2x16xf32>
    %320 = arith.addf %318, %319 : vector<2x16xf32>
    %321 = arith.negf %320 : vector<2x16xf32>
    %322 = math.exp %321 : vector<2x16xf32>
    %cst_92 = arith.constant 1.000000e+00 : f32
    %323 = vector.broadcast %cst_92 : f32 to vector<2x16xf32>
    %324 = arith.addf %323, %322 : vector<2x16xf32>
    %325 = arith.divf %323, %324 : vector<2x16xf32>
    %326 = vector.extract_strided_slice %313 {offsets = [0, 16], sizes = [2, 16], strides = [1, 1]} : vector<2x48xf32> to vector<2x16xf32>
    %327 = vector.extract_strided_slice %317 {offsets = [0, 16], sizes = [2, 16], strides = [1, 1]} : vector<2x48xf32> to vector<2x16xf32>
    %328 = arith.addf %326, %327 : vector<2x16xf32>
    %329 = arith.negf %328 : vector<2x16xf32>
    %330 = math.exp %329 : vector<2x16xf32>
    %cst_93 = arith.constant 1.000000e+00 : f32
    %331 = vector.broadcast %cst_93 : f32 to vector<2x16xf32>
    %332 = arith.addf %331, %330 : vector<2x16xf32>
    %333 = arith.divf %331, %332 : vector<2x16xf32>
    %334 = vector.extract_strided_slice %313 {offsets = [0, 32], sizes = [2, 16], strides = [1, 1]} : vector<2x48xf32> to vector<2x16xf32>
    %335 = vector.extract_strided_slice %317 {offsets = [0, 32], sizes = [2, 16], strides = [1, 1]} : vector<2x48xf32> to vector<2x16xf32>
    %336 = arith.mulf %325, %335 : vector<2x16xf32>
    %337 = arith.addf %334, %336 : vector<2x16xf32>
    %338 = math.tanh %337 : vector<2x16xf32>
    %cst_94 = arith.constant 1.000000e+00 : f32
    %339 = vector.broadcast %cst_94 : f32 to vector<2x16xf32>
    %340 = arith.subf %339, %333 : vector<2x16xf32>
    %341 = arith.mulf %340, %338 : vector<2x16xf32>
    %342 = arith.mulf %333, %277 : vector<2x16xf32>
    %343 = arith.addf %341, %342 : vector<2x16xf32>
    %344 = vector.shape_cast %343 : vector<2x16xf32> to vector<2x1x16xf32>
    %345 = vector.extract_strided_slice %177 {offsets = [0, 5, 48], sizes = [2, 1, 48], strides = [1, 1, 1]} : vector<2x8x96xf32> to vector<2x1x48xf32>
    %346 = vector.shape_cast %345 : vector<2x1x48xf32> to vector<2x48xf32>
    %347 = arith.truncf %310 : vector<2x16xf32> to vector<2x16xbf16>
    %cst_95 = arith.constant dense<0.000000e+00> : vector<2x48xf32>
    %348 = tpu.matmul %347, %169, %cst_95 {dimension_numbers = #tpu.dot_dimension_numbers<[1], [0], [0], [1], [0, 0, 1, 1], [], []>} : vector<2x16xbf16>, vector<16x48xbf16>, vector<2x48xf32> -> vector<2x48xf32>
    %349 = vector.broadcast %170 : vector<1x48xf32> to vector<2x48xf32>
    %350 = arith.addf %348, %349 : vector<2x48xf32>
    %351 = vector.extract_strided_slice %346 {offsets = [0, 0], sizes = [2, 16], strides = [1, 1]} : vector<2x48xf32> to vector<2x16xf32>
    %352 = vector.extract_strided_slice %350 {offsets = [0, 0], sizes = [2, 16], strides = [1, 1]} : vector<2x48xf32> to vector<2x16xf32>
    %353 = arith.addf %351, %352 : vector<2x16xf32>
    %354 = arith.negf %353 : vector<2x16xf32>
    %355 = math.exp %354 : vector<2x16xf32>
    %cst_96 = arith.constant 1.000000e+00 : f32
    %356 = vector.broadcast %cst_96 : f32 to vector<2x16xf32>
    %357 = arith.addf %356, %355 : vector<2x16xf32>
    %358 = arith.divf %356, %357 : vector<2x16xf32>
    %359 = vector.extract_strided_slice %346 {offsets = [0, 16], sizes = [2, 16], strides = [1, 1]} : vector<2x48xf32> to vector<2x16xf32>
    %360 = vector.extract_strided_slice %350 {offsets = [0, 16], sizes = [2, 16], strides = [1, 1]} : vector<2x48xf32> to vector<2x16xf32>
    %361 = arith.addf %359, %360 : vector<2x16xf32>
    %362 = arith.negf %361 : vector<2x16xf32>
    %363 = math.exp %362 : vector<2x16xf32>
    %cst_97 = arith.constant 1.000000e+00 : f32
    %364 = vector.broadcast %cst_97 : f32 to vector<2x16xf32>
    %365 = arith.addf %364, %363 : vector<2x16xf32>
    %366 = arith.divf %364, %365 : vector<2x16xf32>
    %367 = vector.extract_strided_slice %346 {offsets = [0, 32], sizes = [2, 16], strides = [1, 1]} : vector<2x48xf32> to vector<2x16xf32>
    %368 = vector.extract_strided_slice %350 {offsets = [0, 32], sizes = [2, 16], strides = [1, 1]} : vector<2x48xf32> to vector<2x16xf32>
    %369 = arith.mulf %358, %368 : vector<2x16xf32>
    %370 = arith.addf %367, %369 : vector<2x16xf32>
    %371 = math.tanh %370 : vector<2x16xf32>
    %cst_98 = arith.constant 1.000000e+00 : f32
    %372 = vector.broadcast %cst_98 : f32 to vector<2x16xf32>
    %373 = arith.subf %372, %366 : vector<2x16xf32>
    %374 = arith.mulf %373, %371 : vector<2x16xf32>
    %375 = arith.mulf %366, %310 : vector<2x16xf32>
    %376 = arith.addf %374, %375 : vector<2x16xf32>
    %377 = vector.shape_cast %376 : vector<2x16xf32> to vector<2x1x16xf32>
    %378 = vector.extract_strided_slice %177 {offsets = [0, 3, 0], sizes = [2, 1, 48], strides = [1, 1, 1]} : vector<2x8x96xf32> to vector<2x1x48xf32>
    %379 = vector.shape_cast %378 : vector<2x1x48xf32> to vector<2x48xf32>
    %380 = arith.truncf %343 : vector<2x16xf32> to vector<2x16xbf16>
    %cst_99 = arith.constant dense<0.000000e+00> : vector<2x48xf32>
    %381 = tpu.matmul %380, %167, %cst_99 {dimension_numbers = #tpu.dot_dimension_numbers<[1], [0], [0], [1], [0, 0, 1, 1], [], []>} : vector<2x16xbf16>, vector<16x48xbf16>, vector<2x48xf32> -> vector<2x48xf32>
    %382 = vector.broadcast %168 : vector<1x48xf32> to vector<2x48xf32>
    %383 = arith.addf %381, %382 : vector<2x48xf32>
    %384 = vector.extract_strided_slice %379 {offsets = [0, 0], sizes = [2, 16], strides = [1, 1]} : vector<2x48xf32> to vector<2x16xf32>
    %385 = vector.extract_strided_slice %383 {offsets = [0, 0], sizes = [2, 16], strides = [1, 1]} : vector<2x48xf32> to vector<2x16xf32>
    %386 = arith.addf %384, %385 : vector<2x16xf32>
    %387 = arith.negf %386 : vector<2x16xf32>
    %388 = math.exp %387 : vector<2x16xf32>
    %cst_100 = arith.constant 1.000000e+00 : f32
    %389 = vector.broadcast %cst_100 : f32 to vector<2x16xf32>
    %390 = arith.addf %389, %388 : vector<2x16xf32>
    %391 = arith.divf %389, %390 : vector<2x16xf32>
    %392 = vector.extract_strided_slice %379 {offsets = [0, 16], sizes = [2, 16], strides = [1, 1]} : vector<2x48xf32> to vector<2x16xf32>
    %393 = vector.extract_strided_slice %383 {offsets = [0, 16], sizes = [2, 16], strides = [1, 1]} : vector<2x48xf32> to vector<2x16xf32>
    %394 = arith.addf %392, %393 : vector<2x16xf32>
    %395 = arith.negf %394 : vector<2x16xf32>
    %396 = math.exp %395 : vector<2x16xf32>
    %cst_101 = arith.constant 1.000000e+00 : f32
    %397 = vector.broadcast %cst_101 : f32 to vector<2x16xf32>
    %398 = arith.addf %397, %396 : vector<2x16xf32>
    %399 = arith.divf %397, %398 : vector<2x16xf32>
    %400 = vector.extract_strided_slice %379 {offsets = [0, 32], sizes = [2, 16], strides = [1, 1]} : vector<2x48xf32> to vector<2x16xf32>
    %401 = vector.extract_strided_slice %383 {offsets = [0, 32], sizes = [2, 16], strides = [1, 1]} : vector<2x48xf32> to vector<2x16xf32>
    %402 = arith.mulf %391, %401 : vector<2x16xf32>
    %403 = arith.addf %400, %402 : vector<2x16xf32>
    %404 = math.tanh %403 : vector<2x16xf32>
    %cst_102 = arith.constant 1.000000e+00 : f32
    %405 = vector.broadcast %cst_102 : f32 to vector<2x16xf32>
    %406 = arith.subf %405, %399 : vector<2x16xf32>
    %407 = arith.mulf %406, %404 : vector<2x16xf32>
    %408 = arith.mulf %399, %343 : vector<2x16xf32>
    %409 = arith.addf %407, %408 : vector<2x16xf32>
    %410 = vector.shape_cast %409 : vector<2x16xf32> to vector<2x1x16xf32>
    %411 = vector.extract_strided_slice %177 {offsets = [0, 4, 48], sizes = [2, 1, 48], strides = [1, 1, 1]} : vector<2x8x96xf32> to vector<2x1x48xf32>
    %412 = vector.shape_cast %411 : vector<2x1x48xf32> to vector<2x48xf32>
    %413 = arith.truncf %376 : vector<2x16xf32> to vector<2x16xbf16>
    %cst_103 = arith.constant dense<0.000000e+00> : vector<2x48xf32>
    %414 = tpu.matmul %413, %169, %cst_103 {dimension_numbers = #tpu.dot_dimension_numbers<[1], [0], [0], [1], [0, 0, 1, 1], [], []>} : vector<2x16xbf16>, vector<16x48xbf16>, vector<2x48xf32> -> vector<2x48xf32>
    %415 = vector.broadcast %170 : vector<1x48xf32> to vector<2x48xf32>
    %416 = arith.addf %414, %415 : vector<2x48xf32>
    %417 = vector.extract_strided_slice %412 {offsets = [0, 0], sizes = [2, 16], strides = [1, 1]} : vector<2x48xf32> to vector<2x16xf32>
    %418 = vector.extract_strided_slice %416 {offsets = [0, 0], sizes = [2, 16], strides = [1, 1]} : vector<2x48xf32> to vector<2x16xf32>
    %419 = arith.addf %417, %418 : vector<2x16xf32>
    %420 = arith.negf %419 : vector<2x16xf32>
    %421 = math.exp %420 : vector<2x16xf32>
    %cst_104 = arith.constant 1.000000e+00 : f32
    %422 = vector.broadcast %cst_104 : f32 to vector<2x16xf32>
    %423 = arith.addf %422, %421 : vector<2x16xf32>
    %424 = arith.divf %422, %423 : vector<2x16xf32>
    %425 = vector.extract_strided_slice %412 {offsets = [0, 16], sizes = [2, 16], strides = [1, 1]} : vector<2x48xf32> to vector<2x16xf32>
    %426 = vector.extract_strided_slice %416 {offsets = [0, 16], sizes = [2, 16], strides = [1, 1]} : vector<2x48xf32> to vector<2x16xf32>
    %427 = arith.addf %425, %426 : vector<2x16xf32>
    %428 = arith.negf %427 : vector<2x16xf32>
    %429 = math.exp %428 : vector<2x16xf32>
    %cst_105 = arith.constant 1.000000e+00 : f32
    %430 = vector.broadcast %cst_105 : f32 to vector<2x16xf32>
    %431 = arith.addf %430, %429 : vector<2x16xf32>
    %432 = arith.divf %430, %431 : vector<2x16xf32>
    %433 = vector.extract_strided_slice %412 {offsets = [0, 32], sizes = [2, 16], strides = [1, 1]} : vector<2x48xf32> to vector<2x16xf32>
    %434 = vector.extract_strided_slice %416 {offsets = [0, 32], sizes = [2, 16], strides = [1, 1]} : vector<2x48xf32> to vector<2x16xf32>
    %435 = arith.mulf %424, %434 : vector<2x16xf32>
    %436 = arith.addf %433, %435 : vector<2x16xf32>
    %437 = math.tanh %436 : vector<2x16xf32>
    %cst_106 = arith.constant 1.000000e+00 : f32
    %438 = vector.broadcast %cst_106 : f32 to vector<2x16xf32>
    %439 = arith.subf %438, %432 : vector<2x16xf32>
    %440 = arith.mulf %439, %437 : vector<2x16xf32>
    %441 = arith.mulf %432, %376 : vector<2x16xf32>
    %442 = arith.addf %440, %441 : vector<2x16xf32>
    %443 = vector.shape_cast %442 : vector<2x16xf32> to vector<2x1x16xf32>
    %444 = vector.extract_strided_slice %177 {offsets = [0, 4, 0], sizes = [2, 1, 48], strides = [1, 1, 1]} : vector<2x8x96xf32> to vector<2x1x48xf32>
    %445 = vector.shape_cast %444 : vector<2x1x48xf32> to vector<2x48xf32>
    %446 = arith.truncf %409 : vector<2x16xf32> to vector<2x16xbf16>
    %cst_107 = arith.constant dense<0.000000e+00> : vector<2x48xf32>
    %447 = tpu.matmul %446, %167, %cst_107 {dimension_numbers = #tpu.dot_dimension_numbers<[1], [0], [0], [1], [0, 0, 1, 1], [], []>} : vector<2x16xbf16>, vector<16x48xbf16>, vector<2x48xf32> -> vector<2x48xf32>
    %448 = vector.broadcast %168 : vector<1x48xf32> to vector<2x48xf32>
    %449 = arith.addf %447, %448 : vector<2x48xf32>
    %450 = vector.extract_strided_slice %445 {offsets = [0, 0], sizes = [2, 16], strides = [1, 1]} : vector<2x48xf32> to vector<2x16xf32>
    %451 = vector.extract_strided_slice %449 {offsets = [0, 0], sizes = [2, 16], strides = [1, 1]} : vector<2x48xf32> to vector<2x16xf32>
    %452 = arith.addf %450, %451 : vector<2x16xf32>
    %453 = arith.negf %452 : vector<2x16xf32>
    %454 = math.exp %453 : vector<2x16xf32>
    %cst_108 = arith.constant 1.000000e+00 : f32
    %455 = vector.broadcast %cst_108 : f32 to vector<2x16xf32>
    %456 = arith.addf %455, %454 : vector<2x16xf32>
    %457 = arith.divf %455, %456 : vector<2x16xf32>
    %458 = vector.extract_strided_slice %445 {offsets = [0, 16], sizes = [2, 16], strides = [1, 1]} : vector<2x48xf32> to vector<2x16xf32>
    %459 = vector.extract_strided_slice %449 {offsets = [0, 16], sizes = [2, 16], strides = [1, 1]} : vector<2x48xf32> to vector<2x16xf32>
    %460 = arith.addf %458, %459 : vector<2x16xf32>
    %461 = arith.negf %460 : vector<2x16xf32>
    %462 = math.exp %461 : vector<2x16xf32>
    %cst_109 = arith.constant 1.000000e+00 : f32
    %463 = vector.broadcast %cst_109 : f32 to vector<2x16xf32>
    %464 = arith.addf %463, %462 : vector<2x16xf32>
    %465 = arith.divf %463, %464 : vector<2x16xf32>
    %466 = vector.extract_strided_slice %445 {offsets = [0, 32], sizes = [2, 16], strides = [1, 1]} : vector<2x48xf32> to vector<2x16xf32>
    %467 = vector.extract_strided_slice %449 {offsets = [0, 32], sizes = [2, 16], strides = [1, 1]} : vector<2x48xf32> to vector<2x16xf32>
    %468 = arith.mulf %457, %467 : vector<2x16xf32>
    %469 = arith.addf %466, %468 : vector<2x16xf32>
    %470 = math.tanh %469 : vector<2x16xf32>
    %cst_110 = arith.constant 1.000000e+00 : f32
    %471 = vector.broadcast %cst_110 : f32 to vector<2x16xf32>
    %472 = arith.subf %471, %465 : vector<2x16xf32>
    %473 = arith.mulf %472, %470 : vector<2x16xf32>
    %474 = arith.mulf %465, %409 : vector<2x16xf32>
    %475 = arith.addf %473, %474 : vector<2x16xf32>
    %476 = vector.shape_cast %475 : vector<2x16xf32> to vector<2x1x16xf32>
    %477 = vector.extract_strided_slice %177 {offsets = [0, 3, 48], sizes = [2, 1, 48], strides = [1, 1, 1]} : vector<2x8x96xf32> to vector<2x1x48xf32>
    %478 = vector.shape_cast %477 : vector<2x1x48xf32> to vector<2x48xf32>
    %479 = arith.truncf %442 : vector<2x16xf32> to vector<2x16xbf16>
    %cst_111 = arith.constant dense<0.000000e+00> : vector<2x48xf32>
    %480 = tpu.matmul %479, %169, %cst_111 {dimension_numbers = #tpu.dot_dimension_numbers<[1], [0], [0], [1], [0, 0, 1, 1], [], []>} : vector<2x16xbf16>, vector<16x48xbf16>, vector<2x48xf32> -> vector<2x48xf32>
    %481 = vector.broadcast %170 : vector<1x48xf32> to vector<2x48xf32>
    %482 = arith.addf %480, %481 : vector<2x48xf32>
    %483 = vector.extract_strided_slice %478 {offsets = [0, 0], sizes = [2, 16], strides = [1, 1]} : vector<2x48xf32> to vector<2x16xf32>
    %484 = vector.extract_strided_slice %482 {offsets = [0, 0], sizes = [2, 16], strides = [1, 1]} : vector<2x48xf32> to vector<2x16xf32>
    %485 = arith.addf %483, %484 : vector<2x16xf32>
    %486 = arith.negf %485 : vector<2x16xf32>
    %487 = math.exp %486 : vector<2x16xf32>
    %cst_112 = arith.constant 1.000000e+00 : f32
    %488 = vector.broadcast %cst_112 : f32 to vector<2x16xf32>
    %489 = arith.addf %488, %487 : vector<2x16xf32>
    %490 = arith.divf %488, %489 : vector<2x16xf32>
    %491 = vector.extract_strided_slice %478 {offsets = [0, 16], sizes = [2, 16], strides = [1, 1]} : vector<2x48xf32> to vector<2x16xf32>
    %492 = vector.extract_strided_slice %482 {offsets = [0, 16], sizes = [2, 16], strides = [1, 1]} : vector<2x48xf32> to vector<2x16xf32>
    %493 = arith.addf %491, %492 : vector<2x16xf32>
    %494 = arith.negf %493 : vector<2x16xf32>
    %495 = math.exp %494 : vector<2x16xf32>
    %cst_113 = arith.constant 1.000000e+00 : f32
    %496 = vector.broadcast %cst_113 : f32 to vector<2x16xf32>
    %497 = arith.addf %496, %495 : vector<2x16xf32>
    %498 = arith.divf %496, %497 : vector<2x16xf32>
    %499 = vector.extract_strided_slice %478 {offsets = [0, 32], sizes = [2, 16], strides = [1, 1]} : vector<2x48xf32> to vector<2x16xf32>
    %500 = vector.extract_strided_slice %482 {offsets = [0, 32], sizes = [2, 16], strides = [1, 1]} : vector<2x48xf32> to vector<2x16xf32>
    %501 = arith.mulf %490, %500 : vector<2x16xf32>
    %502 = arith.addf %499, %501 : vector<2x16xf32>
    %503 = math.tanh %502 : vector<2x16xf32>
    %cst_114 = arith.constant 1.000000e+00 : f32
    %504 = vector.broadcast %cst_114 : f32 to vector<2x16xf32>
    %505 = arith.subf %504, %498 : vector<2x16xf32>
    %506 = arith.mulf %505, %503 : vector<2x16xf32>
    %507 = arith.mulf %498, %442 : vector<2x16xf32>
    %508 = arith.addf %506, %507 : vector<2x16xf32>
    %509 = vector.shape_cast %508 : vector<2x16xf32> to vector<2x1x16xf32>
    %510 = vector.extract_strided_slice %177 {offsets = [0, 5, 0], sizes = [2, 1, 48], strides = [1, 1, 1]} : vector<2x8x96xf32> to vector<2x1x48xf32>
    %511 = vector.shape_cast %510 : vector<2x1x48xf32> to vector<2x48xf32>
    %512 = arith.truncf %475 : vector<2x16xf32> to vector<2x16xbf16>
    %cst_115 = arith.constant dense<0.000000e+00> : vector<2x48xf32>
    %513 = tpu.matmul %512, %167, %cst_115 {dimension_numbers = #tpu.dot_dimension_numbers<[1], [0], [0], [1], [0, 0, 1, 1], [], []>} : vector<2x16xbf16>, vector<16x48xbf16>, vector<2x48xf32> -> vector<2x48xf32>
    %514 = vector.broadcast %168 : vector<1x48xf32> to vector<2x48xf32>
    %515 = arith.addf %513, %514 : vector<2x48xf32>
    %516 = vector.extract_strided_slice %511 {offsets = [0, 0], sizes = [2, 16], strides = [1, 1]} : vector<2x48xf32> to vector<2x16xf32>
    %517 = vector.extract_strided_slice %515 {offsets = [0, 0], sizes = [2, 16], strides = [1, 1]} : vector<2x48xf32> to vector<2x16xf32>
    %518 = arith.addf %516, %517 : vector<2x16xf32>
    %519 = arith.negf %518 : vector<2x16xf32>
    %520 = math.exp %519 : vector<2x16xf32>
    %cst_116 = arith.constant 1.000000e+00 : f32
    %521 = vector.broadcast %cst_116 : f32 to vector<2x16xf32>
    %522 = arith.addf %521, %520 : vector<2x16xf32>
    %523 = arith.divf %521, %522 : vector<2x16xf32>
    %524 = vector.extract_strided_slice %511 {offsets = [0, 16], sizes = [2, 16], strides = [1, 1]} : vector<2x48xf32> to vector<2x16xf32>
    %525 = vector.extract_strided_slice %515 {offsets = [0, 16], sizes = [2, 16], strides = [1, 1]} : vector<2x48xf32> to vector<2x16xf32>
    %526 = arith.addf %524, %525 : vector<2x16xf32>
    %527 = arith.negf %526 : vector<2x16xf32>
    %528 = math.exp %527 : vector<2x16xf32>
    %cst_117 = arith.constant 1.000000e+00 : f32
    %529 = vector.broadcast %cst_117 : f32 to vector<2x16xf32>
    %530 = arith.addf %529, %528 : vector<2x16xf32>
    %531 = arith.divf %529, %530 : vector<2x16xf32>
    %532 = vector.extract_strided_slice %511 {offsets = [0, 32], sizes = [2, 16], strides = [1, 1]} : vector<2x48xf32> to vector<2x16xf32>
    %533 = vector.extract_strided_slice %515 {offsets = [0, 32], sizes = [2, 16], strides = [1, 1]} : vector<2x48xf32> to vector<2x16xf32>
    %534 = arith.mulf %523, %533 : vector<2x16xf32>
    %535 = arith.addf %532, %534 : vector<2x16xf32>
    %536 = math.tanh %535 : vector<2x16xf32>
    %cst_118 = arith.constant 1.000000e+00 : f32
    %537 = vector.broadcast %cst_118 : f32 to vector<2x16xf32>
    %538 = arith.subf %537, %531 : vector<2x16xf32>
    %539 = arith.mulf %538, %536 : vector<2x16xf32>
    %540 = arith.mulf %531, %475 : vector<2x16xf32>
    %541 = arith.addf %539, %540 : vector<2x16xf32>
    %542 = vector.shape_cast %541 : vector<2x16xf32> to vector<2x1x16xf32>
    %543 = vector.extract_strided_slice %177 {offsets = [0, 2, 48], sizes = [2, 1, 48], strides = [1, 1, 1]} : vector<2x8x96xf32> to vector<2x1x48xf32>
    %544 = vector.shape_cast %543 : vector<2x1x48xf32> to vector<2x48xf32>
    %545 = arith.truncf %508 : vector<2x16xf32> to vector<2x16xbf16>
    %cst_119 = arith.constant dense<0.000000e+00> : vector<2x48xf32>
    %546 = tpu.matmul %545, %169, %cst_119 {dimension_numbers = #tpu.dot_dimension_numbers<[1], [0], [0], [1], [0, 0, 1, 1], [], []>} : vector<2x16xbf16>, vector<16x48xbf16>, vector<2x48xf32> -> vector<2x48xf32>
    %547 = vector.broadcast %170 : vector<1x48xf32> to vector<2x48xf32>
    %548 = arith.addf %546, %547 : vector<2x48xf32>
    %549 = vector.extract_strided_slice %544 {offsets = [0, 0], sizes = [2, 16], strides = [1, 1]} : vector<2x48xf32> to vector<2x16xf32>
    %550 = vector.extract_strided_slice %548 {offsets = [0, 0], sizes = [2, 16], strides = [1, 1]} : vector<2x48xf32> to vector<2x16xf32>
    %551 = arith.addf %549, %550 : vector<2x16xf32>
    %552 = arith.negf %551 : vector<2x16xf32>
    %553 = math.exp %552 : vector<2x16xf32>
    %cst_120 = arith.constant 1.000000e+00 : f32
    %554 = vector.broadcast %cst_120 : f32 to vector<2x16xf32>
    %555 = arith.addf %554, %553 : vector<2x16xf32>
    %556 = arith.divf %554, %555 : vector<2x16xf32>
    %557 = vector.extract_strided_slice %544 {offsets = [0, 16], sizes = [2, 16], strides = [1, 1]} : vector<2x48xf32> to vector<2x16xf32>
    %558 = vector.extract_strided_slice %548 {offsets = [0, 16], sizes = [2, 16], strides = [1, 1]} : vector<2x48xf32> to vector<2x16xf32>
    %559 = arith.addf %557, %558 : vector<2x16xf32>
    %560 = arith.negf %559 : vector<2x16xf32>
    %561 = math.exp %560 : vector<2x16xf32>
    %cst_121 = arith.constant 1.000000e+00 : f32
    %562 = vector.broadcast %cst_121 : f32 to vector<2x16xf32>
    %563 = arith.addf %562, %561 : vector<2x16xf32>
    %564 = arith.divf %562, %563 : vector<2x16xf32>
    %565 = vector.extract_strided_slice %544 {offsets = [0, 32], sizes = [2, 16], strides = [1, 1]} : vector<2x48xf32> to vector<2x16xf32>
    %566 = vector.extract_strided_slice %548 {offsets = [0, 32], sizes = [2, 16], strides = [1, 1]} : vector<2x48xf32> to vector<2x16xf32>
    %567 = arith.mulf %556, %566 : vector<2x16xf32>
    %568 = arith.addf %565, %567 : vector<2x16xf32>
    %569 = math.tanh %568 : vector<2x16xf32>
    %cst_122 = arith.constant 1.000000e+00 : f32
    %570 = vector.broadcast %cst_122 : f32 to vector<2x16xf32>
    %571 = arith.subf %570, %564 : vector<2x16xf32>
    %572 = arith.mulf %571, %569 : vector<2x16xf32>
    %573 = arith.mulf %564, %508 : vector<2x16xf32>
    %574 = arith.addf %572, %573 : vector<2x16xf32>
    %575 = vector.shape_cast %574 : vector<2x16xf32> to vector<2x1x16xf32>
    %576 = vector.extract_strided_slice %177 {offsets = [0, 6, 0], sizes = [2, 1, 48], strides = [1, 1, 1]} : vector<2x8x96xf32> to vector<2x1x48xf32>
    %577 = vector.shape_cast %576 : vector<2x1x48xf32> to vector<2x48xf32>
    %578 = arith.truncf %541 : vector<2x16xf32> to vector<2x16xbf16>
    %cst_123 = arith.constant dense<0.000000e+00> : vector<2x48xf32>
    %579 = tpu.matmul %578, %167, %cst_123 {dimension_numbers = #tpu.dot_dimension_numbers<[1], [0], [0], [1], [0, 0, 1, 1], [], []>} : vector<2x16xbf16>, vector<16x48xbf16>, vector<2x48xf32> -> vector<2x48xf32>
    %580 = vector.broadcast %168 : vector<1x48xf32> to vector<2x48xf32>
    %581 = arith.addf %579, %580 : vector<2x48xf32>
    %582 = vector.extract_strided_slice %577 {offsets = [0, 0], sizes = [2, 16], strides = [1, 1]} : vector<2x48xf32> to vector<2x16xf32>
    %583 = vector.extract_strided_slice %581 {offsets = [0, 0], sizes = [2, 16], strides = [1, 1]} : vector<2x48xf32> to vector<2x16xf32>
    %584 = arith.addf %582, %583 : vector<2x16xf32>
    %585 = arith.negf %584 : vector<2x16xf32>
    %586 = math.exp %585 : vector<2x16xf32>
    %cst_124 = arith.constant 1.000000e+00 : f32
    %587 = vector.broadcast %cst_124 : f32 to vector<2x16xf32>
    %588 = arith.addf %587, %586 : vector<2x16xf32>
    %589 = arith.divf %587, %588 : vector<2x16xf32>
    %590 = vector.extract_strided_slice %577 {offsets = [0, 16], sizes = [2, 16], strides = [1, 1]} : vector<2x48xf32> to vector<2x16xf32>
    %591 = vector.extract_strided_slice %581 {offsets = [0, 16], sizes = [2, 16], strides = [1, 1]} : vector<2x48xf32> to vector<2x16xf32>
    %592 = arith.addf %590, %591 : vector<2x16xf32>
    %593 = arith.negf %592 : vector<2x16xf32>
    %594 = math.exp %593 : vector<2x16xf32>
    %cst_125 = arith.constant 1.000000e+00 : f32
    %595 = vector.broadcast %cst_125 : f32 to vector<2x16xf32>
    %596 = arith.addf %595, %594 : vector<2x16xf32>
    %597 = arith.divf %595, %596 : vector<2x16xf32>
    %598 = vector.extract_strided_slice %577 {offsets = [0, 32], sizes = [2, 16], strides = [1, 1]} : vector<2x48xf32> to vector<2x16xf32>
    %599 = vector.extract_strided_slice %581 {offsets = [0, 32], sizes = [2, 16], strides = [1, 1]} : vector<2x48xf32> to vector<2x16xf32>
    %600 = arith.mulf %589, %599 : vector<2x16xf32>
    %601 = arith.addf %598, %600 : vector<2x16xf32>
    %602 = math.tanh %601 : vector<2x16xf32>
    %cst_126 = arith.constant 1.000000e+00 : f32
    %603 = vector.broadcast %cst_126 : f32 to vector<2x16xf32>
    %604 = arith.subf %603, %597 : vector<2x16xf32>
    %605 = arith.mulf %604, %602 : vector<2x16xf32>
    %606 = arith.mulf %597, %541 : vector<2x16xf32>
    %607 = arith.addf %605, %606 : vector<2x16xf32>
    %608 = vector.shape_cast %607 : vector<2x16xf32> to vector<2x1x16xf32>
    %609 = vector.extract_strided_slice %177 {offsets = [0, 1, 48], sizes = [2, 1, 48], strides = [1, 1, 1]} : vector<2x8x96xf32> to vector<2x1x48xf32>
    %610 = vector.shape_cast %609 : vector<2x1x48xf32> to vector<2x48xf32>
    %611 = arith.truncf %574 : vector<2x16xf32> to vector<2x16xbf16>
    %cst_127 = arith.constant dense<0.000000e+00> : vector<2x48xf32>
    %612 = tpu.matmul %611, %169, %cst_127 {dimension_numbers = #tpu.dot_dimension_numbers<[1], [0], [0], [1], [0, 0, 1, 1], [], []>} : vector<2x16xbf16>, vector<16x48xbf16>, vector<2x48xf32> -> vector<2x48xf32>
    %613 = vector.broadcast %170 : vector<1x48xf32> to vector<2x48xf32>
    %614 = arith.addf %612, %613 : vector<2x48xf32>
    %615 = vector.extract_strided_slice %610 {offsets = [0, 0], sizes = [2, 16], strides = [1, 1]} : vector<2x48xf32> to vector<2x16xf32>
    %616 = vector.extract_strided_slice %614 {offsets = [0, 0], sizes = [2, 16], strides = [1, 1]} : vector<2x48xf32> to vector<2x16xf32>
    %617 = arith.addf %615, %616 : vector<2x16xf32>
    %618 = arith.negf %617 : vector<2x16xf32>
    %619 = math.exp %618 : vector<2x16xf32>
    %cst_128 = arith.constant 1.000000e+00 : f32
    %620 = vector.broadcast %cst_128 : f32 to vector<2x16xf32>
    %621 = arith.addf %620, %619 : vector<2x16xf32>
    %622 = arith.divf %620, %621 : vector<2x16xf32>
    %623 = vector.extract_strided_slice %610 {offsets = [0, 16], sizes = [2, 16], strides = [1, 1]} : vector<2x48xf32> to vector<2x16xf32>
    %624 = vector.extract_strided_slice %614 {offsets = [0, 16], sizes = [2, 16], strides = [1, 1]} : vector<2x48xf32> to vector<2x16xf32>
    %625 = arith.addf %623, %624 : vector<2x16xf32>
    %626 = arith.negf %625 : vector<2x16xf32>
    %627 = math.exp %626 : vector<2x16xf32>
    %cst_129 = arith.constant 1.000000e+00 : f32
    %628 = vector.broadcast %cst_129 : f32 to vector<2x16xf32>
    %629 = arith.addf %628, %627 : vector<2x16xf32>
    %630 = arith.divf %628, %629 : vector<2x16xf32>
    %631 = vector.extract_strided_slice %610 {offsets = [0, 32], sizes = [2, 16], strides = [1, 1]} : vector<2x48xf32> to vector<2x16xf32>
    %632 = vector.extract_strided_slice %614 {offsets = [0, 32], sizes = [2, 16], strides = [1, 1]} : vector<2x48xf32> to vector<2x16xf32>
    %633 = arith.mulf %622, %632 : vector<2x16xf32>
    %634 = arith.addf %631, %633 : vector<2x16xf32>
    %635 = math.tanh %634 : vector<2x16xf32>
    %cst_130 = arith.constant 1.000000e+00 : f32
    %636 = vector.broadcast %cst_130 : f32 to vector<2x16xf32>
    %637 = arith.subf %636, %630 : vector<2x16xf32>
    %638 = arith.mulf %637, %635 : vector<2x16xf32>
    %639 = arith.mulf %630, %574 : vector<2x16xf32>
    %640 = arith.addf %638, %639 : vector<2x16xf32>
    %641 = vector.shape_cast %640 : vector<2x16xf32> to vector<2x1x16xf32>
    %642 = vector.extract_strided_slice %177 {offsets = [0, 7, 0], sizes = [2, 1, 48], strides = [1, 1, 1]} : vector<2x8x96xf32> to vector<2x1x48xf32>
    %643 = vector.shape_cast %642 : vector<2x1x48xf32> to vector<2x48xf32>
    %644 = arith.truncf %607 : vector<2x16xf32> to vector<2x16xbf16>
    %cst_131 = arith.constant dense<0.000000e+00> : vector<2x48xf32>
    %645 = tpu.matmul %644, %167, %cst_131 {dimension_numbers = #tpu.dot_dimension_numbers<[1], [0], [0], [1], [0, 0, 1, 1], [], []>} : vector<2x16xbf16>, vector<16x48xbf16>, vector<2x48xf32> -> vector<2x48xf32>
    %646 = vector.broadcast %168 : vector<1x48xf32> to vector<2x48xf32>
    %647 = arith.addf %645, %646 : vector<2x48xf32>
    %648 = vector.extract_strided_slice %643 {offsets = [0, 0], sizes = [2, 16], strides = [1, 1]} : vector<2x48xf32> to vector<2x16xf32>
    %649 = vector.extract_strided_slice %647 {offsets = [0, 0], sizes = [2, 16], strides = [1, 1]} : vector<2x48xf32> to vector<2x16xf32>
    %650 = arith.addf %648, %649 : vector<2x16xf32>
    %651 = arith.negf %650 : vector<2x16xf32>
    %652 = math.exp %651 : vector<2x16xf32>
    %cst_132 = arith.constant 1.000000e+00 : f32
    %653 = vector.broadcast %cst_132 : f32 to vector<2x16xf32>
    %654 = arith.addf %653, %652 : vector<2x16xf32>
    %655 = arith.divf %653, %654 : vector<2x16xf32>
    %656 = vector.extract_strided_slice %643 {offsets = [0, 16], sizes = [2, 16], strides = [1, 1]} : vector<2x48xf32> to vector<2x16xf32>
    %657 = vector.extract_strided_slice %647 {offsets = [0, 16], sizes = [2, 16], strides = [1, 1]} : vector<2x48xf32> to vector<2x16xf32>
    %658 = arith.addf %656, %657 : vector<2x16xf32>
    %659 = arith.negf %658 : vector<2x16xf32>
    %660 = math.exp %659 : vector<2x16xf32>
    %cst_133 = arith.constant 1.000000e+00 : f32
    %661 = vector.broadcast %cst_133 : f32 to vector<2x16xf32>
    %662 = arith.addf %661, %660 : vector<2x16xf32>
    %663 = arith.divf %661, %662 : vector<2x16xf32>
    %664 = vector.extract_strided_slice %643 {offsets = [0, 32], sizes = [2, 16], strides = [1, 1]} : vector<2x48xf32> to vector<2x16xf32>
    %665 = vector.extract_strided_slice %647 {offsets = [0, 32], sizes = [2, 16], strides = [1, 1]} : vector<2x48xf32> to vector<2x16xf32>
    %666 = arith.mulf %655, %665 : vector<2x16xf32>
    %667 = arith.addf %664, %666 : vector<2x16xf32>
    %668 = math.tanh %667 : vector<2x16xf32>
    %cst_134 = arith.constant 1.000000e+00 : f32
    %669 = vector.broadcast %cst_134 : f32 to vector<2x16xf32>
    %670 = arith.subf %669, %663 : vector<2x16xf32>
    %671 = arith.mulf %670, %668 : vector<2x16xf32>
    %672 = arith.mulf %663, %607 : vector<2x16xf32>
    %673 = arith.addf %671, %672 : vector<2x16xf32>
    %674 = vector.shape_cast %673 : vector<2x16xf32> to vector<2x1x16xf32>
    %675 = vector.extract_strided_slice %177 {offsets = [0, 0, 48], sizes = [2, 1, 48], strides = [1, 1, 1]} : vector<2x8x96xf32> to vector<2x1x48xf32>
    %676 = vector.shape_cast %675 : vector<2x1x48xf32> to vector<2x48xf32>
    %677 = arith.truncf %640 : vector<2x16xf32> to vector<2x16xbf16>
    %cst_135 = arith.constant dense<0.000000e+00> : vector<2x48xf32>
    %678 = tpu.matmul %677, %169, %cst_135 {dimension_numbers = #tpu.dot_dimension_numbers<[1], [0], [0], [1], [0, 0, 1, 1], [], []>} : vector<2x16xbf16>, vector<16x48xbf16>, vector<2x48xf32> -> vector<2x48xf32>
    %679 = vector.broadcast %170 : vector<1x48xf32> to vector<2x48xf32>
    %680 = arith.addf %678, %679 : vector<2x48xf32>
    %681 = vector.extract_strided_slice %676 {offsets = [0, 0], sizes = [2, 16], strides = [1, 1]} : vector<2x48xf32> to vector<2x16xf32>
    %682 = vector.extract_strided_slice %680 {offsets = [0, 0], sizes = [2, 16], strides = [1, 1]} : vector<2x48xf32> to vector<2x16xf32>
    %683 = arith.addf %681, %682 : vector<2x16xf32>
    %684 = arith.negf %683 : vector<2x16xf32>
    %685 = math.exp %684 : vector<2x16xf32>
    %cst_136 = arith.constant 1.000000e+00 : f32
    %686 = vector.broadcast %cst_136 : f32 to vector<2x16xf32>
    %687 = arith.addf %686, %685 : vector<2x16xf32>
    %688 = arith.divf %686, %687 : vector<2x16xf32>
    %689 = vector.extract_strided_slice %676 {offsets = [0, 16], sizes = [2, 16], strides = [1, 1]} : vector<2x48xf32> to vector<2x16xf32>
    %690 = vector.extract_strided_slice %680 {offsets = [0, 16], sizes = [2, 16], strides = [1, 1]} : vector<2x48xf32> to vector<2x16xf32>
    %691 = arith.addf %689, %690 : vector<2x16xf32>
    %692 = arith.negf %691 : vector<2x16xf32>
    %693 = math.exp %692 : vector<2x16xf32>
    %cst_137 = arith.constant 1.000000e+00 : f32
    %694 = vector.broadcast %cst_137 : f32 to vector<2x16xf32>
    %695 = arith.addf %694, %693 : vector<2x16xf32>
    %696 = arith.divf %694, %695 : vector<2x16xf32>
    %697 = vector.extract_strided_slice %676 {offsets = [0, 32], sizes = [2, 16], strides = [1, 1]} : vector<2x48xf32> to vector<2x16xf32>
    %698 = vector.extract_strided_slice %680 {offsets = [0, 32], sizes = [2, 16], strides = [1, 1]} : vector<2x48xf32> to vector<2x16xf32>
    %699 = arith.mulf %688, %698 : vector<2x16xf32>
    %700 = arith.addf %697, %699 : vector<2x16xf32>
    %701 = math.tanh %700 : vector<2x16xf32>
    %cst_138 = arith.constant 1.000000e+00 : f32
    %702 = vector.broadcast %cst_138 : f32 to vector<2x16xf32>
    %703 = arith.subf %702, %696 : vector<2x16xf32>
    %704 = arith.mulf %703, %701 : vector<2x16xf32>
    %705 = arith.mulf %696, %640 : vector<2x16xf32>
    %706 = arith.addf %704, %705 : vector<2x16xf32>
    %707 = vector.shape_cast %706 : vector<2x16xf32> to vector<2x1x16xf32>
    %708 = tpu.concatenate %212, %278, %344, %410, %476, %542, %608, %674 in 1 : vector<2x1x16xf32>, vector<2x1x16xf32>, vector<2x1x16xf32>, vector<2x1x16xf32>, vector<2x1x16xf32>, vector<2x1x16xf32>, vector<2x1x16xf32>, vector<2x1x16xf32> -> vector<2x8x16xf32>
    %709 = tpu.concatenate %707, %641, %575, %509, %443, %377, %311, %245 in 1 : vector<2x1x16xf32>, vector<2x1x16xf32>, vector<2x1x16xf32>, vector<2x1x16xf32>, vector<2x1x16xf32>, vector<2x1x16xf32>, vector<2x1x16xf32>, vector<2x1x16xf32> -> vector<2x8x16xf32>
    %710 = tpu.concatenate %708, %709 in 2 : vector<2x8x16xf32>, vector<2x8x16xf32> -> vector<2x8x32xf32>
    %711 = arith.truncf %710 : vector<2x8x32xf32> to vector<2x8x32xbf16>
    %c0_139 = arith.constant 0 : index
    %c0_140 = arith.constant 0 : index
    %c0_141 = arith.constant 0 : index
    %712 = vector.load %arg19[%c0_139, %c0_140, %c0_141] : memref<2x8x32xbf16, #tpu.memory_space<vmem>>, vector<2x8x32xbf16>
    tpu.vector_store %arg19[%c0_139, %c0_140, %c0_141], %711 {strides = array<i32>} : memref<2x8x32xbf16, #tpu.memory_space<vmem>>, vector<2x8x32xbf16>,
    return
  }
}

module attributes {stable_mosaic.version = 11 : i64} {
  func.func @_decoder_kernel(%arg0: memref<2x8x32xbf16, #tpu.memory_space<vmem>>, %arg1: memref<32x32xbf16, #tpu.memory_space<vmem>>, %arg2: memref<1x32xf32, #tpu.memory_space<vmem>>, %arg3: memref<32x16xbf16, #tpu.memory_space<vmem>>, %arg4: memref<1x16xf32, #tpu.memory_space<vmem>>, %arg5: memref<16x96xbf16, #tpu.memory_space<vmem>>, %arg6: memref<32x96xbf16, #tpu.memory_space<vmem>>, %arg7: memref<1x96xf32, #tpu.memory_space<vmem>>, %arg8: memref<1x96xf32, #tpu.memory_space<vmem>>, %arg9: memref<64x32xbf16, #tpu.memory_space<vmem>>, %arg10: memref<1x32xf32, #tpu.memory_space<vmem>>, %arg11: memref<2x32x96xbf16, #tpu.memory_space<vmem>>, %arg12: memref<2x32x96xbf16, #tpu.memory_space<vmem>>, %arg13: memref<2x1x96xf32, #tpu.memory_space<vmem>>, %arg14: memref<2x1x96xf32, #tpu.memory_space<vmem>>, %arg15: memref<32x16xbf16, #tpu.memory_space<vmem>>, %arg16: memref<1x16xf32, #tpu.memory_space<vmem>>, %arg17: memref<2x32xf32, #tpu.memory_space<vmem>>, %arg18: memref<2x32xf32, #tpu.memory_space<vmem>>, %arg19: memref<2x2x32xf32, #tpu.memory_space<vmem>>, %arg20: memref<2x3x16xf32, #tpu.memory_space<vmem>>) attributes {dimension_semantics = [], scalar_prefetch = 0 : i64, scratch_operands = 0 : i64, tpu.core_type = #tpu.core_type<tc>} {
    %c0 = arith.constant 0 : index
    %c0_0 = arith.constant 0 : index
    %c0_1 = arith.constant 0 : index
    %0 = vector.load %arg0[%c0, %c0_0, %c0_1] : memref<2x8x32xbf16, #tpu.memory_space<vmem>>, vector<2x8x32xbf16>
    %c0_2 = arith.constant 0 : index
    %c0_3 = arith.constant 0 : index
    %1 = vector.load %arg1[%c0_2, %c0_3] : memref<32x32xbf16, #tpu.memory_space<vmem>>, vector<32x32xbf16>
    %c0_4 = arith.constant 0 : index
    %c0_5 = arith.constant 0 : index
    %2 = vector.load %arg2[%c0_4, %c0_5] : memref<1x32xf32, #tpu.memory_space<vmem>>, vector<1x32xf32>
    %c0_6 = arith.constant 0 : index
    %c0_7 = arith.constant 0 : index
    %3 = vector.load %arg3[%c0_6, %c0_7] : memref<32x16xbf16, #tpu.memory_space<vmem>>, vector<32x16xbf16>
    %c0_8 = arith.constant 0 : index
    %c0_9 = arith.constant 0 : index
    %4 = vector.load %arg4[%c0_8, %c0_9] : memref<1x16xf32, #tpu.memory_space<vmem>>, vector<1x16xf32>
    %c0_10 = arith.constant 0 : index
    %c0_11 = arith.constant 0 : index
    %5 = vector.load %arg5[%c0_10, %c0_11] : memref<16x96xbf16, #tpu.memory_space<vmem>>, vector<16x96xbf16>
    %c0_12 = arith.constant 0 : index
    %c0_13 = arith.constant 0 : index
    %6 = vector.load %arg6[%c0_12, %c0_13] : memref<32x96xbf16, #tpu.memory_space<vmem>>, vector<32x96xbf16>
    %c0_14 = arith.constant 0 : index
    %c0_15 = arith.constant 0 : index
    %7 = vector.load %arg7[%c0_14, %c0_15] : memref<1x96xf32, #tpu.memory_space<vmem>>, vector<1x96xf32>
    %c0_16 = arith.constant 0 : index
    %c0_17 = arith.constant 0 : index
    %8 = vector.load %arg8[%c0_16, %c0_17] : memref<1x96xf32, #tpu.memory_space<vmem>>, vector<1x96xf32>
    %c0_18 = arith.constant 0 : index
    %c0_19 = arith.constant 0 : index
    %9 = vector.load %arg9[%c0_18, %c0_19] : memref<64x32xbf16, #tpu.memory_space<vmem>>, vector<64x32xbf16>
    %c0_20 = arith.constant 0 : index
    %c0_21 = arith.constant 0 : index
    %10 = vector.load %arg10[%c0_20, %c0_21] : memref<1x32xf32, #tpu.memory_space<vmem>>, vector<1x32xf32>
    %c0_22 = arith.constant 0 : index
    %c0_23 = arith.constant 0 : index
    %c0_24 = arith.constant 0 : index
    %11 = vector.load %arg11[%c0_22, %c0_23, %c0_24] : memref<2x32x96xbf16, #tpu.memory_space<vmem>>, vector<2x32x96xbf16>
    %c0_25 = arith.constant 0 : index
    %c0_26 = arith.constant 0 : index
    %c0_27 = arith.constant 0 : index
    %12 = vector.load %arg12[%c0_25, %c0_26, %c0_27] : memref<2x32x96xbf16, #tpu.memory_space<vmem>>, vector<2x32x96xbf16>
    %c0_28 = arith.constant 0 : index
    %c0_29 = arith.constant 0 : index
    %c0_30 = arith.constant 0 : index
    %13 = vector.load %arg13[%c0_28, %c0_29, %c0_30] : memref<2x1x96xf32, #tpu.memory_space<vmem>>, vector<2x1x96xf32>
    %c0_31 = arith.constant 0 : index
    %c0_32 = arith.constant 0 : index
    %c0_33 = arith.constant 0 : index
    %14 = vector.load %arg14[%c0_31, %c0_32, %c0_33] : memref<2x1x96xf32, #tpu.memory_space<vmem>>, vector<2x1x96xf32>
    %c0_34 = arith.constant 0 : index
    %c0_35 = arith.constant 0 : index
    %15 = vector.load %arg15[%c0_34, %c0_35] : memref<32x16xbf16, #tpu.memory_space<vmem>>, vector<32x16xbf16>
    %c0_36 = arith.constant 0 : index
    %c0_37 = arith.constant 0 : index
    %16 = vector.load %arg16[%c0_36, %c0_37] : memref<1x16xf32, #tpu.memory_space<vmem>>, vector<1x16xf32>
    %c0_38 = arith.constant 0 : index
    %c0_39 = arith.constant 0 : index
    %17 = vector.load %arg17[%c0_38, %c0_39] : memref<2x32xf32, #tpu.memory_space<vmem>>, vector<2x32xf32>
    %c0_40 = arith.constant 0 : index
    %c0_41 = arith.constant 0 : index
    %18 = vector.load %arg18[%c0_40, %c0_41] : memref<2x32xf32, #tpu.memory_space<vmem>>, vector<2x32xf32>
    %c0_42 = arith.constant 0 : index
    %c0_43 = arith.constant 0 : index
    %c0_44 = arith.constant 0 : index
    %19 = vector.load %arg19[%c0_42, %c0_43, %c0_44] : memref<2x2x32xf32, #tpu.memory_space<vmem>>, vector<1x2x32xf32>
    %20 = vector.shape_cast %19 : vector<1x2x32xf32> to vector<2x32xf32>
    %c1 = arith.constant 1 : index
    %c0_45 = arith.constant 0 : index
    %c0_46 = arith.constant 0 : index
    %21 = vector.load %arg19[%c1, %c0_45, %c0_46] : memref<2x2x32xf32, #tpu.memory_space<vmem>>, vector<1x2x32xf32>
    %22 = vector.shape_cast %21 : vector<1x2x32xf32> to vector<2x32xf32>
    %23 = arith.truncf %17 : vector<2x32xf32> to vector<2x32xbf16>
    %cst = arith.constant dense<0.000000e+00> : vector<2x32xf32>
    %24 = tpu.matmul %23, %1, %cst {dimension_numbers = #tpu.dot_dimension_numbers<[1], [0], [0], [1], [0, 0, 1, 1], [], []>} : vector<2x32xbf16>, vector<32x32xbf16>, vector<2x32xf32> -> vector<2x32xf32>
    %25 = vector.broadcast %2 : vector<1x32xf32> to vector<2x32xf32>
    %26 = arith.addf %24, %25 : vector<2x32xf32>
    %cst_47 = arith.constant 0.000000e+00 : f32
    %27 = vector.broadcast %cst_47 : f32 to vector<2x32xf32>
    %28 = arith.maximumf %26, %27 : vector<2x32xf32>
    %29 = arith.truncf %28 : vector<2x32xf32> to vector<2x32xbf16>
    %cst_48 = arith.constant dense<0.000000e+00> : vector<2x16xf32>
    %30 = tpu.matmul %29, %3, %cst_48 {dimension_numbers = #tpu.dot_dimension_numbers<[1], [0], [0], [1], [0, 0, 1, 1], [], []>} : vector<2x32xbf16>, vector<32x16xbf16>, vector<2x16xf32> -> vector<2x16xf32>
    %31 = vector.broadcast %4 : vector<1x16xf32> to vector<2x16xf32>
    %32 = arith.addf %30, %31 : vector<2x16xf32>
    %cst_49 = arith.constant 0.000000e+00 : f32
    %33 = vector.broadcast %cst_49 : f32 to vector<2x16xf32>
    %34 = arith.maximumf %32, %33 : vector<2x16xf32>
    %35 = arith.truncf %34 : vector<2x16xf32> to vector<2x16xbf16>
    %cst_50 = arith.constant dense<0.000000e+00> : vector<2x96xf32>
    %36 = tpu.matmul %35, %5, %cst_50 {dimension_numbers = #tpu.dot_dimension_numbers<[1], [0], [0], [1], [0, 0, 1, 1], [], []>} : vector<2x16xbf16>, vector<16x96xbf16>, vector<2x96xf32> -> vector<2x96xf32>
    %37 = vector.broadcast %7 : vector<1x96xf32> to vector<2x96xf32>
    %38 = arith.addf %36, %37 : vector<2x96xf32>
    %39 = arith.truncf %18 : vector<2x32xf32> to vector<2x32xbf16>
    %cst_51 = arith.constant dense<0.000000e+00> : vector<2x96xf32>
    %40 = tpu.matmul %39, %6, %cst_51 {dimension_numbers = #tpu.dot_dimension_numbers<[1], [0], [0], [1], [0, 0, 1, 1], [], []>} : vector<2x32xbf16>, vector<32x96xbf16>, vector<2x96xf32> -> vector<2x96xf32>
    %41 = vector.broadcast %8 : vector<1x96xf32> to vector<2x96xf32>
    %42 = arith.addf %40, %41 : vector<2x96xf32>
    %43 = vector.extract_strided_slice %38 {offsets = [0, 0], sizes = [2, 32], strides = [1, 1]} : vector<2x96xf32> to vector<2x32xf32>
    %44 = vector.extract_strided_slice %42 {offsets = [0, 0], sizes = [2, 32], strides = [1, 1]} : vector<2x96xf32> to vector<2x32xf32>
    %45 = arith.addf %43, %44 : vector<2x32xf32>
    %46 = arith.negf %45 : vector<2x32xf32>
    %47 = math.exp %46 : vector<2x32xf32>
    %cst_52 = arith.constant 1.000000e+00 : f32
    %48 = vector.broadcast %cst_52 : f32 to vector<2x32xf32>
    %49 = arith.addf %48, %47 : vector<2x32xf32>
    %50 = arith.divf %48, %49 : vector<2x32xf32>
    %51 = vector.extract_strided_slice %38 {offsets = [0, 32], sizes = [2, 32], strides = [1, 1]} : vector<2x96xf32> to vector<2x32xf32>
    %52 = vector.extract_strided_slice %42 {offsets = [0, 32], sizes = [2, 32], strides = [1, 1]} : vector<2x96xf32> to vector<2x32xf32>
    %53 = arith.addf %51, %52 : vector<2x32xf32>
    %54 = arith.negf %53 : vector<2x32xf32>
    %55 = math.exp %54 : vector<2x32xf32>
    %cst_53 = arith.constant 1.000000e+00 : f32
    %56 = vector.broadcast %cst_53 : f32 to vector<2x32xf32>
    %57 = arith.addf %56, %55 : vector<2x32xf32>
    %58 = arith.divf %56, %57 : vector<2x32xf32>
    %59 = vector.extract_strided_slice %38 {offsets = [0, 64], sizes = [2, 32], strides = [1, 1]} : vector<2x96xf32> to vector<2x32xf32>
    %60 = vector.extract_strided_slice %42 {offsets = [0, 64], sizes = [2, 32], strides = [1, 1]} : vector<2x96xf32> to vector<2x32xf32>
    %61 = arith.mulf %50, %60 : vector<2x32xf32>
    %62 = arith.addf %59, %61 : vector<2x32xf32>
    %63 = math.tanh %62 : vector<2x32xf32>
    %cst_54 = arith.constant 1.000000e+00 : f32
    %64 = vector.broadcast %cst_54 : f32 to vector<2x32xf32>
    %65 = arith.subf %64, %58 : vector<2x32xf32>
    %66 = arith.mulf %65, %63 : vector<2x32xf32>
    %67 = arith.mulf %58, %18 : vector<2x32xf32>
    %68 = arith.addf %66, %67 : vector<2x32xf32>
    %69 = arith.truncf %68 : vector<2x32xf32> to vector<2x32xbf16>
    %70 = vector.shape_cast %69 : vector<2x32xbf16> to vector<2x1x32xbf16>
    "tpu.trace_start"() <{level = 10 : i32, message = "bqd,btd->bqt"}> : () -> ()
    %cst_55 = arith.constant dense<0.000000e+00> : vector<2x1x8xf32>
    %71 = tpu.matmul %70, %0, %cst_55 {dimension_numbers = #tpu.dot_dimension_numbers<[2], [2], [1], [1], [0, 0, 0, 1, 1, 1], [0], [0]>} : vector<2x1x32xbf16>, vector<2x8x32xbf16>, vector<2x1x8xf32> -> vector<2x1x8xf32>
    "tpu.trace_stop"() : () -> ()
    %cst_56 = arith.constant dense<0xFF800000> : vector<2x1xf32>
    %72 = vector.multi_reduction <maximumf>, %71, %cst_56 [2] : vector<2x1x8xf32> to vector<2x1xf32>
    %73 = vector.shape_cast %72 : vector<2x1xf32> to vector<2x1x1xf32>
    %74 = vector.broadcast %73 : vector<2x1x1xf32> to vector<2x1x8xf32>
    %75 = arith.subf %71, %74 : vector<2x1x8xf32>
    %76 = math.exp %75 : vector<2x1x8xf32>
    %cst_57 = arith.constant dense<0.000000e+00> : vector<2x1xf32>
    %77 = vector.multi_reduction <add>, %76, %cst_57 [2] : vector<2x1x8xf32> to vector<2x1xf32>
    %78 = vector.shape_cast %77 : vector<2x1xf32> to vector<2x1x1xf32>
    %79 = tpu.reciprocal %78 {approx = true} : vector<2x1x1xf32> -> vector<2x1x1xf32>
    %80 = vector.broadcast %79 : vector<2x1x1xf32> to vector<2x1x8xf32>
    %81 = arith.mulf %76, %80 : vector<2x1x8xf32>
    %82 = arith.truncf %81 : vector<2x1x8xf32> to vector<2x1x8xbf16>
    "tpu.trace_start"() <{level = 10 : i32, message = "bqt,btd->bqd"}> : () -> ()
    %cst_58 = arith.constant dense<0.000000e+00> : vector<2x1x32xf32>
    %83 = tpu.matmul %82, %0, %cst_58 {dimension_numbers = #tpu.dot_dimension_numbers<[2], [1], [1], [2], [0, 0, 0, 1, 1, 2], [0], [0]>} : vector<2x1x8xbf16>, vector<2x8x32xbf16>, vector<2x1x32xf32> -> vector<2x1x32xf32>
    "tpu.trace_stop"() : () -> ()
    %84 = vector.shape_cast %83 : vector<2x1x32xf32> to vector<2x32xf32>
    %85 = tpu.concatenate %68, %84 in 1 : vector<2x32xf32>, vector<2x32xf32> -> vector<2x64xf32>
    %86 = arith.truncf %85 : vector<2x64xf32> to vector<2x64xbf16>
    %cst_59 = arith.constant dense<0.000000e+00> : vector<2x32xf32>
    %87 = tpu.matmul %86, %9, %cst_59 {dimension_numbers = #tpu.dot_dimension_numbers<[1], [0], [0], [1], [0, 0, 1, 1], [], []>} : vector<2x64xbf16>, vector<64x32xbf16>, vector<2x32xf32> -> vector<2x32xf32>
    %88 = vector.broadcast %10 : vector<1x32xf32> to vector<2x32xf32>
    %89 = arith.addf %87, %88 : vector<2x32xf32>
    %90 = vector.extract_strided_slice %11 {offsets = [0, 0, 0], sizes = [1, 32, 96], strides = [1, 1, 1]} : vector<2x32x96xbf16> to vector<1x32x96xbf16>
    %91 = vector.shape_cast %90 : vector<1x32x96xbf16> to vector<32x96xbf16>
    %92 = arith.truncf %89 : vector<2x32xf32> to vector<2x32xbf16>
    %cst_60 = arith.constant dense<0.000000e+00> : vector<2x96xf32>
    %93 = tpu.matmul %92, %91, %cst_60 {dimension_numbers = #tpu.dot_dimension_numbers<[1], [0], [0], [1], [0, 0, 1, 1], [], []>} : vector<2x32xbf16>, vector<32x96xbf16>, vector<2x96xf32> -> vector<2x96xf32>
    %94 = vector.extract_strided_slice %13 {offsets = [0, 0, 0], sizes = [1, 1, 96], strides = [1, 1, 1]} : vector<2x1x96xf32> to vector<1x1x96xf32>
    %95 = vector.shape_cast %94 : vector<1x1x96xf32> to vector<1x96xf32>
    %96 = vector.broadcast %95 : vector<1x96xf32> to vector<2x96xf32>
    %97 = arith.addf %93, %96 : vector<2x96xf32>
    %98 = vector.extract_strided_slice %12 {offsets = [0, 0, 0], sizes = [1, 32, 96], strides = [1, 1, 1]} : vector<2x32x96xbf16> to vector<1x32x96xbf16>
    %99 = vector.shape_cast %98 : vector<1x32x96xbf16> to vector<32x96xbf16>
    %100 = arith.truncf %20 : vector<2x32xf32> to vector<2x32xbf16>
    %cst_61 = arith.constant dense<0.000000e+00> : vector<2x96xf32>
    %101 = tpu.matmul %100, %99, %cst_61 {dimension_numbers = #tpu.dot_dimension_numbers<[1], [0], [0], [1], [0, 0, 1, 1], [], []>} : vector<2x32xbf16>, vector<32x96xbf16>, vector<2x96xf32> -> vector<2x96xf32>
    %102 = vector.extract_strided_slice %14 {offsets = [0, 0, 0], sizes = [1, 1, 96], strides = [1, 1, 1]} : vector<2x1x96xf32> to vector<1x1x96xf32>
    %103 = vector.shape_cast %102 : vector<1x1x96xf32> to vector<1x96xf32>
    %104 = vector.broadcast %103 : vector<1x96xf32> to vector<2x96xf32>
    %105 = arith.addf %101, %104 : vector<2x96xf32>
    %106 = vector.extract_strided_slice %97 {offsets = [0, 0], sizes = [2, 32], strides = [1, 1]} : vector<2x96xf32> to vector<2x32xf32>
    %107 = vector.extract_strided_slice %105 {offsets = [0, 0], sizes = [2, 32], strides = [1, 1]} : vector<2x96xf32> to vector<2x32xf32>
    %108 = arith.addf %106, %107 : vector<2x32xf32>
    %109 = arith.negf %108 : vector<2x32xf32>
    %110 = math.exp %109 : vector<2x32xf32>
    %cst_62 = arith.constant 1.000000e+00 : f32
    %111 = vector.broadcast %cst_62 : f32 to vector<2x32xf32>
    %112 = arith.addf %111, %110 : vector<2x32xf32>
    %113 = arith.divf %111, %112 : vector<2x32xf32>
    %114 = vector.extract_strided_slice %97 {offsets = [0, 32], sizes = [2, 32], strides = [1, 1]} : vector<2x96xf32> to vector<2x32xf32>
    %115 = vector.extract_strided_slice %105 {offsets = [0, 32], sizes = [2, 32], strides = [1, 1]} : vector<2x96xf32> to vector<2x32xf32>
    %116 = arith.addf %114, %115 : vector<2x32xf32>
    %117 = arith.negf %116 : vector<2x32xf32>
    %118 = math.exp %117 : vector<2x32xf32>
    %cst_63 = arith.constant 1.000000e+00 : f32
    %119 = vector.broadcast %cst_63 : f32 to vector<2x32xf32>
    %120 = arith.addf %119, %118 : vector<2x32xf32>
    %121 = arith.divf %119, %120 : vector<2x32xf32>
    %122 = vector.extract_strided_slice %97 {offsets = [0, 64], sizes = [2, 32], strides = [1, 1]} : vector<2x96xf32> to vector<2x32xf32>
    %123 = vector.extract_strided_slice %105 {offsets = [0, 64], sizes = [2, 32], strides = [1, 1]} : vector<2x96xf32> to vector<2x32xf32>
    %124 = arith.mulf %113, %123 : vector<2x32xf32>
    %125 = arith.addf %122, %124 : vector<2x32xf32>
    %126 = math.tanh %125 : vector<2x32xf32>
    %cst_64 = arith.constant 1.000000e+00 : f32
    %127 = vector.broadcast %cst_64 : f32 to vector<2x32xf32>
    %128 = arith.subf %127, %121 : vector<2x32xf32>
    %129 = arith.mulf %128, %126 : vector<2x32xf32>
    %130 = arith.mulf %121, %20 : vector<2x32xf32>
    %131 = arith.addf %129, %130 : vector<2x32xf32>
    %132 = arith.addf %89, %131 : vector<2x32xf32>
    %133 = vector.extract_strided_slice %11 {offsets = [1, 0, 0], sizes = [1, 32, 96], strides = [1, 1, 1]} : vector<2x32x96xbf16> to vector<1x32x96xbf16>
    %134 = vector.shape_cast %133 : vector<1x32x96xbf16> to vector<32x96xbf16>
    %135 = arith.truncf %132 : vector<2x32xf32> to vector<2x32xbf16>
    %cst_65 = arith.constant dense<0.000000e+00> : vector<2x96xf32>
    %136 = tpu.matmul %135, %134, %cst_65 {dimension_numbers = #tpu.dot_dimension_numbers<[1], [0], [0], [1], [0, 0, 1, 1], [], []>} : vector<2x32xbf16>, vector<32x96xbf16>, vector<2x96xf32> -> vector<2x96xf32>
    %137 = vector.extract_strided_slice %13 {offsets = [1, 0, 0], sizes = [1, 1, 96], strides = [1, 1, 1]} : vector<2x1x96xf32> to vector<1x1x96xf32>
    %138 = vector.shape_cast %137 : vector<1x1x96xf32> to vector<1x96xf32>
    %139 = vector.broadcast %138 : vector<1x96xf32> to vector<2x96xf32>
    %140 = arith.addf %136, %139 : vector<2x96xf32>
    %141 = vector.extract_strided_slice %12 {offsets = [1, 0, 0], sizes = [1, 32, 96], strides = [1, 1, 1]} : vector<2x32x96xbf16> to vector<1x32x96xbf16>
    %142 = vector.shape_cast %141 : vector<1x32x96xbf16> to vector<32x96xbf16>
    %143 = arith.truncf %22 : vector<2x32xf32> to vector<2x32xbf16>
    %cst_66 = arith.constant dense<0.000000e+00> : vector<2x96xf32>
    %144 = tpu.matmul %143, %142, %cst_66 {dimension_numbers = #tpu.dot_dimension_numbers<[1], [0], [0], [1], [0, 0, 1, 1], [], []>} : vector<2x32xbf16>, vector<32x96xbf16>, vector<2x96xf32> -> vector<2x96xf32>
    %145 = vector.extract_strided_slice %14 {offsets = [1, 0, 0], sizes = [1, 1, 96], strides = [1, 1, 1]} : vector<2x1x96xf32> to vector<1x1x96xf32>
    %146 = vector.shape_cast %145 : vector<1x1x96xf32> to vector<1x96xf32>
    %147 = vector.broadcast %146 : vector<1x96xf32> to vector<2x96xf32>
    %148 = arith.addf %144, %147 : vector<2x96xf32>
    %149 = vector.extract_strided_slice %140 {offsets = [0, 0], sizes = [2, 32], strides = [1, 1]} : vector<2x96xf32> to vector<2x32xf32>
    %150 = vector.extract_strided_slice %148 {offsets = [0, 0], sizes = [2, 32], strides = [1, 1]} : vector<2x96xf32> to vector<2x32xf32>
    %151 = arith.addf %149, %150 : vector<2x32xf32>
    %152 = arith.negf %151 : vector<2x32xf32>
    %153 = math.exp %152 : vector<2x32xf32>
    %cst_67 = arith.constant 1.000000e+00 : f32
    %154 = vector.broadcast %cst_67 : f32 to vector<2x32xf32>
    %155 = arith.addf %154, %153 : vector<2x32xf32>
    %156 = arith.divf %154, %155 : vector<2x32xf32>
    %157 = vector.extract_strided_slice %140 {offsets = [0, 32], sizes = [2, 32], strides = [1, 1]} : vector<2x96xf32> to vector<2x32xf32>
    %158 = vector.extract_strided_slice %148 {offsets = [0, 32], sizes = [2, 32], strides = [1, 1]} : vector<2x96xf32> to vector<2x32xf32>
    %159 = arith.addf %157, %158 : vector<2x32xf32>
    %160 = arith.negf %159 : vector<2x32xf32>
    %161 = math.exp %160 : vector<2x32xf32>
    %cst_68 = arith.constant 1.000000e+00 : f32
    %162 = vector.broadcast %cst_68 : f32 to vector<2x32xf32>
    %163 = arith.addf %162, %161 : vector<2x32xf32>
    %164 = arith.divf %162, %163 : vector<2x32xf32>
    %165 = vector.extract_strided_slice %140 {offsets = [0, 64], sizes = [2, 32], strides = [1, 1]} : vector<2x96xf32> to vector<2x32xf32>
    %166 = vector.extract_strided_slice %148 {offsets = [0, 64], sizes = [2, 32], strides = [1, 1]} : vector<2x96xf32> to vector<2x32xf32>
    %167 = arith.mulf %156, %166 : vector<2x32xf32>
    %168 = arith.addf %165, %167 : vector<2x32xf32>
    %169 = math.tanh %168 : vector<2x32xf32>
    %cst_69 = arith.constant 1.000000e+00 : f32
    %170 = vector.broadcast %cst_69 : f32 to vector<2x32xf32>
    %171 = arith.subf %170, %164 : vector<2x32xf32>
    %172 = arith.mulf %171, %169 : vector<2x32xf32>
    %173 = arith.mulf %164, %22 : vector<2x32xf32>
    %174 = arith.addf %172, %173 : vector<2x32xf32>
    %175 = arith.addf %132, %174 : vector<2x32xf32>
    %176 = arith.truncf %175 : vector<2x32xf32> to vector<2x32xbf16>
    %cst_70 = arith.constant dense<0.000000e+00> : vector<2x16xf32>
    %177 = tpu.matmul %176, %15, %cst_70 {dimension_numbers = #tpu.dot_dimension_numbers<[1], [0], [0], [1], [0, 0, 1, 1], [], []>} : vector<2x32xbf16>, vector<32x16xbf16>, vector<2x16xf32> -> vector<2x16xf32>
    %178 = vector.broadcast %16 : vector<1x16xf32> to vector<2x16xf32>
    %179 = arith.addf %177, %178 : vector<2x16xf32>
    %180 = vector.shape_cast %179 : vector<2x16xf32> to vector<2x1x16xf32>
    %181 = arith.truncf %175 : vector<2x32xf32> to vector<2x32xbf16>
    %cst_71 = arith.constant dense<0.000000e+00> : vector<2x32xf32>
    %182 = tpu.matmul %181, %1, %cst_71 {dimension_numbers = #tpu.dot_dimension_numbers<[1], [0], [0], [1], [0, 0, 1, 1], [], []>} : vector<2x32xbf16>, vector<32x32xbf16>, vector<2x32xf32> -> vector<2x32xf32>
    %183 = vector.broadcast %2 : vector<1x32xf32> to vector<2x32xf32>
    %184 = arith.addf %182, %183 : vector<2x32xf32>
    %cst_72 = arith.constant 0.000000e+00 : f32
    %185 = vector.broadcast %cst_72 : f32 to vector<2x32xf32>
    %186 = arith.maximumf %184, %185 : vector<2x32xf32>
    %187 = arith.truncf %186 : vector<2x32xf32> to vector<2x32xbf16>
    %cst_73 = arith.constant dense<0.000000e+00> : vector<2x16xf32>
    %188 = tpu.matmul %187, %3, %cst_73 {dimension_numbers = #tpu.dot_dimension_numbers<[1], [0], [0], [1], [0, 0, 1, 1], [], []>} : vector<2x32xbf16>, vector<32x16xbf16>, vector<2x16xf32> -> vector<2x16xf32>
    %189 = vector.broadcast %4 : vector<1x16xf32> to vector<2x16xf32>
    %190 = arith.addf %188, %189 : vector<2x16xf32>
    %cst_74 = arith.constant 0.000000e+00 : f32
    %191 = vector.broadcast %cst_74 : f32 to vector<2x16xf32>
    %192 = arith.maximumf %190, %191 : vector<2x16xf32>
    %193 = arith.truncf %192 : vector<2x16xf32> to vector<2x16xbf16>
    %cst_75 = arith.constant dense<0.000000e+00> : vector<2x96xf32>
    %194 = tpu.matmul %193, %5, %cst_75 {dimension_numbers = #tpu.dot_dimension_numbers<[1], [0], [0], [1], [0, 0, 1, 1], [], []>} : vector<2x16xbf16>, vector<16x96xbf16>, vector<2x96xf32> -> vector<2x96xf32>
    %195 = vector.broadcast %7 : vector<1x96xf32> to vector<2x96xf32>
    %196 = arith.addf %194, %195 : vector<2x96xf32>
    %197 = arith.truncf %68 : vector<2x32xf32> to vector<2x32xbf16>
    %cst_76 = arith.constant dense<0.000000e+00> : vector<2x96xf32>
    %198 = tpu.matmul %197, %6, %cst_76 {dimension_numbers = #tpu.dot_dimension_numbers<[1], [0], [0], [1], [0, 0, 1, 1], [], []>} : vector<2x32xbf16>, vector<32x96xbf16>, vector<2x96xf32> -> vector<2x96xf32>
    %199 = vector.broadcast %8 : vector<1x96xf32> to vector<2x96xf32>
    %200 = arith.addf %198, %199 : vector<2x96xf32>
    %201 = vector.extract_strided_slice %196 {offsets = [0, 0], sizes = [2, 32], strides = [1, 1]} : vector<2x96xf32> to vector<2x32xf32>
    %202 = vector.extract_strided_slice %200 {offsets = [0, 0], sizes = [2, 32], strides = [1, 1]} : vector<2x96xf32> to vector<2x32xf32>
    %203 = arith.addf %201, %202 : vector<2x32xf32>
    %204 = arith.negf %203 : vector<2x32xf32>
    %205 = math.exp %204 : vector<2x32xf32>
    %cst_77 = arith.constant 1.000000e+00 : f32
    %206 = vector.broadcast %cst_77 : f32 to vector<2x32xf32>
    %207 = arith.addf %206, %205 : vector<2x32xf32>
    %208 = arith.divf %206, %207 : vector<2x32xf32>
    %209 = vector.extract_strided_slice %196 {offsets = [0, 32], sizes = [2, 32], strides = [1, 1]} : vector<2x96xf32> to vector<2x32xf32>
    %210 = vector.extract_strided_slice %200 {offsets = [0, 32], sizes = [2, 32], strides = [1, 1]} : vector<2x96xf32> to vector<2x32xf32>
    %211 = arith.addf %209, %210 : vector<2x32xf32>
    %212 = arith.negf %211 : vector<2x32xf32>
    %213 = math.exp %212 : vector<2x32xf32>
    %cst_78 = arith.constant 1.000000e+00 : f32
    %214 = vector.broadcast %cst_78 : f32 to vector<2x32xf32>
    %215 = arith.addf %214, %213 : vector<2x32xf32>
    %216 = arith.divf %214, %215 : vector<2x32xf32>
    %217 = vector.extract_strided_slice %196 {offsets = [0, 64], sizes = [2, 32], strides = [1, 1]} : vector<2x96xf32> to vector<2x32xf32>
    %218 = vector.extract_strided_slice %200 {offsets = [0, 64], sizes = [2, 32], strides = [1, 1]} : vector<2x96xf32> to vector<2x32xf32>
    %219 = arith.mulf %208, %218 : vector<2x32xf32>
    %220 = arith.addf %217, %219 : vector<2x32xf32>
    %221 = math.tanh %220 : vector<2x32xf32>
    %cst_79 = arith.constant 1.000000e+00 : f32
    %222 = vector.broadcast %cst_79 : f32 to vector<2x32xf32>
    %223 = arith.subf %222, %216 : vector<2x32xf32>
    %224 = arith.mulf %223, %221 : vector<2x32xf32>
    %225 = arith.mulf %216, %68 : vector<2x32xf32>
    %226 = arith.addf %224, %225 : vector<2x32xf32>
    %227 = arith.truncf %226 : vector<2x32xf32> to vector<2x32xbf16>
    %228 = vector.shape_cast %227 : vector<2x32xbf16> to vector<2x1x32xbf16>
    "tpu.trace_start"() <{level = 10 : i32, message = "bqd,btd->bqt"}> : () -> ()
    %cst_80 = arith.constant dense<0.000000e+00> : vector<2x1x8xf32>
    %229 = tpu.matmul %228, %0, %cst_80 {dimension_numbers = #tpu.dot_dimension_numbers<[2], [2], [1], [1], [0, 0, 0, 1, 1, 1], [0], [0]>} : vector<2x1x32xbf16>, vector<2x8x32xbf16>, vector<2x1x8xf32> -> vector<2x1x8xf32>
    "tpu.trace_stop"() : () -> ()
    %cst_81 = arith.constant dense<0xFF800000> : vector<2x1xf32>
    %230 = vector.multi_reduction <maximumf>, %229, %cst_81 [2] : vector<2x1x8xf32> to vector<2x1xf32>
    %231 = vector.shape_cast %230 : vector<2x1xf32> to vector<2x1x1xf32>
    %232 = vector.broadcast %231 : vector<2x1x1xf32> to vector<2x1x8xf32>
    %233 = arith.subf %229, %232 : vector<2x1x8xf32>
    %234 = math.exp %233 : vector<2x1x8xf32>
    %cst_82 = arith.constant dense<0.000000e+00> : vector<2x1xf32>
    %235 = vector.multi_reduction <add>, %234, %cst_82 [2] : vector<2x1x8xf32> to vector<2x1xf32>
    %236 = vector.shape_cast %235 : vector<2x1xf32> to vector<2x1x1xf32>
    %237 = tpu.reciprocal %236 {approx = true} : vector<2x1x1xf32> -> vector<2x1x1xf32>
    %238 = vector.broadcast %237 : vector<2x1x1xf32> to vector<2x1x8xf32>
    %239 = arith.mulf %234, %238 : vector<2x1x8xf32>
    %240 = arith.truncf %239 : vector<2x1x8xf32> to vector<2x1x8xbf16>
    "tpu.trace_start"() <{level = 10 : i32, message = "bqt,btd->bqd"}> : () -> ()
    %cst_83 = arith.constant dense<0.000000e+00> : vector<2x1x32xf32>
    %241 = tpu.matmul %240, %0, %cst_83 {dimension_numbers = #tpu.dot_dimension_numbers<[2], [1], [1], [2], [0, 0, 0, 1, 1, 2], [0], [0]>} : vector<2x1x8xbf16>, vector<2x8x32xbf16>, vector<2x1x32xf32> -> vector<2x1x32xf32>
    "tpu.trace_stop"() : () -> ()
    %242 = vector.shape_cast %241 : vector<2x1x32xf32> to vector<2x32xf32>
    %243 = tpu.concatenate %226, %242 in 1 : vector<2x32xf32>, vector<2x32xf32> -> vector<2x64xf32>
    %244 = arith.truncf %243 : vector<2x64xf32> to vector<2x64xbf16>
    %cst_84 = arith.constant dense<0.000000e+00> : vector<2x32xf32>
    %245 = tpu.matmul %244, %9, %cst_84 {dimension_numbers = #tpu.dot_dimension_numbers<[1], [0], [0], [1], [0, 0, 1, 1], [], []>} : vector<2x64xbf16>, vector<64x32xbf16>, vector<2x32xf32> -> vector<2x32xf32>
    %246 = vector.broadcast %10 : vector<1x32xf32> to vector<2x32xf32>
    %247 = arith.addf %245, %246 : vector<2x32xf32>
    %248 = vector.extract_strided_slice %11 {offsets = [0, 0, 0], sizes = [1, 32, 96], strides = [1, 1, 1]} : vector<2x32x96xbf16> to vector<1x32x96xbf16>
    %249 = vector.shape_cast %248 : vector<1x32x96xbf16> to vector<32x96xbf16>
    %250 = arith.truncf %247 : vector<2x32xf32> to vector<2x32xbf16>
    %cst_85 = arith.constant dense<0.000000e+00> : vector<2x96xf32>
    %251 = tpu.matmul %250, %249, %cst_85 {dimension_numbers = #tpu.dot_dimension_numbers<[1], [0], [0], [1], [0, 0, 1, 1], [], []>} : vector<2x32xbf16>, vector<32x96xbf16>, vector<2x96xf32> -> vector<2x96xf32>
    %252 = vector.extract_strided_slice %13 {offsets = [0, 0, 0], sizes = [1, 1, 96], strides = [1, 1, 1]} : vector<2x1x96xf32> to vector<1x1x96xf32>
    %253 = vector.shape_cast %252 : vector<1x1x96xf32> to vector<1x96xf32>
    %254 = vector.broadcast %253 : vector<1x96xf32> to vector<2x96xf32>
    %255 = arith.addf %251, %254 : vector<2x96xf32>
    %256 = vector.extract_strided_slice %12 {offsets = [0, 0, 0], sizes = [1, 32, 96], strides = [1, 1, 1]} : vector<2x32x96xbf16> to vector<1x32x96xbf16>
    %257 = vector.shape_cast %256 : vector<1x32x96xbf16> to vector<32x96xbf16>
    %258 = arith.truncf %131 : vector<2x32xf32> to vector<2x32xbf16>
    %cst_86 = arith.constant dense<0.000000e+00> : vector<2x96xf32>
    %259 = tpu.matmul %258, %257, %cst_86 {dimension_numbers = #tpu.dot_dimension_numbers<[1], [0], [0], [1], [0, 0, 1, 1], [], []>} : vector<2x32xbf16>, vector<32x96xbf16>, vector<2x96xf32> -> vector<2x96xf32>
    %260 = vector.extract_strided_slice %14 {offsets = [0, 0, 0], sizes = [1, 1, 96], strides = [1, 1, 1]} : vector<2x1x96xf32> to vector<1x1x96xf32>
    %261 = vector.shape_cast %260 : vector<1x1x96xf32> to vector<1x96xf32>
    %262 = vector.broadcast %261 : vector<1x96xf32> to vector<2x96xf32>
    %263 = arith.addf %259, %262 : vector<2x96xf32>
    %264 = vector.extract_strided_slice %255 {offsets = [0, 0], sizes = [2, 32], strides = [1, 1]} : vector<2x96xf32> to vector<2x32xf32>
    %265 = vector.extract_strided_slice %263 {offsets = [0, 0], sizes = [2, 32], strides = [1, 1]} : vector<2x96xf32> to vector<2x32xf32>
    %266 = arith.addf %264, %265 : vector<2x32xf32>
    %267 = arith.negf %266 : vector<2x32xf32>
    %268 = math.exp %267 : vector<2x32xf32>
    %cst_87 = arith.constant 1.000000e+00 : f32
    %269 = vector.broadcast %cst_87 : f32 to vector<2x32xf32>
    %270 = arith.addf %269, %268 : vector<2x32xf32>
    %271 = arith.divf %269, %270 : vector<2x32xf32>
    %272 = vector.extract_strided_slice %255 {offsets = [0, 32], sizes = [2, 32], strides = [1, 1]} : vector<2x96xf32> to vector<2x32xf32>
    %273 = vector.extract_strided_slice %263 {offsets = [0, 32], sizes = [2, 32], strides = [1, 1]} : vector<2x96xf32> to vector<2x32xf32>
    %274 = arith.addf %272, %273 : vector<2x32xf32>
    %275 = arith.negf %274 : vector<2x32xf32>
    %276 = math.exp %275 : vector<2x32xf32>
    %cst_88 = arith.constant 1.000000e+00 : f32
    %277 = vector.broadcast %cst_88 : f32 to vector<2x32xf32>
    %278 = arith.addf %277, %276 : vector<2x32xf32>
    %279 = arith.divf %277, %278 : vector<2x32xf32>
    %280 = vector.extract_strided_slice %255 {offsets = [0, 64], sizes = [2, 32], strides = [1, 1]} : vector<2x96xf32> to vector<2x32xf32>
    %281 = vector.extract_strided_slice %263 {offsets = [0, 64], sizes = [2, 32], strides = [1, 1]} : vector<2x96xf32> to vector<2x32xf32>
    %282 = arith.mulf %271, %281 : vector<2x32xf32>
    %283 = arith.addf %280, %282 : vector<2x32xf32>
    %284 = math.tanh %283 : vector<2x32xf32>
    %cst_89 = arith.constant 1.000000e+00 : f32
    %285 = vector.broadcast %cst_89 : f32 to vector<2x32xf32>
    %286 = arith.subf %285, %279 : vector<2x32xf32>
    %287 = arith.mulf %286, %284 : vector<2x32xf32>
    %288 = arith.mulf %279, %131 : vector<2x32xf32>
    %289 = arith.addf %287, %288 : vector<2x32xf32>
    %290 = arith.addf %247, %289 : vector<2x32xf32>
    %291 = vector.extract_strided_slice %11 {offsets = [1, 0, 0], sizes = [1, 32, 96], strides = [1, 1, 1]} : vector<2x32x96xbf16> to vector<1x32x96xbf16>
    %292 = vector.shape_cast %291 : vector<1x32x96xbf16> to vector<32x96xbf16>
    %293 = arith.truncf %290 : vector<2x32xf32> to vector<2x32xbf16>
    %cst_90 = arith.constant dense<0.000000e+00> : vector<2x96xf32>
    %294 = tpu.matmul %293, %292, %cst_90 {dimension_numbers = #tpu.dot_dimension_numbers<[1], [0], [0], [1], [0, 0, 1, 1], [], []>} : vector<2x32xbf16>, vector<32x96xbf16>, vector<2x96xf32> -> vector<2x96xf32>
    %295 = vector.extract_strided_slice %13 {offsets = [1, 0, 0], sizes = [1, 1, 96], strides = [1, 1, 1]} : vector<2x1x96xf32> to vector<1x1x96xf32>
    %296 = vector.shape_cast %295 : vector<1x1x96xf32> to vector<1x96xf32>
    %297 = vector.broadcast %296 : vector<1x96xf32> to vector<2x96xf32>
    %298 = arith.addf %294, %297 : vector<2x96xf32>
    %299 = vector.extract_strided_slice %12 {offsets = [1, 0, 0], sizes = [1, 32, 96], strides = [1, 1, 1]} : vector<2x32x96xbf16> to vector<1x32x96xbf16>
    %300 = vector.shape_cast %299 : vector<1x32x96xbf16> to vector<32x96xbf16>
    %301 = arith.truncf %174 : vector<2x32xf32> to vector<2x32xbf16>
    %cst_91 = arith.constant dense<0.000000e+00> : vector<2x96xf32>
    %302 = tpu.matmul %301, %300, %cst_91 {dimension_numbers = #tpu.dot_dimension_numbers<[1], [0], [0], [1], [0, 0, 1, 1], [], []>} : vector<2x32xbf16>, vector<32x96xbf16>, vector<2x96xf32> -> vector<2x96xf32>
    %303 = vector.extract_strided_slice %14 {offsets = [1, 0, 0], sizes = [1, 1, 96], strides = [1, 1, 1]} : vector<2x1x96xf32> to vector<1x1x96xf32>
    %304 = vector.shape_cast %303 : vector<1x1x96xf32> to vector<1x96xf32>
    %305 = vector.broadcast %304 : vector<1x96xf32> to vector<2x96xf32>
    %306 = arith.addf %302, %305 : vector<2x96xf32>
    %307 = vector.extract_strided_slice %298 {offsets = [0, 0], sizes = [2, 32], strides = [1, 1]} : vector<2x96xf32> to vector<2x32xf32>
    %308 = vector.extract_strided_slice %306 {offsets = [0, 0], sizes = [2, 32], strides = [1, 1]} : vector<2x96xf32> to vector<2x32xf32>
    %309 = arith.addf %307, %308 : vector<2x32xf32>
    %310 = arith.negf %309 : vector<2x32xf32>
    %311 = math.exp %310 : vector<2x32xf32>
    %cst_92 = arith.constant 1.000000e+00 : f32
    %312 = vector.broadcast %cst_92 : f32 to vector<2x32xf32>
    %313 = arith.addf %312, %311 : vector<2x32xf32>
    %314 = arith.divf %312, %313 : vector<2x32xf32>
    %315 = vector.extract_strided_slice %298 {offsets = [0, 32], sizes = [2, 32], strides = [1, 1]} : vector<2x96xf32> to vector<2x32xf32>
    %316 = vector.extract_strided_slice %306 {offsets = [0, 32], sizes = [2, 32], strides = [1, 1]} : vector<2x96xf32> to vector<2x32xf32>
    %317 = arith.addf %315, %316 : vector<2x32xf32>
    %318 = arith.negf %317 : vector<2x32xf32>
    %319 = math.exp %318 : vector<2x32xf32>
    %cst_93 = arith.constant 1.000000e+00 : f32
    %320 = vector.broadcast %cst_93 : f32 to vector<2x32xf32>
    %321 = arith.addf %320, %319 : vector<2x32xf32>
    %322 = arith.divf %320, %321 : vector<2x32xf32>
    %323 = vector.extract_strided_slice %298 {offsets = [0, 64], sizes = [2, 32], strides = [1, 1]} : vector<2x96xf32> to vector<2x32xf32>
    %324 = vector.extract_strided_slice %306 {offsets = [0, 64], sizes = [2, 32], strides = [1, 1]} : vector<2x96xf32> to vector<2x32xf32>
    %325 = arith.mulf %314, %324 : vector<2x32xf32>
    %326 = arith.addf %323, %325 : vector<2x32xf32>
    %327 = math.tanh %326 : vector<2x32xf32>
    %cst_94 = arith.constant 1.000000e+00 : f32
    %328 = vector.broadcast %cst_94 : f32 to vector<2x32xf32>
    %329 = arith.subf %328, %322 : vector<2x32xf32>
    %330 = arith.mulf %329, %327 : vector<2x32xf32>
    %331 = arith.mulf %322, %174 : vector<2x32xf32>
    %332 = arith.addf %330, %331 : vector<2x32xf32>
    %333 = arith.addf %290, %332 : vector<2x32xf32>
    %334 = arith.truncf %333 : vector<2x32xf32> to vector<2x32xbf16>
    %cst_95 = arith.constant dense<0.000000e+00> : vector<2x16xf32>
    %335 = tpu.matmul %334, %15, %cst_95 {dimension_numbers = #tpu.dot_dimension_numbers<[1], [0], [0], [1], [0, 0, 1, 1], [], []>} : vector<2x32xbf16>, vector<32x16xbf16>, vector<2x16xf32> -> vector<2x16xf32>
    %336 = vector.broadcast %16 : vector<1x16xf32> to vector<2x16xf32>
    %337 = arith.addf %335, %336 : vector<2x16xf32>
    %338 = vector.shape_cast %337 : vector<2x16xf32> to vector<2x1x16xf32>
    %339 = arith.truncf %333 : vector<2x32xf32> to vector<2x32xbf16>
    %cst_96 = arith.constant dense<0.000000e+00> : vector<2x32xf32>
    %340 = tpu.matmul %339, %1, %cst_96 {dimension_numbers = #tpu.dot_dimension_numbers<[1], [0], [0], [1], [0, 0, 1, 1], [], []>} : vector<2x32xbf16>, vector<32x32xbf16>, vector<2x32xf32> -> vector<2x32xf32>
    %341 = vector.broadcast %2 : vector<1x32xf32> to vector<2x32xf32>
    %342 = arith.addf %340, %341 : vector<2x32xf32>
    %cst_97 = arith.constant 0.000000e+00 : f32
    %343 = vector.broadcast %cst_97 : f32 to vector<2x32xf32>
    %344 = arith.maximumf %342, %343 : vector<2x32xf32>
    %345 = arith.truncf %344 : vector<2x32xf32> to vector<2x32xbf16>
    %cst_98 = arith.constant dense<0.000000e+00> : vector<2x16xf32>
    %346 = tpu.matmul %345, %3, %cst_98 {dimension_numbers = #tpu.dot_dimension_numbers<[1], [0], [0], [1], [0, 0, 1, 1], [], []>} : vector<2x32xbf16>, vector<32x16xbf16>, vector<2x16xf32> -> vector<2x16xf32>
    %347 = vector.broadcast %4 : vector<1x16xf32> to vector<2x16xf32>
    %348 = arith.addf %346, %347 : vector<2x16xf32>
    %cst_99 = arith.constant 0.000000e+00 : f32
    %349 = vector.broadcast %cst_99 : f32 to vector<2x16xf32>
    %350 = arith.maximumf %348, %349 : vector<2x16xf32>
    %351 = arith.truncf %350 : vector<2x16xf32> to vector<2x16xbf16>
    %cst_100 = arith.constant dense<0.000000e+00> : vector<2x96xf32>
    %352 = tpu.matmul %351, %5, %cst_100 {dimension_numbers = #tpu.dot_dimension_numbers<[1], [0], [0], [1], [0, 0, 1, 1], [], []>} : vector<2x16xbf16>, vector<16x96xbf16>, vector<2x96xf32> -> vector<2x96xf32>
    %353 = vector.broadcast %7 : vector<1x96xf32> to vector<2x96xf32>
    %354 = arith.addf %352, %353 : vector<2x96xf32>
    %355 = arith.truncf %226 : vector<2x32xf32> to vector<2x32xbf16>
    %cst_101 = arith.constant dense<0.000000e+00> : vector<2x96xf32>
    %356 = tpu.matmul %355, %6, %cst_101 {dimension_numbers = #tpu.dot_dimension_numbers<[1], [0], [0], [1], [0, 0, 1, 1], [], []>} : vector<2x32xbf16>, vector<32x96xbf16>, vector<2x96xf32> -> vector<2x96xf32>
    %357 = vector.broadcast %8 : vector<1x96xf32> to vector<2x96xf32>
    %358 = arith.addf %356, %357 : vector<2x96xf32>
    %359 = vector.extract_strided_slice %354 {offsets = [0, 0], sizes = [2, 32], strides = [1, 1]} : vector<2x96xf32> to vector<2x32xf32>
    %360 = vector.extract_strided_slice %358 {offsets = [0, 0], sizes = [2, 32], strides = [1, 1]} : vector<2x96xf32> to vector<2x32xf32>
    %361 = arith.addf %359, %360 : vector<2x32xf32>
    %362 = arith.negf %361 : vector<2x32xf32>
    %363 = math.exp %362 : vector<2x32xf32>
    %cst_102 = arith.constant 1.000000e+00 : f32
    %364 = vector.broadcast %cst_102 : f32 to vector<2x32xf32>
    %365 = arith.addf %364, %363 : vector<2x32xf32>
    %366 = arith.divf %364, %365 : vector<2x32xf32>
    %367 = vector.extract_strided_slice %354 {offsets = [0, 32], sizes = [2, 32], strides = [1, 1]} : vector<2x96xf32> to vector<2x32xf32>
    %368 = vector.extract_strided_slice %358 {offsets = [0, 32], sizes = [2, 32], strides = [1, 1]} : vector<2x96xf32> to vector<2x32xf32>
    %369 = arith.addf %367, %368 : vector<2x32xf32>
    %370 = arith.negf %369 : vector<2x32xf32>
    %371 = math.exp %370 : vector<2x32xf32>
    %cst_103 = arith.constant 1.000000e+00 : f32
    %372 = vector.broadcast %cst_103 : f32 to vector<2x32xf32>
    %373 = arith.addf %372, %371 : vector<2x32xf32>
    %374 = arith.divf %372, %373 : vector<2x32xf32>
    %375 = vector.extract_strided_slice %354 {offsets = [0, 64], sizes = [2, 32], strides = [1, 1]} : vector<2x96xf32> to vector<2x32xf32>
    %376 = vector.extract_strided_slice %358 {offsets = [0, 64], sizes = [2, 32], strides = [1, 1]} : vector<2x96xf32> to vector<2x32xf32>
    %377 = arith.mulf %366, %376 : vector<2x32xf32>
    %378 = arith.addf %375, %377 : vector<2x32xf32>
    %379 = math.tanh %378 : vector<2x32xf32>
    %cst_104 = arith.constant 1.000000e+00 : f32
    %380 = vector.broadcast %cst_104 : f32 to vector<2x32xf32>
    %381 = arith.subf %380, %374 : vector<2x32xf32>
    %382 = arith.mulf %381, %379 : vector<2x32xf32>
    %383 = arith.mulf %374, %226 : vector<2x32xf32>
    %384 = arith.addf %382, %383 : vector<2x32xf32>
    %385 = arith.truncf %384 : vector<2x32xf32> to vector<2x32xbf16>
    %386 = vector.shape_cast %385 : vector<2x32xbf16> to vector<2x1x32xbf16>
    "tpu.trace_start"() <{level = 10 : i32, message = "bqd,btd->bqt"}> : () -> ()
    %cst_105 = arith.constant dense<0.000000e+00> : vector<2x1x8xf32>
    %387 = tpu.matmul %386, %0, %cst_105 {dimension_numbers = #tpu.dot_dimension_numbers<[2], [2], [1], [1], [0, 0, 0, 1, 1, 1], [0], [0]>} : vector<2x1x32xbf16>, vector<2x8x32xbf16>, vector<2x1x8xf32> -> vector<2x1x8xf32>
    "tpu.trace_stop"() : () -> ()
    %cst_106 = arith.constant dense<0xFF800000> : vector<2x1xf32>
    %388 = vector.multi_reduction <maximumf>, %387, %cst_106 [2] : vector<2x1x8xf32> to vector<2x1xf32>
    %389 = vector.shape_cast %388 : vector<2x1xf32> to vector<2x1x1xf32>
    %390 = vector.broadcast %389 : vector<2x1x1xf32> to vector<2x1x8xf32>
    %391 = arith.subf %387, %390 : vector<2x1x8xf32>
    %392 = math.exp %391 : vector<2x1x8xf32>
    %cst_107 = arith.constant dense<0.000000e+00> : vector<2x1xf32>
    %393 = vector.multi_reduction <add>, %392, %cst_107 [2] : vector<2x1x8xf32> to vector<2x1xf32>
    %394 = vector.shape_cast %393 : vector<2x1xf32> to vector<2x1x1xf32>
    %395 = tpu.reciprocal %394 {approx = true} : vector<2x1x1xf32> -> vector<2x1x1xf32>
    %396 = vector.broadcast %395 : vector<2x1x1xf32> to vector<2x1x8xf32>
    %397 = arith.mulf %392, %396 : vector<2x1x8xf32>
    %398 = arith.truncf %397 : vector<2x1x8xf32> to vector<2x1x8xbf16>
    "tpu.trace_start"() <{level = 10 : i32, message = "bqt,btd->bqd"}> : () -> ()
    %cst_108 = arith.constant dense<0.000000e+00> : vector<2x1x32xf32>
    %399 = tpu.matmul %398, %0, %cst_108 {dimension_numbers = #tpu.dot_dimension_numbers<[2], [1], [1], [2], [0, 0, 0, 1, 1, 2], [0], [0]>} : vector<2x1x8xbf16>, vector<2x8x32xbf16>, vector<2x1x32xf32> -> vector<2x1x32xf32>
    "tpu.trace_stop"() : () -> ()
    %400 = vector.shape_cast %399 : vector<2x1x32xf32> to vector<2x32xf32>
    %401 = tpu.concatenate %384, %400 in 1 : vector<2x32xf32>, vector<2x32xf32> -> vector<2x64xf32>
    %402 = arith.truncf %401 : vector<2x64xf32> to vector<2x64xbf16>
    %cst_109 = arith.constant dense<0.000000e+00> : vector<2x32xf32>
    %403 = tpu.matmul %402, %9, %cst_109 {dimension_numbers = #tpu.dot_dimension_numbers<[1], [0], [0], [1], [0, 0, 1, 1], [], []>} : vector<2x64xbf16>, vector<64x32xbf16>, vector<2x32xf32> -> vector<2x32xf32>
    %404 = vector.broadcast %10 : vector<1x32xf32> to vector<2x32xf32>
    %405 = arith.addf %403, %404 : vector<2x32xf32>
    %406 = vector.extract_strided_slice %11 {offsets = [0, 0, 0], sizes = [1, 32, 96], strides = [1, 1, 1]} : vector<2x32x96xbf16> to vector<1x32x96xbf16>
    %407 = vector.shape_cast %406 : vector<1x32x96xbf16> to vector<32x96xbf16>
    %408 = arith.truncf %405 : vector<2x32xf32> to vector<2x32xbf16>
    %cst_110 = arith.constant dense<0.000000e+00> : vector<2x96xf32>
    %409 = tpu.matmul %408, %407, %cst_110 {dimension_numbers = #tpu.dot_dimension_numbers<[1], [0], [0], [1], [0, 0, 1, 1], [], []>} : vector<2x32xbf16>, vector<32x96xbf16>, vector<2x96xf32> -> vector<2x96xf32>
    %410 = vector.extract_strided_slice %13 {offsets = [0, 0, 0], sizes = [1, 1, 96], strides = [1, 1, 1]} : vector<2x1x96xf32> to vector<1x1x96xf32>
    %411 = vector.shape_cast %410 : vector<1x1x96xf32> to vector<1x96xf32>
    %412 = vector.broadcast %411 : vector<1x96xf32> to vector<2x96xf32>
    %413 = arith.addf %409, %412 : vector<2x96xf32>
    %414 = vector.extract_strided_slice %12 {offsets = [0, 0, 0], sizes = [1, 32, 96], strides = [1, 1, 1]} : vector<2x32x96xbf16> to vector<1x32x96xbf16>
    %415 = vector.shape_cast %414 : vector<1x32x96xbf16> to vector<32x96xbf16>
    %416 = arith.truncf %289 : vector<2x32xf32> to vector<2x32xbf16>
    %cst_111 = arith.constant dense<0.000000e+00> : vector<2x96xf32>
    %417 = tpu.matmul %416, %415, %cst_111 {dimension_numbers = #tpu.dot_dimension_numbers<[1], [0], [0], [1], [0, 0, 1, 1], [], []>} : vector<2x32xbf16>, vector<32x96xbf16>, vector<2x96xf32> -> vector<2x96xf32>
    %418 = vector.extract_strided_slice %14 {offsets = [0, 0, 0], sizes = [1, 1, 96], strides = [1, 1, 1]} : vector<2x1x96xf32> to vector<1x1x96xf32>
    %419 = vector.shape_cast %418 : vector<1x1x96xf32> to vector<1x96xf32>
    %420 = vector.broadcast %419 : vector<1x96xf32> to vector<2x96xf32>
    %421 = arith.addf %417, %420 : vector<2x96xf32>
    %422 = vector.extract_strided_slice %413 {offsets = [0, 0], sizes = [2, 32], strides = [1, 1]} : vector<2x96xf32> to vector<2x32xf32>
    %423 = vector.extract_strided_slice %421 {offsets = [0, 0], sizes = [2, 32], strides = [1, 1]} : vector<2x96xf32> to vector<2x32xf32>
    %424 = arith.addf %422, %423 : vector<2x32xf32>
    %425 = arith.negf %424 : vector<2x32xf32>
    %426 = math.exp %425 : vector<2x32xf32>
    %cst_112 = arith.constant 1.000000e+00 : f32
    %427 = vector.broadcast %cst_112 : f32 to vector<2x32xf32>
    %428 = arith.addf %427, %426 : vector<2x32xf32>
    %429 = arith.divf %427, %428 : vector<2x32xf32>
    %430 = vector.extract_strided_slice %413 {offsets = [0, 32], sizes = [2, 32], strides = [1, 1]} : vector<2x96xf32> to vector<2x32xf32>
    %431 = vector.extract_strided_slice %421 {offsets = [0, 32], sizes = [2, 32], strides = [1, 1]} : vector<2x96xf32> to vector<2x32xf32>
    %432 = arith.addf %430, %431 : vector<2x32xf32>
    %433 = arith.negf %432 : vector<2x32xf32>
    %434 = math.exp %433 : vector<2x32xf32>
    %cst_113 = arith.constant 1.000000e+00 : f32
    %435 = vector.broadcast %cst_113 : f32 to vector<2x32xf32>
    %436 = arith.addf %435, %434 : vector<2x32xf32>
    %437 = arith.divf %435, %436 : vector<2x32xf32>
    %438 = vector.extract_strided_slice %413 {offsets = [0, 64], sizes = [2, 32], strides = [1, 1]} : vector<2x96xf32> to vector<2x32xf32>
    %439 = vector.extract_strided_slice %421 {offsets = [0, 64], sizes = [2, 32], strides = [1, 1]} : vector<2x96xf32> to vector<2x32xf32>
    %440 = arith.mulf %429, %439 : vector<2x32xf32>
    %441 = arith.addf %438, %440 : vector<2x32xf32>
    %442 = math.tanh %441 : vector<2x32xf32>
    %cst_114 = arith.constant 1.000000e+00 : f32
    %443 = vector.broadcast %cst_114 : f32 to vector<2x32xf32>
    %444 = arith.subf %443, %437 : vector<2x32xf32>
    %445 = arith.mulf %444, %442 : vector<2x32xf32>
    %446 = arith.mulf %437, %289 : vector<2x32xf32>
    %447 = arith.addf %445, %446 : vector<2x32xf32>
    %448 = arith.addf %405, %447 : vector<2x32xf32>
    %449 = vector.extract_strided_slice %11 {offsets = [1, 0, 0], sizes = [1, 32, 96], strides = [1, 1, 1]} : vector<2x32x96xbf16> to vector<1x32x96xbf16>
    %450 = vector.shape_cast %449 : vector<1x32x96xbf16> to vector<32x96xbf16>
    %451 = arith.truncf %448 : vector<2x32xf32> to vector<2x32xbf16>
    %cst_115 = arith.constant dense<0.000000e+00> : vector<2x96xf32>
    %452 = tpu.matmul %451, %450, %cst_115 {dimension_numbers = #tpu.dot_dimension_numbers<[1], [0], [0], [1], [0, 0, 1, 1], [], []>} : vector<2x32xbf16>, vector<32x96xbf16>, vector<2x96xf32> -> vector<2x96xf32>
    %453 = vector.extract_strided_slice %13 {offsets = [1, 0, 0], sizes = [1, 1, 96], strides = [1, 1, 1]} : vector<2x1x96xf32> to vector<1x1x96xf32>
    %454 = vector.shape_cast %453 : vector<1x1x96xf32> to vector<1x96xf32>
    %455 = vector.broadcast %454 : vector<1x96xf32> to vector<2x96xf32>
    %456 = arith.addf %452, %455 : vector<2x96xf32>
    %457 = vector.extract_strided_slice %12 {offsets = [1, 0, 0], sizes = [1, 32, 96], strides = [1, 1, 1]} : vector<2x32x96xbf16> to vector<1x32x96xbf16>
    %458 = vector.shape_cast %457 : vector<1x32x96xbf16> to vector<32x96xbf16>
    %459 = arith.truncf %332 : vector<2x32xf32> to vector<2x32xbf16>
    %cst_116 = arith.constant dense<0.000000e+00> : vector<2x96xf32>
    %460 = tpu.matmul %459, %458, %cst_116 {dimension_numbers = #tpu.dot_dimension_numbers<[1], [0], [0], [1], [0, 0, 1, 1], [], []>} : vector<2x32xbf16>, vector<32x96xbf16>, vector<2x96xf32> -> vector<2x96xf32>
    %461 = vector.extract_strided_slice %14 {offsets = [1, 0, 0], sizes = [1, 1, 96], strides = [1, 1, 1]} : vector<2x1x96xf32> to vector<1x1x96xf32>
    %462 = vector.shape_cast %461 : vector<1x1x96xf32> to vector<1x96xf32>
    %463 = vector.broadcast %462 : vector<1x96xf32> to vector<2x96xf32>
    %464 = arith.addf %460, %463 : vector<2x96xf32>
    %465 = vector.extract_strided_slice %456 {offsets = [0, 0], sizes = [2, 32], strides = [1, 1]} : vector<2x96xf32> to vector<2x32xf32>
    %466 = vector.extract_strided_slice %464 {offsets = [0, 0], sizes = [2, 32], strides = [1, 1]} : vector<2x96xf32> to vector<2x32xf32>
    %467 = arith.addf %465, %466 : vector<2x32xf32>
    %468 = arith.negf %467 : vector<2x32xf32>
    %469 = math.exp %468 : vector<2x32xf32>
    %cst_117 = arith.constant 1.000000e+00 : f32
    %470 = vector.broadcast %cst_117 : f32 to vector<2x32xf32>
    %471 = arith.addf %470, %469 : vector<2x32xf32>
    %472 = arith.divf %470, %471 : vector<2x32xf32>
    %473 = vector.extract_strided_slice %456 {offsets = [0, 32], sizes = [2, 32], strides = [1, 1]} : vector<2x96xf32> to vector<2x32xf32>
    %474 = vector.extract_strided_slice %464 {offsets = [0, 32], sizes = [2, 32], strides = [1, 1]} : vector<2x96xf32> to vector<2x32xf32>
    %475 = arith.addf %473, %474 : vector<2x32xf32>
    %476 = arith.negf %475 : vector<2x32xf32>
    %477 = math.exp %476 : vector<2x32xf32>
    %cst_118 = arith.constant 1.000000e+00 : f32
    %478 = vector.broadcast %cst_118 : f32 to vector<2x32xf32>
    %479 = arith.addf %478, %477 : vector<2x32xf32>
    %480 = arith.divf %478, %479 : vector<2x32xf32>
    %481 = vector.extract_strided_slice %456 {offsets = [0, 64], sizes = [2, 32], strides = [1, 1]} : vector<2x96xf32> to vector<2x32xf32>
    %482 = vector.extract_strided_slice %464 {offsets = [0, 64], sizes = [2, 32], strides = [1, 1]} : vector<2x96xf32> to vector<2x32xf32>
    %483 = arith.mulf %472, %482 : vector<2x32xf32>
    %484 = arith.addf %481, %483 : vector<2x32xf32>
    %485 = math.tanh %484 : vector<2x32xf32>
    %cst_119 = arith.constant 1.000000e+00 : f32
    %486 = vector.broadcast %cst_119 : f32 to vector<2x32xf32>
    %487 = arith.subf %486, %480 : vector<2x32xf32>
    %488 = arith.mulf %487, %485 : vector<2x32xf32>
    %489 = arith.mulf %480, %332 : vector<2x32xf32>
    %490 = arith.addf %488, %489 : vector<2x32xf32>
    %491 = arith.addf %448, %490 : vector<2x32xf32>
    %492 = arith.truncf %491 : vector<2x32xf32> to vector<2x32xbf16>
    %cst_120 = arith.constant dense<0.000000e+00> : vector<2x16xf32>
    %493 = tpu.matmul %492, %15, %cst_120 {dimension_numbers = #tpu.dot_dimension_numbers<[1], [0], [0], [1], [0, 0, 1, 1], [], []>} : vector<2x32xbf16>, vector<32x16xbf16>, vector<2x16xf32> -> vector<2x16xf32>
    %494 = vector.broadcast %16 : vector<1x16xf32> to vector<2x16xf32>
    %495 = arith.addf %493, %494 : vector<2x16xf32>
    %496 = vector.shape_cast %495 : vector<2x16xf32> to vector<2x1x16xf32>
    %497 = tpu.concatenate %180, %338, %496 in 1 : vector<2x1x16xf32>, vector<2x1x16xf32>, vector<2x1x16xf32> -> vector<2x3x16xf32>
    %c0_121 = arith.constant 0 : index
    %c0_122 = arith.constant 0 : index
    %c0_123 = arith.constant 0 : index
    %498 = vector.load %arg20[%c0_121, %c0_122, %c0_123] : memref<2x3x16xf32, #tpu.memory_space<vmem>>, vector<2x3x16xf32>
    tpu.vector_store %arg20[%c0_121, %c0_122, %c0_123], %497 {strides = array<i32>} : memref<2x3x16xf32, #tpu.memory_space<vmem>>, vector<2x3x16xf32>,
    return
  }
}

module attributes {stable_mosaic.version = 11 : i64} {
  func.func @_cbhg_stack_kernel(%arg0: memref<2x6x8xf32, #tpu.memory_space<vmem>>, %arg1: memref<32x64xbf16, #tpu.memory_space<vmem>>, %arg2: memref<1x64xf32, #tpu.memory_space<vmem>>, %arg3: memref<192x16xbf16, #tpu.memory_space<vmem>>, %arg4: memref<1x16xf32, #tpu.memory_space<vmem>>, %arg5: memref<48x8xbf16, #tpu.memory_space<vmem>>, %arg6: memref<1x8xf32, #tpu.memory_space<vmem>>, %arg7: memref<4x8x16xbf16, #tpu.memory_space<vmem>>, %arg8: memref<4x1x16xf32, #tpu.memory_space<vmem>>, %arg9: memref<8x96xbf16, #tpu.memory_space<vmem>>, %arg10: memref<1x96xf32, #tpu.memory_space<vmem>>, %arg11: memref<16x48xbf16, #tpu.memory_space<vmem>>, %arg12: memref<1x48xf32, #tpu.memory_space<vmem>>, %arg13: memref<16x48xbf16, #tpu.memory_space<vmem>>, %arg14: memref<1x48xf32, #tpu.memory_space<vmem>>, %arg15: memref<32x8xbf16, #tpu.memory_space<vmem>>, %arg16: memref<1x8xf32, #tpu.memory_space<vmem>>, %arg17: memref<2x6x8xf32, #tpu.memory_space<vmem>>) attributes {dimension_semantics = [], scalar_prefetch = 0 : i64, scratch_operands = 0 : i64, tpu.core_type = #tpu.core_type<tc>} {
    %c0 = arith.constant 0 : index
    %c0_0 = arith.constant 0 : index
    %c0_1 = arith.constant 0 : index
    %0 = vector.load %arg0[%c0, %c0_0, %c0_1] : memref<2x6x8xf32, #tpu.memory_space<vmem>>, vector<2x6x8xf32>
    %cst = arith.constant 0.000000e+00 : f32
    %1 = vector.broadcast %cst : f32 to vector<2x2x8xf32>
    %cst_2 = arith.constant 0.000000e+00 : f32
    %2 = vector.broadcast %cst_2 : f32 to vector<2x2x8xf32>
    %3 = tpu.concatenate %1, %0, %2 in 1 : vector<2x2x8xf32>, vector<2x6x8xf32>, vector<2x2x8xf32> -> vector<2x10x8xf32>
    %4 = vector.extract_strided_slice %3 {offsets = [0, 0, 0], sizes = [2, 6, 8], strides = [1, 1, 1]} : vector<2x10x8xf32> to vector<2x6x8xf32>
    %5 = vector.extract_strided_slice %3 {offsets = [0, 1, 0], sizes = [2, 6, 8], strides = [1, 1, 1]} : vector<2x10x8xf32> to vector<2x6x8xf32>
    %6 = vector.extract_strided_slice %3 {offsets = [0, 2, 0], sizes = [2, 6, 8], strides = [1, 1, 1]} : vector<2x10x8xf32> to vector<2x6x8xf32>
    %7 = vector.extract_strided_slice %3 {offsets = [0, 3, 0], sizes = [2, 6, 8], strides = [1, 1, 1]} : vector<2x10x8xf32> to vector<2x6x8xf32>
    %8 = tpu.concatenate %4, %5, %6, %7 in 2 : vector<2x6x8xf32>, vector<2x6x8xf32>, vector<2x6x8xf32>, vector<2x6x8xf32> -> vector<2x6x32xf32>
    %c0_3 = arith.constant 0 : index
    %c0_4 = arith.constant 0 : index
    %9 = vector.load %arg1[%c0_3, %c0_4] : memref<32x64xbf16, #tpu.memory_space<vmem>>, vector<32x64xbf16>
    %10 = arith.truncf %8 : vector<2x6x32xf32> to vector<2x6x32xbf16>
    "tpu.trace_start"() <{level = 10 : i32, message = "btc,cd->btd"}> : () -> ()
    %cst_5 = arith.constant dense<0.000000e+00> : vector<2x6x64xf32>
    %11 = tpu.matmul %10, %9, %cst_5 {dimension_numbers = #tpu.dot_dimension_numbers<[2], [0], [0, 1], [1], [0, 0, 0, 1, 1, 1], [], []>} : vector<2x6x32xbf16>, vector<32x64xbf16>, vector<2x6x64xf32> -> vector<2x6x64xf32>
    "tpu.trace_stop"() : () -> ()
    %c0_6 = arith.constant 0 : index
    %c0_7 = arith.constant 0 : index
    %12 = vector.load %arg2[%c0_6, %c0_7] : memref<1x64xf32, #tpu.memory_space<vmem>>, vector<1x64xf32>
    %13 = vector.shape_cast %12 : vector<1x64xf32> to vector<1x1x64xf32>
    %14 = vector.broadcast %13 : vector<1x1x64xf32> to vector<2x6x64xf32>
    %15 = arith.addf %11, %14 : vector<2x6x64xf32>
    %cst_8 = arith.constant 0.000000e+00 : f32
    %16 = vector.broadcast %cst_8 : f32 to vector<2x6x64xf32>
    %17 = arith.maximumf %15, %16 : vector<2x6x64xf32>
    %cst_9 = arith.constant 0xFF800000 : f32
    %18 = vector.broadcast %cst_9 : f32 to vector<2x1x64xf32>
    %cst_10 = arith.constant 0xFF800000 : f32
    %19 = vector.broadcast %cst_10 : f32 to vector<2x1x64xf32>
    %20 = tpu.concatenate %18, %17, %19 in 1 : vector<2x1x64xf32>, vector<2x6x64xf32>, vector<2x1x64xf32> -> vector<2x8x64xf32>
    %21 = vector.extract_strided_slice %20 {offsets = [0, 0, 0], sizes = [2, 6, 64], strides = [1, 1, 1]} : vector<2x8x64xf32> to vector<2x6x64xf32>
    %22 = vector.extract_strided_slice %20 {offsets = [0, 1, 0], sizes = [2, 6, 64], strides = [1, 1, 1]} : vector<2x8x64xf32> to vector<2x6x64xf32>
    %23 = arith.maximumf %21, %22 : vector<2x6x64xf32>
    %cst_11 = arith.constant 0.000000e+00 : f32
    %24 = vector.broadcast %cst_11 : f32 to vector<2x1x64xf32>
    %cst_12 = arith.constant 0.000000e+00 : f32
    %25 = vector.broadcast %cst_12 : f32 to vector<2x1x64xf32>
    %26 = tpu.concatenate %24, %23, %25 in 1 : vector<2x1x64xf32>, vector<2x6x64xf32>, vector<2x1x64xf32> -> vector<2x8x64xf32>
    %27 = vector.extract_strided_slice %26 {offsets = [0, 0, 0], sizes = [2, 6, 64], strides = [1, 1, 1]} : vector<2x8x64xf32> to vector<2x6x64xf32>
    %28 = vector.extract_strided_slice %26 {offsets = [0, 1, 0], sizes = [2, 6, 64], strides = [1, 1, 1]} : vector<2x8x64xf32> to vector<2x6x64xf32>
    %29 = vector.extract_strided_slice %26 {offsets = [0, 2, 0], sizes = [2, 6, 64], strides = [1, 1, 1]} : vector<2x8x64xf32> to vector<2x6x64xf32>
    %30 = tpu.concatenate %27, %28, %29 in 2 : vector<2x6x64xf32>, vector<2x6x64xf32>, vector<2x6x64xf32> -> vector<2x6x192xf32>
    %c0_13 = arith.constant 0 : index
    %c0_14 = arith.constant 0 : index
    %31 = vector.load %arg3[%c0_13, %c0_14] : memref<192x16xbf16, #tpu.memory_space<vmem>>, vector<192x16xbf16>
    %32 = arith.truncf %30 : vector<2x6x192xf32> to vector<2x6x192xbf16>
    "tpu.trace_start"() <{level = 10 : i32, message = "btc,cd->btd"}> : () -> ()
    %cst_15 = arith.constant dense<0.000000e+00> : vector<2x6x16xf32>
    %33 = tpu.matmul %32, %31, %cst_15 {dimension_numbers = #tpu.dot_dimension_numbers<[2], [0], [0, 1], [1], [0, 0, 0, 1, 1, 1], [], []>} : vector<2x6x192xbf16>, vector<192x16xbf16>, vector<2x6x16xf32> -> vector<2x6x16xf32>
    "tpu.trace_stop"() : () -> ()
    %c0_16 = arith.constant 0 : index
    %c0_17 = arith.constant 0 : index
    %34 = vector.load %arg4[%c0_16, %c0_17] : memref<1x16xf32, #tpu.memory_space<vmem>>, vector<1x16xf32>
    %35 = vector.shape_cast %34 : vector<1x16xf32> to vector<1x1x16xf32>
    %36 = vector.broadcast %35 : vector<1x1x16xf32> to vector<2x6x16xf32>
    %37 = arith.addf %33, %36 : vector<2x6x16xf32>
    %cst_18 = arith.constant 0.000000e+00 : f32
    %38 = vector.broadcast %cst_18 : f32 to vector<2x6x16xf32>
    %39 = arith.maximumf %37, %38 : vector<2x6x16xf32>
    %cst_19 = arith.constant 0.000000e+00 : f32
    %40 = vector.broadcast %cst_19 : f32 to vector<2x1x16xf32>
    %cst_20 = arith.constant 0.000000e+00 : f32
    %41 = vector.broadcast %cst_20 : f32 to vector<2x1x16xf32>
    %42 = tpu.concatenate %40, %39, %41 in 1 : vector<2x1x16xf32>, vector<2x6x16xf32>, vector<2x1x16xf32> -> vector<2x8x16xf32>
    %43 = vector.extract_strided_slice %42 {offsets = [0, 0, 0], sizes = [2, 6, 16], strides = [1, 1, 1]} : vector<2x8x16xf32> to vector<2x6x16xf32>
    %44 = vector.extract_strided_slice %42 {offsets = [0, 1, 0], sizes = [2, 6, 16], strides = [1, 1, 1]} : vector<2x8x16xf32> to vector<2x6x16xf32>
    %45 = vector.extract_strided_slice %42 {offsets = [0, 2, 0], sizes = [2, 6, 16], strides = [1, 1, 1]} : vector<2x8x16xf32> to vector<2x6x16xf32>
    %46 = tpu.concatenate %43, %44, %45 in 2 : vector<2x6x16xf32>, vector<2x6x16xf32>, vector<2x6x16xf32> -> vector<2x6x48xf32>
    %c0_21 = arith.constant 0 : index
    %c0_22 = arith.constant 0 : index
    %47 = vector.load %arg5[%c0_21, %c0_22] : memref<48x8xbf16, #tpu.memory_space<vmem>>, vector<48x8xbf16>
    %48 = arith.truncf %46 : vector<2x6x48xf32> to vector<2x6x48xbf16>
    "tpu.trace_start"() <{level = 10 : i32, message = "btc,cd->btd"}> : () -> ()
    %cst_23 = arith.constant dense<0.000000e+00> : vector<2x6x8xf32>
    %49 = tpu.matmul %48, %47, %cst_23 {dimension_numbers = #tpu.dot_dimension_numbers<[2], [0], [0, 1], [1], [0, 0, 0, 1, 1, 1], [], []>} : vector<2x6x48xbf16>, vector<48x8xbf16>, vector<2x6x8xf32> -> vector<2x6x8xf32>
    "tpu.trace_stop"() : () -> ()
    %c0_24 = arith.constant 0 : index
    %c0_25 = arith.constant 0 : index
    %50 = vector.load %arg6[%c0_24, %c0_25] : memref<1x8xf32, #tpu.memory_space<vmem>>, vector<1x8xf32>
    %51 = vector.shape_cast %50 : vector<1x8xf32> to vector<1x1x8xf32>
    %52 = vector.broadcast %51 : vector<1x1x8xf32> to vector<2x6x8xf32>
    %53 = arith.addf %49, %52 : vector<2x6x8xf32>
    %54 = arith.addf %53, %0 : vector<2x6x8xf32>
    %c0_26 = arith.constant 0 : index
    %c0_27 = arith.constant 0 : index
    %c0_28 = arith.constant 0 : index
    %55 = vector.load %arg7[%c0_26, %c0_27, %c0_28] : memref<4x8x16xbf16, #tpu.memory_space<vmem>>, vector<4x8x16xbf16>
    %c0_29 = arith.constant 0 : index
    %c0_30 = arith.constant 0 : index
    %c0_31 = arith.constant 0 : index
    %56 = vector.load %arg8[%c0_29, %c0_30, %c0_31] : memref<4x1x16xf32, #tpu.memory_space<vmem>>, vector<4x1x16xf32>
    %57 = vector.extract_strided_slice %55 {offsets = [0, 0, 0], sizes = [1, 8, 16], strides = [1, 1, 1]} : vector<4x8x16xbf16> to vector<1x8x16xbf16>
    %58 = vector.shape_cast %57 : vector<1x8x16xbf16> to vector<8x16xbf16>
    %59 = arith.truncf %54 : vector<2x6x8xf32> to vector<2x6x8xbf16>
    "tpu.trace_start"() <{level = 10 : i32, message = "btc,cd->btd"}> : () -> ()
    %cst_32 = arith.constant dense<0.000000e+00> : vector<2x6x16xf32>
    %60 = tpu.matmul %59, %58, %cst_32 {dimension_numbers = #tpu.dot_dimension_numbers<[2], [0], [0, 1], [1], [0, 0, 0, 1, 1, 1], [], []>} : vector<2x6x8xbf16>, vector<8x16xbf16>, vector<2x6x16xf32> -> vector<2x6x16xf32>
    "tpu.trace_stop"() : () -> ()
    %61 = vector.extract_strided_slice %56 {offsets = [0, 0, 0], sizes = [1, 1, 16], strides = [1, 1, 1]} : vector<4x1x16xf32> to vector<1x1x16xf32>
    %62 = vector.shape_cast %61 : vector<1x1x16xf32> to vector<1x16xf32>
    %63 = vector.shape_cast %62 : vector<1x16xf32> to vector<1x1x16xf32>
    %64 = vector.broadcast %63 : vector<1x1x16xf32> to vector<2x6x16xf32>
    %65 = arith.addf %60, %64 : vector<2x6x16xf32>
    %66 = vector.extract_strided_slice %65 {offsets = [0, 0, 0], sizes = [2, 6, 8], strides = [1, 1, 1]} : vector<2x6x16xf32> to vector<2x6x8xf32>
    %cst_33 = arith.constant 0.000000e+00 : f32
    %67 = vector.broadcast %cst_33 : f32 to vector<2x6x8xf32>
    %68 = arith.maximumf %66, %67 : vector<2x6x8xf32>
    %69 = vector.extract_strided_slice %65 {offsets = [0, 0, 8], sizes = [2, 6, 8], strides = [1, 1, 1]} : vector<2x6x16xf32> to vector<2x6x8xf32>
    %70 = arith.negf %69 : vector<2x6x8xf32>
    %71 = math.exp %70 : vector<2x6x8xf32>
    %cst_34 = arith.constant 1.000000e+00 : f32
    %72 = vector.broadcast %cst_34 : f32 to vector<2x6x8xf32>
    %73 = arith.addf %72, %71 : vector<2x6x8xf32>
    %74 = arith.divf %72, %73 : vector<2x6x8xf32>
    %75 = arith.mulf %68, %74 : vector<2x6x8xf32>
    %cst_35 = arith.constant 1.000000e+00 : f32
    %76 = vector.broadcast %cst_35 : f32 to vector<2x6x8xf32>
    %77 = arith.subf %76, %74 : vector<2x6x8xf32>
    %78 = arith.mulf %54, %77 : vector<2x6x8xf32>
    %79 = arith.addf %75, %78 : vector<2x6x8xf32>
    %80 = vector.extract_strided_slice %55 {offsets = [1, 0, 0], sizes = [1, 8, 16], strides = [1, 1, 1]} : vector<4x8x16xbf16> to vector<1x8x16xbf16>
    %81 = vector.shape_cast %80 : vector<1x8x16xbf16> to vector<8x16xbf16>
    %82 = arith.truncf %79 : vector<2x6x8xf32> to vector<2x6x8xbf16>
    "tpu.trace_start"() <{level = 10 : i32, message = "btc,cd->btd"}> : () -> ()
    %cst_36 = arith.constant dense<0.000000e+00> : vector<2x6x16xf32>
    %83 = tpu.matmul %82, %81, %cst_36 {dimension_numbers = #tpu.dot_dimension_numbers<[2], [0], [0, 1], [1], [0, 0, 0, 1, 1, 1], [], []>} : vector<2x6x8xbf16>, vector<8x16xbf16>, vector<2x6x16xf32> -> vector<2x6x16xf32>
    "tpu.trace_stop"() : () -> ()
    %84 = vector.extract_strided_slice %56 {offsets = [1, 0, 0], sizes = [1, 1, 16], strides = [1, 1, 1]} : vector<4x1x16xf32> to vector<1x1x16xf32>
    %85 = vector.shape_cast %84 : vector<1x1x16xf32> to vector<1x16xf32>
    %86 = vector.shape_cast %85 : vector<1x16xf32> to vector<1x1x16xf32>
    %87 = vector.broadcast %86 : vector<1x1x16xf32> to vector<2x6x16xf32>
    %88 = arith.addf %83, %87 : vector<2x6x16xf32>
    %89 = vector.extract_strided_slice %88 {offsets = [0, 0, 0], sizes = [2, 6, 8], strides = [1, 1, 1]} : vector<2x6x16xf32> to vector<2x6x8xf32>
    %cst_37 = arith.constant 0.000000e+00 : f32
    %90 = vector.broadcast %cst_37 : f32 to vector<2x6x8xf32>
    %91 = arith.maximumf %89, %90 : vector<2x6x8xf32>
    %92 = vector.extract_strided_slice %88 {offsets = [0, 0, 8], sizes = [2, 6, 8], strides = [1, 1, 1]} : vector<2x6x16xf32> to vector<2x6x8xf32>
    %93 = arith.negf %92 : vector<2x6x8xf32>
    %94 = math.exp %93 : vector<2x6x8xf32>
    %cst_38 = arith.constant 1.000000e+00 : f32
    %95 = vector.broadcast %cst_38 : f32 to vector<2x6x8xf32>
    %96 = arith.addf %95, %94 : vector<2x6x8xf32>
    %97 = arith.divf %95, %96 : vector<2x6x8xf32>
    %98 = arith.mulf %91, %97 : vector<2x6x8xf32>
    %cst_39 = arith.constant 1.000000e+00 : f32
    %99 = vector.broadcast %cst_39 : f32 to vector<2x6x8xf32>
    %100 = arith.subf %99, %97 : vector<2x6x8xf32>
    %101 = arith.mulf %79, %100 : vector<2x6x8xf32>
    %102 = arith.addf %98, %101 : vector<2x6x8xf32>
    %103 = vector.extract_strided_slice %55 {offsets = [2, 0, 0], sizes = [1, 8, 16], strides = [1, 1, 1]} : vector<4x8x16xbf16> to vector<1x8x16xbf16>
    %104 = vector.shape_cast %103 : vector<1x8x16xbf16> to vector<8x16xbf16>
    %105 = arith.truncf %102 : vector<2x6x8xf32> to vector<2x6x8xbf16>
    "tpu.trace_start"() <{level = 10 : i32, message = "btc,cd->btd"}> : () -> ()
    %cst_40 = arith.constant dense<0.000000e+00> : vector<2x6x16xf32>
    %106 = tpu.matmul %105, %104, %cst_40 {dimension_numbers = #tpu.dot_dimension_numbers<[2], [0], [0, 1], [1], [0, 0, 0, 1, 1, 1], [], []>} : vector<2x6x8xbf16>, vector<8x16xbf16>, vector<2x6x16xf32> -> vector<2x6x16xf32>
    "tpu.trace_stop"() : () -> ()
    %107 = vector.extract_strided_slice %56 {offsets = [2, 0, 0], sizes = [1, 1, 16], strides = [1, 1, 1]} : vector<4x1x16xf32> to vector<1x1x16xf32>
    %108 = vector.shape_cast %107 : vector<1x1x16xf32> to vector<1x16xf32>
    %109 = vector.shape_cast %108 : vector<1x16xf32> to vector<1x1x16xf32>
    %110 = vector.broadcast %109 : vector<1x1x16xf32> to vector<2x6x16xf32>
    %111 = arith.addf %106, %110 : vector<2x6x16xf32>
    %112 = vector.extract_strided_slice %111 {offsets = [0, 0, 0], sizes = [2, 6, 8], strides = [1, 1, 1]} : vector<2x6x16xf32> to vector<2x6x8xf32>
    %cst_41 = arith.constant 0.000000e+00 : f32
    %113 = vector.broadcast %cst_41 : f32 to vector<2x6x8xf32>
    %114 = arith.maximumf %112, %113 : vector<2x6x8xf32>
    %115 = vector.extract_strided_slice %111 {offsets = [0, 0, 8], sizes = [2, 6, 8], strides = [1, 1, 1]} : vector<2x6x16xf32> to vector<2x6x8xf32>
    %116 = arith.negf %115 : vector<2x6x8xf32>
    %117 = math.exp %116 : vector<2x6x8xf32>
    %cst_42 = arith.constant 1.000000e+00 : f32
    %118 = vector.broadcast %cst_42 : f32 to vector<2x6x8xf32>
    %119 = arith.addf %118, %117 : vector<2x6x8xf32>
    %120 = arith.divf %118, %119 : vector<2x6x8xf32>
    %121 = arith.mulf %114, %120 : vector<2x6x8xf32>
    %cst_43 = arith.constant 1.000000e+00 : f32
    %122 = vector.broadcast %cst_43 : f32 to vector<2x6x8xf32>
    %123 = arith.subf %122, %120 : vector<2x6x8xf32>
    %124 = arith.mulf %102, %123 : vector<2x6x8xf32>
    %125 = arith.addf %121, %124 : vector<2x6x8xf32>
    %126 = vector.extract_strided_slice %55 {offsets = [3, 0, 0], sizes = [1, 8, 16], strides = [1, 1, 1]} : vector<4x8x16xbf16> to vector<1x8x16xbf16>
    %127 = vector.shape_cast %126 : vector<1x8x16xbf16> to vector<8x16xbf16>
    %128 = arith.truncf %125 : vector<2x6x8xf32> to vector<2x6x8xbf16>
    "tpu.trace_start"() <{level = 10 : i32, message = "btc,cd->btd"}> : () -> ()
    %cst_44 = arith.constant dense<0.000000e+00> : vector<2x6x16xf32>
    %129 = tpu.matmul %128, %127, %cst_44 {dimension_numbers = #tpu.dot_dimension_numbers<[2], [0], [0, 1], [1], [0, 0, 0, 1, 1, 1], [], []>} : vector<2x6x8xbf16>, vector<8x16xbf16>, vector<2x6x16xf32> -> vector<2x6x16xf32>
    "tpu.trace_stop"() : () -> ()
    %130 = vector.extract_strided_slice %56 {offsets = [3, 0, 0], sizes = [1, 1, 16], strides = [1, 1, 1]} : vector<4x1x16xf32> to vector<1x1x16xf32>
    %131 = vector.shape_cast %130 : vector<1x1x16xf32> to vector<1x16xf32>
    %132 = vector.shape_cast %131 : vector<1x16xf32> to vector<1x1x16xf32>
    %133 = vector.broadcast %132 : vector<1x1x16xf32> to vector<2x6x16xf32>
    %134 = arith.addf %129, %133 : vector<2x6x16xf32>
    %135 = vector.extract_strided_slice %134 {offsets = [0, 0, 0], sizes = [2, 6, 8], strides = [1, 1, 1]} : vector<2x6x16xf32> to vector<2x6x8xf32>
    %cst_45 = arith.constant 0.000000e+00 : f32
    %136 = vector.broadcast %cst_45 : f32 to vector<2x6x8xf32>
    %137 = arith.maximumf %135, %136 : vector<2x6x8xf32>
    %138 = vector.extract_strided_slice %134 {offsets = [0, 0, 8], sizes = [2, 6, 8], strides = [1, 1, 1]} : vector<2x6x16xf32> to vector<2x6x8xf32>
    %139 = arith.negf %138 : vector<2x6x8xf32>
    %140 = math.exp %139 : vector<2x6x8xf32>
    %cst_46 = arith.constant 1.000000e+00 : f32
    %141 = vector.broadcast %cst_46 : f32 to vector<2x6x8xf32>
    %142 = arith.addf %141, %140 : vector<2x6x8xf32>
    %143 = arith.divf %141, %142 : vector<2x6x8xf32>
    %144 = arith.mulf %137, %143 : vector<2x6x8xf32>
    %cst_47 = arith.constant 1.000000e+00 : f32
    %145 = vector.broadcast %cst_47 : f32 to vector<2x6x8xf32>
    %146 = arith.subf %145, %143 : vector<2x6x8xf32>
    %147 = arith.mulf %125, %146 : vector<2x6x8xf32>
    %148 = arith.addf %144, %147 : vector<2x6x8xf32>
    %c0_48 = arith.constant 0 : index
    %c0_49 = arith.constant 0 : index
    %149 = vector.load %arg11[%c0_48, %c0_49] : memref<16x48xbf16, #tpu.memory_space<vmem>>, vector<16x48xbf16>
    %c0_50 = arith.constant 0 : index
    %c0_51 = arith.constant 0 : index
    %150 = vector.load %arg12[%c0_50, %c0_51] : memref<1x48xf32, #tpu.memory_space<vmem>>, vector<1x48xf32>
    %c0_52 = arith.constant 0 : index
    %c0_53 = arith.constant 0 : index
    %151 = vector.load %arg13[%c0_52, %c0_53] : memref<16x48xbf16, #tpu.memory_space<vmem>>, vector<16x48xbf16>
    %c0_54 = arith.constant 0 : index
    %c0_55 = arith.constant 0 : index
    %152 = vector.load %arg14[%c0_54, %c0_55] : memref<1x48xf32, #tpu.memory_space<vmem>>, vector<1x48xf32>
    %c0_56 = arith.constant 0 : index
    %c0_57 = arith.constant 0 : index
    %153 = vector.load %arg9[%c0_56, %c0_57] : memref<8x96xbf16, #tpu.memory_space<vmem>>, vector<8x96xbf16>
    %154 = arith.truncf %148 : vector<2x6x8xf32> to vector<2x6x8xbf16>
    "tpu.trace_start"() <{level = 10 : i32, message = "btc,cd->btd"}> : () -> ()
    %cst_58 = arith.constant dense<0.000000e+00> : vector<2x6x96xf32>
    %155 = tpu.matmul %154, %153, %cst_58 {dimension_numbers = #tpu.dot_dimension_numbers<[2], [0], [0, 1], [1], [0, 0, 0, 1, 1, 1], [], []>} : vector<2x6x8xbf16>, vector<8x96xbf16>, vector<2x6x96xf32> -> vector<2x6x96xf32>
    "tpu.trace_stop"() : () -> ()
    %c0_59 = arith.constant 0 : index
    %c0_60 = arith.constant 0 : index
    %156 = vector.load %arg10[%c0_59, %c0_60] : memref<1x96xf32, #tpu.memory_space<vmem>>, vector<1x96xf32>
    %157 = vector.shape_cast %156 : vector<1x96xf32> to vector<1x1x96xf32>
    %158 = vector.broadcast %157 : vector<1x1x96xf32> to vector<2x6x96xf32>
    %159 = arith.addf %155, %158 : vector<2x6x96xf32>
    %cst_61 = arith.constant 0.000000e+00 : f32
    %160 = vector.broadcast %cst_61 : f32 to vector<2x16xf32>
    %cst_62 = arith.constant 0.000000e+00 : f32
    %161 = vector.broadcast %cst_62 : f32 to vector<2x16xf32>
    %162 = vector.extract_strided_slice %159 {offsets = [0, 0, 0], sizes = [2, 1, 48], strides = [1, 1, 1]} : vector<2x6x96xf32> to vector<2x1x48xf32>
    %163 = vector.shape_cast %162 : vector<2x1x48xf32> to vector<2x48xf32>
    %164 = arith.truncf %160 : vector<2x16xf32> to vector<2x16xbf16>
    %cst_63 = arith.constant dense<0.000000e+00> : vector<2x48xf32>
    %165 = tpu.matmul %164, %149, %cst_63 {dimension_numbers = #tpu.dot_dimension_numbers<[1], [0], [0], [1], [0, 0, 1, 1], [], []>} : vector<2x16xbf16>, vector<16x48xbf16>, vector<2x48xf32> -> vector<2x48xf32>
    %166 = vector.broadcast %150 : vector<1x48xf32> to vector<2x48xf32>
    %167 = arith.addf %165, %166 : vector<2x48xf32>
    %168 = vector.extract_strided_slice %163 {offsets = [0, 0], sizes = [2, 16], strides = [1, 1]} : vector<2x48xf32> to vector<2x16xf32>
    %169 = vector.extract_strided_slice %167 {offsets = [0, 0], sizes = [2, 16], strides = [1, 1]} : vector<2x48xf32> to vector<2x16xf32>
    %170 = arith.addf %168, %169 : vector<2x16xf32>
    %171 = arith.negf %170 : vector<2x16xf32>
    %172 = math.exp %171 : vector<2x16xf32>
    %cst_64 = arith.constant 1.000000e+00 : f32
    %173 = vector.broadcast %cst_64 : f32 to vector<2x16xf32>
    %174 = arith.addf %173, %172 : vector<2x16xf32>
    %175 = arith.divf %173, %174 : vector<2x16xf32>
    %176 = vector.extract_strided_slice %163 {offsets = [0, 16], sizes = [2, 16], strides = [1, 1]} : vector<2x48xf32> to vector<2x16xf32>
    %177 = vector.extract_strided_slice %167 {offsets = [0, 16], sizes = [2, 16], strides = [1, 1]} : vector<2x48xf32> to vector<2x16xf32>
    %178 = arith.addf %176, %177 : vector<2x16xf32>
    %179 = arith.negf %178 : vector<2x16xf32>
    %180 = math.exp %179 : vector<2x16xf32>
    %cst_65 = arith.constant 1.000000e+00 : f32
    %181 = vector.broadcast %cst_65 : f32 to vector<2x16xf32>
    %182 = arith.addf %181, %180 : vector<2x16xf32>
    %183 = arith.divf %181, %182 : vector<2x16xf32>
    %184 = vector.extract_strided_slice %163 {offsets = [0, 32], sizes = [2, 16], strides = [1, 1]} : vector<2x48xf32> to vector<2x16xf32>
    %185 = vector.extract_strided_slice %167 {offsets = [0, 32], sizes = [2, 16], strides = [1, 1]} : vector<2x48xf32> to vector<2x16xf32>
    %186 = arith.mulf %175, %185 : vector<2x16xf32>
    %187 = arith.addf %184, %186 : vector<2x16xf32>
    %188 = math.tanh %187 : vector<2x16xf32>
    %cst_66 = arith.constant 1.000000e+00 : f32
    %189 = vector.broadcast %cst_66 : f32 to vector<2x16xf32>
    %190 = arith.subf %189, %183 : vector<2x16xf32>
    %191 = arith.mulf %190, %188 : vector<2x16xf32>
    %192 = arith.mulf %183, %160 : vector<2x16xf32>
    %193 = arith.addf %191, %192 : vector<2x16xf32>
    %194 = vector.shape_cast %193 : vector<2x16xf32> to vector<2x1x16xf32>
    %195 = vector.extract_strided_slice %159 {offsets = [0, 5, 48], sizes = [2, 1, 48], strides = [1, 1, 1]} : vector<2x6x96xf32> to vector<2x1x48xf32>
    %196 = vector.shape_cast %195 : vector<2x1x48xf32> to vector<2x48xf32>
    %197 = arith.truncf %161 : vector<2x16xf32> to vector<2x16xbf16>
    %cst_67 = arith.constant dense<0.000000e+00> : vector<2x48xf32>
    %198 = tpu.matmul %197, %151, %cst_67 {dimension_numbers = #tpu.dot_dimension_numbers<[1], [0], [0], [1], [0, 0, 1, 1], [], []>} : vector<2x16xbf16>, vector<16x48xbf16>, vector<2x48xf32> -> vector<2x48xf32>
    %199 = vector.broadcast %152 : vector<1x48xf32> to vector<2x48xf32>
    %200 = arith.addf %198, %199 : vector<2x48xf32>
    %201 = vector.extract_strided_slice %196 {offsets = [0, 0], sizes = [2, 16], strides = [1, 1]} : vector<2x48xf32> to vector<2x16xf32>
    %202 = vector.extract_strided_slice %200 {offsets = [0, 0], sizes = [2, 16], strides = [1, 1]} : vector<2x48xf32> to vector<2x16xf32>
    %203 = arith.addf %201, %202 : vector<2x16xf32>
    %204 = arith.negf %203 : vector<2x16xf32>
    %205 = math.exp %204 : vector<2x16xf32>
    %cst_68 = arith.constant 1.000000e+00 : f32
    %206 = vector.broadcast %cst_68 : f32 to vector<2x16xf32>
    %207 = arith.addf %206, %205 : vector<2x16xf32>
    %208 = arith.divf %206, %207 : vector<2x16xf32>
    %209 = vector.extract_strided_slice %196 {offsets = [0, 16], sizes = [2, 16], strides = [1, 1]} : vector<2x48xf32> to vector<2x16xf32>
    %210 = vector.extract_strided_slice %200 {offsets = [0, 16], sizes = [2, 16], strides = [1, 1]} : vector<2x48xf32> to vector<2x16xf32>
    %211 = arith.addf %209, %210 : vector<2x16xf32>
    %212 = arith.negf %211 : vector<2x16xf32>
    %213 = math.exp %212 : vector<2x16xf32>
    %cst_69 = arith.constant 1.000000e+00 : f32
    %214 = vector.broadcast %cst_69 : f32 to vector<2x16xf32>
    %215 = arith.addf %214, %213 : vector<2x16xf32>
    %216 = arith.divf %214, %215 : vector<2x16xf32>
    %217 = vector.extract_strided_slice %196 {offsets = [0, 32], sizes = [2, 16], strides = [1, 1]} : vector<2x48xf32> to vector<2x16xf32>
    %218 = vector.extract_strided_slice %200 {offsets = [0, 32], sizes = [2, 16], strides = [1, 1]} : vector<2x48xf32> to vector<2x16xf32>
    %219 = arith.mulf %208, %218 : vector<2x16xf32>
    %220 = arith.addf %217, %219 : vector<2x16xf32>
    %221 = math.tanh %220 : vector<2x16xf32>
    %cst_70 = arith.constant 1.000000e+00 : f32
    %222 = vector.broadcast %cst_70 : f32 to vector<2x16xf32>
    %223 = arith.subf %222, %216 : vector<2x16xf32>
    %224 = arith.mulf %223, %221 : vector<2x16xf32>
    %225 = arith.mulf %216, %161 : vector<2x16xf32>
    %226 = arith.addf %224, %225 : vector<2x16xf32>
    %227 = vector.shape_cast %226 : vector<2x16xf32> to vector<2x1x16xf32>
    %228 = vector.extract_strided_slice %159 {offsets = [0, 1, 0], sizes = [2, 1, 48], strides = [1, 1, 1]} : vector<2x6x96xf32> to vector<2x1x48xf32>
    %229 = vector.shape_cast %228 : vector<2x1x48xf32> to vector<2x48xf32>
    %230 = arith.truncf %193 : vector<2x16xf32> to vector<2x16xbf16>
    %cst_71 = arith.constant dense<0.000000e+00> : vector<2x48xf32>
    %231 = tpu.matmul %230, %149, %cst_71 {dimension_numbers = #tpu.dot_dimension_numbers<[1], [0], [0], [1], [0, 0, 1, 1], [], []>} : vector<2x16xbf16>, vector<16x48xbf16>, vector<2x48xf32> -> vector<2x48xf32>
    %232 = vector.broadcast %150 : vector<1x48xf32> to vector<2x48xf32>
    %233 = arith.addf %231, %232 : vector<2x48xf32>
    %234 = vector.extract_strided_slice %229 {offsets = [0, 0], sizes = [2, 16], strides = [1, 1]} : vector<2x48xf32> to vector<2x16xf32>
    %235 = vector.extract_strided_slice %233 {offsets = [0, 0], sizes = [2, 16], strides = [1, 1]} : vector<2x48xf32> to vector<2x16xf32>
    %236 = arith.addf %234, %235 : vector<2x16xf32>
    %237 = arith.negf %236 : vector<2x16xf32>
    %238 = math.exp %237 : vector<2x16xf32>
    %cst_72 = arith.constant 1.000000e+00 : f32
    %239 = vector.broadcast %cst_72 : f32 to vector<2x16xf32>
    %240 = arith.addf %239, %238 : vector<2x16xf32>
    %241 = arith.divf %239, %240 : vector<2x16xf32>
    %242 = vector.extract_strided_slice %229 {offsets = [0, 16], sizes = [2, 16], strides = [1, 1]} : vector<2x48xf32> to vector<2x16xf32>
    %243 = vector.extract_strided_slice %233 {offsets = [0, 16], sizes = [2, 16], strides = [1, 1]} : vector<2x48xf32> to vector<2x16xf32>
    %244 = arith.addf %242, %243 : vector<2x16xf32>
    %245 = arith.negf %244 : vector<2x16xf32>
    %246 = math.exp %245 : vector<2x16xf32>
    %cst_73 = arith.constant 1.000000e+00 : f32
    %247 = vector.broadcast %cst_73 : f32 to vector<2x16xf32>
    %248 = arith.addf %247, %246 : vector<2x16xf32>
    %249 = arith.divf %247, %248 : vector<2x16xf32>
    %250 = vector.extract_strided_slice %229 {offsets = [0, 32], sizes = [2, 16], strides = [1, 1]} : vector<2x48xf32> to vector<2x16xf32>
    %251 = vector.extract_strided_slice %233 {offsets = [0, 32], sizes = [2, 16], strides = [1, 1]} : vector<2x48xf32> to vector<2x16xf32>
    %252 = arith.mulf %241, %251 : vector<2x16xf32>
    %253 = arith.addf %250, %252 : vector<2x16xf32>
    %254 = math.tanh %253 : vector<2x16xf32>
    %cst_74 = arith.constant 1.000000e+00 : f32
    %255 = vector.broadcast %cst_74 : f32 to vector<2x16xf32>
    %256 = arith.subf %255, %249 : vector<2x16xf32>
    %257 = arith.mulf %256, %254 : vector<2x16xf32>
    %258 = arith.mulf %249, %193 : vector<2x16xf32>
    %259 = arith.addf %257, %258 : vector<2x16xf32>
    %260 = vector.shape_cast %259 : vector<2x16xf32> to vector<2x1x16xf32>
    %261 = vector.extract_strided_slice %159 {offsets = [0, 4, 48], sizes = [2, 1, 48], strides = [1, 1, 1]} : vector<2x6x96xf32> to vector<2x1x48xf32>
    %262 = vector.shape_cast %261 : vector<2x1x48xf32> to vector<2x48xf32>
    %263 = arith.truncf %226 : vector<2x16xf32> to vector<2x16xbf16>
    %cst_75 = arith.constant dense<0.000000e+00> : vector<2x48xf32>
    %264 = tpu.matmul %263, %151, %cst_75 {dimension_numbers = #tpu.dot_dimension_numbers<[1], [0], [0], [1], [0, 0, 1, 1], [], []>} : vector<2x16xbf16>, vector<16x48xbf16>, vector<2x48xf32> -> vector<2x48xf32>
    %265 = vector.broadcast %152 : vector<1x48xf32> to vector<2x48xf32>
    %266 = arith.addf %264, %265 : vector<2x48xf32>
    %267 = vector.extract_strided_slice %262 {offsets = [0, 0], sizes = [2, 16], strides = [1, 1]} : vector<2x48xf32> to vector<2x16xf32>
    %268 = vector.extract_strided_slice %266 {offsets = [0, 0], sizes = [2, 16], strides = [1, 1]} : vector<2x48xf32> to vector<2x16xf32>
    %269 = arith.addf %267, %268 : vector<2x16xf32>
    %270 = arith.negf %269 : vector<2x16xf32>
    %271 = math.exp %270 : vector<2x16xf32>
    %cst_76 = arith.constant 1.000000e+00 : f32
    %272 = vector.broadcast %cst_76 : f32 to vector<2x16xf32>
    %273 = arith.addf %272, %271 : vector<2x16xf32>
    %274 = arith.divf %272, %273 : vector<2x16xf32>
    %275 = vector.extract_strided_slice %262 {offsets = [0, 16], sizes = [2, 16], strides = [1, 1]} : vector<2x48xf32> to vector<2x16xf32>
    %276 = vector.extract_strided_slice %266 {offsets = [0, 16], sizes = [2, 16], strides = [1, 1]} : vector<2x48xf32> to vector<2x16xf32>
    %277 = arith.addf %275, %276 : vector<2x16xf32>
    %278 = arith.negf %277 : vector<2x16xf32>
    %279 = math.exp %278 : vector<2x16xf32>
    %cst_77 = arith.constant 1.000000e+00 : f32
    %280 = vector.broadcast %cst_77 : f32 to vector<2x16xf32>
    %281 = arith.addf %280, %279 : vector<2x16xf32>
    %282 = arith.divf %280, %281 : vector<2x16xf32>
    %283 = vector.extract_strided_slice %262 {offsets = [0, 32], sizes = [2, 16], strides = [1, 1]} : vector<2x48xf32> to vector<2x16xf32>
    %284 = vector.extract_strided_slice %266 {offsets = [0, 32], sizes = [2, 16], strides = [1, 1]} : vector<2x48xf32> to vector<2x16xf32>
    %285 = arith.mulf %274, %284 : vector<2x16xf32>
    %286 = arith.addf %283, %285 : vector<2x16xf32>
    %287 = math.tanh %286 : vector<2x16xf32>
    %cst_78 = arith.constant 1.000000e+00 : f32
    %288 = vector.broadcast %cst_78 : f32 to vector<2x16xf32>
    %289 = arith.subf %288, %282 : vector<2x16xf32>
    %290 = arith.mulf %289, %287 : vector<2x16xf32>
    %291 = arith.mulf %282, %226 : vector<2x16xf32>
    %292 = arith.addf %290, %291 : vector<2x16xf32>
    %293 = vector.shape_cast %292 : vector<2x16xf32> to vector<2x1x16xf32>
    %294 = vector.extract_strided_slice %159 {offsets = [0, 2, 0], sizes = [2, 1, 48], strides = [1, 1, 1]} : vector<2x6x96xf32> to vector<2x1x48xf32>
    %295 = vector.shape_cast %294 : vector<2x1x48xf32> to vector<2x48xf32>
    %296 = arith.truncf %259 : vector<2x16xf32> to vector<2x16xbf16>
    %cst_79 = arith.constant dense<0.000000e+00> : vector<2x48xf32>
    %297 = tpu.matmul %296, %149, %cst_79 {dimension_numbers = #tpu.dot_dimension_numbers<[1], [0], [0], [1], [0, 0, 1, 1], [], []>} : vector<2x16xbf16>, vector<16x48xbf16>, vector<2x48xf32> -> vector<2x48xf32>
    %298 = vector.broadcast %150 : vector<1x48xf32> to vector<2x48xf32>
    %299 = arith.addf %297, %298 : vector<2x48xf32>
    %300 = vector.extract_strided_slice %295 {offsets = [0, 0], sizes = [2, 16], strides = [1, 1]} : vector<2x48xf32> to vector<2x16xf32>
    %301 = vector.extract_strided_slice %299 {offsets = [0, 0], sizes = [2, 16], strides = [1, 1]} : vector<2x48xf32> to vector<2x16xf32>
    %302 = arith.addf %300, %301 : vector<2x16xf32>
    %303 = arith.negf %302 : vector<2x16xf32>
    %304 = math.exp %303 : vector<2x16xf32>
    %cst_80 = arith.constant 1.000000e+00 : f32
    %305 = vector.broadcast %cst_80 : f32 to vector<2x16xf32>
    %306 = arith.addf %305, %304 : vector<2x16xf32>
    %307 = arith.divf %305, %306 : vector<2x16xf32>
    %308 = vector.extract_strided_slice %295 {offsets = [0, 16], sizes = [2, 16], strides = [1, 1]} : vector<2x48xf32> to vector<2x16xf32>
    %309 = vector.extract_strided_slice %299 {offsets = [0, 16], sizes = [2, 16], strides = [1, 1]} : vector<2x48xf32> to vector<2x16xf32>
    %310 = arith.addf %308, %309 : vector<2x16xf32>
    %311 = arith.negf %310 : vector<2x16xf32>
    %312 = math.exp %311 : vector<2x16xf32>
    %cst_81 = arith.constant 1.000000e+00 : f32
    %313 = vector.broadcast %cst_81 : f32 to vector<2x16xf32>
    %314 = arith.addf %313, %312 : vector<2x16xf32>
    %315 = arith.divf %313, %314 : vector<2x16xf32>
    %316 = vector.extract_strided_slice %295 {offsets = [0, 32], sizes = [2, 16], strides = [1, 1]} : vector<2x48xf32> to vector<2x16xf32>
    %317 = vector.extract_strided_slice %299 {offsets = [0, 32], sizes = [2, 16], strides = [1, 1]} : vector<2x48xf32> to vector<2x16xf32>
    %318 = arith.mulf %307, %317 : vector<2x16xf32>
    %319 = arith.addf %316, %318 : vector<2x16xf32>
    %320 = math.tanh %319 : vector<2x16xf32>
    %cst_82 = arith.constant 1.000000e+00 : f32
    %321 = vector.broadcast %cst_82 : f32 to vector<2x16xf32>
    %322 = arith.subf %321, %315 : vector<2x16xf32>
    %323 = arith.mulf %322, %320 : vector<2x16xf32>
    %324 = arith.mulf %315, %259 : vector<2x16xf32>
    %325 = arith.addf %323, %324 : vector<2x16xf32>
    %326 = vector.shape_cast %325 : vector<2x16xf32> to vector<2x1x16xf32>
    %327 = vector.extract_strided_slice %159 {offsets = [0, 3, 48], sizes = [2, 1, 48], strides = [1, 1, 1]} : vector<2x6x96xf32> to vector<2x1x48xf32>
    %328 = vector.shape_cast %327 : vector<2x1x48xf32> to vector<2x48xf32>
    %329 = arith.truncf %292 : vector<2x16xf32> to vector<2x16xbf16>
    %cst_83 = arith.constant dense<0.000000e+00> : vector<2x48xf32>
    %330 = tpu.matmul %329, %151, %cst_83 {dimension_numbers = #tpu.dot_dimension_numbers<[1], [0], [0], [1], [0, 0, 1, 1], [], []>} : vector<2x16xbf16>, vector<16x48xbf16>, vector<2x48xf32> -> vector<2x48xf32>
    %331 = vector.broadcast %152 : vector<1x48xf32> to vector<2x48xf32>
    %332 = arith.addf %330, %331 : vector<2x48xf32>
    %333 = vector.extract_strided_slice %328 {offsets = [0, 0], sizes = [2, 16], strides = [1, 1]} : vector<2x48xf32> to vector<2x16xf32>
    %334 = vector.extract_strided_slice %332 {offsets = [0, 0], sizes = [2, 16], strides = [1, 1]} : vector<2x48xf32> to vector<2x16xf32>
    %335 = arith.addf %333, %334 : vector<2x16xf32>
    %336 = arith.negf %335 : vector<2x16xf32>
    %337 = math.exp %336 : vector<2x16xf32>
    %cst_84 = arith.constant 1.000000e+00 : f32
    %338 = vector.broadcast %cst_84 : f32 to vector<2x16xf32>
    %339 = arith.addf %338, %337 : vector<2x16xf32>
    %340 = arith.divf %338, %339 : vector<2x16xf32>
    %341 = vector.extract_strided_slice %328 {offsets = [0, 16], sizes = [2, 16], strides = [1, 1]} : vector<2x48xf32> to vector<2x16xf32>
    %342 = vector.extract_strided_slice %332 {offsets = [0, 16], sizes = [2, 16], strides = [1, 1]} : vector<2x48xf32> to vector<2x16xf32>
    %343 = arith.addf %341, %342 : vector<2x16xf32>
    %344 = arith.negf %343 : vector<2x16xf32>
    %345 = math.exp %344 : vector<2x16xf32>
    %cst_85 = arith.constant 1.000000e+00 : f32
    %346 = vector.broadcast %cst_85 : f32 to vector<2x16xf32>
    %347 = arith.addf %346, %345 : vector<2x16xf32>
    %348 = arith.divf %346, %347 : vector<2x16xf32>
    %349 = vector.extract_strided_slice %328 {offsets = [0, 32], sizes = [2, 16], strides = [1, 1]} : vector<2x48xf32> to vector<2x16xf32>
    %350 = vector.extract_strided_slice %332 {offsets = [0, 32], sizes = [2, 16], strides = [1, 1]} : vector<2x48xf32> to vector<2x16xf32>
    %351 = arith.mulf %340, %350 : vector<2x16xf32>
    %352 = arith.addf %349, %351 : vector<2x16xf32>
    %353 = math.tanh %352 : vector<2x16xf32>
    %cst_86 = arith.constant 1.000000e+00 : f32
    %354 = vector.broadcast %cst_86 : f32 to vector<2x16xf32>
    %355 = arith.subf %354, %348 : vector<2x16xf32>
    %356 = arith.mulf %355, %353 : vector<2x16xf32>
    %357 = arith.mulf %348, %292 : vector<2x16xf32>
    %358 = arith.addf %356, %357 : vector<2x16xf32>
    %359 = vector.shape_cast %358 : vector<2x16xf32> to vector<2x1x16xf32>
    %360 = vector.extract_strided_slice %159 {offsets = [0, 3, 0], sizes = [2, 1, 48], strides = [1, 1, 1]} : vector<2x6x96xf32> to vector<2x1x48xf32>
    %361 = vector.shape_cast %360 : vector<2x1x48xf32> to vector<2x48xf32>
    %362 = arith.truncf %325 : vector<2x16xf32> to vector<2x16xbf16>
    %cst_87 = arith.constant dense<0.000000e+00> : vector<2x48xf32>
    %363 = tpu.matmul %362, %149, %cst_87 {dimension_numbers = #tpu.dot_dimension_numbers<[1], [0], [0], [1], [0, 0, 1, 1], [], []>} : vector<2x16xbf16>, vector<16x48xbf16>, vector<2x48xf32> -> vector<2x48xf32>
    %364 = vector.broadcast %150 : vector<1x48xf32> to vector<2x48xf32>
    %365 = arith.addf %363, %364 : vector<2x48xf32>
    %366 = vector.extract_strided_slice %361 {offsets = [0, 0], sizes = [2, 16], strides = [1, 1]} : vector<2x48xf32> to vector<2x16xf32>
    %367 = vector.extract_strided_slice %365 {offsets = [0, 0], sizes = [2, 16], strides = [1, 1]} : vector<2x48xf32> to vector<2x16xf32>
    %368 = arith.addf %366, %367 : vector<2x16xf32>
    %369 = arith.negf %368 : vector<2x16xf32>
    %370 = math.exp %369 : vector<2x16xf32>
    %cst_88 = arith.constant 1.000000e+00 : f32
    %371 = vector.broadcast %cst_88 : f32 to vector<2x16xf32>
    %372 = arith.addf %371, %370 : vector<2x16xf32>
    %373 = arith.divf %371, %372 : vector<2x16xf32>
    %374 = vector.extract_strided_slice %361 {offsets = [0, 16], sizes = [2, 16], strides = [1, 1]} : vector<2x48xf32> to vector<2x16xf32>
    %375 = vector.extract_strided_slice %365 {offsets = [0, 16], sizes = [2, 16], strides = [1, 1]} : vector<2x48xf32> to vector<2x16xf32>
    %376 = arith.addf %374, %375 : vector<2x16xf32>
    %377 = arith.negf %376 : vector<2x16xf32>
    %378 = math.exp %377 : vector<2x16xf32>
    %cst_89 = arith.constant 1.000000e+00 : f32
    %379 = vector.broadcast %cst_89 : f32 to vector<2x16xf32>
    %380 = arith.addf %379, %378 : vector<2x16xf32>
    %381 = arith.divf %379, %380 : vector<2x16xf32>
    %382 = vector.extract_strided_slice %361 {offsets = [0, 32], sizes = [2, 16], strides = [1, 1]} : vector<2x48xf32> to vector<2x16xf32>
    %383 = vector.extract_strided_slice %365 {offsets = [0, 32], sizes = [2, 16], strides = [1, 1]} : vector<2x48xf32> to vector<2x16xf32>
    %384 = arith.mulf %373, %383 : vector<2x16xf32>
    %385 = arith.addf %382, %384 : vector<2x16xf32>
    %386 = math.tanh %385 : vector<2x16xf32>
    %cst_90 = arith.constant 1.000000e+00 : f32
    %387 = vector.broadcast %cst_90 : f32 to vector<2x16xf32>
    %388 = arith.subf %387, %381 : vector<2x16xf32>
    %389 = arith.mulf %388, %386 : vector<2x16xf32>
    %390 = arith.mulf %381, %325 : vector<2x16xf32>
    %391 = arith.addf %389, %390 : vector<2x16xf32>
    %392 = vector.shape_cast %391 : vector<2x16xf32> to vector<2x1x16xf32>
    %393 = vector.extract_strided_slice %159 {offsets = [0, 2, 48], sizes = [2, 1, 48], strides = [1, 1, 1]} : vector<2x6x96xf32> to vector<2x1x48xf32>
    %394 = vector.shape_cast %393 : vector<2x1x48xf32> to vector<2x48xf32>
    %395 = arith.truncf %358 : vector<2x16xf32> to vector<2x16xbf16>
    %cst_91 = arith.constant dense<0.000000e+00> : vector<2x48xf32>
    %396 = tpu.matmul %395, %151, %cst_91 {dimension_numbers = #tpu.dot_dimension_numbers<[1], [0], [0], [1], [0, 0, 1, 1], [], []>} : vector<2x16xbf16>, vector<16x48xbf16>, vector<2x48xf32> -> vector<2x48xf32>
    %397 = vector.broadcast %152 : vector<1x48xf32> to vector<2x48xf32>
    %398 = arith.addf %396, %397 : vector<2x48xf32>
    %399 = vector.extract_strided_slice %394 {offsets = [0, 0], sizes = [2, 16], strides = [1, 1]} : vector<2x48xf32> to vector<2x16xf32>
    %400 = vector.extract_strided_slice %398 {offsets = [0, 0], sizes = [2, 16], strides = [1, 1]} : vector<2x48xf32> to vector<2x16xf32>
    %401 = arith.addf %399, %400 : vector<2x16xf32>
    %402 = arith.negf %401 : vector<2x16xf32>
    %403 = math.exp %402 : vector<2x16xf32>
    %cst_92 = arith.constant 1.000000e+00 : f32
    %404 = vector.broadcast %cst_92 : f32 to vector<2x16xf32>
    %405 = arith.addf %404, %403 : vector<2x16xf32>
    %406 = arith.divf %404, %405 : vector<2x16xf32>
    %407 = vector.extract_strided_slice %394 {offsets = [0, 16], sizes = [2, 16], strides = [1, 1]} : vector<2x48xf32> to vector<2x16xf32>
    %408 = vector.extract_strided_slice %398 {offsets = [0, 16], sizes = [2, 16], strides = [1, 1]} : vector<2x48xf32> to vector<2x16xf32>
    %409 = arith.addf %407, %408 : vector<2x16xf32>
    %410 = arith.negf %409 : vector<2x16xf32>
    %411 = math.exp %410 : vector<2x16xf32>
    %cst_93 = arith.constant 1.000000e+00 : f32
    %412 = vector.broadcast %cst_93 : f32 to vector<2x16xf32>
    %413 = arith.addf %412, %411 : vector<2x16xf32>
    %414 = arith.divf %412, %413 : vector<2x16xf32>
    %415 = vector.extract_strided_slice %394 {offsets = [0, 32], sizes = [2, 16], strides = [1, 1]} : vector<2x48xf32> to vector<2x16xf32>
    %416 = vector.extract_strided_slice %398 {offsets = [0, 32], sizes = [2, 16], strides = [1, 1]} : vector<2x48xf32> to vector<2x16xf32>
    %417 = arith.mulf %406, %416 : vector<2x16xf32>
    %418 = arith.addf %415, %417 : vector<2x16xf32>
    %419 = math.tanh %418 : vector<2x16xf32>
    %cst_94 = arith.constant 1.000000e+00 : f32
    %420 = vector.broadcast %cst_94 : f32 to vector<2x16xf32>
    %421 = arith.subf %420, %414 : vector<2x16xf32>
    %422 = arith.mulf %421, %419 : vector<2x16xf32>
    %423 = arith.mulf %414, %358 : vector<2x16xf32>
    %424 = arith.addf %422, %423 : vector<2x16xf32>
    %425 = vector.shape_cast %424 : vector<2x16xf32> to vector<2x1x16xf32>
    %426 = vector.extract_strided_slice %159 {offsets = [0, 4, 0], sizes = [2, 1, 48], strides = [1, 1, 1]} : vector<2x6x96xf32> to vector<2x1x48xf32>
    %427 = vector.shape_cast %426 : vector<2x1x48xf32> to vector<2x48xf32>
    %428 = arith.truncf %391 : vector<2x16xf32> to vector<2x16xbf16>
    %cst_95 = arith.constant dense<0.000000e+00> : vector<2x48xf32>
    %429 = tpu.matmul %428, %149, %cst_95 {dimension_numbers = #tpu.dot_dimension_numbers<[1], [0], [0], [1], [0, 0, 1, 1], [], []>} : vector<2x16xbf16>, vector<16x48xbf16>, vector<2x48xf32> -> vector<2x48xf32>
    %430 = vector.broadcast %150 : vector<1x48xf32> to vector<2x48xf32>
    %431 = arith.addf %429, %430 : vector<2x48xf32>
    %432 = vector.extract_strided_slice %427 {offsets = [0, 0], sizes = [2, 16], strides = [1, 1]} : vector<2x48xf32> to vector<2x16xf32>
    %433 = vector.extract_strided_slice %431 {offsets = [0, 0], sizes = [2, 16], strides = [1, 1]} : vector<2x48xf32> to vector<2x16xf32>
    %434 = arith.addf %432, %433 : vector<2x16xf32>
    %435 = arith.negf %434 : vector<2x16xf32>
    %436 = math.exp %435 : vector<2x16xf32>
    %cst_96 = arith.constant 1.000000e+00 : f32
    %437 = vector.broadcast %cst_96 : f32 to vector<2x16xf32>
    %438 = arith.addf %437, %436 : vector<2x16xf32>
    %439 = arith.divf %437, %438 : vector<2x16xf32>
    %440 = vector.extract_strided_slice %427 {offsets = [0, 16], sizes = [2, 16], strides = [1, 1]} : vector<2x48xf32> to vector<2x16xf32>
    %441 = vector.extract_strided_slice %431 {offsets = [0, 16], sizes = [2, 16], strides = [1, 1]} : vector<2x48xf32> to vector<2x16xf32>
    %442 = arith.addf %440, %441 : vector<2x16xf32>
    %443 = arith.negf %442 : vector<2x16xf32>
    %444 = math.exp %443 : vector<2x16xf32>
    %cst_97 = arith.constant 1.000000e+00 : f32
    %445 = vector.broadcast %cst_97 : f32 to vector<2x16xf32>
    %446 = arith.addf %445, %444 : vector<2x16xf32>
    %447 = arith.divf %445, %446 : vector<2x16xf32>
    %448 = vector.extract_strided_slice %427 {offsets = [0, 32], sizes = [2, 16], strides = [1, 1]} : vector<2x48xf32> to vector<2x16xf32>
    %449 = vector.extract_strided_slice %431 {offsets = [0, 32], sizes = [2, 16], strides = [1, 1]} : vector<2x48xf32> to vector<2x16xf32>
    %450 = arith.mulf %439, %449 : vector<2x16xf32>
    %451 = arith.addf %448, %450 : vector<2x16xf32>
    %452 = math.tanh %451 : vector<2x16xf32>
    %cst_98 = arith.constant 1.000000e+00 : f32
    %453 = vector.broadcast %cst_98 : f32 to vector<2x16xf32>
    %454 = arith.subf %453, %447 : vector<2x16xf32>
    %455 = arith.mulf %454, %452 : vector<2x16xf32>
    %456 = arith.mulf %447, %391 : vector<2x16xf32>
    %457 = arith.addf %455, %456 : vector<2x16xf32>
    %458 = vector.shape_cast %457 : vector<2x16xf32> to vector<2x1x16xf32>
    %459 = vector.extract_strided_slice %159 {offsets = [0, 1, 48], sizes = [2, 1, 48], strides = [1, 1, 1]} : vector<2x6x96xf32> to vector<2x1x48xf32>
    %460 = vector.shape_cast %459 : vector<2x1x48xf32> to vector<2x48xf32>
    %461 = arith.truncf %424 : vector<2x16xf32> to vector<2x16xbf16>
    %cst_99 = arith.constant dense<0.000000e+00> : vector<2x48xf32>
    %462 = tpu.matmul %461, %151, %cst_99 {dimension_numbers = #tpu.dot_dimension_numbers<[1], [0], [0], [1], [0, 0, 1, 1], [], []>} : vector<2x16xbf16>, vector<16x48xbf16>, vector<2x48xf32> -> vector<2x48xf32>
    %463 = vector.broadcast %152 : vector<1x48xf32> to vector<2x48xf32>
    %464 = arith.addf %462, %463 : vector<2x48xf32>
    %465 = vector.extract_strided_slice %460 {offsets = [0, 0], sizes = [2, 16], strides = [1, 1]} : vector<2x48xf32> to vector<2x16xf32>
    %466 = vector.extract_strided_slice %464 {offsets = [0, 0], sizes = [2, 16], strides = [1, 1]} : vector<2x48xf32> to vector<2x16xf32>
    %467 = arith.addf %465, %466 : vector<2x16xf32>
    %468 = arith.negf %467 : vector<2x16xf32>
    %469 = math.exp %468 : vector<2x16xf32>
    %cst_100 = arith.constant 1.000000e+00 : f32
    %470 = vector.broadcast %cst_100 : f32 to vector<2x16xf32>
    %471 = arith.addf %470, %469 : vector<2x16xf32>
    %472 = arith.divf %470, %471 : vector<2x16xf32>
    %473 = vector.extract_strided_slice %460 {offsets = [0, 16], sizes = [2, 16], strides = [1, 1]} : vector<2x48xf32> to vector<2x16xf32>
    %474 = vector.extract_strided_slice %464 {offsets = [0, 16], sizes = [2, 16], strides = [1, 1]} : vector<2x48xf32> to vector<2x16xf32>
    %475 = arith.addf %473, %474 : vector<2x16xf32>
    %476 = arith.negf %475 : vector<2x16xf32>
    %477 = math.exp %476 : vector<2x16xf32>
    %cst_101 = arith.constant 1.000000e+00 : f32
    %478 = vector.broadcast %cst_101 : f32 to vector<2x16xf32>
    %479 = arith.addf %478, %477 : vector<2x16xf32>
    %480 = arith.divf %478, %479 : vector<2x16xf32>
    %481 = vector.extract_strided_slice %460 {offsets = [0, 32], sizes = [2, 16], strides = [1, 1]} : vector<2x48xf32> to vector<2x16xf32>
    %482 = vector.extract_strided_slice %464 {offsets = [0, 32], sizes = [2, 16], strides = [1, 1]} : vector<2x48xf32> to vector<2x16xf32>
    %483 = arith.mulf %472, %482 : vector<2x16xf32>
    %484 = arith.addf %481, %483 : vector<2x16xf32>
    %485 = math.tanh %484 : vector<2x16xf32>
    %cst_102 = arith.constant 1.000000e+00 : f32
    %486 = vector.broadcast %cst_102 : f32 to vector<2x16xf32>
    %487 = arith.subf %486, %480 : vector<2x16xf32>
    %488 = arith.mulf %487, %485 : vector<2x16xf32>
    %489 = arith.mulf %480, %424 : vector<2x16xf32>
    %490 = arith.addf %488, %489 : vector<2x16xf32>
    %491 = vector.shape_cast %490 : vector<2x16xf32> to vector<2x1x16xf32>
    %492 = vector.extract_strided_slice %159 {offsets = [0, 5, 0], sizes = [2, 1, 48], strides = [1, 1, 1]} : vector<2x6x96xf32> to vector<2x1x48xf32>
    %493 = vector.shape_cast %492 : vector<2x1x48xf32> to vector<2x48xf32>
    %494 = arith.truncf %457 : vector<2x16xf32> to vector<2x16xbf16>
    %cst_103 = arith.constant dense<0.000000e+00> : vector<2x48xf32>
    %495 = tpu.matmul %494, %149, %cst_103 {dimension_numbers = #tpu.dot_dimension_numbers<[1], [0], [0], [1], [0, 0, 1, 1], [], []>} : vector<2x16xbf16>, vector<16x48xbf16>, vector<2x48xf32> -> vector<2x48xf32>
    %496 = vector.broadcast %150 : vector<1x48xf32> to vector<2x48xf32>
    %497 = arith.addf %495, %496 : vector<2x48xf32>
    %498 = vector.extract_strided_slice %493 {offsets = [0, 0], sizes = [2, 16], strides = [1, 1]} : vector<2x48xf32> to vector<2x16xf32>
    %499 = vector.extract_strided_slice %497 {offsets = [0, 0], sizes = [2, 16], strides = [1, 1]} : vector<2x48xf32> to vector<2x16xf32>
    %500 = arith.addf %498, %499 : vector<2x16xf32>
    %501 = arith.negf %500 : vector<2x16xf32>
    %502 = math.exp %501 : vector<2x16xf32>
    %cst_104 = arith.constant 1.000000e+00 : f32
    %503 = vector.broadcast %cst_104 : f32 to vector<2x16xf32>
    %504 = arith.addf %503, %502 : vector<2x16xf32>
    %505 = arith.divf %503, %504 : vector<2x16xf32>
    %506 = vector.extract_strided_slice %493 {offsets = [0, 16], sizes = [2, 16], strides = [1, 1]} : vector<2x48xf32> to vector<2x16xf32>
    %507 = vector.extract_strided_slice %497 {offsets = [0, 16], sizes = [2, 16], strides = [1, 1]} : vector<2x48xf32> to vector<2x16xf32>
    %508 = arith.addf %506, %507 : vector<2x16xf32>
    %509 = arith.negf %508 : vector<2x16xf32>
    %510 = math.exp %509 : vector<2x16xf32>
    %cst_105 = arith.constant 1.000000e+00 : f32
    %511 = vector.broadcast %cst_105 : f32 to vector<2x16xf32>
    %512 = arith.addf %511, %510 : vector<2x16xf32>
    %513 = arith.divf %511, %512 : vector<2x16xf32>
    %514 = vector.extract_strided_slice %493 {offsets = [0, 32], sizes = [2, 16], strides = [1, 1]} : vector<2x48xf32> to vector<2x16xf32>
    %515 = vector.extract_strided_slice %497 {offsets = [0, 32], sizes = [2, 16], strides = [1, 1]} : vector<2x48xf32> to vector<2x16xf32>
    %516 = arith.mulf %505, %515 : vector<2x16xf32>
    %517 = arith.addf %514, %516 : vector<2x16xf32>
    %518 = math.tanh %517 : vector<2x16xf32>
    %cst_106 = arith.constant 1.000000e+00 : f32
    %519 = vector.broadcast %cst_106 : f32 to vector<2x16xf32>
    %520 = arith.subf %519, %513 : vector<2x16xf32>
    %521 = arith.mulf %520, %518 : vector<2x16xf32>
    %522 = arith.mulf %513, %457 : vector<2x16xf32>
    %523 = arith.addf %521, %522 : vector<2x16xf32>
    %524 = vector.shape_cast %523 : vector<2x16xf32> to vector<2x1x16xf32>
    %525 = vector.extract_strided_slice %159 {offsets = [0, 0, 48], sizes = [2, 1, 48], strides = [1, 1, 1]} : vector<2x6x96xf32> to vector<2x1x48xf32>
    %526 = vector.shape_cast %525 : vector<2x1x48xf32> to vector<2x48xf32>
    %527 = arith.truncf %490 : vector<2x16xf32> to vector<2x16xbf16>
    %cst_107 = arith.constant dense<0.000000e+00> : vector<2x48xf32>
    %528 = tpu.matmul %527, %151, %cst_107 {dimension_numbers = #tpu.dot_dimension_numbers<[1], [0], [0], [1], [0, 0, 1, 1], [], []>} : vector<2x16xbf16>, vector<16x48xbf16>, vector<2x48xf32> -> vector<2x48xf32>
    %529 = vector.broadcast %152 : vector<1x48xf32> to vector<2x48xf32>
    %530 = arith.addf %528, %529 : vector<2x48xf32>
    %531 = vector.extract_strided_slice %526 {offsets = [0, 0], sizes = [2, 16], strides = [1, 1]} : vector<2x48xf32> to vector<2x16xf32>
    %532 = vector.extract_strided_slice %530 {offsets = [0, 0], sizes = [2, 16], strides = [1, 1]} : vector<2x48xf32> to vector<2x16xf32>
    %533 = arith.addf %531, %532 : vector<2x16xf32>
    %534 = arith.negf %533 : vector<2x16xf32>
    %535 = math.exp %534 : vector<2x16xf32>
    %cst_108 = arith.constant 1.000000e+00 : f32
    %536 = vector.broadcast %cst_108 : f32 to vector<2x16xf32>
    %537 = arith.addf %536, %535 : vector<2x16xf32>
    %538 = arith.divf %536, %537 : vector<2x16xf32>
    %539 = vector.extract_strided_slice %526 {offsets = [0, 16], sizes = [2, 16], strides = [1, 1]} : vector<2x48xf32> to vector<2x16xf32>
    %540 = vector.extract_strided_slice %530 {offsets = [0, 16], sizes = [2, 16], strides = [1, 1]} : vector<2x48xf32> to vector<2x16xf32>
    %541 = arith.addf %539, %540 : vector<2x16xf32>
    %542 = arith.negf %541 : vector<2x16xf32>
    %543 = math.exp %542 : vector<2x16xf32>
    %cst_109 = arith.constant 1.000000e+00 : f32
    %544 = vector.broadcast %cst_109 : f32 to vector<2x16xf32>
    %545 = arith.addf %544, %543 : vector<2x16xf32>
    %546 = arith.divf %544, %545 : vector<2x16xf32>
    %547 = vector.extract_strided_slice %526 {offsets = [0, 32], sizes = [2, 16], strides = [1, 1]} : vector<2x48xf32> to vector<2x16xf32>
    %548 = vector.extract_strided_slice %530 {offsets = [0, 32], sizes = [2, 16], strides = [1, 1]} : vector<2x48xf32> to vector<2x16xf32>
    %549 = arith.mulf %538, %548 : vector<2x16xf32>
    %550 = arith.addf %547, %549 : vector<2x16xf32>
    %551 = math.tanh %550 : vector<2x16xf32>
    %cst_110 = arith.constant 1.000000e+00 : f32
    %552 = vector.broadcast %cst_110 : f32 to vector<2x16xf32>
    %553 = arith.subf %552, %546 : vector<2x16xf32>
    %554 = arith.mulf %553, %551 : vector<2x16xf32>
    %555 = arith.mulf %546, %490 : vector<2x16xf32>
    %556 = arith.addf %554, %555 : vector<2x16xf32>
    %557 = vector.shape_cast %556 : vector<2x16xf32> to vector<2x1x16xf32>
    %558 = tpu.concatenate %194, %260, %326, %392, %458, %524 in 1 : vector<2x1x16xf32>, vector<2x1x16xf32>, vector<2x1x16xf32>, vector<2x1x16xf32>, vector<2x1x16xf32>, vector<2x1x16xf32> -> vector<2x6x16xf32>
    %559 = tpu.concatenate %557, %491, %425, %359, %293, %227 in 1 : vector<2x1x16xf32>, vector<2x1x16xf32>, vector<2x1x16xf32>, vector<2x1x16xf32>, vector<2x1x16xf32>, vector<2x1x16xf32> -> vector<2x6x16xf32>
    %560 = tpu.concatenate %558, %559 in 2 : vector<2x6x16xf32>, vector<2x6x16xf32> -> vector<2x6x32xf32>
    %c0_111 = arith.constant 0 : index
    %c0_112 = arith.constant 0 : index
    %561 = vector.load %arg15[%c0_111, %c0_112] : memref<32x8xbf16, #tpu.memory_space<vmem>>, vector<32x8xbf16>
    %562 = arith.truncf %560 : vector<2x6x32xf32> to vector<2x6x32xbf16>
    "tpu.trace_start"() <{level = 10 : i32, message = "btc,cd->btd"}> : () -> ()
    %cst_113 = arith.constant dense<0.000000e+00> : vector<2x6x8xf32>
    %563 = tpu.matmul %562, %561, %cst_113 {dimension_numbers = #tpu.dot_dimension_numbers<[2], [0], [0, 1], [1], [0, 0, 0, 1, 1, 1], [], []>} : vector<2x6x32xbf16>, vector<32x8xbf16>, vector<2x6x8xf32> -> vector<2x6x8xf32>
    "tpu.trace_stop"() : () -> ()
    %c0_114 = arith.constant 0 : index
    %c0_115 = arith.constant 0 : index
    %564 = vector.load %arg16[%c0_114, %c0_115] : memref<1x8xf32, #tpu.memory_space<vmem>>, vector<1x8xf32>
    %565 = vector.shape_cast %564 : vector<1x8xf32> to vector<1x1x8xf32>
    %566 = vector.broadcast %565 : vector<1x1x8xf32> to vector<2x6x8xf32>
    %567 = arith.addf %563, %566 : vector<2x6x8xf32>
    %c0_116 = arith.constant 0 : index
    %c0_117 = arith.constant 0 : index
    %c0_118 = arith.constant 0 : index
    %568 = vector.load %arg17[%c0_116, %c0_117, %c0_118] : memref<2x6x8xf32, #tpu.memory_space<vmem>>, vector<2x6x8xf32>
    tpu.vector_store %arg17[%c0_116, %c0_117, %c0_118], %567 {strides = array<i32>} : memref<2x6x8xf32, #tpu.memory_space<vmem>>, vector<2x6x8xf32>,
    return
  }
}

</mosaic_0001>

<bundles_post_ra>
// kernel: run.4
= control target key start
LH: loop header
LB: loop body
LE: loop exit
PB: predicated region body
PF: predicated region fallthrough
CT: control target
= control target key end

     0   :  { %v3416_v0 = vmov 0.0   ;;  %vm3417_vm0 = vmmov 0   ;;  %vm144_vm1 = vcmask 261120   ;;  %vm265_vm2 = vcmask 130048   ;;  %s3418_s22 = smov 64   ;;  %s3419_s25 = smov 96   ;;  %s4259_s1 = inlined_call_operand.vmem [shape: bf16[32,32], index: 1, kind: input, shape index: {}]   ;;  %s4260_s17 = inlined_call_operand.vmem [shape: f32[2,32], index: 17, kind: input, shape index: {}, may-alias: {17,18}]   ;;  %s4261_s3 = inlined_call_operand.vmem [shape: bf16[32,16], index: 3, kind: input, shape index: {}]   ;;  %s4262_s6 = inlined_call_operand.vmem [shape: bf16[32,96], index: 6, kind: input, shape index: {}]   ;;  %s4263_s5 = inlined_call_operand.vmem [shape: bf16[16,96], index: 5, kind: input, shape index: {}]   ;;  %s4264_s2 = inlined_call_operand.vmem [shape: f32[1,32], index: 2, kind: input, shape index: {}]   ;;  %s4265_s18 = inlined_call_operand.vmem [shape: f32[2,32], index: 18, kind: input, shape index: {}, may-alias: {17,18}]   ;;  %s4266_s4 = inlined_call_operand.vmem [shape: f32[1,16], index: 4, kind: input, shape index: {}]   ;;  %s4267_s8 = inlined_call_operand.vmem [shape: f32[1,96], index: 8, kind: input, shape index: {}]   ;;  %s4268_s7 = inlined_call_operand.vmem [shape: f32[1,96], index: 7, kind: input, shape index: {}]   ;;  %s4269_s0 = inlined_call_operand.vmem [shape: bf16[2,8,32], index: 0, kind: input, shape index: {}]   ;;  %s4270_s9 = inlined_call_operand.vmem [shape: bf16[64,32], index: 9, kind: input, shape index: {}]   ;;  %s4271_s11 = inlined_call_operand.vmem [shape: bf16[2,32,96], index: 11, kind: input, shape index: {}]   ;;  %s4272_s12 = inlined_call_operand.vmem [shape: bf16[2,32,96], index: 12, kind: input, shape index: {}]   ;;  %s4273_s10 = inlined_call_operand.vmem [shape: f32[1,32], index: 10, kind: input, shape index: {}]   ;;  %s4274_s19 = inlined_call_operand.vmem [shape: f32[2,2,32], index: 19, kind: input, shape index: {}]   ;;  %s4275_s14 = inlined_call_operand.vmem [shape: f32[2,1,96], index: 14, kind: input, shape index: {}]   ;;  %s4276_s13 = inlined_call_operand.vmem [shape: f32[2,1,96], index: 13, kind: input, shape index: {}]   ;;  %s4277_s15 = inlined_call_operand.vmem [shape: bf16[32,16], index: 15, kind: input, shape index: {}]   ;;  %s4278_s16 = inlined_call_operand.vmem [shape: f32[1,16], index: 16, kind: input, shape index: {}]   ;;  %s4279_s20 = inlined_call_operand.vmem [shape: f32[2,3,16], index: 20, kind: output, shape index: {}]  }
   0x1   :  { %4284 = sst [smem:[#allocation2_spill]] %s4259_s1  ;;  %2963 = vmatprep.subr.bf16.mxu0 %v3416_v0  ;;  %2967 = vmatprep.mubr.msk.bf16.mxu0 %vm3417_vm0, %v3416_v0  ;;  %v3577_v8 = vld [vmem:[%s4264_s2] ss:$0 sm:$0xff]  ;;  %v3636_v51 = vld [vmem:[%s4269_s0 + $0x4] sm:$0xf]  ;;  %v406_v56 = vlaneseq  ;;  %vm525_vm3 = vcmask 57344  }
   0x2   :  { %4285 = sst [smem:[#allocation3_spill]] %s4260_s17  ;;  %s4289_s23 = sld [smem:[#allocation2_spill]]  ;;  %2971 = vmatprep.subr.bf16.mxu1 %v3416_v0  ;;  %2975 = vmatprep.mubr.msk.bf16.mxu1 %vm3417_vm0, %v3416_v0  ;;  %v121_v18 = vld [vmem:[%s4265_s18] sm:$0x3]  ;;  %v3644_v53 = vsel %vm144_vm1, %v3636_v51, 0  ;;  %vm554_vm4 = vcmask 1043456  }
   0x3   :  { %4286 = sst [smem:[#allocation4_spill]] %s4261_s3  ;;  %s4290_s26 = sld [smem:[#allocation3_spill]]  ;;  %v309_v19 = vpack.c.bf16 %v121_v18, %v121_v18  ;;  %v3606_v20 = vld [vmem:[%s4266_s4] ss:$0 sm:$0xff]  ;;  %v3421_v54 = vmov 1966171168  }
   0x4   :  { %4287 = sst [smem:[#allocation5_spill]] %s4262_s6  ;;  %v3612_v28 = vld [vmem:[%s4267_s8] ss:$0 sm:$0xff]  ;;  %v404_v55 = vunpack.c.l.s4 %v3421_v54  ;;  %v407_v60 = vshrl.u32 %v406_v56, 7  ;;  %vm550_vm5 = vcmask 64512   ;;  %vm649_vm6 = vcmask 1041409  }
   0x5   :  { %4288 = sst [smem:[#allocation6_spill]] %s4263_s5  ;;  %s4291_s5 = sld [smem:[#allocation4_spill]]  ;;  %v3622_v34 = vld [vmem:[%s4268_s7] ss:$0 sm:$0xff]  ;;  %vm686_vm7 = vcmask 523264   ;;  %vm2747_vm8 = vcmask 1040384  }
   0x6   :  { %s4292_s17 = sld [smem:[#allocation6_spill]]  ;;  %s4293_s6 = sld [smem:[#allocation5_spill]]  ;;  %v3631_v50 = vld [vmem:[%s4269_s0] sm:$0xf]  ;;  %v405_v59 = vunpack.c.0.s8 %v404_v55  ;;  %vm2750_vm9 = vcmask 1041408   ;;  %vm2753_vm10 = vcmask 124928  }
   0x7   :  { %v3640_v52 = vsel %vm144_vm1, %v3631_v50, 0 }
   0x8   :  { %v3531_v1 = vld [vmem:[%s4289_s23] sm:$0xff]   ;;  %v3542_v2 = vld [vmem:[%s4289_s23 + $0x8] sm:$0xff]  }
   0x9   :  { %2964 = vmatpush3.bf16.msra.mxu0 %v3531_v1  ;;  %v120_v3 = vld [vmem:[%s4290_s26] sm:$0x3]  ;;  %s3420_s26 = smov 32  }
   0xa   :  { %2965 = vmatprep.subr.bf16.mxu0 %v3416_v0  ;;  %v125_v4 = vpack.c.bf16 %v120_v3, %v120_v3  ;;  %v3650_v3 = vsub.s32 %v405_v59, %v407_v60  ;;  %v3711_v59 = vld [vmem:[%s4270_s9 + $0x10] sm:$0xff]  }
   0xb   :  { %v3556_v5 = vld [vmem:[%s4291_s5] sm:$0xff]   ;;  %v3563_v6 = vld [vmem:[%s4291_s5 + $0x8] sm:$0xff]  }
   0xc   :  { %2972 = vmatpush3.bf16.msra.mxu1 %v3556_v5  ;;  %v3570_v7 = vld [vmem:[%s4292_s17] sm:$0xff]   ;;  %v3590_v17 = vld [vmem:[%s4293_s6 + $0x8] sm:$0xff]  }
   0xd   :  { %2966 = vmatpush3.bf16.msra.mxu0 %v3542_v2  ;;  %2973 = vmatprep.subr.bf16.mxu1 %v3416_v0  ;;  %v3583_v15 = vld [vmem:[%s4293_s6] sm:$0xff]  }
   0xe   :  { %2979 = vmatprep.subr.bf16.mxu0 %v3416_v0 }
  0x10   :  { %2968 = vmatmul.mubr.msk.bf16.vlgmr.msra.gmra.mrb[0].mxu0 %vm144_vm1, %v125_v4  ;;  %2974 = vmatpush3.bf16.msra.mxu1 %v3563_v6 }
  0x11   :  { %2981 = vmatprep.mubr.msk.bf16.mxu0 %vm3417_vm0, %v3416_v0  ;;  %2985 = vmatprep.subr.bf16.mxu1 %v3416_v0 }
  0x12   :  { %2980 = vmatpush3.bf16.msra.mxu0 %v3570_v7 }
  0x13   :  { %2993 = vmatprep.subr.bf16.mxu0 %v3416_v0 }
  0xe3   :  { %v182_v9 = vpop.f32.mrb[0].mxu0 }
  0xe4   :  { %v183_v10 = vadd.f32 %v3577_v8, %v182_v9  ;;  %v2969_v11 = vpop.f32.mrb[1].mxu0 }
  0xe5   :  { %v185_v12 = vpop.f32.mrb[2].mxu0 }
  0xe6   :  { %v188_v13 = vmax.f32 %v183_v10, 0.0  ;;  %v2970_v14 = vpop.f32.mrb[3].mxu0  ;;  %v3661_v12 = vsub.s32 0, %v407_v60  ;;  %v3719_v60 = vld [vmem:[%s4270_s9 + $0x18] sm:$0xff]  }
  0xe8   :  { %v189_v16 = vpack.c.bf16 %v188_v13, %v188_v13 }
  0xea   :  { %2976 = vmatmul.mubr.msk.bf16.vlgmr.msra.gmra.mrb[0].mxu1 %vm144_vm1, %v189_v16 }
  0xeb   :  { %2986 = vmatpush3.bf16.msra.mxu1 %v3583_v15  ;;  %2989 = vmatprep.mubr.msk.bf16.mxu1 %vm3417_vm0, %v3416_v0 }
  0xec   :  { %2987 = vmatprep.subr.bf16.mxu1 %v3416_v0 }
  0xef   :  { %2988 = vmatpush3.bf16.msra.mxu1 %v3590_v17 }
  0xf0   :  { %2999 = vmatprep.subr.bf16.mxu1 %v3416_v0 }
  0xf2   :  { %2990 = vmatmul.mubr.msk.bf16.vlgmr.msra.gmra.mrb[4].mxu1 %vm144_vm1, %v309_v19 }
  0xf3   :  { %3001 = vmatprep.mubr.msk.bf16.mxu1 %vm3417_vm0, %v3416_v0 }
  0xf8   :  { %3000 = vmatpush3.bf16.xpose.msra.mxu1 %v3644_v53 }
  0xf9   :  { %3011 = vmatprep.subr.bf16.mxu1 %v3416_v0 }
 0x1bd   :  { %v245_v21 = vpop.f32.mrb[0].mxu1 }
 0x1be   :  { %v246_v22 = vadd.f32 %v3606_v20, %v245_v21  ;;  %v2977_v23 = vpop.f32.mrb[1].mxu1 }
 0x1bf   :  { %v248_v24 = vpop.f32.mrb[2].mxu1 }
 0x1c0   :  { %v251_v25 = vmax.f32 %v246_v22, 0.0  ;;  %v2978_v26 = vpop.f32.mrb[3].mxu1 }
 0x1c2   :  { %v252_v27 = vpack.c.bf16 %v251_v25, %v251_v25 }
 0x1c4   :  { %2982 = vmatmul.mubr.msk.bf16.vlgmr.msra.gmra.mrb[4].mxu0 %vm265_vm2, %v252_v27 }
 0x1c5   :  { %v365_v29 = vpop.f32.mrb[4].mxu1  ;;  %2995 = vmatprep.mubr.msk.bf16.mxu0 %vm3417_vm0, %v3416_v0  ;;  %2994 = vmatpush3.bf16.xpose.msra.mxu0 %v3640_v52 }
 0x1c6   :  { %v366_v30 = vadd.f32 %v3612_v28, %v365_v29  ;;  %v2991_v31 = vpop.f32.mrb[5].mxu1  ;;  %3005 = vmatprep.subr.bf16.mxu0 %v3416_v0 }
 0x1c7   :  { %v368_v32 = vpop.f32.mrb[6].mxu1 }
 0x1c8   :  { %v2992_v33 = vpop.f32.mrb[7].mxu1  ;;  %379 = vrot.lane.b32.xlu0 %v366_v30, %s3418_s22 }
 0x23a   :  { %v380_v44 = vpop.permute.xlu0 %379 }
 0x297   :  { %v303_v35 = vpop.f32.mrb[4].mxu0 }
 0x298   :  { %v304_v36 = vadd.f32 %v3622_v34, %v303_v35  ;;  %v2983_v37 = vpop.f32.mrb[5].mxu0 }
 0x299   :  { %v306_v38 = vpop.f32.mrb[6].mxu0 }
 0x29a   :  { %v371_v39 = vadd.f32 %v366_v30, %v304_v36  ;;  %v2984_v40 = vpop.f32.mrb[7].mxu0 }
 0x29c   :  { %v2776_v41 = vmul.f32 -1.442695, %v371_v39 }
 0x29e   :  { %3308 = vpow2.f32 %v2776_v41 }
 0x2a8   :  { %v3309_v42 = vpop.eup %3308 }
 0x2a9   :  { %v375_v43 = vadd.f32 1.0, %v3309_v42 }
 0x2ab   :  { %3310 = vrcp.f32 %v375_v43 }
 0x2b5   :  { %v3311_v45 = vpop.eup %3310 }
 0x2b6   :  { %v382_v46 = vmul.f32 %v3311_v45, %v380_v44  ;;  %v389_v58 = vsub.f32 1.0, %v3311_v45 }
 0x2b8   :  { %384 = vrot.lane.b32.xlu0 %v382_v46, %s3418_s22  ;;  %v3685_v46 = vsel %vm554_vm4, %v3631_v50, 0 }
 0x32a   :  { %v385_v47 = vpop.permute.xlu0 %384 }
 0x32b   :  { %v387_v48 = vadd.f32 %v385_v47, %v304_v36 }
 0x32d   :  { %3312 = vtanh.f32 %v387_v48 }
 0x337   :  { %v3313_v49 = vpop.eup %3312 }
 0x338   :  { %391 = vrot.lane.b32.xlu1 %v3313_v49, %s3419_s25 }
 0x33c   :  { %396 = vrot.lane.b32.xlu1 %v121_v18, %s3420_s26 }
 0x3aa   :  { %v392_v57 = vpop.permute.xlu1 %391 }
 0x3ab   :  { %v394_v62 = vmul.f32 %v392_v57, %v389_v58  ;;  %v3698_v57 = vld [vmem:[%s4270_s9] sm:$0xff]   ;;  %v3704_v58 = vld [vmem:[%s4270_s9 + $0x8] sm:$0xff]  }
 0x3ae   :  { %v397_v61 = vpop.permute.xlu1 %396 }
 0x3af   :  { %v399_v63 = vmul.f32 %v3311_v45, %v397_v61  ;;  %v3680_v45 = vsel %vm554_vm4, %v3636_v51, 0  ;;  %v3726_v61 = vld [vmem:[%s4271_s11] sm:$0xff]  }
 0x3b1   :  { %v3652_v4 = vadd.f32 %v399_v63, %v394_v62 }
 0x3b3   :  { %v3656_v9 = vpack.c.bf16 %v3652_v4, %v3652_v4 }
 0x3b5   :  { %v409_v10 = vrot.slane %v3656_v9, %v3650_v3 }
 0x3b7   :  { %v416_v11 = vrot.slane %v409_v10, %v3650_v3 }
 0x3b9   :  { %v2777_v13 = vpack.i.b16 %v416_v11, %v416_v11  ;;  %v418_v14 = vunpack.i.h.s16 %v416_v11 }
 0x3bb   :  { %v423_v16 = vrot.slane %v2777_v13, %v3661_v12  ;;  %v472_v18 = vpack.i.b16 %v418_v14, %v418_v14 }
 0x3bd   :  { %424 = vrot.lane.b32.xlu1 %v423_v16, %s3419_s25  ;;  %v476_v19 = vrot.slane %v472_v18, %v3661_v12 }
 0x3bf   :  { %477 = vrot.lane.b32.xlu0 %v476_v19, %s3419_s25 }
 0x42f   :  { %v425_v21 = vpop.permute.xlu1 %424 }
 0x430   :  { %2996 = vmatmul.mubr.msk.bf16.vlgmr.msra.gmra.mrb[8].mxu0 %vm144_vm1, %v425_v21 }
 0x431   :  { %v478_v22 = vpop.permute.xlu0 %477  ;;  %3007 = vmatprep.mubr.msk.bf16.mxu0 %vm3417_vm0, %v3416_v0  ;;  %3006 = vmatpush3.bf16.msra.mxu0 %v3685_v46 }
 0x432   :  { %3002 = vmatmul.mubr.msk.bf16.vlgmr.msra.gmra.mrb[8].mxu1 %vm144_vm1, %v478_v22  ;;  %3017 = vmatprep.subr.bf16.mxu0 %v3416_v0 }
 0x433   :  { %3013 = vmatprep.mubr.msk.bf16.mxu1 %vm3417_vm0, %v3416_v0  ;;  %3012 = vmatpush3.bf16.msra.mxu1 %v3680_v45 }
 0x434   :  { %3029 = vmatprep.subr.bf16.mxu1 %v3416_v0 }
 0x503   :  { %v466_v23 = vpop.f32.mrb[8].mxu0 }
 0x504   :  { %v2997_v24 = vpop.f32.mrb[9].mxu0  ;;  %v526_v25 = vsel %vm525_vm3, %v466_v23, -inf }
 0x505   :  { %v519_v26 = vpop.f32.mrb[8].mxu1  ;;  %527 = vmax.xlane.f32.xlu1 %v526_v25  ;;  %v469_v27 = vpop.f32.mrb[10].mxu0 }
 0x506   :  { %v2998_v29 = vpop.f32.mrb[11].mxu0  ;;  %v3003_v30 = vpop.f32.mrb[9].mxu1  ;;  %v529_v31 = vsel %vm525_vm3, %v519_v26, -inf  ;;  %v3746_v27 = vld [vmem:[%s4273_s10] ss:$0 sm:$0xff] }
 0x507   :  { %530 = vmax.xlane.f32.xlu0 %v529_v31  ;;  %v522_v32 = vpop.f32.mrb[10].mxu1 }
 0x508   :  { %v3004_v33 = vpop.f32.mrb[11].mxu1 }
 0x509   :  { %v3754_v33 = vld [vmem:[%s4272_s12] sm:$0xff]  }
 0x516   :  { %643 = vrot.lane.b32.xlu1 %v3652_v4, %s3419_s25 }
 0x592   :  { %v528_v35 = vpop.xlane.xlu1 %527 }
 0x593   :  { %v532_v36 = vsub.f32 %v466_v23, %v528_v35 }
 0x594   :  { %v531_v37 = vpop.xlane.xlu0 %530 }
 0x595   :  { %v533_v38 = vsub.f32 %v519_v26, %v531_v37  ;;  %v534_v39 = vmul.f32 1.442695, %v532_v36  ;;  %v3739_v26 = vld [vmem:[%s4271_s11 + $0x8] sm:$0xff]  }
 0x596   :  { %v644_v22 = vpop.permute.xlu1 %643  ;;  %v3763_v37 = vld [vmem:[%s4272_s12 + $0x8] sm:$0xff]  }
 0x597   :  { %v536_v40 = vmul.f32 1.442695, %v533_v38  ;;  %v122_v38 = vld [vmem:[%s4274_s19] sm:$0x3] }
 0x599   :  { %3314 = vpow2.f32 %v536_v40 }
 0x59a   :  { %3316 = vpow2.f32 %v534_v39  ;;  %v792_v39 = vpack.c.bf16 %v122_v38, %v122_v38 }
 0x5a3   :  { %v3315_v41 = vpop.eup %3314 }
 0x5a4   :  { %v541_v42 = vsel %vm525_vm3, %v3315_v41, 0.0  ;;  %v3317_v43 = vpop.eup %3316 }
 0x5a5   :  { %542 = vadd.xlane.f32.xlu0 %v541_v42  ;;  %v538_v44 = vsel %vm525_vm3, %v3317_v43, 0.0 }
 0x5a9   :  { %539 = vadd.xlane.f32.xlu0 %v538_v44  ;;  %v3779_v44 = vld [vmem:[%s4275_s14] ss:$0 sm:$0xff] }
 0x632   :  { %v543_v47 = vpop.xlane.xlu0 %542 }
 0x633   :  { %3318 = vrcp.f32 %v543_v47 }
 0x636   :  { %v540_v48 = vpop.xlane.xlu0 %539 }
 0x637   :  { %3320 = vrcp.f32 %v540_v48 }
 0x63d   :  { %v3319_v49 = vpop.eup %3318 }
 0x63e   :  { %v547_v54 = vmul.f32 %v3319_v49, %v3315_v41 }
 0x640   :  { %v549_v51 = vpack.c.bf16 %v547_v54, %v547_v54 }
 0x641   :  { %v3321_v55 = vpop.eup %3320 }
 0x642   :  { %v546_v56 = vmul.f32 %v3321_v55, %v3317_v43  ;;  %3014 = vmatmul.mubr.msk.bf16.vlgmr.msra.gmra.mrb[12].mxu1 %vm550_vm5, %v549_v51  ;;  %v3786_v55 = vld [vmem:[%s4276_s13] ss:$0 sm:$0xff] }
 0x643   :  { %3033 = vmatprep.mubr.msk.bf16.mxu1 %vm3417_vm0, %v3416_v0  ;;  %3030 = vmatpush3.bf16.msra.mxu1 %v3726_v61 }
 0x644   :  { %v548_v50 = vpack.c.bf16 %v546_v56, %v546_v56  ;;  %3031 = vmatprep.subr.bf16.mxu1 %v3416_v0 }
 0x646   :  { %3008 = vmatmul.mubr.msk.bf16.vlgmr.msra.gmra.mrb[12].mxu0 %vm550_vm5, %v548_v50 }
 0x647   :  { %3025 = vmatprep.mubr.msk.bf16.mxu0 %vm3417_vm0, %v3416_v0  ;;  %3018 = vmatpush3.bf16.msra.mxu0 %v3698_v57 }
 0x648   :  { %3019 = vmatprep.subr.bf16.mxu0 %v3416_v0  ;;  %3032 = vmatpush3.bf16.msra.mxu1 %v3739_v26 }
 0x649   :  { %3037 = vmatprep.subr.bf16.mxu1 %v3416_v0 }
 0x64b   :  { %3020 = vmatpush3.bf16.msra.mxu0 %v3704_v58 }
 0x64c   :  { %3021 = vmatprep.subr.bf16.mxu0 %v3416_v0 }
 0x64f   :  { %3022 = vmatpush3.bf16.msra.mxu0 %v3711_v59 }
 0x650   :  { %3023 = vmatprep.subr.bf16.mxu0 %v3416_v0 }
 0x653   :  { %3024 = vmatpush3.bf16.msra.mxu0 %v3719_v60 }
 0x654   :  { %3045 = vmatprep.subr.bf16.mxu0 %v3416_v0 }
 0x715   :  { %v636_v62 = vpop.f32.mrb[12].mxu1 }
 0x716   :  { %v3015_v63 = vpop.f32.mrb[13].mxu1  ;;  %v648_v11 = vrot.slane %v636_v62, 7 }
 0x717   :  { %v639_v10 = vpop.f32.mrb[14].mxu1 }
 0x718   :  { %v3016_v13 = vpop.f32.mrb[15].mxu1 }
 0x719   :  { %v591_v14 = vpop.f32.mrb[12].mxu0 }
 0x71a   :  { %v3009_v16 = vpop.f32.mrb[13].mxu0  ;;  %v650_v18 = vsel %vm649_vm6, %v648_v11, %v591_v14 }
 0x71b   :  { %651 = vrot.lane.b32.xlu0 %v650_v18, %s3420_s26  ;;  %v594_v19 = vpop.f32.mrb[14].mxu0 }
 0x71c   :  { %v3010_v21 = vpop.f32.mrb[15].mxu0  ;;  %v3794_v19 = vld [vmem:[%s4272_s12 + $0x10] sm:$0xff]  }
 0x71d   :  { %v3799_v21 = vld [vmem:[%s4271_s11 + $0x10] sm:$0xff]  }
 0x78d   :  { %v652_v23 = vpop.permute.xlu0 %651 }
 0x78e   :  { %v654_v24 = vsel %vm144_vm1, %v644_v22, %v652_v23  ;;  %v3805_v22 = vld [vmem:[%s4272_s12 + $0x18] sm:$0xff]   ;;  %v2760_v23 = vld [vmem:[%s4274_s19 + $0x2] sm:$0x3] }
 0x78f   :  { %v655_v25 = vpack.c.bf16 %v654_v24, %v654_v24  ;;  %v951_v24 = vpack.c.bf16 %v2760_v23, %v2760_v23 }
 0x791   :  { %3026 = vmatmul.mubr.msk.bf16.vlgmr.msra.gmra.mrb[16].mxu0 %vm686_vm7, %v655_v25 }
 0x792   :  { %3049 = vmatprep.mubr.msk.bf16.mxu0 %vm3417_vm0, %v3416_v0  ;;  %3046 = vmatpush3.bf16.msra.mxu0 %v3799_v21 }
 0x793   :  { %3047 = vmatprep.subr.bf16.mxu0 %v3416_v0 }
 0x864   :  { %v724_v29 = vpop.f32.mrb[16].mxu0 }
 0x865   :  { %v3749_v30 = vadd.f32 %v3746_v27, %v724_v29  ;;  %v3027_v31 = vpop.f32.mrb[17].mxu0  ;;  %v3826_v29 = vld [vmem:[%s4271_s11 + $0x18] sm:$0xff]  }
 0x866   :  { %v727_v32 = vpop.f32.mrb[18].mxu0  ;;  %3048 = vmatpush3.bf16.msra.mxu0 %v3826_v29 }
 0x867   :  { %v730_v35 = vpack.c.bf16 %v3749_v30, %v3749_v30  ;;  %v3028_v36 = vpop.f32.mrb[19].mxu0  ;;  %3061 = vmatprep.subr.bf16.mxu0 %v3416_v0 }
 0x869   :  { %3034 = vmatmul.mubr.msk.bf16.vlgmr.msra.gmra.mrb[16].mxu1 %vm144_vm1, %v730_v35 }
 0x86a   :  { %3038 = vmatpush3.bf16.msra.mxu1 %v3754_v33  ;;  %3041 = vmatprep.mubr.msk.bf16.mxu1 %vm3417_vm0, %v3416_v0 }
 0x86b   :  { %3039 = vmatprep.subr.bf16.mxu1 %v3416_v0 }
 0x86e   :  { %3040 = vmatpush3.bf16.msra.mxu1 %v3763_v37 }
 0x86f   :  { %3053 = vmatprep.subr.bf16.mxu1 %v3416_v0 }
 0x871   :  { %3042 = vmatmul.mubr.msk.bf16.vlgmr.msra.gmra.mrb[20].mxu1 %vm144_vm1, %v792_v39 }
 0x872   :  { %3057 = vmatprep.mubr.msk.bf16.mxu1 %vm3417_vm0, %v3416_v0  ;;  %3054 = vmatpush3.bf16.msra.mxu1 %v3794_v19 }
 0x873   :  { %3055 = vmatprep.subr.bf16.mxu1 %v3416_v0 }
 0x876   :  { %3056 = vmatpush3.bf16.msra.mxu1 %v3805_v22 }
 0x877   :  { %3069 = vmatprep.subr.bf16.mxu1 %v3416_v0 }
 0x879   :  { %3058 = vmatmul.mubr.msk.bf16.vlgmr.msra.gmra.mrb[24].mxu1 %vm144_vm1, %v951_v24 }
 0x87a   :  { %3070 = vmatpush3.bf16.msra.mxu1 %v3531_v1  ;;  %3073 = vmatprep.mubr.msk.bf16.mxu1 %vm3417_vm0, %v3416_v0 }
 0x87b   :  { %3071 = vmatprep.subr.bf16.mxu1 %v3416_v0 }
 0x87e   :  { %3072 = vmatpush3.bf16.msra.mxu1 %v3542_v2  ;;  %v3837_v2 = vld [vmem:[%s4275_s14 + $0x1] ss:$0 sm:$0xff] }
 0x87f   :  { %3085 = vmatprep.subr.bf16.mxu1 %v3416_v0 }
 0x93c   :  { %v786_v40 = vpop.f32.mrb[16].mxu1 }
 0x93d   :  { %v3035_v41 = vpop.f32.mrb[17].mxu1  ;;  %v787_v56 = vadd.f32 %v3786_v55, %v786_v40 }
 0x93e   :  { %v789_v42 = vpop.f32.mrb[18].mxu1 }
 0x93f   :  { %v3036_v43 = vpop.f32.mrb[19].mxu1 }
 0x944   :  { %v848_v47 = vpop.f32.mrb[20].mxu1 }
 0x945   :  { %v849_v48 = vadd.f32 %v3779_v44, %v848_v47  ;;  %v3043_v49 = vpop.f32.mrb[21].mxu1 }
 0x946   :  { %v851_v54 = vpop.f32.mrb[22].mxu1 }
 0x947   :  { %862 = vrot.lane.b32.xlu1 %v849_v48, %s3418_s22  ;;  %v3044_v51 = vpop.f32.mrb[23].mxu1  ;;  %v854_v50 = vadd.f32 %v849_v48, %v787_v56  ;;  %v3848_v54 = vld [vmem:[%s4276_s13 + $0x1] ss:$0 sm:$0xff] }
 0x949   :  { %v2796_v62 = vmul.f32 -1.442695, %v854_v50 }
 0x94b   :  { %3322 = vpow2.f32 %v2796_v62 }
 0x94c   :  { %v1007_v39 = vpop.f32.mrb[24].mxu1 }
 0x94d   :  { %v1008_v40 = vadd.f32 %v3837_v2, %v1007_v39  ;;  %v3059_v41 = vpop.f32.mrb[25].mxu1 }
 0x94e   :  { %v1010_v42 = vpop.f32.mrb[26].mxu1 }
 0x94f   :  { %v3060_v43 = vpop.f32.mrb[27].mxu1 }
 0x955   :  { %v3323_v63 = vpop.eup %3322 }
 0x956   :  { %v858_v10 = vadd.f32 1.0, %v3323_v63 }
 0x958   :  { %3324 = vrcp.f32 %v858_v10 }
 0x962   :  { %v3325_v11 = vpop.eup %3324 }
 0x963   :  { %v872_v1 = vsub.f32 1.0, %v3325_v11 }
 0x9b9   :  { %v863_v13 = vpop.permute.xlu1 %862 }
 0x9ba   :  { %v865_v14 = vmul.f32 %v3325_v11, %v863_v13 }
 0x9bc   :  { %867 = vrot.lane.b32.xlu1 %v865_v14, %s3418_s22 }
 0x9c0   :  { %879 = vrot.lane.b32.xlu1 %v122_v38, %s3420_s26 }
 0x9c4   :  { %1021 = vrot.lane.b32.xlu1 %v1008_v40, %s3418_s22 }
 0xa2e   :  { %v868_v16 = vpop.permute.xlu1 %867 }
 0xa2f   :  { %v870_v18 = vadd.f32 %v868_v16, %v787_v56 }
 0xa31   :  { %3326 = vtanh.f32 %v870_v18 }
 0xa32   :  { %v880_v31 = vpop.permute.xlu1 %879 }
 0xa33   :  { %v882_v35 = vmul.f32 %v3325_v11, %v880_v31  ;;  %v3858_v31 = vld [vmem:[%s4277_s15] sm:$0xff]  }
 0xa36   :  { %v1022_v14 = vpop.permute.xlu1 %1021 }
 0xa3b   :  { %v3327_v25 = vpop.eup %3326 }
 0xa3c   :  { %874 = vrot.lane.b32.xlu0 %v3327_v25, %s3419_s25 }
 0xaae   :  { %v875_v32 = vpop.permute.xlu0 %874 }
 0xaaf   :  { %v877_v36 = vmul.f32 %v875_v32, %v872_v1 }
 0xab1   :  { %v3830_v38 = vadd.f32 %v882_v35, %v877_v36 }
 0xab3   :  { %885 = vrot.lane.b32.xlu0 %v3830_v38, %s3419_s25 }
 0xb25   :  { %v886_v47 = vpop.permute.xlu0 %885 }
 0xb26   :  { %v888_v48 = vadd.f32 %v886_v47, %v3749_v30 }
 0xb28   :  { %v889_v49 = vpack.c.bf16 %v888_v48, %v888_v48 }
 0xb2a   :  { %3050 = vmatmul.mubr.msk.bf16.vlgmr.msra.gmra.mrb[20].mxu0 %vm144_vm1, %v889_v49 }
 0xb2b   :  { %3065 = vmatprep.mubr.msk.bf16.mxu0 %vm3417_vm0, %v3416_v0  ;;  %3062 = vmatpush3.bf16.msra.mxu0 %v3858_v31 }
 0xb2c   :  { %3063 = vmatprep.subr.bf16.mxu0 %v3416_v0 }
 0xbfd   :  { %v945_v51 = vpop.f32.mrb[20].mxu0 }
 0xbfe   :  { %v946_v56 = vadd.f32 %v3848_v54, %v945_v51  ;;  %v3051_v50 = vpop.f32.mrb[21].mxu0 }
 0xbff   :  { %v948_v62 = vpop.f32.mrb[22].mxu0 }
 0xc00   :  { %v1013_v63 = vadd.f32 %v1008_v40, %v946_v56  ;;  %v3052_v10 = vpop.f32.mrb[23].mxu0 }
 0xc02   :  { %v2805_v11 = vmul.f32 -1.442695, %v1013_v63 }
 0xc04   :  { %3328 = vpow2.f32 %v2805_v11 }
 0xc0e   :  { %v3329_v30 = vpop.eup %3328 }
 0xc0f   :  { %v1017_v13 = vadd.f32 1.0, %v3329_v30 }
 0xc11   :  { %3330 = vrcp.f32 %v1017_v13 }
 0xc1b   :  { %v3331_v16 = vpop.eup %3330 }
 0xc1c   :  { %v1024_v18 = vmul.f32 %v3331_v16, %v1022_v14  ;;  %v1031_v32 = vsub.f32 1.0, %v3331_v16 }
 0xc1e   :  { %1026 = vrot.lane.b32.xlu0 %v1024_v18, %s3418_s22 }
 0xc22   :  { %1038 = vrot.lane.b32.xlu0 %v2760_v23, %s3420_s26  ;;  %v3866_v23 = vld [vmem:[%s4277_s15 + $0x8] sm:$0xff]  }
 0xc23   :  { %3064 = vmatpush3.bf16.msra.mxu0 %v3866_v23 }
 0xc24   :  { %3077 = vmatprep.subr.bf16.mxu0 %v3416_v0 }
 0xc26   :  { %1265 = vrot.lane.b32.xlu0 %v3656_v9, %s3419_s25 }
 0xc90   :  { %v1027_v24 = vpop.permute.xlu0 %1026 }
 0xc91   :  { %v1029_v25 = vadd.f32 %v1027_v24, %v946_v56 }
 0xc93   :  { %3332 = vtanh.f32 %v1029_v25 }
 0xc94   :  { %v1039_v9 = vpop.permute.xlu0 %1038 }
 0xc95   :  { %v1041_v36 = vmul.f32 %v3331_v16, %v1039_v9 }
 0xc9d   :  { %v3333_v1 = vpop.eup %3332 }
 0xc9e   :  { %1033 = vrot.lane.b32.xlu1 %v3333_v1, %s3419_s25 }
 0xd10   :  { %v1034_v35 = vpop.permute.xlu1 %1033 }
 0xd11   :  { %v1036_v39 = vmul.f32 %v1034_v35, %v1031_v32 }
 0xd13   :  { %v3870_v40 = vadd.f32 %v1041_v36, %v1036_v39 }
 0xd15   :  { %1044 = vrot.lane.b32.xlu1 %v3870_v40, %s3419_s25 }
 0xd87   :  { %v1045_v41 = vpop.permute.xlu1 %1044 }
 0xd88   :  { %v1047_v42 = vadd.f32 %v1045_v41, %v888_v48 }
 0xd8a   :  { %v1048_v43 = vpack.c.bf16 %v1047_v42, %v1047_v42 }
 0xd8c   :  { %3066 = vmatmul.mubr.msk.bf16.vlgmr.msra.gmra.mrb[24].mxu0 %vm144_vm1, %v1048_v43  ;;  %3074 = vmatmul.mubr.msk.bf16.vlgmr.msra.gmra.mrb[28].mxu1 %vm144_vm1, %v1048_v43 }
 0xd8d   :  { %3078 = vmatpush3.bf16.msra.mxu0 %v3556_v5  ;;  %3081 = vmatprep.mubr.msk.bf16.mxu0 %vm3417_vm0, %v3416_v0 }
 0xd8e   :  { %3079 = vmatprep.subr.bf16.mxu0 %v3416_v0  ;;  %3086 = vmatpush3.bf16.msra.mxu1 %v3570_v7 }
 0xd8f   :  { %3087 = vmatprep.mubr.msk.bf16.mxu1 %vm3417_vm0, %v3416_v0  ;;  %3099 = vmatprep.subr.bf16.mxu1 %v3416_v0 }
 0xd91   :  { %3080 = vmatpush3.bf16.msra.mxu0 %v3563_v6  ;;  %v1266_v6 = vpop.permute.xlu0 %1265 }
 0xd92   :  { %3091 = vmatprep.subr.bf16.mxu0 %v3416_v0 }
 0xe5f   :  { %v3886_v47 = vpop.f32.mrb[24].mxu0  ;;  %v1169_v48 = vpop.f32.mrb[28].mxu1 }
 0xe60   :  { %v1170_v5 = vadd.f32 %v3577_v8, %v1169_v48  ;;  %v3067_v49 = vpop.f32.mrb[25].mxu0  ;;  %v3075_v51 = vpop.f32.mrb[29].mxu1 }
 0xe61   :  { %v1107_v56 = vpop.f32.mrb[26].mxu0  ;;  %v1172_v50 = vpop.f32.mrb[30].mxu1 }
 0xe62   :  { %v1175_v62 = vmax.f32 %v1170_v5, 0.0  ;;  %v3068_v7 = vpop.f32.mrb[27].mxu0  ;;  %v3076_v63 = vpop.f32.mrb[31].mxu1 }
 0xe64   :  { %v1176_v10 = vpack.c.bf16 %v1175_v62, %v1175_v62 }
 0xe66   :  { %3082 = vmatmul.mubr.msk.bf16.vlgmr.msra.gmra.mrb[28].mxu0 %vm144_vm1, %v1176_v10 }
 0xe67   :  { %3092 = vmatpush3.bf16.msra.mxu0 %v3583_v15  ;;  %3095 = vmatprep.mubr.msk.bf16.mxu0 %vm3417_vm0, %v3416_v0 }
 0xe68   :  { %3093 = vmatprep.subr.bf16.mxu0 %v3416_v0 }
 0xe6b   :  { %3094 = vmatpush3.bf16.msra.mxu0 %v3590_v17 }
 0xe6c   :  { %3105 = vmatprep.subr.bf16.mxu0 %v3416_v0 }
 0xe6e   :  { %3096 = vmatmul.mubr.msk.bf16.vlgmr.msra.gmra.mrb[32].mxu0 %vm144_vm1, %v1266_v6 }
 0xe6f   :  { %3107 = vmatprep.mubr.msk.bf16.mxu0 %vm3417_vm0, %v3416_v0 }
 0xe74   :  { %3106 = vmatpush3.bf16.xpose.msra.mxu0 %v3644_v53 }
 0xe75   :  { %3117 = vmatprep.subr.bf16.mxu0 %v3416_v0 }
 0xf39   :  { %v1214_v8 = vpop.f32.mrb[28].mxu0 }
 0xf3a   :  { %v1215_v15 = vadd.f32 %v3606_v20, %v1214_v8  ;;  %v3083_v11 = vpop.f32.mrb[29].mxu0 }
 0xf3b   :  { %v1217_v30 = vpop.f32.mrb[30].mxu0 }
 0xf3c   :  { %v1220_v13 = vmax.f32 %v1215_v15, 0.0  ;;  %v3084_v14 = vpop.f32.mrb[31].mxu0 }
 0xf3e   :  { %v1221_v17 = vpack.c.bf16 %v1220_v13, %v1220_v13 }
 0xf40   :  { %3088 = vmatmul.mubr.msk.bf16.vlgmr.msra.gmra.mrb[32].mxu1 %vm265_vm2, %v1221_v17 }
 0xf41   :  { %v1304_v16 = vpop.f32.mrb[32].mxu0  ;;  %3100 = vmatpush3.bf16.xpose.msra.mxu1 %v3640_v52  ;;  %3101 = vmatprep.mubr.msk.bf16.mxu1 %vm3417_vm0, %v3416_v0 }
 0xf42   :  { %v1305_v18 = vadd.f32 %v3612_v28, %v1304_v16  ;;  %v3097_v24 = vpop.f32.mrb[33].mxu0  ;;  %3111 = vmatprep.subr.bf16.mxu1 %v3416_v0 }
 0xf43   :  { %v1307_v25 = vpop.f32.mrb[34].mxu0 }
 0xf44   :  { %1318 = vrot.lane.b32.xlu1 %v1305_v18, %s3418_s22  ;;  %v3098_v20 = vpop.f32.mrb[35].mxu0 }
 0xfb6   :  { %v1319_v48 = vpop.permute.xlu1 %1318 }
0x1013   :  { %v1259_v1 = vpop.f32.mrb[32].mxu1 }
0x1014   :  { %v1260_v9 = vadd.f32 %v3622_v34, %v1259_v1  ;;  %v3089_v32 = vpop.f32.mrb[33].mxu1 }
0x1015   :  { %v1262_v35 = vpop.f32.mrb[34].mxu1 }
0x1016   :  { %v1310_v36 = vadd.f32 %v1305_v18, %v1260_v9  ;;  %v3090_v39 = vpop.f32.mrb[35].mxu1 }
0x1017   :  { %v1664_v39 = vpack.c.bf16 %v3830_v38, %v3830_v38 }
0x1018   :  { %v2814_v41 = vmul.f32 -1.442695, %v1310_v36 }
0x101a   :  { %3334 = vpow2.f32 %v2814_v41 }
0x1024   :  { %v3335_v42 = vpop.eup %3334 }
0x1025   :  { %v1314_v43 = vadd.f32 1.0, %v3335_v42 }
0x1027   :  { %3336 = vrcp.f32 %v1314_v43 }
0x1031   :  { %v3337_v28 = vpop.eup %3336 }
0x1032   :  { %v1321_v5 = vmul.f32 %v3337_v28, %v1319_v48  ;;  %v1328_v34 = vsub.f32 1.0, %v3337_v28  ;;  %v1334_v62 = vmul.f32 %v3337_v28, %v3652_v4 }
0x1034   :  { %1323 = vrot.lane.b32.xlu0 %v1321_v5, %s3418_s22 }
0x10a6   :  { %v1324_v49 = vpop.permute.xlu0 %1323 }
0x10a7   :  { %v1326_v51 = vadd.f32 %v1324_v49, %v1260_v9 }
0x10a9   :  { %3338 = vtanh.f32 %v1326_v51 }
0x10b3   :  { %v3339_v56 = vpop.eup %3338 }
0x10b4   :  { %1330 = vrot.lane.b32.xlu1 %v3339_v56, %s3419_s25 }
0x1126   :  { %v1331_v50 = vpop.permute.xlu1 %1330 }
0x1127   :  { %v1333_v7 = vmul.f32 %v1331_v50, %v1328_v34 }
0x1129   :  { %v3913_v63 = vadd.f32 %v1334_v62, %v1333_v7 }
0x112b   :  { %v3917_v10 = vpack.c.bf16 %v3913_v63, %v3913_v63 }
0x112d   :  { %v1344_v6 = vrot.slane %v3917_v10, %v3650_v3 }
0x112f   :  { %v1351_v8 = vrot.slane %v1344_v6, %v3650_v3 }
0x1131   :  { %v2815_v15 = vpack.i.b16 %v1351_v8, %v1351_v8  ;;  %v1353_v11 = vunpack.i.h.s16 %v1351_v8 }
0x1133   :  { %v1358_v30 = vrot.slane %v2815_v15, %v3661_v12  ;;  %v1404_v13 = vpack.i.b16 %v1353_v11, %v1353_v11 }
0x1135   :  { %1359 = vrot.lane.b32.xlu1 %v1358_v30, %s3419_s25  ;;  %v1408_v4 = vrot.slane %v1404_v13, %v3661_v12 }
0x1137   :  { %1409 = vrot.lane.b32.xlu0 %v1408_v4, %s3419_s25 }
0x11a7   :  { %v1360_v14 = vpop.permute.xlu1 %1359 }
0x11a8   :  { %3102 = vmatmul.mubr.msk.bf16.vlgmr.msra.gmra.mrb[36].mxu1 %vm144_vm1, %v1360_v14 }
0x11a9   :  { %v1410_v17 = vpop.permute.xlu0 %1409  ;;  %3112 = vmatpush3.bf16.msra.mxu1 %v3685_v46  ;;  %3113 = vmatprep.mubr.msk.bf16.mxu1 %vm3417_vm0, %v3416_v0 }
0x11aa   :  { %3108 = vmatmul.mubr.msk.bf16.vlgmr.msra.gmra.mrb[36].mxu0 %vm144_vm1, %v1410_v17  ;;  %3123 = vmatprep.subr.bf16.mxu1 %v3416_v0 }
0x11ab   :  { %3118 = vmatpush3.bf16.msra.mxu0 %v3680_v45  ;;  %3119 = vmatprep.mubr.msk.bf16.mxu0 %vm3417_vm0, %v3416_v0 }
0x11ac   :  { %3135 = vmatprep.subr.bf16.mxu0 %v3416_v0 }
0x127b   :  { %v1398_v16 = vpop.f32.mrb[36].mxu1 }
0x127c   :  { %v3103_v18 = vpop.f32.mrb[37].mxu1  ;;  %v1454_v24 = vsel %vm525_vm3, %v1398_v16, -inf }
0x127d   :  { %1455 = vmax.xlane.f32.xlu1 %v1454_v24  ;;  %v1401_v25 = vpop.f32.mrb[38].mxu1  ;;  %v1448_v20 = vpop.f32.mrb[36].mxu0 }
0x127e   :  { %v3104_v1 = vpop.f32.mrb[39].mxu1  ;;  %v3109_v9 = vpop.f32.mrb[37].mxu0  ;;  %v1457_v32 = vsel %vm525_vm3, %v1448_v20, -inf }
0x127f   :  { %1458 = vmax.xlane.f32.xlu0 %v1457_v32  ;;  %v1451_v35 = vpop.f32.mrb[38].mxu0 }
0x1280   :  { %v3110_v36 = vpop.f32.mrb[39].mxu0 }
0x128e   :  { %1565 = vrot.lane.b32.xlu1 %v3913_v63, %s3419_s25 }
0x1292   :  { %1666 = vrot.lane.b32.xlu1 %v1664_v39, %s3419_s25 }
0x130a   :  { %v1456_v41 = vpop.xlane.xlu1 %1455 }
0x130b   :  { %v1460_v42 = vsub.f32 %v1398_v16, %v1456_v41 }
0x130c   :  { %v1459_v43 = vpop.xlane.xlu0 %1458 }
0x130d   :  { %v1461_v28 = vsub.f32 %v1448_v20, %v1459_v43  ;;  %v1462_v48 = vmul.f32 1.442695, %v1460_v42 }
0x130f   :  { %v1464_v5 = vmul.f32 1.442695, %v1461_v28 }
0x1311   :  { %3340 = vpow2.f32 %v1464_v5 }
0x1312   :  { %3342 = vpow2.f32 %v1462_v48 }
0x131b   :  { %v3341_v49 = vpop.eup %3340 }
0x131c   :  { %v1469_v51 = vsel %vm525_vm3, %v3341_v49, 0.0  ;;  %v3343_v56 = vpop.eup %3342 }
0x131d   :  { %1470 = vadd.xlane.f32.xlu0 %v1469_v51  ;;  %v1466_v34 = vsel %vm525_vm3, %v3343_v56, 0.0 }
0x1321   :  { %1467 = vadd.xlane.f32.xlu0 %v1466_v34 }
0x13aa   :  { %v1471_v50 = vpop.xlane.xlu0 %1470 }
0x13ab   :  { %3344 = vrcp.f32 %v1471_v50 }
0x13ae   :  { %v1468_v62 = vpop.xlane.xlu0 %1467 }
0x13af   :  { %3346 = vrcp.f32 %v1468_v62 }
0x13b5   :  { %v3345_v7 = vpop.eup %3344 }
0x13b6   :  { %v1475_v6 = vmul.f32 %v3345_v7, %v3341_v49  ;;  %v3386_v7 = vld [vmem:[%s4289_s23] sm:$0xff]  }
0x13b8   :  { %v1477_v8 = vpack.c.bf16 %v1475_v6, %v1475_v6  ;;  %v3387_v6 = vld [vmem:[%s4289_s23 + $0x8] sm:$0xff]  }
0x13b9   :  { %v3347_v15 = vpop.eup %3346 }
0x13ba   :  { %v1474_v11 = vmul.f32 %v3347_v15, %v3343_v56  ;;  %3120 = vmatmul.mubr.msk.bf16.vlgmr.msra.gmra.mrb[40].mxu0 %vm550_vm5, %v1477_v8 }
0x13bb   :  { %3136 = vmatpush3.bf16.msra.mxu0 %v3726_v61  ;;  %3139 = vmatprep.mubr.msk.bf16.mxu0 %vm3417_vm0, %v3416_v0 }
0x13bc   :  { %v1476_v30 = vpack.c.bf16 %v1474_v11, %v1474_v11  ;;  %3137 = vmatprep.subr.bf16.mxu0 %v3416_v0 }
0x13be   :  { %3114 = vmatmul.mubr.msk.bf16.vlgmr.msra.gmra.mrb[40].mxu1 %vm550_vm5, %v1476_v30 }
0x13bf   :  { %3124 = vmatpush3.bf16.msra.mxu1 %v3698_v57  ;;  %3131 = vmatprep.mubr.msk.bf16.mxu1 %vm3417_vm0, %v3416_v0 }
0x13c0   :  { %3125 = vmatprep.subr.bf16.mxu1 %v3416_v0  ;;  %3138 = vmatpush3.bf16.msra.mxu0 %v3739_v26 }
0x13c1   :  { %3143 = vmatprep.subr.bf16.mxu0 %v3416_v0 }
0x13c3   :  { %3126 = vmatpush3.bf16.msra.mxu1 %v3704_v58 }
0x13c4   :  { %3127 = vmatprep.subr.bf16.mxu1 %v3416_v0 }
0x13c7   :  { %3128 = vmatpush3.bf16.msra.mxu1 %v3711_v59  ;;  %v1566_v59 = vpop.permute.xlu1 %1565 }
0x13c8   :  { %3129 = vmatprep.subr.bf16.mxu1 %v3416_v0 }
0x13cb   :  { %3130 = vmatpush3.bf16.msra.mxu1 %v3719_v60 }
0x13cc   :  { %3151 = vmatprep.subr.bf16.mxu1 %v3416_v0 }
0x148d   :  { %v1558_v57 = vpop.f32.mrb[40].mxu0 }
0x148e   :  { %v3121_v61 = vpop.f32.mrb[41].mxu0  ;;  %v1570_v4 = vrot.slane %v1558_v57, 7 }
0x148f   :  { %v1561_v13 = vpop.f32.mrb[42].mxu0 }
0x1490   :  { %v3122_v14 = vpop.f32.mrb[43].mxu0 }
0x1491   :  { %v1515_v26 = vpop.f32.mrb[40].mxu1 }
0x1492   :  { %v3115_v17 = vpop.f32.mrb[41].mxu1  ;;  %v1571_v16 = vsel %vm649_vm6, %v1570_v4, %v1515_v26 }
0x1493   :  { %v1518_v58 = vpop.f32.mrb[42].mxu1  ;;  %1572 = vrot.lane.b32.xlu0 %v1571_v16, %s3420_s26 }
0x1494   :  { %v3116_v18 = vpop.f32.mrb[43].mxu1 }
0x1505   :  { %v1573_v24 = vpop.permute.xlu0 %1572 }
0x1506   :  { %v1575_v25 = vsel %vm144_vm1, %v1566_v59, %v1573_v24 }
0x1507   :  { %v1576_v60 = vpack.c.bf16 %v1575_v25, %v1575_v25 }
0x1509   :  { %3132 = vmatmul.mubr.msk.bf16.vlgmr.msra.gmra.mrb[44].mxu1 %vm686_vm7, %v1576_v60 }
0x150a   :  { %3152 = vmatpush3.bf16.msra.mxu1 %v3799_v21  ;;  %3155 = vmatprep.mubr.msk.bf16.mxu1 %vm3417_vm0, %v3416_v0 }
0x150b   :  { %3153 = vmatprep.subr.bf16.mxu1 %v3416_v0 }
0x150e   :  { %3154 = vmatpush3.bf16.msra.mxu1 %v3826_v29 }
0x150f   :  { %3167 = vmatprep.subr.bf16.mxu1 %v3416_v0 }
0x15dc   :  { %v1614_v20 = vpop.f32.mrb[44].mxu1 }
0x15dd   :  { %v3974_v1 = vadd.f32 %v3746_v27, %v1614_v20  ;;  %v3133_v9 = vpop.f32.mrb[45].mxu1  ;;  %v1667_v27 = vpop.permute.xlu1 %1666 }
0x15de   :  { %v1617_v32 = vpop.f32.mrb[46].mxu1 }
0x15df   :  { %v1620_v35 = vpack.c.bf16 %v3974_v1, %v3974_v1  ;;  %v3134_v36 = vpop.f32.mrb[47].mxu1 }
0x15e1   :  { %3140 = vmatmul.mubr.msk.bf16.vlgmr.msra.gmra.mrb[44].mxu0 %vm144_vm1, %v1620_v35 }
0x15e2   :  { %3144 = vmatpush3.bf16.msra.mxu0 %v3754_v33  ;;  %3147 = vmatprep.mubr.msk.bf16.mxu0 %vm3417_vm0, %v3416_v0 }
0x15e3   :  { %3145 = vmatprep.subr.bf16.mxu0 %v3416_v0 }
0x15e6   :  { %3146 = vmatpush3.bf16.msra.mxu0 %v3763_v37 }
0x15e7   :  { %3159 = vmatprep.subr.bf16.mxu0 %v3416_v0 }
0x15e9   :  { %3148 = vmatmul.mubr.msk.bf16.vlgmr.msra.gmra.mrb[48].mxu0 %vm144_vm1, %v1667_v27 }
0x15ea   :  { %3160 = vmatpush3.bf16.msra.mxu0 %v3794_v19  ;;  %3163 = vmatprep.mubr.msk.bf16.mxu0 %vm3417_vm0, %v3416_v0 }
0x15eb   :  { %3161 = vmatprep.subr.bf16.mxu0 %v3416_v0 }
0x15ee   :  { %3162 = vmatpush3.bf16.msra.mxu0 %v3805_v22 }
0x15ef   :  { %3175 = vmatprep.subr.bf16.mxu0 %v3416_v0 }
0x16b4   :  { %v1658_v33 = vpop.f32.mrb[44].mxu0 }
0x16b5   :  { %v3141_v21 = vpop.f32.mrb[45].mxu0  ;;  %v1659_v28 = vadd.f32 %v3786_v55, %v1658_v33 }
0x16b6   :  { %v1661_v29 = vpop.f32.mrb[46].mxu0 }
0x16b7   :  { %v3142_v37 = vpop.f32.mrb[47].mxu0 }
0x16bc   :  { %v1705_v39 = vpop.f32.mrb[48].mxu0 }
0x16bd   :  { %v1706_v41 = vadd.f32 %v3779_v44, %v1705_v39  ;;  %v3149_v42 = vpop.f32.mrb[49].mxu0  ;;  %v1786_v44 = vpack.c.bf16 %v3870_v40, %v3870_v40 }
0x16be   :  { %v1708_v43 = vpop.f32.mrb[50].mxu0 }
0x16bf   :  { %1719 = vrot.lane.b32.xlu1 %v1706_v41, %s3418_s22  ;;  %v3150_v19 = vpop.f32.mrb[51].mxu0  ;;  %v1711_v48 = vadd.f32 %v1706_v41, %v1659_v28  ;;  %v3390_v43 = vld [vmem:[%s4291_s5 + $0x8] sm:$0xff]  }
0x16c0   :  { %v4057_v19 = vld [vmem:[%s4278_s16] ss:$0 sm:$0xff] }
0x16c1   :  { %v2823_v5 = vmul.f32 -1.442695, %v1711_v48 }
0x16c3   :  { %3348 = vpow2.f32 %v2823_v5 }
0x16cd   :  { %v3349_v22 = vpop.eup %3348 }
0x16ce   :  { %v1715_v49 = vadd.f32 1.0, %v3349_v22 }
0x16d0   :  { %3350 = vrcp.f32 %v1715_v49 }
0x16da   :  { %v3351_v51 = vpop.eup %3350 }
0x16db   :  { %v1729_v15 = vsub.f32 1.0, %v3351_v51  ;;  %v1735_v30 = vmul.f32 %v3351_v51, %v3830_v38 }
0x1731   :  { %v1720_v56 = vpop.permute.xlu1 %1719 }
0x1732   :  { %v1722_v34 = vmul.f32 %v3351_v51, %v1720_v56  ;;  %v3391_v51 = vld [vmem:[%s4264_s2] ss:$0 sm:$0xff] }
0x1734   :  { %1724 = vrot.lane.b32.xlu0 %v1722_v34, %s3418_s22 }
0x1738   :  { %1788 = vrot.lane.b32.xlu0 %v1786_v44, %s3419_s25 }
0x17a6   :  { %v1725_v50 = vpop.permute.xlu0 %1724 }
0x17a7   :  { %v1727_v62 = vadd.f32 %v1725_v50, %v1659_v28  ;;  %v1105_v28 = vadd.f32 %v4057_v19, %v3886_v47 }
0x17a9   :  { %3352 = vtanh.f32 %v1727_v62  ;;  %v1117_v22 = vrot.slane %v1105_v28, %v3650_v3 }
0x17aa   :  { %v1789_v55 = vpop.permute.xlu0 %1788 }
0x17ab   :  { %3164 = vmatmul.mubr.msk.bf16.vlgmr.msra.gmra.mrb[52].mxu0 %vm144_vm1, %v1789_v55 }
0x17ac   :  { %3176 = vmatpush3.bf16.msra.mxu0 %v3386_v7  ;;  %3179 = vmatprep.mubr.msk.bf16.mxu0 %vm3417_vm0, %v3416_v0 }
0x17ad   :  { %3177 = vmatprep.subr.bf16.mxu0 %v3416_v0 }
0x17b0   :  { %3178 = vmatpush3.bf16.msra.mxu0 %v3387_v6 }
0x17b1   :  { %3191 = vmatprep.subr.bf16.mxu0 %v3416_v0 }
0x17b3   :  { %v3353_v8 = vpop.eup %3352 }
0x17b4   :  { %1731 = vrot.lane.b32.xlu1 %v3353_v8, %s3419_s25  ;;  %v1118_v8 = vcombine.high %v1117_v22, %v1117_v22 }
0x1826   :  { %v1732_v11 = vpop.permute.xlu1 %1731 }
0x1827   :  { %v1734_v57 = vmul.f32 %v1732_v11, %v1729_v15 }
0x1829   :  { %v4012_v61 = vadd.f32 %v1735_v30, %v1734_v57  ;;  %v1125_v57 = vrot.slane %v1117_v22, %v3650_v3 }
0x182b   :  { %1738 = vrot.lane.b32.xlu1 %v4012_v61, %s3419_s25 }
0x187e   :  { %v1827_v13 = vpop.f32.mrb[52].mxu0 }
0x187f   :  { %v1828_v4 = vadd.f32 %v3837_v2, %v1827_v13  ;;  %v3165_v14 = vpop.f32.mrb[53].mxu0 }
0x1880   :  { %v1830_v26 = vpop.f32.mrb[54].mxu0  ;;  %v3392_v14 = vld [vmem:[%s4293_s6] sm:$0xff]  }
0x1881   :  { %1841 = vrot.lane.b32.xlu0 %v1828_v4, %s3418_s22  ;;  %v3166_v17 = vpop.f32.mrb[55].mxu0  ;;  %v1132_v26 = vrot.slane %v1118_v8, %v3650_v3 }
0x189d   :  { %v1739_v16 = vpop.permute.xlu1 %1738 }
0x189e   :  { %v1741_v58 = vadd.f32 %v1739_v16, %v3974_v1 }
0x18a0   :  { %v1742_v18 = vpack.c.bf16 %v1741_v58, %v1741_v58 }
0x18a2   :  { %3156 = vmatmul.mubr.msk.bf16.vlgmr.msra.gmra.mrb[48].mxu1 %vm144_vm1, %v1742_v18  ;;  %v3393_v18 = vld [vmem:[%s4293_s6 + $0x8] sm:$0xff]  }
0x18a3   :  { %3168 = vmatpush3.bf16.msra.mxu1 %v3858_v31  ;;  %3171 = vmatprep.mubr.msk.bf16.mxu1 %vm3417_vm0, %v3416_v0 }
0x18a4   :  { %3169 = vmatprep.subr.bf16.mxu1 %v3416_v0 }
0x18a7   :  { %3170 = vmatpush3.bf16.msra.mxu1 %v3866_v23 }
0x18a8   :  { %3183 = vmatprep.subr.bf16.mxu1 %v3416_v0 }
0x18f3   :  { %v1842_v32 = vpop.permute.xlu0 %1841 }
0x1975   :  { %v1780_v38 = vpop.f32.mrb[48].mxu1 }
0x1976   :  { %v1781_v2 = vadd.f32 %v3848_v54, %v1780_v38  ;;  %v3157_v59 = vpop.f32.mrb[49].mxu1 }
0x1977   :  { %v1783_v24 = vpop.f32.mrb[50].mxu1  ;;  %v3394_v59 = vld [vmem:[%s4266_s4] ss:$0 sm:$0xff] }
0x1978   :  { %v1833_v25 = vadd.f32 %v1828_v4, %v1781_v2  ;;  %v3158_v60 = vpop.f32.mrb[51].mxu1 }
0x197a   :  { %v2826_v20 = vmul.f32 -1.442695, %v1833_v25 }
0x197c   :  { %3354 = vpow2.f32 %v2826_v20 }
0x1986   :  { %v3355_v1 = vpop.eup %3354 }
0x1987   :  { %v1837_v31 = vadd.f32 1.0, %v3355_v1 }
0x1989   :  { %3356 = vrcp.f32 %v1837_v31 }
0x1993   :  { %v3357_v9 = vpop.eup %3356 }
0x1994   :  { %v1844_v35 = vmul.f32 %v3357_v9, %v1842_v32  ;;  %v1851_v54 = vsub.f32 1.0, %v3357_v9  ;;  %v1857_v21 = vmul.f32 %v3357_v9, %v3870_v40  ;;  %v3389_v40 = vld [vmem:[%s4292_s17] sm:$0xff]  }
0x1996   :  { %1846 = vrot.lane.b32.xlu1 %v1844_v35, %s3418_s22 }
0x1a08   :  { %v1847_v23 = vpop.permute.xlu1 %1846 }
0x1a09   :  { %v1849_v36 = vadd.f32 %v1847_v23, %v1781_v2 }
0x1a0b   :  { %3358 = vtanh.f32 %v1849_v36 }
0x1a15   :  { %v3359_v27 = vpop.eup %3358 }
0x1a16   :  { %1853 = vrot.lane.b32.xlu0 %v3359_v27, %s3419_s25 }
0x1a1a   :  { %2061 = vrot.lane.b32.xlu0 %v3917_v10, %s3419_s25  ;;  %v3388_v10 = vld [vmem:[%s4291_s5] sm:$0xff]  }
0x1a88   :  { %v1854_v33 = vpop.permute.xlu0 %1853 }
0x1a89   :  { %v1856_v29 = vmul.f32 %v1854_v33, %v1851_v54 }
0x1a8b   :  { %v4032_v37 = vadd.f32 %v1857_v21, %v1856_v29 }
0x1a8c   :  { %v2062_v38 = vpop.permute.xlu0 %2061 }
0x1a8d   :  { %1860 = vrot.lane.b32.xlu1 %v4032_v37, %s3419_s25 }
0x1aff   :  { %v1861_v39 = vpop.permute.xlu1 %1860 }
0x1b00   :  { %v1863_v41 = vadd.f32 %v1861_v39, %v1741_v58 }
0x1b02   :  { %v1864_v42 = vpack.c.bf16 %v1863_v41, %v1863_v41 }
0x1b04   :  { %3172 = vmatmul.mubr.msk.bf16.vlgmr.msra.gmra.mrb[52].mxu1 %vm144_vm1, %v1864_v42  ;;  %3180 = vmatmul.mubr.msk.bf16.vlgmr.msra.gmra.mrb[56].mxu0 %vm144_vm1, %v1864_v42 }
0x1b05   :  { %3184 = vmatpush3.bf16.msra.mxu1 %v3388_v10  ;;  %3187 = vmatprep.mubr.msk.bf16.mxu1 %vm3417_vm0, %v3416_v0 }
0x1b06   :  { %3185 = vmatprep.subr.bf16.mxu1 %v3416_v0  ;;  %3192 = vmatpush3.bf16.msra.mxu0 %v3389_v40 }
0x1b07   :  { %3193 = vmatprep.mubr.msk.bf16.mxu0 %vm3417_vm0, %v3416_v0  ;;  %3205 = vmatprep.subr.bf16.mxu0 %v3416_v0 }
0x1b09   :  { %3186 = vmatpush3.bf16.msra.mxu1 %v3390_v43 }
0x1b0a   :  { %3197 = vmatprep.subr.bf16.mxu1 %v3416_v0 }
0x1bd7   :  { %v1902_v48 = vpop.f32.mrb[52].mxu1  ;;  %v1965_v5 = vpop.f32.mrb[56].mxu0 }
0x1bd8   :  { %v1903_v49 = vadd.f32 %v4057_v19, %v1902_v48  ;;  %v1966_v56 = vadd.f32 %v3391_v51, %v1965_v5  ;;  %v3173_v34 = vpop.f32.mrb[53].mxu1  ;;  %v3181_v44 = vpop.f32.mrb[57].mxu0 }
0x1bd9   :  { %v1905_v50 = vpop.f32.mrb[54].mxu1  ;;  %v1968_v62 = vpop.f32.mrb[58].mxu0 }
0x1bda   :  { %v1915_v55 = vrot.slane %v1903_v49, %v3650_v3  ;;  %v1971_v7 = vmax.f32 %v1966_v56, 0.0  ;;  %v3174_v6 = vpop.f32.mrb[55].mxu1  ;;  %v3182_v47 = vpop.f32.mrb[59].mxu0 }
0x1bdc   :  { %v1916_v15 = vcombine.high %v1915_v55, %v1915_v55  ;;  %v1923_v11 = vrot.slane %v1915_v55, %v3650_v3  ;;  %v1972_v30 = vpack.c.bf16 %v1971_v7, %v1971_v7 }
0x1bde   :  { %v1930_v13 = vrot.slane %v1916_v15, %v3650_v3  ;;  %v2730_v4 = vrot.slane %v1923_v11, %v3661_v12  ;;  %3188 = vmatmul.mubr.msk.bf16.vlgmr.msra.gmra.mrb[56].mxu1 %vm144_vm1, %v1972_v30 }
0x1bdf   :  { %3198 = vmatpush3.bf16.msra.mxu1 %v3392_v14  ;;  %3201 = vmatprep.mubr.msk.bf16.mxu1 %vm3417_vm0, %v3416_v0 }
0x1be0   :  { %v2734_v17 = vrot.slane %v1930_v13, %v3661_v12  ;;  %v4079_v16 = vsel %vm2747_vm8, %v1125_v57, %v2730_v4  ;;  %3199 = vmatprep.subr.bf16.mxu1 %v3416_v0 }
0x1be2   :  { %v4082_v58 = vsel %vm2747_vm8, %v1132_v26, %v2734_v17 }
0x1be3   :  { %3200 = vmatpush3.bf16.msra.mxu1 %v3393_v18 }
0x1be4   :  { %3211 = vmatprep.subr.bf16.mxu1 %v3416_v0 }
0x1be6   :  { %3202 = vmatmul.mubr.msk.bf16.vlgmr.msra.gmra.mrb[60].mxu1 %vm144_vm1, %v2062_v38 }
0x1be7   :  { %3213 = vmatprep.mubr.msk.bf16.mxu1 %vm3417_vm0, %v3416_v0 }
0x1bec   :  { %3212 = vmatpush3.bf16.xpose.msra.mxu1 %v3644_v53  ;;  %v3395_v53 = vld [vmem:[%s4267_s8] ss:$0 sm:$0xff] }
0x1bed   :  { %3223 = vmatprep.subr.bf16.mxu1 %v3416_v0 }
0x1cb1   :  { %v2010_v2 = vpop.f32.mrb[56].mxu1 }
0x1cb2   :  { %v2011_v24 = vadd.f32 %v3394_v59, %v2010_v2  ;;  %v3189_v25 = vpop.f32.mrb[57].mxu1 }
0x1cb3   :  { %v2013_v60 = vpop.f32.mrb[58].mxu1 }
0x1cb4   :  { %v2016_v20 = vmax.f32 %v2011_v24, 0.0  ;;  %v3190_v1 = vpop.f32.mrb[59].mxu1 }
0x1cb6   :  { %v2017_v31 = vpack.c.bf16 %v2016_v20, %v2016_v20 }
0x1cb8   :  { %3194 = vmatmul.mubr.msk.bf16.vlgmr.msra.gmra.mrb[60].mxu0 %vm265_vm2, %v2017_v31 }
0x1cb9   :  { %v2100_v9 = vpop.f32.mrb[60].mxu1  ;;  %3206 = vmatpush3.bf16.xpose.msra.mxu0 %v3640_v52  ;;  %3207 = vmatprep.mubr.msk.bf16.mxu0 %vm3417_vm0, %v3416_v0  ;;  %v3396_v52 = vld [vmem:[%s4268_s7] ss:$0 sm:$0xff] }
0x1cba   :  { %v2101_v32 = vadd.f32 %v3395_v53, %v2100_v9  ;;  %v3203_v35 = vpop.f32.mrb[61].mxu1  ;;  %3217 = vmatprep.subr.bf16.mxu0 %v3416_v0 }
0x1cbb   :  { %v2103_v23 = vpop.f32.mrb[62].mxu1 }
0x1cbc   :  { %2114 = vrot.lane.b32.xlu1 %v2101_v32, %s3418_s22  ;;  %v3204_v36 = vpop.f32.mrb[63].mxu1 }
0x1d2e   :  { %v2115_v43 = vpop.permute.xlu1 %2114 }
0x1d8b   :  { %v2055_v27 = vpop.f32.mrb[60].mxu0 }
0x1d8c   :  { %v2056_v54 = vadd.f32 %v3396_v52, %v2055_v27  ;;  %v3195_v33 = vpop.f32.mrb[61].mxu0 }
0x1d8d   :  { %v2058_v21 = vpop.f32.mrb[62].mxu0  ;;  %v3397_v33 = vld [vmem:[%s4271_s11] sm:$0xff]  }
0x1d8e   :  { %v2106_v29 = vadd.f32 %v2101_v32, %v2056_v54  ;;  %v3196_v39 = vpop.f32.mrb[63].mxu0 }
0x1d8f   :  { %v3399_v39 = vld [vmem:[%s4271_s11 + $0x8] sm:$0xff]  }
0x1d90   :  { %v2832_v41 = vmul.f32 -1.442695, %v2106_v29  ;;  %v3398_v29 = vld [vmem:[%s4270_s9] sm:$0xff]  }
0x1d92   :  { %3360 = vpow2.f32 %v2832_v41  ;;  %v3400_v41 = vld [vmem:[%s4270_s9 + $0x8] sm:$0xff]  }
0x1d9c   :  { %v3361_v42 = vpop.eup %3360 }
0x1d9d   :  { %v2110_v10 = vadd.f32 1.0, %v3361_v42  ;;  %v3401_v42 = vld [vmem:[%s4270_s9 + $0x10] sm:$0xff]  }
0x1d9f   :  { %3362 = vrcp.f32 %v2110_v10  ;;  %v3402_v10 = vld [vmem:[%s4270_s9 + $0x18] sm:$0xff]  }
0x1da9   :  { %v3363_v40 = vpop.eup %3362 }
0x1daa   :  { %v2117_v28 = vmul.f32 %v3363_v40, %v2115_v43  ;;  %v2124_v49 = vsub.f32 1.0, %v3363_v40  ;;  %v2130_v56 = vmul.f32 %v3363_v40, %v3913_v63 }
0x1dac   :  { %2119 = vrot.lane.b32.xlu0 %v2117_v28, %s3418_s22 }
0x1e1e   :  { %v2120_v48 = vpop.permute.xlu0 %2119 }
0x1e1f   :  { %v2122_v5 = vadd.f32 %v2120_v48, %v2056_v54 }
0x1e21   :  { %3364 = vtanh.f32 %v2122_v5 }
0x1e2b   :  { %v3365_v22 = vpop.eup %3364 }
0x1e2c   :  { %2126 = vrot.lane.b32.xlu1 %v3365_v22, %s3419_s25 }
0x1e9e   :  { %v2127_v51 = vpop.permute.xlu1 %2126 }
0x1e9f   :  { %v2129_v34 = vmul.f32 %v2127_v51, %v2124_v49 }
0x1ea1   :  { %v2131_v44 = vadd.f32 %v2130_v56, %v2129_v34 }
0x1ea3   :  { %v2132_v50 = vpack.c.bf16 %v2131_v44, %v2131_v44 }
0x1ea5   :  { %v2140_v62 = vrot.slane %v2132_v50, %v3650_v3 }
0x1ea7   :  { %v2147_v55 = vrot.slane %v2140_v62, %v3650_v3 }
0x1ea9   :  { %v2833_v7 = vpack.i.b16 %v2147_v55, %v2147_v55  ;;  %v2149_v6 = vunpack.i.h.s16 %v2147_v55 }
0x1eab   :  { %v2154_v47 = vrot.slane %v2833_v7, %v3661_v12  ;;  %v2200_v8 = vpack.i.b16 %v2149_v6, %v2149_v6  ;;  %v3403_v7 = vld [vmem:[%s4271_s11 + $0x10] sm:$0xff]   ;;  %v3404_v6 = vld [vmem:[%s4271_s11 + $0x18] sm:$0xff]  }
0x1ead   :  { %2155 = vrot.lane.b32.xlu1 %v2154_v47, %s3419_s25  ;;  %v2204_v15 = vrot.slane %v2200_v8, %v3661_v12  ;;  %v3405_v8 = vld [vmem:[%s4273_s10] ss:$0 sm:$0xff] }
0x1eaf   :  { %2205 = vrot.lane.b32.xlu0 %v2204_v15, %s3419_s25 }
0x1f1f   :  { %v2156_v11 = vpop.permute.xlu1 %2155 }
0x1f20   :  { %3208 = vmatmul.mubr.msk.bf16.vlgmr.msra.gmra.mrb[64].mxu0 %vm144_vm1, %v2156_v11 }
0x1f21   :  { %v2206_v63 = vpop.permute.xlu0 %2205  ;;  %3218 = vmatpush3.bf16.msra.mxu0 %v3685_v46  ;;  %3219 = vmatprep.mubr.msk.bf16.mxu0 %vm3417_vm0, %v3416_v0 }
0x1f22   :  { %3214 = vmatmul.mubr.msk.bf16.vlgmr.msra.gmra.mrb[64].mxu1 %vm144_vm1, %v2206_v63  ;;  %3229 = vmatprep.subr.bf16.mxu0 %v3416_v0 }
0x1f23   :  { %3224 = vmatpush3.bf16.msra.mxu1 %v3680_v45  ;;  %3225 = vmatprep.mubr.msk.bf16.mxu1 %vm3417_vm0, %v3416_v0  ;;  %v2460_v45 = vpack.c.bf16 %v4012_v61, %v4012_v61 }
0x1f24   :  { %3241 = vmatprep.subr.bf16.mxu1 %v3416_v0 }
0x1ff3   :  { %v2194_v30 = vpop.f32.mrb[64].mxu0 }
0x1ff4   :  { %v3209_v57 = vpop.f32.mrb[65].mxu0  ;;  %v2250_v13 = vsel %vm525_vm3, %v2194_v30, -inf }
0x1ff5   :  { %v2244_v4 = vpop.f32.mrb[64].mxu1  ;;  %2251 = vmax.xlane.f32.xlu1 %v2250_v13  ;;  %v2197_v46 = vpop.f32.mrb[66].mxu0  ;;  %v3406_v13 = vld [vmem:[%s4272_s12] sm:$0xff]  }
0x1ff6   :  { %v3210_v14 = vpop.f32.mrb[67].mxu0  ;;  %v3215_v26 = vpop.f32.mrb[65].mxu1  ;;  %v2253_v17 = vsel %vm525_vm3, %v2244_v4, -inf }
0x1ff7   :  { %2254 = vmax.xlane.f32.xlu0 %v2253_v17  ;;  %v2247_v18 = vpop.f32.mrb[66].mxu1  ;;  %v3408_v14 = vld [vmem:[%s4272_s12 + $0x10] sm:$0xff]   ;;  %v3409_v26 = vld [vmem:[%s4272_s12 + $0x18] sm:$0xff]  }
0x1ff8   :  { %v3216_v38 = vpop.f32.mrb[67].mxu1 }
0x2006   :  { %2361 = vrot.lane.b32.xlu1 %v2131_v44, %s3419_s25 }
0x200a   :  { %2462 = vrot.lane.b32.xlu1 %v2460_v45, %s3419_s25 }
0x2082   :  { %v2252_v2 = vpop.xlane.xlu1 %2251 }
0x2083   :  { %v2256_v59 = vsub.f32 %v2194_v30, %v2252_v2 }
0x2084   :  { %v2255_v24 = vpop.xlane.xlu0 %2254 }
0x2085   :  { %v2257_v25 = vsub.f32 %v2244_v4, %v2255_v24  ;;  %v2258_v60 = vmul.f32 1.442695, %v2256_v59  ;;  %v3407_v4 = vld [vmem:[%s4272_s12 + $0x8] sm:$0xff]   ;;  %v3410_v59 = vld [vmem:[%s4275_s14] ss:$0 sm:$0xff] }
0x2086   :  { %v2362_v44 = vpop.permute.xlu1 %2361 }
0x2087   :  { %v2260_v20 = vmul.f32 1.442695, %v2257_v25 }
0x2089   :  { %3366 = vpow2.f32 %v2260_v20 }
0x208a   :  { %3368 = vpow2.f32 %v2258_v60  ;;  %v2463_v46 = vpop.permute.xlu1 %2462 }
0x2093   :  { %v3367_v1 = vpop.eup %3366 }
0x2094   :  { %v2265_v31 = vsel %vm525_vm3, %v3367_v1, 0.0  ;;  %v3369_v9 = vpop.eup %3368 }
0x2095   :  { %2266 = vadd.xlane.f32.xlu0 %v2265_v31  ;;  %v2262_v53 = vsel %vm525_vm3, %v3369_v9, 0.0 }
0x2099   :  { %2263 = vadd.xlane.f32.xlu0 %v2262_v53 }
0x2122   :  { %v2267_v32 = vpop.xlane.xlu0 %2266 }
0x2123   :  { %3370 = vrcp.f32 %v2267_v32 }
0x2126   :  { %v2264_v35 = vpop.xlane.xlu0 %2263 }
0x2127   :  { %3372 = vrcp.f32 %v2264_v35 }
0x212d   :  { %v3371_v23 = vpop.eup %3370 }
0x212e   :  { %v2271_v36 = vmul.f32 %v3371_v23, %v3367_v1  ;;  %v3411_v1 = vld [vmem:[%s4276_s13] ss:$0 sm:$0xff] }
0x2130   :  { %v2273_v27 = vpack.c.bf16 %v2271_v36, %v2271_v36 }
0x2131   :  { %v3373_v52 = vpop.eup %3372 }
0x2132   :  { %v2270_v54 = vmul.f32 %v3373_v52, %v3369_v9  ;;  %3226 = vmatmul.mubr.msk.bf16.vlgmr.msra.gmra.mrb[68].mxu1 %vm550_vm5, %v2273_v27  ;;  %v2582_v52 = vpack.c.bf16 %v4032_v37, %v4032_v37 }
0x2133   :  { %3242 = vmatpush3.bf16.msra.mxu1 %v3397_v33  ;;  %3245 = vmatprep.mubr.msk.bf16.mxu1 %vm3417_vm0, %v3416_v0 }
0x2134   :  { %v2272_v21 = vpack.c.bf16 %v2270_v54, %v2270_v54  ;;  %3243 = vmatprep.subr.bf16.mxu1 %v3416_v0 }
0x2136   :  { %3220 = vmatmul.mubr.msk.bf16.vlgmr.msra.gmra.mrb[68].mxu0 %vm550_vm5, %v2272_v21 }
0x2137   :  { %3230 = vmatpush3.bf16.msra.mxu0 %v3398_v29  ;;  %3237 = vmatprep.mubr.msk.bf16.mxu0 %vm3417_vm0, %v3416_v0 }
0x2138   :  { %3231 = vmatprep.subr.bf16.mxu0 %v3416_v0  ;;  %3244 = vmatpush3.bf16.msra.mxu1 %v3399_v39 }
0x2139   :  { %3249 = vmatprep.subr.bf16.mxu1 %v3416_v0 }
0x213b   :  { %3232 = vmatpush3.bf16.msra.mxu0 %v3400_v41 }
0x213c   :  { %3233 = vmatprep.subr.bf16.mxu0 %v3416_v0 }
0x213f   :  { %3234 = vmatpush3.bf16.msra.mxu0 %v3401_v42 }
0x2140   :  { %3235 = vmatprep.subr.bf16.mxu0 %v3416_v0 }
0x2143   :  { %3236 = vmatpush3.bf16.msra.mxu0 %v3402_v10 }
0x2144   :  { %3257 = vmatprep.subr.bf16.mxu0 %v3416_v0 }
0x2205   :  { %v2354_v40 = vpop.f32.mrb[68].mxu1 }
0x2206   :  { %v3227_v43 = vpop.f32.mrb[69].mxu1  ;;  %v2366_v48 = vrot.slane %v2354_v40, 7 }
0x2207   :  { %v2357_v28 = vpop.f32.mrb[70].mxu1 }
0x2208   :  { %v3228_v5 = vpop.f32.mrb[71].mxu1  ;;  %v3412_v28 = vld [vmem:[%s4275_s14 + $0x1] ss:$0 sm:$0xff] }
0x2209   :  { %v2311_v22 = vpop.f32.mrb[68].mxu0 }
0x220a   :  { %v3221_v49 = vpop.f32.mrb[69].mxu0  ;;  %v2367_v51 = vsel %vm649_vm6, %v2366_v48, %v2311_v22 }
0x220b   :  { %2368 = vrot.lane.b32.xlu0 %v2367_v51, %s3420_s26  ;;  %v2314_v56 = vpop.f32.mrb[70].mxu0 }
0x220c   :  { %v3222_v34 = vpop.f32.mrb[71].mxu0 }
0x227d   :  { %v2369_v50 = vpop.permute.xlu0 %2368 }
0x227e   :  { %v2371_v62 = vsel %vm144_vm1, %v2362_v44, %v2369_v50  ;;  %v3414_v44 = vld [vmem:[%s4277_s15 + $0x8] sm:$0xff]  }
0x227f   :  { %v2372_v55 = vpack.c.bf16 %v2371_v62, %v2371_v62  ;;  %v3415_v62 = vld [vmem:[%s4276_s13 + $0x1] ss:$0 sm:$0xff] }
0x2281   :  { %3238 = vmatmul.mubr.msk.bf16.vlgmr.msra.gmra.mrb[72].mxu0 %vm686_vm7, %v2372_v55 }
0x2282   :  { %3258 = vmatpush3.bf16.msra.mxu0 %v3403_v7  ;;  %3261 = vmatprep.mubr.msk.bf16.mxu0 %vm3417_vm0, %v3416_v0 }
0x2283   :  { %3259 = vmatprep.subr.bf16.mxu0 %v3416_v0 }
0x2286   :  { %3260 = vmatpush3.bf16.msra.mxu0 %v3404_v6 }
0x2287   :  { %3273 = vmatprep.subr.bf16.mxu0 %v3416_v0 }
0x2354   :  { %v2410_v47 = vpop.f32.mrb[72].mxu0 }
0x2355   :  { %v4182_v15 = vadd.f32 %v3405_v8, %v2410_v47  ;;  %v3239_v11 = vpop.f32.mrb[73].mxu0 }
0x2356   :  { %v2413_v63 = vpop.f32.mrb[74].mxu0 }
0x2357   :  { %v2416_v30 = vpack.c.bf16 %v4182_v15, %v4182_v15  ;;  %v3240_v57 = vpop.f32.mrb[75].mxu0 }
0x2359   :  { %3246 = vmatmul.mubr.msk.bf16.vlgmr.msra.gmra.mrb[72].mxu1 %vm144_vm1, %v2416_v30 }
0x235a   :  { %3250 = vmatpush3.bf16.msra.mxu1 %v3406_v13  ;;  %3253 = vmatprep.mubr.msk.bf16.mxu1 %vm3417_vm0, %v3416_v0 }
0x235b   :  { %3251 = vmatprep.subr.bf16.mxu1 %v3416_v0 }
0x235e   :  { %3252 = vmatpush3.bf16.msra.mxu1 %v3407_v4 }
0x235f   :  { %3265 = vmatprep.subr.bf16.mxu1 %v3416_v0 }
0x2361   :  { %3254 = vmatmul.mubr.msk.bf16.vlgmr.msra.gmra.mrb[76].mxu1 %vm144_vm1, %v2463_v46 }
0x2362   :  { %3266 = vmatpush3.bf16.msra.mxu1 %v3408_v14  ;;  %3269 = vmatprep.mubr.msk.bf16.mxu1 %vm3417_vm0, %v3416_v0 }
0x2363   :  { %3267 = vmatprep.subr.bf16.mxu1 %v3416_v0 }
0x2366   :  { %3268 = vmatpush3.bf16.msra.mxu1 %v3409_v26 }
0x242c   :  { %v2454_v17 = vpop.f32.mrb[72].mxu1 }
0x242d   :  { %v3247_v18 = vpop.f32.mrb[73].mxu1  ;;  %v2455_v31 = vadd.f32 %v3411_v1, %v2454_v17 }
0x242e   :  { %v2457_v38 = vpop.f32.mrb[74].mxu1 }
0x242f   :  { %v3248_v45 = vpop.f32.mrb[75].mxu1 }
0x2434   :  { %v2501_v2 = vpop.f32.mrb[76].mxu1 }
0x2435   :  { %v2502_v24 = vadd.f32 %v3410_v59, %v2501_v2  ;;  %v3255_v25 = vpop.f32.mrb[77].mxu1 }
0x2436   :  { %v2504_v60 = vpop.f32.mrb[78].mxu1 }
0x2437   :  { %2515 = vrot.lane.b32.xlu1 %v2502_v24, %s3418_s22  ;;  %v3256_v20 = vpop.f32.mrb[79].mxu1  ;;  %v2507_v9 = vadd.f32 %v2502_v24, %v2455_v31 }
0x2439   :  { %v2841_v53 = vmul.f32 -1.442695, %v2507_v9 }
0x243b   :  { %3374 = vpow2.f32 %v2841_v53 }
0x2445   :  { %v3375_v32 = vpop.eup %3374 }
0x2446   :  { %v2511_v35 = vadd.f32 1.0, %v3375_v32 }
0x2448   :  { %3376 = vrcp.f32 %v2511_v35 }
0x2452   :  { %v3377_v23 = vpop.eup %3376 }
0x2453   :  { %v2525_v39 = vsub.f32 1.0, %v3377_v23  ;;  %v2531_v42 = vmul.f32 %v3377_v23, %v4012_v61  ;;  %v3413_v61 = vld [vmem:[%s4277_s15] sm:$0xff]  }
0x24a9   :  { %v2516_v36 = vpop.permute.xlu1 %2515 }
0x24aa   :  { %v2518_v27 = vmul.f32 %v3377_v23, %v2516_v36 }
0x24ac   :  { %2520 = vrot.lane.b32.xlu0 %v2518_v27, %s3418_s22 }
0x24b0   :  { %2584 = vrot.lane.b32.xlu0 %v2582_v52, %s3419_s25 }
0x251e   :  { %v2521_v54 = vpop.permute.xlu0 %2520 }
0x251f   :  { %v2523_v33 = vadd.f32 %v2521_v54, %v2455_v31 }
0x2521   :  { %3378 = vtanh.f32 %v2523_v33 }
0x2522   :  { %v2585_v21 = vpop.permute.xlu0 %2584 }
0x2523   :  { %3270 = vmatmul.mubr.msk.bf16.vlgmr.msra.gmra.mrb[80].mxu1 %vm144_vm1, %v2585_v21 }
0x252b   :  { %v3379_v29 = vpop.eup %3378 }
0x252c   :  { %2527 = vrot.lane.b32.xlu1 %v3379_v29, %s3419_s25 }
0x259e   :  { %v2528_v41 = vpop.permute.xlu1 %2527 }
0x259f   :  { %v2530_v10 = vmul.f32 %v2528_v41, %v2525_v39 }
0x25a1   :  { %v2532_v40 = vadd.f32 %v2531_v42, %v2530_v10 }
0x25a3   :  { %2534 = vrot.lane.b32.xlu1 %v2532_v40, %s3419_s25 }
0x25f6   :  { %v2623_v43 = vpop.f32.mrb[80].mxu1 }
0x25f7   :  { %v2624_v48 = vadd.f32 %v3412_v28, %v2623_v43  ;;  %v3271_v5 = vpop.f32.mrb[81].mxu1 }
0x25f8   :  { %v2626_v22 = vpop.f32.mrb[82].mxu1 }
0x25f9   :  { %2637 = vrot.lane.b32.xlu0 %v2624_v48, %s3418_s22  ;;  %v3272_v49 = vpop.f32.mrb[83].mxu1 }
0x2615   :  { %v2535_v51 = vpop.permute.xlu1 %2534 }
0x2616   :  { %v2537_v56 = vadd.f32 %v2535_v51, %v4182_v15 }
0x2618   :  { %v2538_v34 = vpack.c.bf16 %v2537_v56, %v2537_v56 }
0x261a   :  { %3262 = vmatmul.mubr.msk.bf16.vlgmr.msra.gmra.mrb[76].mxu0 %vm144_vm1, %v2538_v34 }
0x261b   :  { %3274 = vmatpush3.bf16.msra.mxu0 %v3413_v61  ;;  %3277 = vmatprep.mubr.msk.bf16.mxu0 %vm3417_vm0, %v3416_v0 }
0x261c   :  { %3275 = vmatprep.subr.bf16.mxu0 %v3416_v0 }
0x261f   :  { %3276 = vmatpush3.bf16.msra.mxu0 %v3414_v44 }
0x266b   :  { %v2638_v30 = vpop.permute.xlu0 %2637 }
0x26ed   :  { %v2576_v50 = vpop.f32.mrb[76].mxu0 }
0x26ee   :  { %v2577_v55 = vadd.f32 %v3415_v62, %v2576_v50  ;;  %v3263_v7 = vpop.f32.mrb[77].mxu0 }
0x26ef   :  { %v2579_v6 = vpop.f32.mrb[78].mxu0 }
0x26f0   :  { %v2629_v47 = vadd.f32 %v2624_v48, %v2577_v55  ;;  %v3264_v8 = vpop.f32.mrb[79].mxu0 }
0x26f2   :  { %v2844_v15 = vmul.f32 -1.442695, %v2629_v47 }
0x26f4   :  { %3380 = vpow2.f32 %v2844_v15 }
0x26fe   :  { %v3381_v11 = vpop.eup %3380 }
0x26ff   :  { %v2633_v63 = vadd.f32 1.0, %v3381_v11 }
0x2701   :  { %3382 = vrcp.f32 %v2633_v63 }
0x270b   :  { %v3383_v0 = vpop.eup %3382 }
0x270c   :  { %v2640_v57 = vmul.f32 %v3383_v0, %v2638_v30  ;;  %v2647_v14 = vsub.f32 1.0, %v3383_v0  ;;  %v2653_v17 = vmul.f32 %v3383_v0, %v4032_v37 }
0x270e   :  { %2642 = vrot.lane.b32.xlu1 %v2640_v57, %s3418_s22 }
0x2780   :  { %v2643_v13 = vpop.permute.xlu1 %2642 }
0x2781   :  { %v2645_v4 = vadd.f32 %v2643_v13, %v2577_v55 }
0x2783   :  { %3384 = vtanh.f32 %v2645_v4 }
0x278d   :  { %v3385_v46 = vpop.eup %3384 }
0x278e   :  { %2649 = vrot.lane.b32.xlu0 %v3385_v46, %s3419_s25 }
0x2800   :  { %v2650_v26 = vpop.permute.xlu0 %2649 }
0x2801   :  { %v2652_v18 = vmul.f32 %v2650_v26, %v2647_v14 }
0x2803   :  { %v2654_v38 = vadd.f32 %v2653_v17, %v2652_v18 }
0x2805   :  { %2656 = vrot.lane.b32.xlu1 %v2654_v38, %s3419_s25 }
0x2877   :  { %v2657_v45 = vpop.permute.xlu1 %2656 }
0x2878   :  { %v2659_v2 = vadd.f32 %v2657_v45, %v2537_v56 }
0x287a   :  { %v2660_v59 = vpack.c.bf16 %v2659_v2, %v2659_v2 }
0x287c   :  { %3278 = vmatmul.mubr.msk.bf16.vlgmr.msra.gmra.mrb[80].mxu0 %vm144_vm1, %v2660_v59 }
0x294f   :  { %v2698_v24 = vpop.f32.mrb[80].mxu0 }
0x2950   :  { %v2699_v25 = vadd.f32 %v4057_v19, %v2698_v24  ;;  %v3279_v60 = vpop.f32.mrb[81].mxu0 }
0x2951   :  { %v2701_v20 = vpop.f32.mrb[82].mxu0 }
0x2952   :  { %v2711_v1 = vrot.slane %v2699_v25, %v3650_v3  ;;  %v3280_v31 = vpop.f32.mrb[83].mxu0 }
0x2954   :  { %v2712_v9 = vcombine.high %v2711_v1, %v2711_v1  ;;  %v2719_v37 = vrot.slane %v2711_v1, %v3650_v3 }
0x2956   :  { %v2726_v53 = vrot.slane %v2712_v9, %v3650_v3  ;;  %v2740_v32 = vrot.slane %v2719_v37, %v3661_v12 }
0x2958   :  { %v2744_v35 = vrot.slane %v2726_v53, %v3661_v12  ;;  %v2751_v23 = vsel %vm2750_vm9, %v4079_v16, %v2740_v32 }
0x2959   :  { %2754 = vst.msk [vmem:[%s4279_s20] sm:$0x7] %vm2753_vm10, %v2751_v23 }
0x295a   :  { %v2752_v19 = vsel %vm2750_vm9, %v4082_v58, %v2744_v35 }
0x295b   :  { %2755 = vst.msk [vmem:[%s4279_s20 + $0x4] sm:$0x7] %vm2753_vm10, %v2752_v19 }

// kernel: run.3
= control target key start
LH: loop header
LB: loop body
LE: loop exit
PB: predicated region body
PF: predicated region fallthrough
CT: control target
= control target key end

     0   :  { %vm84_vm0 = vcmask 1043456   ;;  %v3775_v0 = vmov 0.0   ;;  %vm3776_vm1 = vmmov 0   ;;  %vm80_vm2 = vcmask 64512   ;;  %s3779_s26 = smov 32   ;;  %s3783_s24 = smov 96   ;;  %s4726_s1 = inlined_call_operand.vmem [shape: bf16[8,32], index: 1, kind: input, shape index: {}]   ;;  %s4727_s0 = inlined_call_operand.vmem [shape: f32[2,8,8], index: 0, kind: input, shape index: {}]   ;;  %s4728_s3 = inlined_call_operand.vmem [shape: bf16[32,16], index: 3, kind: input, shape index: {}]   ;;  %s4729_s2 = inlined_call_operand.vmem [shape: f32[1,32], index: 2, kind: input, shape index: {}]   ;;  %s4730_s5 = inlined_call_operand.vmem [shape: bf16[64,64], index: 5, kind: input, shape index: {}]   ;;  %s4731_s4 = inlined_call_operand.vmem [shape: f32[1,16], index: 4, kind: input, shape index: {}]   ;;  %s4732_s7 = inlined_call_operand.vmem [shape: bf16[192,16], index: 7, kind: input, shape index: {}]   ;;  %s4733_s6 = inlined_call_operand.vmem [shape: f32[1,64], index: 6, kind: input, shape index: {}]   ;;  %s4734_s9 = inlined_call_operand.vmem [shape: bf16[48,16], index: 9, kind: input, shape index: {}]   ;;  %s4735_s8 = inlined_call_operand.vmem [shape: f32[1,16], index: 8, kind: input, shape index: {}]   ;;  %s4736_s11 = inlined_call_operand.vmem [shape: bf16[4,16,32], index: 11, kind: input, shape index: {}]   ;;  %s4737_s10 = inlined_call_operand.vmem [shape: f32[1,16], index: 10, kind: input, shape index: {}]   ;;  %s4738_s12 = inlined_call_operand.vmem [shape: f32[4,1,32], index: 12, kind: input, shape index: {}]   ;;  %s4739_s13 = inlined_call_operand.vmem [shape: bf16[16,96], index: 13, kind: input, shape index: {}]   ;;  %s4740_s15 = inlined_call_operand.vmem [shape: bf16[16,48], index: 15, kind: input, shape index: {}]   ;;  %s4741_s17 = inlined_call_operand.vmem [shape: bf16[16,48], index: 17, kind: input, shape index: {}]   ;;  %s4742_s18 = inlined_call_operand.vmem [shape: f32[1,48], index: 18, kind: input, shape index: {}]   ;;  %s4743_s14 = inlined_call_operand.vmem [shape: f32[1,96], index: 14, kind: input, shape index: {}]   ;;  %s4744_s16 = inlined_call_operand.vmem [shape: f32[1,48], index: 16, kind: input, shape index: {}]   ;;  %s4745_s19 = inlined_call_operand.vmem [shape: bf16[2,8,32], index: 19, kind: output, shape index: {}]  }
   0x1   :  { %4748 = sst [smem:[#allocation2_spill]] %s4726_s1  ;;  %3307 = vmatprep.subr.bf16.mxu0 %v3775_v0  ;;  %3309 = vmatprep.mubr.msk.bf16.mxu0 %vm3776_vm1, %v3775_v0  ;;  %vm161_vm3 = vcmask 261120   ;;  %v3521_v18 = vld [vmem:[%s4730_s5] sm:$0xff]   ;;  %v3522_v19 = vld [vmem:[%s4730_s5 + $0x8] sm:$0xff]   ;;  %vm214_vm4 = vcmask 1041408   ;;  %v3523_v30 = vld [vmem:[%s4730_s5 + $0x10] sm:$0xff]  }
   0x2   :  { %4749 = sst [smem:[#allocation3_spill]] %s4727_s0  ;;  %s4752_s20 = sld [smem:[#allocation2_spill]]  ;;  %3313 = vmatprep.subr.bf16.mxu1 %v3775_v0  ;;  %3317 = vmatprep.mubr.msk.bf16.mxu1 %vm3776_vm1, %v3775_v0  ;;  %v3128_v20 = vld [vmem:[%s4731_s4] ss:$0 sm:$0xff]  ;;  %v3524_v40 = vld [vmem:[%s4730_s5 + $0x18] sm:$0xff]   ;;  %vm249_vm5 = vcmask 1044480  }
   0x3   :  { %4750 = sst [smem:[#allocation4_spill]] %s4728_s3  ;;  %s4753_s22 = sld [smem:[#allocation3_spill]]  ;;  %vm223_vm6 = vcmask 1046528   ;;  %vm236_vm7 = vcmask 1045504   ;;  %vm262_vm8 = vcmask 130048   ;;  %vm267_vm9 = vcmask 392192  }
   0x4   :  { %4751 = sst [smem:[#allocation5_spill]] %s4729_s2  ;;  %s4754_s2 = sld [smem:[#allocation4_spill]]  ;;  %vm316_vm10 = vcmask 523264   ;;  %vm369_vm11 = vcmask 1040384   ;;  %vm1429_vm12 = vcmask 1041409   ;;  %vm3073_vm13 = vcmask 1042432  }
   0x5   :  { %s4755_s1 = sld [smem:[#allocation5_spill]]  ;;  %s3777_s5 = smov 48   ;;  %vm3118_vm14 = vcmask 257024  }
   0x8   :  { %v65_v1 = vld [vmem:[%s4752_s20] sm:$0xf] }
   0x9   :  { %v63_v2 = vld [vmem:[%s4753_s22] sm:$0xff]  ;;  %v64_v3 = vld [vmem:[%s4753_s22 + $0x8] sm:$0xff]  ;;  %v86_v4 = vsel %vm84_vm0, %v65_v1, 0 }
   0xa   :  { %v3240_v5 = vpack.c.bf16 %v64_v3, %v63_v2  ;;  %3308 = vmatpush3.bf16.msra.mxu0 %v86_v4  ;;  %v3519_v6 = vld [vmem:[%s4754_s2] sm:$0xff]   ;;  %v3520_v7 = vld [vmem:[%s4754_s2 + $0x8] sm:$0xff]   ;;  %s3778_s2 = smov 16  }
   0xb   :  { %3321 = vmatprep.subr.bf16.mxu0 %v3775_v0  ;;  %3314 = vmatpush3.bf16.msra.mxu1 %v3519_v6  ;;  %v3125_v8 = vld [vmem:[%s4755_s1] ss:$0 sm:$0xff] }
   0xc   :  { %3315 = vmatprep.subr.bf16.mxu1 %v3775_v0 }
   0xd   :  { %3310 = vmatmul.mubr.msk.bf16.vlgmr.msra.gmra.mrb[0].mxu0 %vm80_vm2, %v3240_v5 }
   0xe   :  { %3329 = vmatprep.mubr.msk.bf16.mxu0 %vm3776_vm1, %v3775_v0  ;;  %3322 = vmatpush3.bf16.msra.mxu0 %v3521_v18  ;;  %v3531_v18 = vld [vmem:[%s4732_s7 + $0x30] sm:$0xff]  }
   0xf   :  { %3316 = vmatpush3.bf16.msra.mxu1 %v3520_v7  ;;  %3323 = vmatprep.subr.bf16.mxu0 %v3775_v0 }
  0x12   :  { %3324 = vmatpush3.bf16.msra.mxu0 %v3522_v19  ;;  %v3532_v19 = vld [vmem:[%s4732_s7 + $0x38] sm:$0xff]  }
  0x13   :  { %3325 = vmatprep.subr.bf16.mxu0 %v3775_v0 }
  0x16   :  { %3326 = vmatpush3.bf16.msra.mxu0 %v3523_v30 }
  0x17   :  { %3327 = vmatprep.subr.bf16.mxu0 %v3775_v0 }
  0x1a   :  { %3328 = vmatpush3.bf16.msra.mxu0 %v3524_v40 }
  0x1b   :  { %3333 = vmatprep.subr.bf16.mxu0 %v3775_v0 }
  0xe0   :  { %v122_v9 = vpop.f32.mrb[0].mxu0 }
  0xe1   :  { %v123_v10 = vadd.f32 %v3125_v8, %v122_v9  ;;  %v3311_v11 = vpop.f32.mrb[1].mxu0 }
  0xe2   :  { %v125_v12 = vpop.f32.mrb[2].mxu0  ;;  %v3780_v11 = vmov 0  }
  0xe3   :  { %v126_v13 = vadd.f32 %v3125_v8, %v125_v12  ;;  %v3312_v14 = vpop.f32.mrb[3].mxu0  ;;  %v129_v15 = vmax.f32 %v123_v10, 0.0  ;;  %545 = vmatprep.subr.bf16.mxu1 %v3780_v11  ;;  %v3525_v12 = vld [vmem:[%s4732_s7] sm:$0xff]  }
  0xe4   :  { %v3527_v14 = vld [vmem:[%s4732_s7 + $0x10] sm:$0xff]  }
  0xe5   :  { %v130_v16 = vmax.f32 %v126_v13, 0.0  ;;  %v3526_v13 = vld [vmem:[%s4732_s7 + $0x8] sm:$0xff]  }
  0xe7   :  { %v3241_v17 = vpack.c.bf16 %v130_v16, %v129_v15  ;;  %v3528_v15 = vld [vmem:[%s4732_s7 + $0x18] sm:$0xff]   ;;  %v3529_v16 = vld [vmem:[%s4732_s7 + $0x20] sm:$0xff]  }
  0xe9   :  { %3318 = vmatmul.mubr.msk.bf16.vlgmr.msra.gmra.mrb[0].mxu1 %vm161_vm3, %v3241_v17  ;;  %v3530_v17 = vld [vmem:[%s4732_s7 + $0x28] sm:$0xff]  }
  0xea   :  { %546 = vmatpush1.bf16.msra.mxu1 %v3525_v12 }
  0xeb   :  { %547 = vmatprep.subr.bf16.mxu1 %v3780_v11 }
  0xee   :  { %548 = vmatpush1.bf16.msra.mxu1 %v3526_v13 }
  0xef   :  { %549 = vmatprep.subr.bf16.mxu1 %v3780_v11 }
  0xf2   :  { %550 = vmatpush1.bf16.msra.mxu1 %v3527_v14 }
  0xf3   :  { %551 = vmatprep.subr.bf16.mxu1 %v3780_v11 }
  0xf6   :  { %552 = vmatpush1.bf16.msra.mxu1 %v3528_v15  ;;  %v3537_v15 = vld [vmem:[%s4734_s9] sm:$0xff]  }
  0xf7   :  { %553 = vmatprep.subr.bf16.mxu1 %v3780_v11 }
  0xfa   :  { %554 = vmatpush1.bf16.msra.mxu1 %v3529_v16  ;;  %v3538_v16 = vld [vmem:[%s4734_s9 + $0x8] sm:$0xff]  }
  0xfb   :  { %555 = vmatprep.subr.bf16.mxu1 %v3780_v11 }
  0xfe   :  { %556 = vmatpush1.bf16.msra.mxu1 %v3530_v17  ;;  %v3140_v17 = vld [vmem:[%s4735_s8] ss:$0 sm:$0xff] }
  0xff   :  { %557 = vmatprep.subr.bf16.mxu1 %v3780_v11 }
 0x102   :  { %558 = vmatpush1.bf16.msra.mxu1 %v3531_v18 }
 0x103   :  { %559 = vmatprep.subr.bf16.mxu1 %v3780_v11 }
 0x106   :  { %560 = vmatpush1.bf16.msra.mxu1 %v3532_v19 }
 0x107   :  { %561 = vmatprep.subr.bf16.mxu1 %v3780_v11 }
 0x1bc   :  { %v199_v21 = vpop.f32.mrb[0].mxu1 }
 0x1bd   :  { %v3926_v22 = vadd.f32 %v3128_v20, %v199_v21  ;;  %v3319_v23 = vpop.f32.mrb[1].mxu1  ;;  %v3534_v21 = vld [vmem:[%s4732_s7 + $0x48] sm:$0xff]  }
 0x1be   :  { %v202_v24 = vpop.f32.mrb[2].mxu1  ;;  %v3535_v23 = vld [vmem:[%s4732_s7 + $0x50] sm:$0xff]  }
 0x1bf   :  { %v206_v25 = vmax.f32 %v3926_v22, 0.0  ;;  %v3929_v26 = vadd.f32 %v3128_v20, %v202_v24  ;;  %v3320_v27 = vpop.f32.mrb[3].mxu1  ;;  %v3533_v20 = vld [vmem:[%s4732_s7 + $0x40] sm:$0xff]  }
 0x1c0   :  { %562 = vmatpush1.bf16.msra.mxu1 %v3533_v20  ;;  %v3133_v24 = vld [vmem:[%s4733_s6] ss:$0 sm:$0xff]  ;;  %s3782_s6 = smov 112  }
 0x1c1   :  { %v210_v28 = vrot.slane %v206_v25, 6  ;;  %v207_v29 = vmax.f32 %v3929_v26, 0.0  ;;  %563 = vmatprep.subr.bf16.mxu1 %v3780_v11 }
 0x1c3   :  { %v215_v31 = vsel %vm214_vm4, 0.0, %v210_v28  ;;  %v217_v32 = vsel %vm214_vm4, %v210_v28, 0.0  ;;  %v211_v33 = vrot.slane %v207_v29, 6 }
 0x1c4   :  { %v250_v34 = vrot.slane %v215_v31, 3  ;;  %v251_v35 = vrot.slane %v217_v32, 3  ;;  %v224_v38 = vrot.slane %v215_v31, 1  ;;  %v225_v39 = vrot.slane %v217_v32, 1  ;;  %564 = vmatpush1.bf16.msra.mxu1 %v3534_v21 }
 0x1c5   :  { %v216_v36 = vsel %vm214_vm4, 0.0, %v211_v33  ;;  %v218_v37 = vsel %vm214_vm4, %v211_v33, 0.0  ;;  %v237_v47 = vrot.slane %v215_v31, 2  ;;  %v238_v48 = vrot.slane %v217_v32, 2  ;;  %565 = vmatprep.subr.bf16.mxu1 %v3780_v11 }
 0x1c6   :  { %v240_v41 = vrot.slane %v216_v36, 2  ;;  %v253_v42 = vrot.slane %v216_v36, 3  ;;  %v241_v43 = vrot.slane %v218_v37, 2  ;;  %v254_v44 = vrot.slane %v218_v37, 3 }
 0x1c7   :  { %v227_v45 = vrot.slane %v216_v36, 1  ;;  %v228_v46 = vrot.slane %v218_v37, 1  ;;  %v252_v49 = vsel %vm249_vm5, %v250_v34, %v251_v35  ;;  %v226_v51 = vsel %vm223_vm6, %v224_v38, %v225_v39 }
 0x1c8   :  { %v255_v50 = vsel %vm249_vm5, %v253_v42, %v254_v44  ;;  %v242_v55 = vsel %vm236_vm7, %v240_v41, %v241_v43  ;;  %v239_v56 = vsel %vm236_vm7, %v237_v47, %v238_v48  ;;  %566 = vmatpush1.bf16.msra.mxu1 %v3535_v23  ;;  %v3536_v48 = vld [vmem:[%s4732_s7 + $0x58] sm:$0xff]   ;;  %s3781_s7 = smov 64  }
 0x1c9   :  { %v229_v52 = vsel %vm223_vm6, %v227_v45, %v228_v46  ;;  %v3489_v53 = vpack.i.bf16 %v255_v50, %v252_v49  ;;  %v3484_v57 = vpack.i.bf16 %v242_v55, %v239_v56  ;;  %567 = vmatprep.subr.bf16.mxu1 %v3780_v11 }
 0x1ca   :  { %v3479_v54 = vpack.i.bf16 %v229_v52, %v226_v51 }
 0x1cb   :  { %3490 = vrot.lane.b32.xlu1 %v3489_v53, %s3777_s5 }
 0x1cc   :  { %3480 = vrot.lane.b32.xlu0 %v3479_v54, %s3778_s2  ;;  %568 = vmatpush1.bf16.msra.mxu1 %v3536_v48 }
 0x1cd   :  { %3367 = vmatprep.subr.bf16.mxu1 %v3775_v0 }
 0x1d0   :  { %3485 = vrot.lane.b32.xlu0 %v3484_v57, %s3779_s26 }
 0x23d   :  { %v3491_v61 = vpop.permute.xlu1 %3490 }
 0x23e   :  { %v3481_v58 = vpop.permute.xlu0 %3480  ;;  %v3493_v2 = vunpack.i.h.bf16 %v3491_v61  ;;  %v3492_v3 = vunpack.i.l.bf16 %v3491_v61 }
 0x23f   :  { %v3483_v59 = vunpack.i.h.bf16 %v3481_v58  ;;  %v3482_v60 = vunpack.i.l.bf16 %v3481_v58 }
 0x241   :  { %v264_v4 = vsel %vm262_vm8, %v216_v36, %v3483_v59  ;;  %v263_v5 = vsel %vm262_vm8, %v215_v31, %v3482_v60 }
 0x242   :  { %v3486_v62 = vpop.permute.xlu0 %3485 }
 0x243   :  { %v3488_v63 = vunpack.i.h.bf16 %v3486_v62  ;;  %v3487_v1 = vunpack.i.l.bf16 %v3486_v62 }
 0x245   :  { %v265_v6 = vsel %vm161_vm3, %v263_v5, %v3487_v1  ;;  %v266_v7 = vsel %vm161_vm3, %v264_v4, %v3488_v63 }
 0x246   :  { %v268_v8 = vsel %vm267_vm9, %v265_v6, %v3492_v3  ;;  %v269_v9 = vsel %vm267_vm9, %v266_v7, %v3493_v2 }
 0x247   :  { %v3242_v10 = vpack.c.bf16 %v269_v9, %v268_v8 }
 0x249   :  { %3330 = vmatmul.mubr.msk.bf16.vlgmr.msra.gmra.mrb[4].mxu0 %vm316_vm10, %v3242_v10 }
 0x24a   :  { %3339 = vmatprep.mubr.msk.bf16.mxu0 %vm3776_vm1, %v3775_v0  ;;  %3334 = vmatpush3.bf16.msra.mxu0 %v3537_v15 }
 0x24b   :  { %3335 = vmatprep.subr.bf16.mxu0 %v3775_v0 }
 0x24e   :  { %3336 = vmatpush3.bf16.msra.mxu0 %v3538_v16 }
 0x24f   :  { %3337 = vmatprep.subr.bf16.mxu0 %v3775_v0 }
 0x31c   :  { %v354_v27 = vpop.f32.mrb[4].mxu0 }
 0x31d   :  { %v355_v28 = vadd.f32 %v3133_v24, %v354_v27  ;;  %v3331_v30 = vpop.f32.mrb[5].mxu0 }
 0x31e   :  { %v357_v31 = vpop.f32.mrb[6].mxu0 }
 0x31f   :  { %v361_v32 = vmax.f32 %v355_v28, 0.0  ;;  %v358_v33 = vadd.f32 %v3133_v24, %v357_v31  ;;  %v3332_v34 = vpop.f32.mrb[7].mxu0  ;;  %v3539_v28 = vld [vmem:[%s4734_s9 + $0x10] sm:$0xff]  }
 0x320   :  { %3338 = vmatpush3.bf16.msra.mxu0 %v3539_v28 }
 0x321   :  { %v365_v35 = vrot.slane %v361_v32, 7  ;;  %v362_v36 = vmax.f32 %v358_v33, 0.0  ;;  %3343 = vmatprep.subr.bf16.mxu0 %v3775_v0 }
 0x323   :  { %v370_v37 = vsel %vm369_vm11, -inf, %v365_v35  ;;  %v372_v38 = vsel %vm369_vm11, %v365_v35, -inf  ;;  %v366_v39 = vrot.slane %v362_v36, 7 }
 0x324   :  { %v378_v40 = vrot.slane %v370_v37, 1  ;;  %v379_v41 = vrot.slane %v372_v38, 1 }
 0x325   :  { %v371_v42 = vsel %vm369_vm11, -inf, %v366_v39  ;;  %v373_v43 = vsel %vm369_vm11, %v366_v39, -inf }
 0x326   :  { %v380_v44 = vsel %vm223_vm6, %v378_v40, %v379_v41  ;;  %v381_v45 = vrot.slane %v371_v42, 1  ;;  %v382_v46 = vrot.slane %v373_v43, 1 }
 0x327   :  { %v386_v47 = vmax.f32 %v370_v37, %v380_v44 }
 0x328   :  { %v383_v49 = vsel %vm223_vm6, %v381_v45, %v382_v46 }
 0x329   :  { %v390_v50 = vrot.slane %v386_v47, 7  ;;  %v387_v51 = vmax.f32 %v371_v42, %v383_v49 }
 0x32b   :  { %v394_v52 = vsel %vm369_vm11, 0.0, %v390_v50  ;;  %v396_v53 = vsel %vm369_vm11, %v390_v50, 0.0  ;;  %v391_v54 = vrot.slane %v387_v51, 7 }
 0x32c   :  { %v402_v55 = vrot.slane %v394_v52, 1  ;;  %v403_v56 = vrot.slane %v396_v53, 1  ;;  %v414_v57 = vrot.slane %v394_v52, 2  ;;  %v415_v58 = vrot.slane %v396_v53, 2 }
 0x32d   :  { %v395_v59 = vsel %vm369_vm11, 0.0, %v391_v54  ;;  %v397_v60 = vsel %vm369_vm11, %v391_v54, 0.0 }
 0x32e   :  { %v405_v61 = vrot.slane %v395_v59, 1  ;;  %v406_v62 = vrot.slane %v397_v60, 1  ;;  %v417_v63 = vrot.slane %v395_v59, 2  ;;  %v418_v1 = vrot.slane %v397_v60, 2 }
 0x32f   :  { %v416_v2 = vsel %vm236_vm7, %v414_v57, %v415_v58  ;;  %v404_v4 = vsel %vm223_vm6, %v402_v55, %v403_v56 }
 0x330   :  { %v419_v3 = vsel %vm236_vm7, %v417_v63, %v418_v1  ;;  %v407_v5 = vsel %vm223_vm6, %v405_v61, %v406_v62  ;;  %v3540_v62 = vld [vmem:[%s4736_s11] sm:$0xff]  }
 0x331   :  { %v3244_v6 = vpack.c.bf16 %v419_v3, %v416_v2  ;;  %v3494_v7 = vpack.i.bf16 %v407_v5, %v404_v4  ;;  %v3156_v63 = vld [vmem:[%s4737_s10] ss:$0 sm:$0xff] }
 0x333   :  { %3155 = vmatprep.mubr.msk.bf16.mxu1 %vm316_vm10, %v3244_v6  ;;  %3495 = vrot.lane.b32.xlu1 %v3494_v7, %s3781_s7 }
 0x3a5   :  { %v3496_v8 = vpop.permute.xlu1 %3495 }
 0x3a6   :  { %v3498_v9 = vunpack.i.h.bf16 %v3496_v8  ;;  %v3497_v10 = vunpack.i.l.bf16 %v3496_v8 }
 0x3a8   :  { %v423_v12 = vsel %vm316_vm10, %v395_v59, %v3498_v9  ;;  %v422_v13 = vsel %vm316_vm10, %v394_v52, %v3497_v10  ;;  %v3162_v10 = vld [vmem:[%s4738_s12] ss:$0 sm:$0xff] }
 0x3a9   :  { %v3243_v14 = vpack.c.bf16 %v423_v12, %v422_v13 }
 0x3ab   :  { %578 = vmatmul.mubr.bf16.vlgmr.msra.gmra.mrb[4].mxu1 %v3243_v14 }
 0x3ac   :  { %3369 = vmatprep.mubr.msk.bf16.mxu1 %vm3776_vm1, %v3775_v0 }
 0x47e   :  { %v579_v18 = vpop.f32.mrb[4].mxu1 }
 0x47f   :  { %v580_v19 = vadd.f32 %v3140_v17, %v579_v18  ;;  %v581_v20 = vpop.f32.mrb[5].mxu1 }
 0x480   :  { %v582_v21 = vpop.f32.mrb[6].mxu1  ;;  %v3541_v20 = vld [vmem:[%s4736_s11 + $0x8] sm:$0xff]  }
 0x481   :  { %v586_v23 = vmax.f32 %v580_v19, 0.0  ;;  %v583_v24 = vadd.f32 %v3140_v17, %v582_v21  ;;  %v584_v27 = vpop.f32.mrb[7].mxu1 }
 0x483   :  { %v590_v30 = vrot.slane %v586_v23, 7  ;;  %v587_v31 = vmax.f32 %v583_v24, 0.0 }
 0x485   :  { %v594_v32 = vsel %vm369_vm11, 0.0, %v590_v30  ;;  %v596_v33 = vsel %vm369_vm11, %v590_v30, 0.0  ;;  %v591_v34 = vrot.slane %v587_v31, 7 }
 0x486   :  { %v602_v35 = vrot.slane %v594_v32, 1  ;;  %v603_v36 = vrot.slane %v596_v33, 1  ;;  %v614_v37 = vrot.slane %v594_v32, 2  ;;  %v615_v38 = vrot.slane %v596_v33, 2 }
 0x487   :  { %v595_v39 = vsel %vm369_vm11, 0.0, %v591_v34  ;;  %v597_v40 = vsel %vm369_vm11, %v591_v34, 0.0 }
 0x488   :  { %v605_v41 = vrot.slane %v595_v39, 1  ;;  %v606_v42 = vrot.slane %v597_v40, 1  ;;  %v617_v43 = vrot.slane %v595_v39, 2  ;;  %v618_v44 = vrot.slane %v597_v40, 2 }
 0x489   :  { %v616_v45 = vsel %vm236_vm7, %v614_v37, %v615_v38  ;;  %v604_v47 = vsel %vm223_vm6, %v602_v35, %v603_v36 }
 0x48a   :  { %v619_v46 = vsel %vm236_vm7, %v617_v43, %v618_v44  ;;  %v607_v48 = vsel %vm223_vm6, %v605_v41, %v606_v42  ;;  %v3168_v42 = vld [vmem:[%s4738_s12 + $0x1] ss:$0 sm:$0xff] }
 0x48b   :  { %v3504_v49 = vpack.i.bf16 %v619_v46, %v616_v45  ;;  %v3499_v50 = vpack.i.bf16 %v607_v48, %v604_v47 }
 0x48d   :  { %3505 = vrot.lane.b32.xlu1 %v3504_v49, %s3779_s26  ;;  %3500 = vrot.lane.b32.xlu0 %v3499_v50, %s3778_s2 }
 0x4ff   :  { %v3506_v51 = vpop.permute.xlu1 %3505  ;;  %v3501_v52 = vpop.permute.xlu0 %3500 }
 0x500   :  { %v3508_v53 = vunpack.i.h.bf16 %v3506_v51  ;;  %v3507_v54 = vunpack.i.l.bf16 %v3506_v51  ;;  %v3503_v55 = vunpack.i.h.bf16 %v3501_v52  ;;  %v3502_v56 = vunpack.i.l.bf16 %v3501_v52 }
 0x502   :  { %v627_v57 = vsel %vm262_vm8, %v595_v39, %v3503_v55  ;;  %v626_v58 = vsel %vm262_vm8, %v594_v32, %v3502_v56  ;;  %v3542_v55 = vld [vmem:[%s4736_s11 + $0x10] sm:$0xff]  }
 0x503   :  { %v629_v59 = vsel %vm161_vm3, %v627_v57, %v3508_v53  ;;  %v628_v60 = vsel %vm161_vm3, %v626_v58, %v3507_v54 }
 0x504   :  { %v3245_v61 = vpack.c.bf16 %v629_v59, %v628_v60 }
 0x506   :  { %3340 = vmatmul.mubr.msk.bf16.vlgmr.msra.gmra.mrb[8].mxu0 %vm267_vm9, %v3245_v61 }
 0x507   :  { %3345 = vmatprep.mubr.msk.bf16.mxu0 %vm3776_vm1, %v3775_v0  ;;  %3344 = vmatpush3.bf16.msra.mxu0 %v3540_v62 }
 0x508   :  { %3349 = vmatprep.subr.bf16.mxu0 %v3775_v0 }
 0x5d9   :  { %v705_v1 = vpop.f32.mrb[8].mxu0 }
 0x5da   :  { %v706_v2 = vadd.f32 %v3156_v63, %v705_v1  ;;  %v3341_v3 = vpop.f32.mrb[9].mxu0 }
 0x5db   :  { %v708_v4 = vpop.f32.mrb[10].mxu0 }
 0x5dc   :  { %v709_v5 = vadd.f32 %v3156_v63, %v708_v4  ;;  %v3342_v6 = vpop.f32.mrb[11].mxu0  ;;  %v712_v7 = vadd.f32 %v706_v2, %v206_v25 }
 0x5de   :  { %v713_v8 = vadd.f32 %v709_v5, %v207_v29 }
 0x5e0   :  { %v3246_v9 = vpack.c.bf16 %v713_v8, %v712_v7 }
 0x5e2   :  { %3346 = vmatmul.mubr.msk.bf16.vlgmr.msra.gmra.mrb[12].mxu0 %vm262_vm8, %v3246_v9 }
 0x5e3   :  { %3351 = vmatprep.mubr.msk.bf16.mxu0 %vm3776_vm1, %v3775_v0  ;;  %3350 = vmatpush3.bf16.msra.mxu0 %v3541_v20  ;;  %v3543_v20 = vld [vmem:[%s4736_s11 + $0x18] sm:$0xff]  }
 0x5e4   :  { %3355 = vmatprep.subr.bf16.mxu0 %v3775_v0 }
 0x6b5   :  { %v782_v12 = vpop.f32.mrb[12].mxu0 }
 0x6b6   :  { %v783_v13 = vadd.f32 %v3162_v10, %v782_v12  ;;  %v3347_v14 = vpop.f32.mrb[13].mxu0 }
 0x6b7   :  { %v785_v15 = vpop.f32.mrb[14].mxu0 }
 0x6b8   :  { %v3166_v16 = vmul.f32 -1.442695, %v783_v13  ;;  %v786_v22 = vadd.f32 %v3162_v10, %v785_v15  ;;  %v3348_v25 = vpop.f32.mrb[15].mxu0  ;;  %v789_v32 = vmax.f32 %v783_v13, 0.0  ;;  %v3174_v10 = vld [vmem:[%s4738_s12 + $0x2] ss:$0 sm:$0xff] }
 0x6ba   :  { %3547 = vpow2.f32 %v3166_v16  ;;  %v3167_v26 = vmul.f32 -1.442695, %v786_v22  ;;  %v790_v33 = vmax.f32 %v786_v22, 0.0 }
 0x6bc   :  { %3549 = vpow2.f32 %v3167_v26 }
 0x6c4   :  { %v3548_v29 = vpop.eup %3547 }
 0x6c5   :  { %v797_v17 = vadd.f32 1.0, %v3548_v29 }
 0x6c6   :  { %v3550_v18 = vpop.eup %3549 }
 0x6c7   :  { %3551 = vrcp.f32 %v797_v17  ;;  %v798_v19 = vadd.f32 1.0, %v3550_v18 }
 0x6c9   :  { %3553 = vrcp.f32 %v798_v19 }
 0x6d1   :  { %v3552_v21 = vpop.eup %3551 }
 0x6d2   :  { %805 = vrot.lane.b32.xlu0 %v3552_v21, %s3782_s6  ;;  %v813_v24 = vsub.f32 1.0, %v3552_v21 }
 0x6d3   :  { %v3554_v23 = vpop.eup %3553 }
 0x6d4   :  { %807 = vrot.lane.b32.xlu1 %v3554_v23, %s3782_s6  ;;  %v814_v27 = vsub.f32 1.0, %v3554_v23 }
 0x6d6   :  { %817 = vrot.lane.b32.xlu0 %v813_v24, %s3782_s6 }
 0x6d8   :  { %819 = vrot.lane.b32.xlu1 %v814_v27, %s3782_s6 }
 0x744   :  { %v806_v28 = vpop.permute.xlu0 %805 }
 0x745   :  { %v811_v36 = vmul.f32 %v806_v28, %v789_v32 }
 0x746   :  { %v808_v30 = vpop.permute.xlu1 %807 }
 0x747   :  { %v812_v37 = vmul.f32 %v808_v30, %v790_v33 }
 0x748   :  { %v818_v31 = vpop.permute.xlu0 %817 }
 0x749   :  { %v823_v34 = vmul.f32 %v818_v31, %v712_v7 }
 0x74a   :  { %v820_v35 = vpop.permute.xlu1 %819 }
 0x74b   :  { %v824_v38 = vmul.f32 %v820_v35, %v713_v8  ;;  %v825_v39 = vadd.f32 %v823_v34, %v811_v36 }
 0x74d   :  { %v826_v40 = vadd.f32 %v824_v38, %v812_v37 }
 0x74f   :  { %v3247_v41 = vpack.c.bf16 %v826_v40, %v825_v39 }
 0x751   :  { %3352 = vmatmul.mubr.msk.bf16.vlgmr.msra.gmra.mrb[16].mxu0 %vm262_vm8, %v3247_v41 }
 0x752   :  { %3357 = vmatprep.mubr.msk.bf16.mxu0 %vm3776_vm1, %v3775_v0  ;;  %3356 = vmatpush3.bf16.msra.mxu0 %v3542_v55  ;;  %v3544_v55 = vld [vmem:[%s4739_s13] sm:$0xff]  }
 0x753   :  { %3361 = vmatprep.subr.bf16.mxu0 %v3775_v0  ;;  %3368 = vmatpush3.bf16.msra.mxu1 %v3544_v55 }
 0x754   :  { %3379 = vmatprep.subr.bf16.mxu1 %v3775_v0 }
 0x824   :  { %v883_v43 = vpop.f32.mrb[16].mxu0 }
 0x825   :  { %v884_v44 = vadd.f32 %v3168_v42, %v883_v43  ;;  %v3353_v45 = vpop.f32.mrb[17].mxu0 }
 0x826   :  { %v886_v46 = vpop.f32.mrb[18].mxu0 }
 0x827   :  { %v3172_v47 = vmul.f32 -1.442695, %v884_v44  ;;  %v887_v48 = vadd.f32 %v3168_v42, %v886_v46  ;;  %v3354_v49 = vpop.f32.mrb[19].mxu0  ;;  %v890_v63 = vmax.f32 %v884_v44, 0.0  ;;  %v3180_v42 = vld [vmem:[%s4738_s12 + $0x3] ss:$0 sm:$0xff] }
 0x829   :  { %3555 = vpow2.f32 %v3172_v47  ;;  %v3173_v50 = vmul.f32 -1.442695, %v887_v48  ;;  %v891_v1 = vmax.f32 %v887_v48, 0.0 }
 0x82b   :  { %3557 = vpow2.f32 %v3173_v50 }
 0x833   :  { %v3556_v51 = vpop.eup %3555 }
 0x834   :  { %v898_v52 = vadd.f32 1.0, %v3556_v51 }
 0x835   :  { %v3558_v53 = vpop.eup %3557 }
 0x836   :  { %3559 = vrcp.f32 %v898_v52  ;;  %v899_v54 = vadd.f32 1.0, %v3558_v53 }
 0x838   :  { %3561 = vrcp.f32 %v899_v54 }
 0x840   :  { %v3560_v56 = vpop.eup %3559 }
 0x841   :  { %906 = vrot.lane.b32.xlu0 %v3560_v56, %s3782_s6  ;;  %v914_v58 = vsub.f32 1.0, %v3560_v56  ;;  %v4135_v56 = vld [vmem:[%s4740_s15] sm:$0xff]  }
 0x842   :  { %v3562_v57 = vpop.eup %3561 }
 0x843   :  { %908 = vrot.lane.b32.xlu1 %v3562_v57, %s3782_s6  ;;  %v915_v59 = vsub.f32 1.0, %v3562_v57 }
 0x845   :  { %918 = vrot.lane.b32.xlu0 %v914_v58, %s3782_s6 }
 0x847   :  { %920 = vrot.lane.b32.xlu1 %v915_v59, %s3782_s6 }
 0x8b3   :  { %v907_v60 = vpop.permute.xlu0 %906 }
 0x8b4   :  { %v912_v4 = vmul.f32 %v907_v60, %v890_v63 }
 0x8b5   :  { %v909_v61 = vpop.permute.xlu1 %908 }
 0x8b6   :  { %v913_v5 = vmul.f32 %v909_v61, %v891_v1 }
 0x8b7   :  { %v919_v62 = vpop.permute.xlu0 %918 }
 0x8b8   :  { %v924_v2 = vmul.f32 %v919_v62, %v825_v39 }
 0x8b9   :  { %v921_v3 = vpop.permute.xlu1 %920 }
 0x8ba   :  { %v925_v6 = vmul.f32 %v921_v3, %v826_v40  ;;  %v926_v7 = vadd.f32 %v924_v2, %v912_v4 }
 0x8bc   :  { %v927_v8 = vadd.f32 %v925_v6, %v913_v5 }
 0x8be   :  { %v3248_v9 = vpack.c.bf16 %v927_v8, %v926_v7 }
 0x8c0   :  { %3358 = vmatmul.mubr.msk.bf16.vlgmr.msra.gmra.mrb[20].mxu0 %vm262_vm8, %v3248_v9 }
 0x8c1   :  { %3363 = vmatprep.mubr.msk.bf16.mxu0 %vm3776_vm1, %v3775_v0  ;;  %3362 = vmatpush3.bf16.msra.mxu0 %v3543_v20 }
 0x8c2   :  { %3373 = vmatprep.subr.bf16.mxu0 %v3775_v0 }
 0x993   :  { %v984_v12 = vpop.f32.mrb[20].mxu0 }
 0x994   :  { %v985_v13 = vadd.f32 %v3174_v10, %v984_v12  ;;  %v3359_v14 = vpop.f32.mrb[21].mxu0 }
 0x995   :  { %v987_v15 = vpop.f32.mrb[22].mxu0 }
 0x996   :  { %v3178_v16 = vmul.f32 -1.442695, %v985_v13  ;;  %v988_v22 = vadd.f32 %v3174_v10, %v987_v15  ;;  %v3360_v25 = vpop.f32.mrb[23].mxu0  ;;  %v991_v32 = vmax.f32 %v985_v13, 0.0  ;;  %v4152_v10 = vld [vmem:[%s4741_s17] sm:$0xff]  }
 0x998   :  { %3563 = vpow2.f32 %v3178_v16  ;;  %v3179_v26 = vmul.f32 -1.442695, %v988_v22  ;;  %v992_v33 = vmax.f32 %v988_v22, 0.0 }
 0x99a   :  { %3565 = vpow2.f32 %v3179_v26 }
 0x9a2   :  { %v3564_v29 = vpop.eup %3563 }
 0x9a3   :  { %v999_v17 = vadd.f32 1.0, %v3564_v29 }
 0x9a4   :  { %v3566_v18 = vpop.eup %3565 }
 0x9a5   :  { %3567 = vrcp.f32 %v999_v17  ;;  %v1000_v19 = vadd.f32 1.0, %v3566_v18  ;;  %v4167_v17 = vld [vmem:[%s4742_s18] ss:$0 sm:$0xff] }
 0x9a7   :  { %3569 = vrcp.f32 %v1000_v19 }
 0x9af   :  { %v3568_v21 = vpop.eup %3567 }
 0x9b0   :  { %1007 = vrot.lane.b32.xlu0 %v3568_v21, %s3782_s6  ;;  %v1015_v24 = vsub.f32 1.0, %v3568_v21 }
 0x9b1   :  { %v3570_v23 = vpop.eup %3569 }
 0x9b2   :  { %1009 = vrot.lane.b32.xlu1 %v3570_v23, %s3782_s6  ;;  %v1016_v27 = vsub.f32 1.0, %v3570_v23 }
 0x9b4   :  { %1019 = vrot.lane.b32.xlu0 %v1015_v24, %s3782_s6 }
 0x9b6   :  { %1021 = vrot.lane.b32.xlu1 %v1016_v27, %s3782_s6  ;;  %v3186_v27 = vld [vmem:[%s4743_s14] ss:$0 sm:$0xff] }
 0xa22   :  { %v1008_v28 = vpop.permute.xlu0 %1007 }
 0xa23   :  { %v1013_v36 = vmul.f32 %v1008_v28, %v991_v32 }
 0xa24   :  { %v1010_v30 = vpop.permute.xlu1 %1009 }
 0xa25   :  { %v1014_v37 = vmul.f32 %v1010_v30, %v992_v33 }
 0xa26   :  { %v1020_v31 = vpop.permute.xlu0 %1019 }
 0xa27   :  { %v1025_v34 = vmul.f32 %v1020_v31, %v926_v7 }
 0xa28   :  { %v1022_v35 = vpop.permute.xlu1 %1021 }
 0xa29   :  { %v1026_v38 = vmul.f32 %v1022_v35, %v927_v8  ;;  %v1027_v39 = vadd.f32 %v1025_v34, %v1013_v36 }
 0xa2b   :  { %v1028_v40 = vadd.f32 %v1026_v38, %v1014_v37 }
 0xa2d   :  { %v3249_v41 = vpack.c.bf16 %v1028_v40, %v1027_v39 }
 0xa2f   :  { %3364 = vmatmul.mubr.msk.bf16.vlgmr.msra.gmra.mrb[24].mxu0 %vm262_vm8, %v3249_v41 }
 0xa30   :  { %3375 = vmatprep.mubr.msk.bf16.mxu0 %vm3776_vm1, %v3775_v0  ;;  %3374 = vmatpush3.bf16.msra.mxu0 %v4135_v56 }
 0xa31   :  { %3385 = vmatprep.subr.bf16.mxu0 %v3775_v0 }
 0xa37   :  { %3376 = vmatmul.mubr.bf16.vlgmr.msra.gmra.mrb[28].mxu0 %v3780_v11 }
 0xa38   :  { %3386 = vmatpush3.bf16.msra.mxu0 %v4135_v56  ;;  %3387 = vmatprep.mubr.msk.bf16.mxu0 %vm3776_vm1, %v3775_v0 }
 0xa39   :  { %3397 = vmatprep.subr.bf16.mxu0 %v3775_v0 }
 0xb02   :  { %v1085_v43 = vpop.f32.mrb[24].mxu0 }
 0xb03   :  { %v1086_v44 = vadd.f32 %v3180_v42, %v1085_v43  ;;  %v3365_v45 = vpop.f32.mrb[25].mxu0 }
 0xb04   :  { %v1088_v46 = vpop.f32.mrb[26].mxu0 }
 0xb05   :  { %v3184_v47 = vmul.f32 -1.442695, %v1086_v44  ;;  %v1089_v48 = vadd.f32 %v3180_v42, %v1088_v46  ;;  %v3366_v49 = vpop.f32.mrb[27].mxu0  ;;  %v1092_v1 = vmax.f32 %v1086_v44, 0.0 }
 0xb07   :  { %3571 = vpow2.f32 %v3184_v47  ;;  %v3185_v50 = vmul.f32 -1.442695, %v1089_v48  ;;  %v1093_v2 = vmax.f32 %v1089_v48, 0.0 }
 0xb09   :  { %3573 = vpow2.f32 %v3185_v50 }
 0xb0a   :  { %v1251_v13 = vpop.f32.mrb[28].mxu0 }
 0xb0b   :  { %v3377_v14 = vpop.f32.mrb[29].mxu0 }
 0xb0c   :  { %v1254_v15 = vpop.f32.mrb[30].mxu0 }
 0xb0d   :  { %v3378_v16 = vpop.f32.mrb[31].mxu0 }
 0xb11   :  { %v3572_v51 = vpop.eup %3571 }
 0xb12   :  { %v1100_v52 = vadd.f32 1.0, %v3572_v51  ;;  %v4190_v51 = vld [vmem:[%s4744_s16] ss:$0 sm:$0xff] }
 0xb13   :  { %v3574_v53 = vpop.eup %3573 }
 0xb14   :  { %3575 = vrcp.f32 %v1100_v52  ;;  %v1101_v54 = vadd.f32 1.0, %v3574_v53  ;;  %v1252_v53 = vadd.f32 %v4190_v51, %v1251_v13 }
 0xb16   :  { %3577 = vrcp.f32 %v1101_v54  ;;  %v1258_v55 = vrot.slane %v1252_v53, 1 }
 0xb1e   :  { %v3576_v57 = vpop.eup %3575 }
 0xb1f   :  { %1108 = vrot.lane.b32.xlu0 %v3576_v57, %s3782_s6  ;;  %v1116_v59 = vsub.f32 1.0, %v3576_v57 }
 0xb20   :  { %v3578_v58 = vpop.eup %3577 }
 0xb21   :  { %1110 = vrot.lane.b32.xlu1 %v3578_v58, %s3782_s6  ;;  %v1117_v60 = vsub.f32 1.0, %v3578_v58 }
 0xb23   :  { %1120 = vrot.lane.b32.xlu0 %v1116_v59, %s3782_s6 }
 0xb25   :  { %1122 = vrot.lane.b32.xlu1 %v1117_v60, %s3782_s6 }
 0xb91   :  { %v1109_v61 = vpop.permute.xlu0 %1108 }
 0xb92   :  { %v1114_v5 = vmul.f32 %v1109_v61, %v1092_v1 }
 0xb93   :  { %v1111_v62 = vpop.permute.xlu1 %1110 }
 0xb94   :  { %v1115_v6 = vmul.f32 %v1111_v62, %v1093_v2 }
 0xb95   :  { %v1121_v63 = vpop.permute.xlu0 %1120 }
 0xb96   :  { %v1126_v3 = vmul.f32 %v1121_v63, %v1027_v39 }
 0xb97   :  { %v1123_v4 = vpop.permute.xlu1 %1122 }
 0xb98   :  { %v1127_v7 = vmul.f32 %v1123_v4, %v1028_v40  ;;  %v1128_v8 = vadd.f32 %v1126_v3, %v1114_v5 }
 0xb9a   :  { %v1129_v9 = vadd.f32 %v1127_v7, %v1115_v6 }
 0xb9c   :  { %v3250_v12 = vpack.c.bf16 %v1129_v9, %v1128_v8 }
 0xb9e   :  { %3370 = vmatmul.mubr.msk.bf16.vlgmr.msra.gmra.mrb[8].mxu1 %vm262_vm8, %v3250_v12 }
 0xb9f   :  { %3380 = vmatpush3.bf16.msra.mxu1 %v4152_v10  ;;  %3381 = vmatprep.mubr.msk.bf16.mxu1 %vm3776_vm1, %v3775_v0 }
 0xba0   :  { %3391 = vmatprep.subr.bf16.mxu1 %v3775_v0 }
 0xba6   :  { %3382 = vmatmul.mubr.bf16.vlgmr.msra.gmra.mrb[12].mxu1 %v3780_v11 }
 0xba7   :  { %3392 = vmatpush3.bf16.msra.mxu1 %v4152_v10  ;;  %3393 = vmatprep.mubr.msk.bf16.mxu1 %vm3776_vm1, %v3775_v0 }
 0xba8   :  { %3403 = vmatprep.subr.bf16.mxu1 %v3775_v0 }
 0xc71   :  { %v1195_v22 = vpop.f32.mrb[8].mxu1 }
 0xc72   :  { %v3371_v25 = vpop.f32.mrb[9].mxu1  ;;  %v4177_v28 = vadd.f32 %v3186_v27, %v1195_v22 }
 0xc73   :  { %v1198_v26 = vpop.f32.mrb[10].mxu1 }
 0xc74   :  { %v3372_v29 = vpop.f32.mrb[11].mxu1  ;;  %v4179_v30 = vadd.f32 %v3186_v27, %v1198_v26  ;;  %v1261_v57 = vadd.f32 %v1252_v53, %v4177_v28 }
 0xc76   :  { %v3192_v58 = vmul.f32 -1.442695, %v1261_v57  ;;  %v1262_v59 = vadd.f32 %v1258_v55, %v4179_v30 }
 0xc78   :  { %v3193_v60 = vmul.f32 -1.442695, %v1262_v59 }
 0xc79   :  { %v1357_v11 = vpop.f32.mrb[12].mxu1 }
 0xc7a   :  { %v1358_v18 = vadd.f32 %v4167_v17, %v1357_v11  ;;  %v3383_v19 = vpop.f32.mrb[13].mxu1 }
 0xc7b   :  { %v1360_v20 = vpop.f32.mrb[14].mxu1 }
 0xc7c   :  { %v1364_v21 = vrot.slane %v1358_v18, 1  ;;  %v1365_v23 = vrot.slane %v1358_v18, 2  ;;  %v3384_v24 = vpop.f32.mrb[15].mxu1 }
 0xc7e   :  { %1368 = vrot.lane.b32.xlu1 %v1365_v23, %s3777_s5  ;;  %1366 = vrot.lane.b32.xlu0 %v1364_v21, %s3777_s5 }
 0xc82   :  { %1388 = vrot.lane.b32.xlu1 %v1365_v23, %s3778_s2  ;;  %1386 = vrot.lane.b32.xlu0 %v1364_v21, %s3778_s2 }
 0xcf0   :  { %v1369_v31 = vpop.permute.xlu1 %1368  ;;  %v1367_v32 = vpop.permute.xlu0 %1366 }
 0xcf1   :  { %v1373_v33 = vadd.f32 %v1369_v31, %v4179_v30  ;;  %v1372_v34 = vadd.f32 %v1367_v32, %v4177_v28 }
 0xcf3   :  { %v3197_v35 = vmul.f32 -1.442695, %v1373_v33  ;;  %v3196_v36 = vmul.f32 -1.442695, %v1372_v34 }
 0xcf4   :  { %v1389_v42 = vpop.permute.xlu1 %1388  ;;  %v1387_v45 = vpop.permute.xlu0 %1386 }
 0xcf5   :  { %3579 = vpow2.f32 %v3197_v35 }
 0xcf6   :  { %3581 = vpow2.f32 %v3196_v36 }
 0xcff   :  { %v3580_v37 = vpop.eup %3579 }
 0xd00   :  { %v3582_v38 = vpop.eup %3581  ;;  %v1381_v39 = vadd.f32 1.0, %v3580_v37 }
 0xd01   :  { %v1380_v40 = vadd.f32 1.0, %v3582_v38 }
 0xd02   :  { %3583 = vrcp.f32 %v1381_v39 }
 0xd03   :  { %3585 = vrcp.f32 %v1380_v40 }
 0xd0c   :  { %v3584_v41 = vpop.eup %3583 }
 0xd0d   :  { %v3586_v43 = vpop.eup %3585  ;;  %v1393_v44 = vmul.f32 %v3584_v41, %v1389_v42  ;;  %v1407_v1 = vsub.f32 1.0, %v3584_v41  ;;  %v1419_v4 = vmul.f32 0.0, %v3584_v41 }
 0xd0e   :  { %v1392_v46 = vmul.f32 %v3586_v43, %v1387_v45  ;;  %v1406_v3 = vsub.f32 1.0, %v3586_v43  ;;  %v1418_v8 = vmul.f32 0.0, %v3586_v43 }
 0xd0f   :  { %1398 = vrot.lane.b32.xlu1 %v1393_v44, %s3779_s26 }
 0xd10   :  { %1396 = vrot.lane.b32.xlu0 %v1392_v46, %s3779_s26 }
 0xd81   :  { %v1399_v47 = vpop.permute.xlu1 %1398 }
 0xd82   :  { %v1403_v48 = vadd.f32 %v1399_v47, %v4179_v30  ;;  %v1397_v49 = vpop.permute.xlu0 %1396 }
 0xd83   :  { %v1402_v50 = vadd.f32 %v1397_v49, %v4177_v28 }
 0xd84   :  { %3587 = vtanh.f32 %v1403_v48 }
 0xd85   :  { %3589 = vtanh.f32 %v1402_v50 }
 0xd86   :  { %3591 = vpow2.f32 %v3192_v58 }
 0xd87   :  { %3593 = vpow2.f32 %v3193_v60 }
 0xd8e   :  { %v3588_v52 = vpop.eup %3587 }
 0xd8f   :  { %v3590_v54 = vpop.eup %3589  ;;  %1412 = vrot.lane.b32.xlu1 %v3588_v52, %s3782_s6 }
 0xd90   :  { %1410 = vrot.lane.b32.xlu0 %v3590_v54, %s3782_s6  ;;  %v3592_v61 = vpop.eup %3591 }
 0xd91   :  { %v1269_v62 = vadd.f32 1.0, %v3592_v61  ;;  %v3594_v63 = vpop.eup %3593 }
 0xd92   :  { %v1270_v7 = vadd.f32 1.0, %v3594_v63 }
 0xd93   :  { %3595 = vrcp.f32 %v1269_v62 }
 0xd94   :  { %1277 = vrot.lane.b32.xlu0 %v1258_v55, %s3783_s24  ;;  %3597 = vrcp.f32 %v1270_v7 }
 0xd98   :  { %1275 = vrot.lane.b32.xlu0 %v1252_v53, %s3783_s24 }
 0xd9d   :  { %v3596_v26 = vpop.eup %3595 }
 0xd9e   :  { %v3598_v23 = vpop.eup %3597  ;;  %v1295_v38 = vsub.f32 1.0, %v3596_v26  ;;  %v1307_v40 = vmul.f32 0.0, %v3596_v26 }
 0xd9f   :  { %v1296_v41 = vsub.f32 1.0, %v3598_v23  ;;  %v1308_v44 = vmul.f32 0.0, %v3598_v23 }
 0xe01   :  { %v1413_v2 = vpop.permute.xlu1 %1412 }
 0xe02   :  { %v1417_v5 = vmul.f32 %v1413_v2, %v1407_v1  ;;  %v1411_v6 = vpop.permute.xlu0 %1410 }
 0xe03   :  { %v1416_v9 = vmul.f32 %v1411_v6, %v1406_v3 }
 0xe04   :  { %v4199_v12 = vadd.f32 %v1419_v4, %v1417_v5 }
 0xe05   :  { %v4201_v13 = vadd.f32 %v1418_v8, %v1416_v9 }
 0xe06   :  { %v1538_v14 = vpack.c.bf16 %v4199_v12, %v4199_v12  ;;  %v1278_v15 = vpop.permute.xlu0 %1277 }
 0xe07   :  { %v1537_v16 = vpack.c.bf16 %v4201_v13, %v4201_v13  ;;  %v1282_v24 = vmul.f32 %v3598_v23, %v1278_v15 }
 0xe08   :  { %v1542_v22 = vunpack.c.l.b16 %v1538_v14 }
 0xe09   :  { %v1541_v25 = vunpack.c.l.b16 %v1537_v16 }
 0xe0a   :  { %v1276_v29 = vpop.permute.xlu0 %1275  ;;  %v1544_v11 = vrot.slane %v1542_v22, 6 }
 0xe0b   :  { %v1281_v18 = vmul.f32 %v3596_v26, %v1276_v29  ;;  %v1543_v19 = vrot.slane %v1541_v25, 7 }
 0xe0d   :  { %1285 = vrot.lane.b32.xlu0 %v1281_v18, %s3779_s26  ;;  %v1545_v20 = vsel %vm1429_vm12, %v1544_v11, %v1543_v19 }
 0xe0e   :  { %v1546_v21 = vpack.c.b16 %v1545_v20, %v1545_v20 }
 0xe10   :  { %1547 = vrot.lane.b32.xlu1 %v1546_v21, %s3781_s7 }
 0xe14   :  { %1287 = vrot.lane.b32.xlu1 %v1282_v24, %s3779_s26 }
 0xe7f   :  { %v1286_v27 = vpop.permute.xlu0 %1285 }
 0xe80   :  { %v1291_v31 = vadd.f32 %v1286_v27, %v4177_v28 }
 0xe82   :  { %3599 = vtanh.f32 %v1291_v31  ;;  %v1548_v32 = vpop.permute.xlu1 %1547 }
 0xe83   :  { %3394 = vmatmul.mubr.msk.bf16.vlgmr.msra.gmra.mrb[16].mxu1 %vm262_vm8, %v1548_v32 }
 0xe84   :  { %3404 = vmatpush3.bf16.msra.mxu1 %v4152_v10  ;;  %3405 = vmatprep.mubr.msk.bf16.mxu1 %vm3776_vm1, %v3775_v0 }
 0xe85   :  { %3415 = vmatprep.subr.bf16.mxu1 %v3775_v0 }
 0xe86   :  { %v1288_v33 = vpop.permute.xlu1 %1287 }
 0xe87   :  { %v1292_v34 = vadd.f32 %v1288_v33, %v4179_v30 }
 0xe89   :  { %3601 = vtanh.f32 %v1292_v34 }
 0xe8c   :  { %v3600_v35 = vpop.eup %3599 }
 0xe8d   :  { %1299 = vrot.lane.b32.xlu0 %v3600_v35, %s3782_s6 }
 0xe93   :  { %v3602_v36 = vpop.eup %3601 }
 0xe94   :  { %1301 = vrot.lane.b32.xlu1 %v3602_v36, %s3782_s6 }
 0xeff   :  { %v1300_v37 = vpop.permute.xlu0 %1299 }
 0xf00   :  { %v1305_v39 = vmul.f32 %v1300_v37, %v1295_v38 }
 0xf02   :  { %v4220_v43 = vadd.f32 %v1307_v40, %v1305_v39 }
 0xf04   :  { %v1422_v47 = vpack.c.bf16 %v4220_v43, %v4220_v43 }
 0xf06   :  { %v1302_v42 = vpop.permute.xlu1 %1301  ;;  %v1426_v50 = vunpack.c.l.b16 %v1422_v47 }
 0xf07   :  { %v1306_v45 = vmul.f32 %v1302_v42, %v1296_v41 }
 0xf09   :  { %v4222_v46 = vadd.f32 %v1308_v44, %v1306_v45  ;;  %v1649_v44 = vrot.slane %v4201_v13, 1 }
 0xf0b   :  { %v1423_v48 = vpack.c.bf16 %v4222_v46, %v4222_v46 }
 0xf0d   :  { %v1427_v49 = vunpack.c.l.b16 %v1423_v48  ;;  %v1650_v48 = vrot.slane %v4199_v12, 1 }
 0xf0f   :  { %v1428_v52 = vrot.slane %v1427_v49, 7 }
 0xf11   :  { %v1430_v53 = vsel %vm1429_vm12, %v1428_v52, %v1426_v50 }
 0xf12   :  { %v1431_v54 = vpack.c.b16 %v1430_v53, %v1430_v53 }
 0xf14   :  { %1432 = vrot.lane.b32.xlu1 %v1431_v54, %s3782_s6 }
 0xf56   :  { %v1586_v55 = vpop.f32.mrb[16].mxu1 }
 0xf57   :  { %v1587_v57 = vadd.f32 %v4167_v17, %v1586_v55  ;;  %v3395_v58 = vpop.f32.mrb[17].mxu1 }
 0xf58   :  { %v1589_v59 = vpop.f32.mrb[18].mxu1 }
 0xf59   :  { %v1593_v60 = vrot.slane %v1587_v57, 2  ;;  %v1594_v61 = vrot.slane %v1587_v57, 3  ;;  %v3396_v62 = vpop.f32.mrb[19].mxu1 }
 0xf5b   :  { %1595 = vrot.lane.b32.xlu0 %v1593_v60, %s3777_s5  ;;  %1597 = vrot.lane.b32.xlu1 %v1594_v61, %s3777_s5 }
 0xf5f   :  { %1615 = vrot.lane.b32.xlu0 %v1593_v60, %s3778_s2  ;;  %1617 = vrot.lane.b32.xlu1 %v1594_v61, %s3778_s2 }
 0xf86   :  { %v1433_v63 = vpop.permute.xlu1 %1432 }
 0xf87   :  { %3388 = vmatmul.mubr.msk.bf16.vlgmr.msra.gmra.mrb[32].mxu0 %vm262_vm8, %v1433_v63 }
 0xf88   :  { %3398 = vmatpush3.bf16.msra.mxu0 %v4135_v56  ;;  %3399 = vmatprep.mubr.msk.bf16.mxu0 %vm3776_vm1, %v3775_v0 }
 0xf89   :  { %3409 = vmatprep.subr.bf16.mxu0 %v3775_v0 }
 0xfcd   :  { %v1596_v1 = vpop.permute.xlu0 %1595  ;;  %v1598_v2 = vpop.permute.xlu1 %1597 }
 0xfce   :  { %v1601_v3 = vadd.f32 %v1596_v1, %v4177_v28  ;;  %v1602_v4 = vadd.f32 %v1598_v2, %v4179_v30 }
 0xfd0   :  { %v3202_v5 = vmul.f32 -1.442695, %v1601_v3  ;;  %v3203_v6 = vmul.f32 -1.442695, %v1602_v4 }
 0xfd1   :  { %v1616_v16 = vpop.permute.xlu0 %1615  ;;  %v1618_v26 = vpop.permute.xlu1 %1617 }
 0xfd2   :  { %3603 = vpow2.f32 %v3202_v5 }
 0xfd3   :  { %3605 = vpow2.f32 %v3203_v6 }
 0xfdc   :  { %v3604_v7 = vpop.eup %3603 }
 0xfdd   :  { %v3606_v8 = vpop.eup %3605  ;;  %v1609_v9 = vadd.f32 1.0, %v3604_v7 }
 0xfde   :  { %v1610_v14 = vadd.f32 1.0, %v3606_v8 }
 0xfdf   :  { %3607 = vrcp.f32 %v1609_v9 }
 0xfe0   :  { %3609 = vrcp.f32 %v1610_v14 }
 0xfe9   :  { %v3608_v15 = vpop.eup %3607 }
 0xfea   :  { %v3610_v22 = vpop.eup %3609  ;;  %v1621_v25 = vmul.f32 %v3608_v15, %v1616_v16  ;;  %v1635_v42 = vsub.f32 1.0, %v3608_v15  ;;  %v1653_v49 = vmul.f32 %v3608_v15, %v1649_v44 }
 0xfeb   :  { %v1622_v29 = vmul.f32 %v3610_v22, %v1618_v26  ;;  %v1636_v47 = vsub.f32 1.0, %v3610_v22  ;;  %v1654_v54 = vmul.f32 %v3610_v22, %v1650_v48 }
 0xfec   :  { %1625 = vrot.lane.b32.xlu0 %v1621_v25, %s3779_s26 }
 0xfed   :  { %1627 = vrot.lane.b32.xlu1 %v1622_v29, %s3779_s26 }
0x105a   :  { %v1471_v11 = vpop.f32.mrb[32].mxu0 }
0x105b   :  { %v3389_v18 = vpop.f32.mrb[33].mxu0  ;;  %v1472_v31 = vadd.f32 %v4190_v51, %v1471_v11 }
0x105c   :  { %v1474_v19 = vpop.f32.mrb[34].mxu0 }
0x105d   :  { %v3390_v20 = vpop.f32.mrb[35].mxu0  ;;  %v1478_v34 = vrot.slane %v1472_v31, 7  ;;  %v1482_v37 = vadd.f32 %v1472_v31, %v4179_v30  ;;  %v1529_v19 = vrot.slane %v4220_v43, 7 }
0x105e   :  { %v1626_v21 = vpop.permute.xlu0 %1625 }
0x105f   :  { %v1631_v23 = vadd.f32 %v1626_v21, %v4177_v28  ;;  %v1628_v24 = vpop.permute.xlu1 %1627  ;;  %v1481_v35 = vadd.f32 %v1478_v34, %v4177_v28  ;;  %v3200_v38 = vmul.f32 -1.442695, %v1482_v37 }
0x1060   :  { %v1632_v27 = vadd.f32 %v1628_v24, %v4179_v30 }
0x1061   :  { %3611 = vtanh.f32 %v1631_v23  ;;  %v3199_v36 = vmul.f32 -1.442695, %v1481_v35 }
0x1062   :  { %3613 = vtanh.f32 %v1632_v27 }
0x1063   :  { %3615 = vpow2.f32 %v3199_v36 }
0x1064   :  { %3617 = vpow2.f32 %v3200_v38 }
0x106b   :  { %v3612_v32 = vpop.eup %3611 }
0x106c   :  { %v3614_v33 = vpop.eup %3613  ;;  %1639 = vrot.lane.b32.xlu0 %v3612_v32, %s3782_s6 }
0x106d   :  { %1641 = vrot.lane.b32.xlu1 %v3614_v33, %s3782_s6  ;;  %v3616_v39 = vpop.eup %3615 }
0x106e   :  { %v1489_v40 = vadd.f32 1.0, %v3616_v39  ;;  %v3618_v41 = vpop.eup %3617 }
0x106f   :  { %v1490_v53 = vadd.f32 1.0, %v3618_v41 }
0x1070   :  { %1495 = vrot.lane.b32.xlu0 %v1478_v34, %s3783_s24  ;;  %3619 = vrcp.f32 %v1489_v40 }
0x1071   :  { %1497 = vrot.lane.b32.xlu1 %v1472_v31, %s3783_s24  ;;  %3621 = vrcp.f32 %v1490_v53  ;;  %v1530_v31 = vrot.slane %v4222_v46, 7 }
0x107a   :  { %v3620_v58 = vpop.eup %3619 }
0x107b   :  { %v3622_v8 = vpop.eup %3621  ;;  %v1515_v18 = vsub.f32 1.0, %v3620_v58  ;;  %v1533_v21 = vmul.f32 %v3620_v58, %v1529_v19 }
0x107c   :  { %v1516_v27 = vsub.f32 1.0, %v3622_v8  ;;  %v1534_v33 = vmul.f32 %v3622_v8, %v1530_v31 }
0x10de   :  { %v1640_v45 = vpop.permute.xlu0 %1639 }
0x10df   :  { %v1645_v50 = vmul.f32 %v1640_v45, %v1635_v42  ;;  %v1642_v52 = vpop.permute.xlu1 %1641 }
0x10e0   :  { %v1646_v55 = vmul.f32 %v1642_v52, %v1636_v47 }
0x10e1   :  { %v4255_v57 = vadd.f32 %v1653_v49, %v1645_v50 }
0x10e2   :  { %v4257_v59 = vadd.f32 %v1654_v54, %v1646_v55  ;;  %v1496_v60 = vpop.permute.xlu0 %1495 }
0x10e3   :  { %v1772_v61 = vpack.c.bf16 %v4255_v57, %v4255_v57  ;;  %v1501_v62 = vmul.f32 %v3620_v58, %v1496_v60  ;;  %v1498_v7 = vpop.permute.xlu1 %1497 }
0x10e4   :  { %v1773_v63 = vpack.c.bf16 %v4257_v59, %v4257_v59  ;;  %v1502_v9 = vmul.f32 %v3622_v8, %v1498_v7 }
0x10e5   :  { %v1776_v1 = vunpack.c.l.b16 %v1772_v61  ;;  %1505 = vrot.lane.b32.xlu1 %v1501_v62, %s3779_s26 }
0x10e6   :  { %v1777_v2 = vunpack.c.l.b16 %v1773_v63 }
0x10e7   :  { %v1778_v3 = vrot.slane %v1776_v1, 6 }
0x10e8   :  { %v1779_v4 = vrot.slane %v1777_v2, 5 }
0x10ea   :  { %v1780_v5 = vsel %vm1429_vm12, %v1779_v4, %v1778_v3 }
0x10eb   :  { %v1781_v6 = vpack.c.b16 %v1780_v5, %v1780_v5 }
0x10ed   :  { %1782 = vrot.lane.b32.xlu0 %v1781_v6, %s3781_s7 }
0x10f1   :  { %1507 = vrot.lane.b32.xlu0 %v1502_v9, %s3779_s26 }
0x1157   :  { %v1506_v14 = vpop.permute.xlu1 %1505 }
0x1158   :  { %v1511_v15 = vadd.f32 %v1506_v14, %v4177_v28 }
0x115a   :  { %3623 = vtanh.f32 %v1511_v15 }
0x115f   :  { %v1783_v16 = vpop.permute.xlu0 %1782 }
0x1160   :  { %3406 = vmatmul.mubr.msk.bf16.vlgmr.msra.gmra.mrb[20].mxu1 %vm262_vm8, %v1783_v16 }
0x1161   :  { %3416 = vmatpush3.bf16.msra.mxu1 %v4152_v10  ;;  %3417 = vmatprep.mubr.msk.bf16.mxu1 %vm3776_vm1, %v3775_v0 }
0x1162   :  { %3427 = vmatprep.subr.bf16.mxu1 %v3775_v0 }
0x1163   :  { %v1508_v22 = vpop.permute.xlu0 %1507 }
0x1164   :  { %v3624_v25 = vpop.eup %3623  ;;  %v1512_v26 = vadd.f32 %v1508_v22, %v4179_v30 }
0x1165   :  { %1519 = vrot.lane.b32.xlu1 %v3624_v25, %s3782_s6 }
0x1166   :  { %3625 = vtanh.f32 %v1512_v26 }
0x1170   :  { %v3626_v29 = vpop.eup %3625 }
0x1171   :  { %1521 = vrot.lane.b32.xlu0 %v3626_v29, %s3782_s6 }
0x11d7   :  { %v1520_v11 = vpop.permute.xlu1 %1519 }
0x11d8   :  { %v1525_v20 = vmul.f32 %v1520_v11, %v1515_v18 }
0x11da   :  { %v4277_v23 = vadd.f32 %v1533_v21, %v1525_v20 }
0x11dc   :  { %v1657_v24 = vpack.c.bf16 %v4277_v23, %v4277_v23 }
0x11de   :  { %v1661_v35 = vunpack.c.l.b16 %v1657_v24 }
0x11e0   :  { %v1663_v39 = vrot.slane %v1661_v35, 1 }
0x11e3   :  { %v1522_v32 = vpop.permute.xlu0 %1521 }
0x11e4   :  { %v1526_v34 = vmul.f32 %v1522_v32, %v1516_v27 }
0x11e6   :  { %v4282_v36 = vadd.f32 %v1534_v33, %v1526_v34 }
0x11e8   :  { %v1658_v37 = vpack.c.bf16 %v4282_v36, %v4282_v36 }
0x11ea   :  { %v1662_v38 = vunpack.c.l.b16 %v1658_v37 }
0x11ec   :  { %v1664_v40 = vsel %vm1429_vm12, %v1662_v38, %v1663_v39  ;;  %v1884_v38 = vrot.slane %v4255_v57, 1 }
0x11ed   :  { %v1665_v41 = vpack.c.b16 %v1664_v40, %v1664_v40 }
0x11ef   :  { %1666 = vrot.lane.b32.xlu1 %v1665_v41, %s3782_s6  ;;  %v1885_v41 = vrot.slane %v4257_v59, 1 }
0x1233   :  { %v1821_v42 = vpop.f32.mrb[20].mxu1 }
0x1234   :  { %v1822_v44 = vadd.f32 %v4167_v17, %v1821_v42  ;;  %v3407_v45 = vpop.f32.mrb[21].mxu1 }
0x1235   :  { %v1824_v47 = vpop.f32.mrb[22].mxu1 }
0x1236   :  { %v1828_v48 = vrot.slane %v1822_v44, 3  ;;  %v1829_v49 = vrot.slane %v1822_v44, 4  ;;  %v3408_v50 = vpop.f32.mrb[23].mxu1 }
0x1238   :  { %1830 = vrot.lane.b32.xlu0 %v1828_v48, %s3777_s5  ;;  %1832 = vrot.lane.b32.xlu1 %v1829_v49, %s3777_s5 }
0x123c   :  { %1850 = vrot.lane.b32.xlu0 %v1828_v48, %s3778_s2  ;;  %1852 = vrot.lane.b32.xlu1 %v1829_v49, %s3778_s2 }
0x1261   :  { %v1667_v52 = vpop.permute.xlu1 %1666 }
0x1262   :  { %3400 = vmatmul.mubr.msk.bf16.vlgmr.msra.gmra.mrb[36].mxu0 %vm262_vm8, %v1667_v52 }
0x1263   :  { %3410 = vmatpush3.bf16.msra.mxu0 %v4135_v56  ;;  %3411 = vmatprep.mubr.msk.bf16.mxu0 %vm3776_vm1, %v3775_v0 }
0x1264   :  { %3421 = vmatprep.subr.bf16.mxu0 %v3775_v0 }
0x12aa   :  { %v1831_v53 = vpop.permute.xlu0 %1830  ;;  %v1833_v54 = vpop.permute.xlu1 %1832 }
0x12ab   :  { %v1836_v55 = vadd.f32 %v1831_v53, %v4177_v28  ;;  %v1837_v58 = vadd.f32 %v1833_v54, %v4179_v30 }
0x12ad   :  { %v3208_v60 = vmul.f32 -1.442695, %v1836_v55  ;;  %v3209_v61 = vmul.f32 -1.442695, %v1837_v58 }
0x12ae   :  { %v1851_v4 = vpop.permute.xlu0 %1850  ;;  %v1853_v7 = vpop.permute.xlu1 %1852 }
0x12af   :  { %3627 = vpow2.f32 %v3208_v60 }
0x12b0   :  { %3629 = vpow2.f32 %v3209_v61 }
0x12b9   :  { %v3628_v62 = vpop.eup %3627 }
0x12ba   :  { %v3630_v63 = vpop.eup %3629  ;;  %v1844_v1 = vadd.f32 1.0, %v3628_v62 }
0x12bb   :  { %v1845_v2 = vadd.f32 1.0, %v3630_v63 }
0x12bc   :  { %3631 = vrcp.f32 %v1844_v1 }
0x12bd   :  { %3633 = vrcp.f32 %v1845_v2 }
0x12c6   :  { %v3632_v3 = vpop.eup %3631 }
0x12c7   :  { %v3634_v5 = vpop.eup %3633  ;;  %v1856_v6 = vmul.f32 %v3632_v3, %v1851_v4  ;;  %v1870_v37 = vsub.f32 1.0, %v3632_v3  ;;  %v1888_v42 = vmul.f32 %v3632_v3, %v1884_v38 }
0x12c8   :  { %v1857_v8 = vmul.f32 %v3634_v5, %v1853_v7  ;;  %v1871_v40 = vsub.f32 1.0, %v3634_v5  ;;  %v1889_v48 = vmul.f32 %v3634_v5, %v1885_v41 }
0x12c9   :  { %1860 = vrot.lane.b32.xlu0 %v1856_v6, %s3779_s26 }
0x12ca   :  { %1862 = vrot.lane.b32.xlu1 %v1857_v8, %s3779_s26 }
0x1335   :  { %v1705_v9 = vpop.f32.mrb[36].mxu0 }
0x1336   :  { %v3401_v14 = vpop.f32.mrb[37].mxu0  ;;  %v1706_v11 = vadd.f32 %v4190_v51, %v1705_v9 }
0x1337   :  { %v1708_v15 = vpop.f32.mrb[38].mxu0 }
0x1338   :  { %v3402_v16 = vpop.f32.mrb[39].mxu0  ;;  %v1712_v20 = vrot.slane %v1706_v11, 6  ;;  %v1713_v21 = vrot.slane %v1706_v11, 7 }
0x133a   :  { %v1716_v24 = vadd.f32 %v1712_v20, %v4177_v28  ;;  %v1717_v31 = vadd.f32 %v1713_v21, %v4179_v30 }
0x133b   :  { %v1861_v22 = vpop.permute.xlu0 %1860 }
0x133c   :  { %v1866_v25 = vadd.f32 %v1861_v22, %v4177_v28  ;;  %v1863_v26 = vpop.permute.xlu1 %1862  ;;  %v3205_v27 = vmul.f32 -1.442695, %v1716_v24  ;;  %v3206_v32 = vmul.f32 -1.442695, %v1717_v31  ;;  %v1765_v24 = vrot.slane %v4282_v36, 7 }
0x133d   :  { %v1867_v29 = vadd.f32 %v1863_v26, %v4179_v30  ;;  %v1764_v26 = vrot.slane %v4277_v23, 7 }
0x133e   :  { %3635 = vtanh.f32 %v1866_v25 }
0x133f   :  { %3637 = vtanh.f32 %v1867_v29 }
0x1340   :  { %3639 = vpow2.f32 %v3205_v27 }
0x1341   :  { %3641 = vpow2.f32 %v3206_v32 }
0x1348   :  { %v3636_v18 = vpop.eup %3635 }
0x1349   :  { %v3638_v19 = vpop.eup %3637  ;;  %1874 = vrot.lane.b32.xlu0 %v3636_v18, %s3782_s6 }
0x134a   :  { %1876 = vrot.lane.b32.xlu1 %v3638_v19, %s3782_s6  ;;  %v3640_v33 = vpop.eup %3639  ;;  %v3069_v19 = vsel %vm369_vm11, %v4220_v43, %v4277_v23 }
0x134b   :  { %v1724_v34 = vadd.f32 1.0, %v3640_v33  ;;  %v3642_v35 = vpop.eup %3641 }
0x134c   :  { %v1725_v47 = vadd.f32 1.0, %v3642_v35  ;;  %v3070_v35 = vsel %vm369_vm11, %v4222_v46, %v4282_v36 }
0x134d   :  { %1730 = vrot.lane.b32.xlu0 %v1712_v20, %s3783_s24  ;;  %3643 = vrcp.f32 %v1724_v34 }
0x134e   :  { %1732 = vrot.lane.b32.xlu1 %v1713_v21, %s3783_s24  ;;  %3645 = vrcp.f32 %v1725_v47 }
0x1357   :  { %v3644_v52 = vpop.eup %3643 }
0x1358   :  { %v3646_v5 = vpop.eup %3645  ;;  %v1750_v25 = vsub.f32 1.0, %v3644_v52 }
0x1359   :  { %v1751_v21 = vsub.f32 1.0, %v3646_v5  ;;  %v1769_v32 = vmul.f32 %v3646_v5, %v1765_v24 }
0x13bb   :  { %v1875_v39 = vpop.permute.xlu0 %1874 }
0x13bc   :  { %v1880_v44 = vmul.f32 %v1875_v39, %v1870_v37  ;;  %v1877_v45 = vpop.permute.xlu1 %1876 }
0x13bd   :  { %v1881_v49 = vmul.f32 %v1877_v45, %v1871_v40 }
0x13be   :  { %v4313_v50 = vadd.f32 %v1888_v42, %v1880_v44 }
0x13bf   :  { %v4315_v53 = vadd.f32 %v1889_v48, %v1881_v49  ;;  %v1731_v54 = vpop.permute.xlu0 %1730 }
0x13c0   :  { %v2008_v55 = vpack.c.bf16 %v4313_v50, %v4313_v50  ;;  %v1736_v58 = vmul.f32 %v3644_v52, %v1731_v54  ;;  %v1733_v4 = vpop.permute.xlu1 %1732 }
0x13c1   :  { %v2009_v60 = vpack.c.bf16 %v4315_v53, %v4315_v53  ;;  %v1737_v6 = vmul.f32 %v3646_v5, %v1733_v4 }
0x13c2   :  { %v2012_v61 = vunpack.c.l.b16 %v2008_v55  ;;  %1740 = vrot.lane.b32.xlu1 %v1736_v58, %s3779_s26 }
0x13c3   :  { %v2013_v62 = vunpack.c.l.b16 %v2009_v60 }
0x13c4   :  { %v2014_v63 = vrot.slane %v2012_v61, 5 }
0x13c5   :  { %v2015_v1 = vrot.slane %v2013_v62, 4 }
0x13c7   :  { %v2016_v2 = vsel %vm1429_vm12, %v2015_v1, %v2014_v63 }
0x13c8   :  { %v2017_v3 = vpack.c.b16 %v2016_v2, %v2016_v2 }
0x13ca   :  { %2018 = vrot.lane.b32.xlu0 %v2017_v3, %s3781_s7 }
0x13ce   :  { %1742 = vrot.lane.b32.xlu0 %v1737_v6, %s3779_s26 }
0x1434   :  { %v1741_v7 = vpop.permute.xlu1 %1740 }
0x1435   :  { %v1746_v8 = vadd.f32 %v1741_v7, %v4177_v28 }
0x1437   :  { %3647 = vtanh.f32 %v1746_v8 }
0x143c   :  { %v2019_v9 = vpop.permute.xlu0 %2018 }
0x143d   :  { %3418 = vmatmul.mubr.msk.bf16.vlgmr.msra.gmra.mrb[24].mxu1 %vm262_vm8, %v2019_v9 }
0x143e   :  { %3428 = vmatpush3.bf16.msra.mxu1 %v4152_v10  ;;  %3429 = vmatprep.mubr.msk.bf16.mxu1 %vm3776_vm1, %v3775_v0  ;;  %v1768_v10 = vmul.f32 %v3644_v52, %v1764_v26 }
0x143f   :  { %3439 = vmatprep.subr.bf16.mxu1 %v3775_v0 }
0x1440   :  { %v1743_v14 = vpop.permute.xlu0 %1742 }
0x1441   :  { %v3648_v15 = vpop.eup %3647  ;;  %v1747_v16 = vadd.f32 %v1743_v14, %v4179_v30 }
0x1442   :  { %1754 = vrot.lane.b32.xlu1 %v3648_v15, %s3782_s6 }
0x1443   :  { %3649 = vtanh.f32 %v1747_v16 }
0x144d   :  { %v3650_v22 = vpop.eup %3649 }
0x144e   :  { %1756 = vrot.lane.b32.xlu0 %v3650_v22, %s3782_s6 }
0x14b4   :  { %v1755_v29 = vpop.permute.xlu1 %1754 }
0x14b5   :  { %v1760_v11 = vmul.f32 %v1755_v29, %v1750_v25 }
0x14b7   :  { %v4335_v18 = vadd.f32 %v1768_v10, %v1760_v11 }
0x14b9   :  { %v4342_v20 = vsel %vm214_vm4, %v3069_v19, %v4335_v18  ;;  %v1892_v31 = vpack.c.bf16 %v4335_v18, %v4335_v18 }
0x14bb   :  { %v1896_v43 = vunpack.c.l.b16 %v1892_v31 }
0x14bd   :  { %v1898_v39 = vrot.slane %v1896_v43, 2 }
0x14c0   :  { %v1757_v27 = vpop.permute.xlu0 %1756 }
0x14c1   :  { %v1761_v33 = vmul.f32 %v1757_v27, %v1751_v21 }
0x14c3   :  { %v4347_v34 = vadd.f32 %v1769_v32, %v1761_v33 }
0x14c5   :  { %v1893_v23 = vpack.c.bf16 %v4347_v34, %v4347_v34  ;;  %v4356_v37 = vsel %vm214_vm4, %v3070_v35, %v4347_v34 }
0x14c7   :  { %v1897_v38 = vunpack.c.l.b16 %v1893_v23 }
0x14c9   :  { %v1899_v40 = vrot.slane %v1897_v38, 1 }
0x14cb   :  { %v1900_v41 = vsel %vm1429_vm12, %v1899_v40, %v1898_v39 }
0x14cc   :  { %v1901_v42 = vpack.c.b16 %v1900_v41, %v1900_v41 }
0x14ce   :  { %1902 = vrot.lane.b32.xlu1 %v1901_v42, %s3782_s6 }
0x1510   :  { %v2057_v44 = vpop.f32.mrb[24].mxu1 }
0x1511   :  { %v2058_v45 = vadd.f32 %v4167_v17, %v2057_v44  ;;  %v3419_v46 = vpop.f32.mrb[25].mxu1 }
0x1512   :  { %v2060_v36 = vpop.f32.mrb[26].mxu1 }
0x1513   :  { %v2064_v47 = vrot.slane %v2058_v45, 4  ;;  %v2065_v48 = vrot.slane %v2058_v45, 5  ;;  %v3420_v49 = vpop.f32.mrb[27].mxu1  ;;  %v2120_v45 = vrot.slane %v4313_v50, 1  ;;  %v2121_v36 = vrot.slane %v4315_v53, 1 }
0x1515   :  { %2066 = vrot.lane.b32.xlu0 %v2064_v47, %s3777_s5  ;;  %2068 = vrot.lane.b32.xlu1 %v2065_v48, %s3777_s5 }
0x1519   :  { %2086 = vrot.lane.b32.xlu0 %v2064_v47, %s3778_s2  ;;  %2088 = vrot.lane.b32.xlu1 %v2065_v48, %s3778_s2 }
0x1540   :  { %v1903_v52 = vpop.permute.xlu1 %1902 }
0x1541   :  { %3412 = vmatmul.mubr.msk.bf16.vlgmr.msra.gmra.mrb[40].mxu0 %vm262_vm8, %v1903_v52 }
0x1542   :  { %3422 = vmatpush3.bf16.msra.mxu0 %v4135_v56  ;;  %3423 = vmatprep.mubr.msk.bf16.mxu0 %vm3776_vm1, %v3775_v0 }
0x1543   :  { %3433 = vmatprep.subr.bf16.mxu0 %v3775_v0 }
0x1587   :  { %v2067_v17 = vpop.permute.xlu0 %2066  ;;  %v2069_v54 = vpop.permute.xlu1 %2068 }
0x1588   :  { %v2072_v55 = vadd.f32 %v2067_v17, %v4177_v28  ;;  %v2073_v58 = vadd.f32 %v2069_v54, %v4179_v30 }
0x158a   :  { %v3214_v60 = vmul.f32 -1.442695, %v2072_v55  ;;  %v3215_v61 = vmul.f32 -1.442695, %v2073_v58 }
0x158b   :  { %v2087_v3 = vpop.permute.xlu0 %2086  ;;  %v2089_v6 = vpop.permute.xlu1 %2088 }
0x158c   :  { %3651 = vpow2.f32 %v3214_v60 }
0x158d   :  { %3653 = vpow2.f32 %v3215_v61 }
0x1596   :  { %v3652_v62 = vpop.eup %3651 }
0x1597   :  { %v3654_v63 = vpop.eup %3653  ;;  %v2080_v1 = vadd.f32 1.0, %v3652_v62 }
0x1598   :  { %v2081_v2 = vadd.f32 1.0, %v3654_v63 }
0x1599   :  { %3655 = vrcp.f32 %v2080_v1 }
0x159a   :  { %3657 = vrcp.f32 %v2081_v2 }
0x15a3   :  { %v3656_v56 = vpop.eup %3655 }
0x15a4   :  { %v3658_v4 = vpop.eup %3657  ;;  %v2092_v5 = vmul.f32 %v3656_v56, %v2087_v3  ;;  %v2106_v44 = vsub.f32 1.0, %v3656_v56  ;;  %v2124_v49 = vmul.f32 %v3656_v56, %v2120_v45 }
0x15a5   :  { %v2093_v7 = vmul.f32 %v3658_v4, %v2089_v6  ;;  %v2107_v46 = vsub.f32 1.0, %v3658_v4  ;;  %v2125_v17 = vmul.f32 %v3658_v4, %v2121_v36 }
0x15a6   :  { %2096 = vrot.lane.b32.xlu0 %v2092_v5, %s3779_s26 }
0x15a7   :  { %2098 = vrot.lane.b32.xlu1 %v2093_v7, %s3779_s26 }
0x1614   :  { %v1941_v8 = vpop.f32.mrb[40].mxu0 }
0x1615   :  { %v1942_v9 = vadd.f32 %v4190_v51, %v1941_v8  ;;  %v3413_v14 = vpop.f32.mrb[41].mxu0 }
0x1616   :  { %v1944_v15 = vpop.f32.mrb[42].mxu0 }
0x1617   :  { %v1948_v16 = vrot.slane %v1942_v9, 5  ;;  %v1949_v22 = vrot.slane %v1942_v9, 6  ;;  %v3414_v25 = vpop.f32.mrb[43].mxu0  ;;  %v4405_v15 = vld [vmem:[%s4741_s17] sm:$0xff]  }
0x1618   :  { %v2097_v26 = vpop.permute.xlu0 %2096 }
0x1619   :  { %v2102_v29 = vadd.f32 %v2097_v26, %v4177_v28  ;;  %v2099_v10 = vpop.permute.xlu1 %2098  ;;  %1968 = vrot.lane.b32.xlu1 %v1949_v22, %s3783_s24  ;;  %1966 = vrot.lane.b32.xlu0 %v1948_v16, %s3783_s24  ;;  %v1952_v51 = vadd.f32 %v1948_v16, %v4177_v28  ;;  %v1953_v24 = vadd.f32 %v1949_v22, %v4179_v30  ;;  %v2001_v22 = vrot.slane %v4347_v34, 7 }
0x161a   :  { %v2103_v11 = vadd.f32 %v2099_v10, %v4179_v30  ;;  %v2000_v26 = vrot.slane %v4335_v18, 7 }
0x161b   :  { %3659 = vtanh.f32 %v2102_v29  ;;  %v3211_v27 = vmul.f32 -1.442695, %v1952_v51  ;;  %v3212_v31 = vmul.f32 -1.442695, %v1953_v24 }
0x161c   :  { %3661 = vtanh.f32 %v2103_v11 }
0x161d   :  { %3663 = vpow2.f32 %v3211_v27 }
0x161e   :  { %3665 = vpow2.f32 %v3212_v31 }
0x1625   :  { %v3660_v19 = vpop.eup %3659 }
0x1626   :  { %v3662_v21 = vpop.eup %3661  ;;  %2110 = vrot.lane.b32.xlu0 %v3660_v19, %s3782_s6 }
0x1627   :  { %2112 = vrot.lane.b32.xlu1 %v3662_v21, %s3782_s6  ;;  %v3664_v32 = vpop.eup %3663 }
0x1628   :  { %v3666_v33 = vpop.eup %3665  ;;  %v1960_v35 = vadd.f32 1.0, %v3664_v32 }
0x1629   :  { %v1961_v43 = vadd.f32 1.0, %v3666_v33 }
0x162a   :  { %3667 = vrcp.f32 %v1960_v35 }
0x162b   :  { %3669 = vrcp.f32 %v1961_v43 }
0x1634   :  { %v3668_v23 = vpop.eup %3667 }
0x1635   :  { %v3670_v38 = vpop.eup %3669  ;;  %v1986_v25 = vsub.f32 1.0, %v3668_v23  ;;  %v2004_v21 = vmul.f32 %v3668_v23, %v2000_v26 }
0x1636   :  { %v1987_v16 = vsub.f32 1.0, %v3670_v38  ;;  %v2005_v11 = vmul.f32 %v3670_v38, %v2001_v22 }
0x168b   :  { %v1969_v39 = vpop.permute.xlu1 %1968  ;;  %v1967_v40 = vpop.permute.xlu0 %1966 }
0x168c   :  { %v1973_v41 = vmul.f32 %v3670_v38, %v1969_v39  ;;  %v1972_v42 = vmul.f32 %v3668_v23, %v1967_v40 }
0x168e   :  { %1978 = vrot.lane.b32.xlu1 %v1973_v41, %s3779_s26  ;;  %1976 = vrot.lane.b32.xlu0 %v1972_v42, %s3779_s26 }
0x1698   :  { %v2111_v47 = vpop.permute.xlu0 %2110 }
0x1699   :  { %v2113_v48 = vpop.permute.xlu1 %2112  ;;  %v2116_v52 = vmul.f32 %v2111_v47, %v2106_v44  ;;  %v4447_v47 = vld [vmem:[%s4740_s15] sm:$0xff]  }
0x169a   :  { %v2117_v54 = vmul.f32 %v2113_v48, %v2107_v46 }
0x169b   :  { %v4387_v55 = vadd.f32 %v2124_v49, %v2116_v52 }
0x169c   :  { %v4389_v58 = vadd.f32 %v2125_v17, %v2117_v54 }
0x169d   :  { %v2244_v60 = vpack.c.bf16 %v4387_v55, %v4387_v55 }
0x169e   :  { %v2245_v61 = vpack.c.bf16 %v4389_v58, %v4389_v58 }
0x169f   :  { %v2248_v62 = vunpack.c.l.b16 %v2244_v60 }
0x16a0   :  { %v2249_v63 = vunpack.c.l.b16 %v2245_v61 }
0x16a1   :  { %v2250_v1 = vrot.slane %v2248_v62, 4 }
0x16a2   :  { %v2251_v2 = vrot.slane %v2249_v63, 3 }
0x16a4   :  { %v2252_v3 = vsel %vm1429_vm12, %v2251_v2, %v2250_v1 }
0x16a5   :  { %v2253_v56 = vpack.c.b16 %v2252_v3, %v2252_v3 }
0x16a7   :  { %2254 = vrot.lane.b32.xlu0 %v2253_v56, %s3781_s7 }
0x1700   :  { %v1979_v4 = vpop.permute.xlu1 %1978  ;;  %v1977_v5 = vpop.permute.xlu0 %1976 }
0x1701   :  { %v1983_v6 = vadd.f32 %v1979_v4, %v4179_v30  ;;  %v1982_v7 = vadd.f32 %v1977_v5, %v4177_v28 }
0x1703   :  { %3671 = vtanh.f32 %v1983_v6 }
0x1704   :  { %3673 = vtanh.f32 %v1982_v7 }
0x170d   :  { %v3672_v8 = vpop.eup %3671 }
0x170e   :  { %v3674_v9 = vpop.eup %3673  ;;  %1992 = vrot.lane.b32.xlu0 %v3672_v8, %s3782_s6  ;;  %v4460_v8 = vld [vmem:[%s4744_s16] ss:$0 sm:$0xff]  ;;  %s3784_s16 = smov 80  }
0x170f   :  { %1990 = vrot.lane.b32.xlu1 %v3674_v9, %s3782_s6 }
0x1719   :  { %v2255_v14 = vpop.permute.xlu0 %2254 }
0x171a   :  { %3430 = vmatmul.mubr.msk.bf16.vlgmr.msra.gmra.mrb[28].mxu1 %vm262_vm8, %v2255_v14 }
0x171b   :  { %3440 = vmatpush3.bf16.msra.mxu1 %v4405_v15  ;;  %3441 = vmatprep.mubr.msk.bf16.mxu1 %vm3776_vm1, %v3775_v0 }
0x171c   :  { %3451 = vmatprep.subr.bf16.mxu1 %v3775_v0 }
0x1780   :  { %v1993_v29 = vpop.permute.xlu0 %1992 }
0x1781   :  { %v1991_v10 = vpop.permute.xlu1 %1990  ;;  %v1997_v19 = vmul.f32 %v1993_v29, %v1987_v16 }
0x1782   :  { %v1996_v51 = vmul.f32 %v1991_v10, %v1986_v25 }
0x1783   :  { %v4413_v24 = vadd.f32 %v2005_v11, %v1997_v19 }
0x1784   :  { %v4415_v27 = vadd.f32 %v2004_v21, %v1996_v51 }
0x1785   :  { %v2129_v31 = vpack.c.bf16 %v4413_v24, %v4413_v24  ;;  %v4422_v34 = vsel %vm3073_vm13, %v4356_v37, %v4413_v24  ;;  %v4436_v37 = vld [vmem:[%s4742_s18] ss:$0 sm:$0xff] }
0x1786   :  { %v2128_v18 = vpack.c.bf16 %v4415_v27, %v4415_v27  ;;  %v4429_v32 = vsel %vm3073_vm13, %v4342_v20, %v4415_v27 }
0x1787   :  { %v2133_v33 = vunpack.c.l.b16 %v2129_v31 }
0x1788   :  { %v2132_v35 = vunpack.c.l.b16 %v2128_v18 }
0x1789   :  { %v2135_v43 = vrot.slane %v2133_v33, 2 }
0x178a   :  { %v2134_v23 = vrot.slane %v2132_v35, 3 }
0x178c   :  { %v2136_v38 = vsel %vm1429_vm12, %v2135_v43, %v2134_v23 }
0x178d   :  { %v2137_v39 = vpack.c.b16 %v2136_v38, %v2136_v38 }
0x178f   :  { %2138 = vrot.lane.b32.xlu1 %v2137_v39, %s3782_s6 }
0x17ed   :  { %v2293_v40 = vpop.f32.mrb[28].mxu1 }
0x17ee   :  { %v2294_v41 = vadd.f32 %v4436_v37, %v2293_v40  ;;  %v3431_v42 = vpop.f32.mrb[29].mxu1 }
0x17ef   :  { %v2296_v20 = vpop.f32.mrb[30].mxu1 }
0x17f0   :  { %v2300_v44 = vrot.slane %v2294_v41, 5  ;;  %v2301_v45 = vrot.slane %v2294_v41, 6  ;;  %v3432_v46 = vpop.f32.mrb[31].mxu1 }
0x17f2   :  { %2302 = vrot.lane.b32.xlu0 %v2300_v44, %s3777_s5  ;;  %2304 = vrot.lane.b32.xlu1 %v2301_v45, %s3777_s5 }
0x17f6   :  { %2322 = vrot.lane.b32.xlu0 %v2300_v44, %s3778_s2  ;;  %2324 = vrot.lane.b32.xlu1 %v2301_v45, %s3778_s2 }
0x1801   :  { %v2139_v36 = vpop.permute.xlu1 %2138 }
0x1802   :  { %3424 = vmatmul.mubr.msk.bf16.vlgmr.msra.gmra.mrb[44].mxu0 %vm262_vm8, %v2139_v36  ;;  %v2357_v36 = vrot.slane %v4389_v58, 1 }
0x1803   :  { %3434 = vmatpush3.bf16.msra.mxu0 %v4447_v47  ;;  %3435 = vmatprep.mubr.msk.bf16.mxu0 %vm3776_vm1, %v3775_v0 }
0x1804   :  { %3445 = vmatprep.subr.bf16.mxu0 %v3775_v0 }
0x1864   :  { %v2305_v48 = vpop.permute.xlu1 %2304  ;;  %v2303_v49 = vpop.permute.xlu0 %2302 }
0x1865   :  { %v2309_v52 = vadd.f32 %v2305_v48, %v4179_v30  ;;  %v2308_v17 = vadd.f32 %v2303_v49, %v4177_v28 }
0x1867   :  { %v3221_v54 = vmul.f32 -1.442695, %v2309_v52  ;;  %v3220_v60 = vmul.f32 -1.442695, %v2308_v17  ;;  %v2356_v52 = vrot.slane %v4387_v55, 1 }
0x1868   :  { %v2325_v3 = vpop.permute.xlu1 %2324  ;;  %v2323_v5 = vpop.permute.xlu0 %2322 }
0x1869   :  { %3675 = vpow2.f32 %v3221_v54 }
0x186a   :  { %3677 = vpow2.f32 %v3220_v60 }
0x1873   :  { %v3676_v61 = vpop.eup %3675 }
0x1874   :  { %v3678_v62 = vpop.eup %3677  ;;  %v2317_v63 = vadd.f32 1.0, %v3676_v61 }
0x1875   :  { %v2316_v1 = vadd.f32 1.0, %v3678_v62 }
0x1876   :  { %3679 = vrcp.f32 %v2317_v63 }
0x1877   :  { %3681 = vrcp.f32 %v2316_v1 }
0x1880   :  { %v3680_v2 = vpop.eup %3679 }
0x1881   :  { %v3682_v56 = vpop.eup %3681  ;;  %v2329_v4 = vmul.f32 %v3680_v2, %v2325_v3  ;;  %v2343_v46 = vsub.f32 1.0, %v3680_v2  ;;  %v2361_v17 = vmul.f32 %v3680_v2, %v2357_v36 }
0x1882   :  { %v2328_v6 = vmul.f32 %v3682_v56, %v2323_v5  ;;  %v2342_v49 = vsub.f32 1.0, %v3682_v56  ;;  %v2360_v61 = vmul.f32 %v3682_v56, %v2356_v52 }
0x1883   :  { %2334 = vrot.lane.b32.xlu1 %v2329_v4, %s3779_s26 }
0x1884   :  { %2332 = vrot.lane.b32.xlu0 %v2328_v6, %s3779_s26 }
0x18d5   :  { %v2177_v7 = vpop.f32.mrb[44].mxu0 }
0x18d6   :  { %v2178_v9 = vadd.f32 %v4460_v8, %v2177_v7  ;;  %v3425_v14 = vpop.f32.mrb[45].mxu0 }
0x18d7   :  { %v2180_v16 = vpop.f32.mrb[46].mxu0 }
0x18d8   :  { %v2184_v22 = vrot.slane %v2178_v9, 4  ;;  %v2185_v25 = vrot.slane %v2178_v9, 5  ;;  %v3426_v26 = vpop.f32.mrb[47].mxu0 }
0x18da   :  { %2204 = vrot.lane.b32.xlu1 %v2185_v25, %s3783_s24  ;;  %2202 = vrot.lane.b32.xlu0 %v2184_v22, %s3783_s24  ;;  %v2188_v31 = vadd.f32 %v2184_v22, %v4177_v28  ;;  %v2189_v18 = vadd.f32 %v2185_v25, %v4179_v30 }
0x18dc   :  { %v3217_v33 = vmul.f32 -1.442695, %v2188_v31  ;;  %v3218_v35 = vmul.f32 -1.442695, %v2189_v18 }
0x18f5   :  { %v2335_v29 = vpop.permute.xlu1 %2334 }
0x18f6   :  { %v2339_v10 = vadd.f32 %v2335_v29, %v4179_v30  ;;  %v2333_v11 = vpop.permute.xlu0 %2332 }
0x18f7   :  { %v2338_v19 = vadd.f32 %v2333_v11, %v4177_v28 }
0x18f8   :  { %3683 = vtanh.f32 %v2339_v10 }
0x18f9   :  { %3685 = vtanh.f32 %v2338_v19  ;;  %v2237_v19 = vrot.slane %v4413_v24, 7 }
0x18fa   :  { %3687 = vpow2.f32 %v3217_v33 }
0x18fb   :  { %3689 = vpow2.f32 %v3218_v35 }
0x1902   :  { %v3684_v21 = vpop.eup %3683 }
0x1903   :  { %v3686_v51 = vpop.eup %3685  ;;  %2348 = vrot.lane.b32.xlu1 %v3684_v21, %s3782_s6 }
0x1904   :  { %2346 = vrot.lane.b32.xlu0 %v3686_v51, %s3782_s6  ;;  %v3688_v43 = vpop.eup %3687  ;;  %v2236_v51 = vrot.slane %v4415_v27, 7 }
0x1905   :  { %v3690_v23 = vpop.eup %3689  ;;  %v2196_v38 = vadd.f32 1.0, %v3688_v43 }
0x1906   :  { %v2197_v39 = vadd.f32 1.0, %v3690_v23 }
0x1907   :  { %3691 = vrcp.f32 %v2196_v38 }
0x1908   :  { %3693 = vrcp.f32 %v2197_v39 }
0x1911   :  { %v3692_v40 = vpop.eup %3691 }
0x1912   :  { %v3694_v41 = vpop.eup %3693  ;;  %v2222_v21 = vsub.f32 1.0, %v3692_v40  ;;  %v2240_v43 = vmul.f32 %v3692_v40, %v2236_v51 }
0x1913   :  { %v2223_v11 = vsub.f32 1.0, %v3694_v41  ;;  %v2241_v33 = vmul.f32 %v3694_v41, %v2237_v19 }
0x194c   :  { %v2205_v42 = vpop.permute.xlu1 %2204  ;;  %v2203_v20 = vpop.permute.xlu0 %2202 }
0x194d   :  { %v2209_v44 = vmul.f32 %v3694_v41, %v2205_v42  ;;  %v2208_v45 = vmul.f32 %v3692_v40, %v2203_v20 }
0x194f   :  { %2214 = vrot.lane.b32.xlu1 %v2209_v44, %s3779_s26  ;;  %2212 = vrot.lane.b32.xlu0 %v2208_v45, %s3779_s26 }
0x1975   :  { %v2349_v48 = vpop.permute.xlu1 %2348 }
0x1976   :  { %v2353_v54 = vmul.f32 %v2349_v48, %v2343_v46  ;;  %v2347_v60 = vpop.permute.xlu0 %2346 }
0x1977   :  { %v2352_v62 = vmul.f32 %v2347_v60, %v2342_v49 }
0x1978   :  { %v4475_v63 = vadd.f32 %v2361_v17, %v2353_v54 }
0x1979   :  { %v4477_v1 = vadd.f32 %v2360_v61, %v2352_v62 }
0x197a   :  { %v2481_v3 = vpack.c.bf16 %v4475_v63, %v4475_v63 }
0x197b   :  { %v2480_v4 = vpack.c.bf16 %v4477_v1, %v4477_v1 }
0x197c   :  { %v2485_v5 = vunpack.c.l.b16 %v2481_v3 }
0x197d   :  { %v2484_v6 = vunpack.c.l.b16 %v2480_v4 }
0x197e   :  { %v2487_v7 = vrot.slane %v2485_v5, 2 }
0x197f   :  { %v2486_v9 = vrot.slane %v2484_v6, 3 }
0x1981   :  { %v2488_v2 = vsel %vm1429_vm12, %v2487_v7, %v2486_v9 }
0x1982   :  { %v2489_v14 = vpack.c.b16 %v2488_v2, %v2488_v2 }
0x1984   :  { %2490 = vrot.lane.b32.xlu0 %v2489_v14, %s3781_s7 }
0x19c1   :  { %v2215_v56 = vpop.permute.xlu1 %2214  ;;  %v2213_v16 = vpop.permute.xlu0 %2212 }
0x19c2   :  { %v2219_v22 = vadd.f32 %v2215_v56, %v4179_v30  ;;  %v2218_v25 = vadd.f32 %v2213_v16, %v4177_v28 }
0x19c4   :  { %3695 = vtanh.f32 %v2219_v22 }
0x19c5   :  { %3697 = vtanh.f32 %v2218_v25 }
0x19ce   :  { %v3696_v26 = vpop.eup %3695 }
0x19cf   :  { %v3698_v29 = vpop.eup %3697  ;;  %2228 = vrot.lane.b32.xlu0 %v3696_v26, %s3782_s6 }
0x19d0   :  { %2226 = vrot.lane.b32.xlu1 %v3698_v29, %s3782_s6 }
0x19f6   :  { %v2491_v10 = vpop.permute.xlu0 %2490 }
0x19f7   :  { %3442 = vmatmul.mubr.msk.bf16.vlgmr.msra.gmra.mrb[32].mxu1 %vm262_vm8, %v2491_v10 }
0x19f8   :  { %3452 = vmatpush3.bf16.msra.mxu1 %v4405_v15  ;;  %3453 = vmatprep.mubr.msk.bf16.mxu1 %vm3776_vm1, %v3775_v0 }
0x19f9   :  { %3463 = vmatprep.subr.bf16.mxu1 %v3775_v0 }
0x1a41   :  { %v2229_v31 = vpop.permute.xlu0 %2228 }
0x1a42   :  { %v2227_v18 = vpop.permute.xlu1 %2226  ;;  %v2233_v35 = vmul.f32 %v2229_v31, %v2223_v11 }
0x1a43   :  { %v2232_v23 = vmul.f32 %v2227_v18, %v2222_v21 }
0x1a44   :  { %v4496_v38 = vadd.f32 %v2241_v33, %v2233_v35 }
0x1a45   :  { %v4498_v39 = vadd.f32 %v2240_v43, %v2232_v23 }
0x1a46   :  { %v2365_v42 = vpack.c.bf16 %v4496_v38, %v4496_v38  ;;  %v4505_v24 = vsel %vm84_vm0, %v4422_v34, %v4496_v38 }
0x1a47   :  { %v2364_v27 = vpack.c.bf16 %v4498_v39, %v4498_v39  ;;  %v4512_v40 = vsel %vm84_vm0, %v4429_v32, %v4498_v39 }
0x1a48   :  { %v2369_v41 = vunpack.c.l.b16 %v2365_v42 }
0x1a49   :  { %v2368_v20 = vunpack.c.l.b16 %v2364_v27 }
0x1a4a   :  { %v2371_v44 = vrot.slane %v2369_v41, 3 }
0x1a4b   :  { %v2370_v45 = vrot.slane %v2368_v20, 4 }
0x1a4d   :  { %v2372_v46 = vsel %vm1429_vm12, %v2371_v44, %v2370_v45 }
0x1a4e   :  { %v2373_v36 = vpack.c.b16 %v2372_v46, %v2372_v46 }
0x1a50   :  { %2374 = vrot.lane.b32.xlu1 %v2373_v36, %s3782_s6 }
0x1ac2   :  { %v2375_v48 = vpop.permute.xlu1 %2374 }
0x1ac3   :  { %3436 = vmatmul.mubr.msk.bf16.vlgmr.msra.gmra.mrb[48].mxu0 %vm262_vm8, %v2375_v48 }
0x1ac4   :  { %3446 = vmatpush3.bf16.msra.mxu0 %v4447_v47  ;;  %3447 = vmatprep.mubr.msk.bf16.mxu0 %vm3776_vm1, %v3775_v0 }
0x1ac5   :  { %3457 = vmatprep.subr.bf16.mxu0 %v3775_v0 }
0x1aca   :  { %v2529_v34 = vpop.f32.mrb[32].mxu1 }
0x1acb   :  { %v2530_v32 = vadd.f32 %v4436_v37, %v2529_v34  ;;  %v3443_v49 = vpop.f32.mrb[33].mxu1 }
0x1acc   :  { %v2532_v52 = vpop.f32.mrb[34].mxu1 }
0x1acd   :  { %v2536_v17 = vrot.slane %v2530_v32, 6  ;;  %v2537_v54 = vrot.slane %v2530_v32, 7  ;;  %v3444_v60 = vpop.f32.mrb[35].mxu1 }
0x1acf   :  { %2538 = vrot.lane.b32.xlu0 %v2536_v17, %s3777_s5  ;;  %2540 = vrot.lane.b32.xlu1 %v2537_v54, %s3777_s5 }
0x1ad3   :  { %2558 = vrot.lane.b32.xlu0 %v2536_v17, %s3778_s2  ;;  %2560 = vrot.lane.b32.xlu1 %v2537_v54, %s3778_s2 }
0x1b41   :  { %v2541_v61 = vpop.permute.xlu1 %2540  ;;  %v2539_v62 = vpop.permute.xlu0 %2538 }
0x1b42   :  { %v2545_v3 = vadd.f32 %v2541_v61, %v4179_v30  ;;  %v2544_v4 = vadd.f32 %v2539_v62, %v4177_v28 }
0x1b44   :  { %v3227_v5 = vmul.f32 -1.442695, %v2545_v3  ;;  %v3226_v6 = vmul.f32 -1.442695, %v2544_v4 }
0x1b45   :  { %v2561_v16 = vpop.permute.xlu1 %2560  ;;  %v2559_v26 = vpop.permute.xlu0 %2558 }
0x1b46   :  { %3699 = vpow2.f32 %v3227_v5  ;;  %v2593_v5 = vrot.slane %v4475_v63, 1 }
0x1b47   :  { %3701 = vpow2.f32 %v3226_v6 }
0x1b50   :  { %v3700_v7 = vpop.eup %3699 }
0x1b51   :  { %v3702_v9 = vpop.eup %3701  ;;  %v2553_v2 = vadd.f32 1.0, %v3700_v7 }
0x1b52   :  { %v2552_v14 = vadd.f32 1.0, %v3702_v9  ;;  %v2592_v9 = vrot.slane %v4477_v1, 1 }
0x1b53   :  { %3703 = vrcp.f32 %v2553_v2 }
0x1b54   :  { %3705 = vrcp.f32 %v2552_v14 }
0x1b5d   :  { %v3704_v56 = vpop.eup %3703 }
0x1b5e   :  { %v3706_v22 = vpop.eup %3705  ;;  %v2565_v25 = vmul.f32 %v3704_v56, %v2561_v16  ;;  %v2579_v6 = vsub.f32 1.0, %v3704_v56  ;;  %v2597_v16 = vmul.f32 %v3704_v56, %v2593_v5 }
0x1b5f   :  { %v2564_v29 = vmul.f32 %v3706_v22, %v2559_v26  ;;  %v2578_v7 = vsub.f32 1.0, %v3706_v22  ;;  %v2596_v26 = vmul.f32 %v3706_v22, %v2592_v9 }
0x1b60   :  { %2570 = vrot.lane.b32.xlu1 %v2565_v25, %s3779_s26 }
0x1b61   :  { %2568 = vrot.lane.b32.xlu0 %v2564_v29, %s3779_s26 }
0x1b96   :  { %v2413_v10 = vpop.f32.mrb[48].mxu0 }
0x1b97   :  { %v2414_v11 = vadd.f32 %v4460_v8, %v2413_v10  ;;  %v3437_v19 = vpop.f32.mrb[49].mxu0 }
0x1b98   :  { %v2416_v21 = vpop.f32.mrb[50].mxu0 }
0x1b99   :  { %v2420_v51 = vrot.slane %v2414_v11, 3  ;;  %v2421_v31 = vrot.slane %v2414_v11, 4  ;;  %v3438_v18 = vpop.f32.mrb[51].mxu0 }
0x1b9b   :  { %2440 = vrot.lane.b32.xlu1 %v2421_v31, %s3783_s24  ;;  %2438 = vrot.lane.b32.xlu0 %v2420_v51, %s3783_s24  ;;  %v2424_v33 = vadd.f32 %v2420_v51, %v4177_v28  ;;  %v2425_v35 = vadd.f32 %v2421_v31, %v4179_v30 }
0x1b9d   :  { %v3223_v43 = vmul.f32 -1.442695, %v2424_v33  ;;  %v3224_v23 = vmul.f32 -1.442695, %v2425_v35 }
0x1b9f   :  { %3707 = vpow2.f32 %v3223_v43 }
0x1ba0   :  { %3709 = vpow2.f32 %v3224_v23 }
0x1ba9   :  { %v3708_v42 = vpop.eup %3707 }
0x1baa   :  { %v3710_v27 = vpop.eup %3709  ;;  %v2432_v41 = vadd.f32 1.0, %v3708_v42  ;;  %v2473_v42 = vrot.slane %v4496_v38, 7 }
0x1bab   :  { %v2433_v20 = vadd.f32 1.0, %v3710_v27 }
0x1bac   :  { %3711 = vrcp.f32 %v2432_v41 }
0x1bad   :  { %3713 = vrcp.f32 %v2433_v20  ;;  %v2472_v20 = vrot.slane %v4498_v39, 7 }
0x1bb6   :  { %v3712_v48 = vpop.eup %3711 }
0x1bb7   :  { %v3714_v34 = vpop.eup %3713  ;;  %v2458_v41 = vsub.f32 1.0, %v3712_v48 }
0x1bb8   :  { %v2459_v23 = vsub.f32 1.0, %v3714_v34 }
0x1bd2   :  { %v2571_v44 = vpop.permute.xlu1 %2570 }
0x1bd3   :  { %v2569_v45 = vpop.permute.xlu0 %2568  ;;  %v2575_v46 = vadd.f32 %v2571_v44, %v4179_v30  ;;  %v2477_v44 = vmul.f32 %v3714_v34, %v2473_v42 }
0x1bd4   :  { %v2574_v36 = vadd.f32 %v2569_v45, %v4177_v28 }
0x1bd5   :  { %3715 = vtanh.f32 %v2575_v46 }
0x1bd6   :  { %3717 = vtanh.f32 %v2574_v36  ;;  %v2476_v36 = vmul.f32 %v3712_v48, %v2472_v20 }
0x1bdf   :  { %v3716_v54 = vpop.eup %3715 }
0x1be0   :  { %v3718_v60 = vpop.eup %3717 }
0x1c0d   :  { %v2441_v32 = vpop.permute.xlu1 %2440  ;;  %v2439_v49 = vpop.permute.xlu0 %2438 }
0x1c0e   :  { %v2445_v52 = vmul.f32 %v3714_v34, %v2441_v32  ;;  %v2444_v17 = vmul.f32 %v3712_v48, %v2439_v49 }
0x1c10   :  { %2450 = vrot.lane.b32.xlu1 %v2445_v52, %s3779_s26  ;;  %2448 = vrot.lane.b32.xlu0 %v2444_v17, %s3779_s26 }
0x1c14   :  { %2584 = vrot.lane.b32.xlu1 %v3716_v54, %s3782_s6  ;;  %2582 = vrot.lane.b32.xlu0 %v3718_v60, %s3782_s6 }
0x1c82   :  { %v2451_v61 = vpop.permute.xlu1 %2450  ;;  %v2449_v62 = vpop.permute.xlu0 %2448 }
0x1c83   :  { %v2455_v3 = vadd.f32 %v2451_v61, %v4179_v30  ;;  %v2454_v4 = vadd.f32 %v2449_v62, %v4177_v28 }
0x1c85   :  { %3719 = vtanh.f32 %v2455_v3 }
0x1c86   :  { %3721 = vtanh.f32 %v2454_v4  ;;  %v2585_v2 = vpop.permute.xlu1 %2584  ;;  %v2583_v14 = vpop.permute.xlu0 %2582 }
0x1c87   :  { %v2589_v25 = vmul.f32 %v2585_v2, %v2579_v6  ;;  %v2588_v29 = vmul.f32 %v2583_v14, %v2578_v7 }
0x1c89   :  { %v4545_v10 = vadd.f32 %v2597_v16, %v2589_v25  ;;  %v4547_v11 = vadd.f32 %v2596_v26, %v2588_v29 }
0x1c8b   :  { %v2717_v19 = vpack.c.bf16 %v4545_v10, %v4545_v10  ;;  %v2716_v21 = vpack.c.bf16 %v4547_v11, %v4547_v11 }
0x1c8d   :  { %v2721_v51 = vunpack.c.l.b16 %v2717_v19  ;;  %v2720_v31 = vunpack.c.l.b16 %v2716_v21 }
0x1c8f   :  { %v3720_v18 = vpop.eup %3719  ;;  %v2723_v33 = vrot.slane %v2721_v51, 1  ;;  %v2722_v35 = vrot.slane %v2720_v31, 2 }
0x1c90   :  { %v3722_v43 = vpop.eup %3721  ;;  %2464 = vrot.lane.b32.xlu1 %v3720_v18, %s3782_s6 }
0x1c91   :  { %2462 = vrot.lane.b32.xlu0 %v3722_v43, %s3782_s6  ;;  %v2724_v56 = vsel %vm1429_vm12, %v2723_v33, %v2722_v35 }
0x1c92   :  { %v2725_v22 = vpack.c.b16 %v2724_v56, %v2724_v56 }
0x1c95   :  { %2726 = vrot.lane.b32.xlu0 %v2725_v22, %s3781_s7 }
0x1d02   :  { %v2465_v27 = vpop.permute.xlu1 %2464 }
0x1d03   :  { %v2469_v45 = vmul.f32 %v2465_v27, %v2459_v23  ;;  %v2463_v46 = vpop.permute.xlu0 %2462 }
0x1d04   :  { %v2468_v32 = vmul.f32 %v2463_v46, %v2458_v41 }
0x1d05   :  { %v4559_v49 = vadd.f32 %v2477_v44, %v2469_v45 }
0x1d06   :  { %v4561_v52 = vadd.f32 %v2476_v36, %v2468_v32 }
0x1d07   :  { %v2601_v17 = vpack.c.bf16 %v4559_v49, %v4559_v49  ;;  %v4568_v38 = vsel %vm249_vm5, %v4505_v24, %v4559_v49  ;;  %v2727_v54 = vpop.permute.xlu0 %2726 }
0x1d08   :  { %v2600_v39 = vpack.c.bf16 %v4561_v52, %v4561_v52  ;;  %v4575_v48 = vsel %vm249_vm5, %v4512_v40, %v4561_v52  ;;  %3454 = vmatmul.mubr.msk.bf16.vlgmr.msra.gmra.mrb[36].mxu1 %vm262_vm8, %v2727_v54 }
0x1d09   :  { %v2605_v34 = vunpack.c.l.b16 %v2601_v17  ;;  %3464 = vmatpush3.bf16.msra.mxu1 %v4405_v15  ;;  %3465 = vmatprep.mubr.msk.bf16.mxu1 %vm3776_vm1, %v3775_v0 }
0x1d0a   :  { %v2604_v60 = vunpack.c.l.b16 %v2600_v39 }
0x1d0b   :  { %v2607_v24 = vrot.slane %v2605_v34, 4 }
0x1d0c   :  { %v2606_v61 = vrot.slane %v2604_v60, 5 }
0x1d0e   :  { %v2608_v62 = vsel %vm1429_vm12, %v2607_v24, %v2606_v61 }
0x1d0f   :  { %v2609_v3 = vpack.c.b16 %v2608_v62, %v2608_v62 }
0x1d11   :  { %2610 = vrot.lane.b32.xlu1 %v2609_v3, %s3782_s6 }
0x1d83   :  { %v2611_v4 = vpop.permute.xlu1 %2610 }
0x1d84   :  { %3448 = vmatmul.mubr.msk.bf16.vlgmr.msra.gmra.mrb[52].mxu0 %vm262_vm8, %v2611_v4 }
0x1d85   :  { %3458 = vmatpush3.bf16.msra.mxu0 %v4447_v47  ;;  %3459 = vmatprep.mubr.msk.bf16.mxu0 %vm3776_vm1, %v3775_v0 }
0x1ddb   :  { %v2765_v15 = vpop.f32.mrb[36].mxu1 }
0x1ddc   :  { %v2766_v40 = vadd.f32 %v4436_v37, %v2765_v15  ;;  %v3455_v5 = vpop.f32.mrb[37].mxu1 }
0x1ddd   :  { %v2768_v6 = vpop.f32.mrb[38].mxu1 }
0x1dde   :  { %v2772_v7 = vrot.slane %v2766_v40, 7  ;;  %2775 = vrot.lane.b32.xlu1 %v2766_v40, %s3777_s5  ;;  %v3456_v9 = vpop.f32.mrb[39].mxu1 }
0x1de0   :  { %2773 = vrot.lane.b32.xlu0 %v2772_v7, %s3777_s5 }
0x1de2   :  { %2795 = vrot.lane.b32.xlu1 %v2766_v40, %s3778_s2 }
0x1de4   :  { %2793 = vrot.lane.b32.xlu0 %v2772_v7, %s3778_s2 }
0x1e50   :  { %v2776_v2 = vpop.permute.xlu1 %2775 }
0x1e51   :  { %v2780_v47 = vadd.f32 %v2776_v2, %v4179_v30 }
0x1e52   :  { %v2774_v14 = vpop.permute.xlu0 %2773 }
0x1e53   :  { %v3233_v0 = vmul.f32 -1.442695, %v2780_v47  ;;  %v2779_v16 = vadd.f32 %v2774_v14, %v4177_v28 }
0x1e54   :  { %v2796_v23 = vpop.permute.xlu1 %2795 }
0x1e55   :  { %3723 = vpow2.f32 %v3233_v0  ;;  %v3232_v25 = vmul.f32 -1.442695, %v2779_v16 }
0x1e56   :  { %v2794_v41 = vpop.permute.xlu0 %2793 }
0x1e57   :  { %3725 = vpow2.f32 %v3232_v25  ;;  %v2649_v26 = vpop.f32.mrb[52].mxu0 }
0x1e58   :  { %v2650_v29 = vadd.f32 %v4460_v8, %v2649_v26  ;;  %v3449_v19 = vpop.f32.mrb[53].mxu0  ;;  %v2828_v26 = vrot.slane %v4545_v10, 1 }
0x1e59   :  { %v2652_v21 = vpop.f32.mrb[54].mxu0 }
0x1e5a   :  { %v2656_v51 = vrot.slane %v2650_v29, 2  ;;  %v2657_v31 = vrot.slane %v2650_v29, 3  ;;  %v3450_v18 = vpop.f32.mrb[55].mxu0 }
0x1e5c   :  { %2676 = vrot.lane.b32.xlu1 %v2657_v31, %s3783_s24  ;;  %2674 = vrot.lane.b32.xlu0 %v2656_v51, %s3783_s24  ;;  %v2660_v44 = vadd.f32 %v2656_v51, %v4177_v28  ;;  %v2661_v45 = vadd.f32 %v2657_v31, %v4179_v30  ;;  %v2827_v31 = vrot.slane %v4547_v11, 1 }
0x1e5e   :  { %v3229_v46 = vmul.f32 -1.442695, %v2660_v44  ;;  %v3230_v36 = vmul.f32 -1.442695, %v2661_v45 }
0x1e5f   :  { %v3724_v33 = vpop.eup %3723 }
0x1e60   :  { %v2788_v35 = vadd.f32 1.0, %v3724_v33 }
0x1e61   :  { %v3726_v43 = vpop.eup %3725 }
0x1e62   :  { %3727 = vrcp.f32 %v2788_v35  ;;  %v2787_v56 = vadd.f32 1.0, %v3726_v43 }
0x1e64   :  { %3729 = vrcp.f32 %v2787_v56 }
0x1e65   :  { %3731 = vpow2.f32 %v3229_v46 }
0x1e66   :  { %3733 = vpow2.f32 %v3230_v36 }
0x1e6c   :  { %v3728_v22 = vpop.eup %3727 }
0x1e6d   :  { %v2800_v42 = vmul.f32 %v3728_v22, %v2796_v23  ;;  %v2814_v25 = vsub.f32 1.0, %v3728_v22  ;;  %v2832_v19 = vmul.f32 %v3728_v22, %v2828_v26 }
0x1e6e   :  { %v3730_v27 = vpop.eup %3729 }
0x1e6f   :  { %v2799_v20 = vmul.f32 %v3730_v27, %v2794_v41  ;;  %2805 = vrot.lane.b32.xlu1 %v2800_v42, %s3779_s26  ;;  %v3732_v32 = vpop.eup %3731  ;;  %v2813_v51 = vsub.f32 1.0, %v3730_v27  ;;  %v2831_v35 = vmul.f32 %v3730_v27, %v2827_v31  ;;  %v2709_v27 = vrot.slane %v4559_v49, 7 }
0x1e70   :  { %v3734_v17 = vpop.eup %3733  ;;  %v2668_v54 = vadd.f32 1.0, %v3732_v32 }
0x1e71   :  { %2803 = vrot.lane.b32.xlu0 %v2799_v20, %s3779_s26  ;;  %v2669_v39 = vadd.f32 1.0, %v3734_v17  ;;  %v2708_v17 = vrot.slane %v4561_v52, 7 }
0x1e72   :  { %3735 = vrcp.f32 %v2668_v54 }
0x1e73   :  { %3737 = vrcp.f32 %v2669_v39 }
0x1e7c   :  { %v3736_v34 = vpop.eup %3735 }
0x1e7d   :  { %v3738_v60 = vpop.eup %3737  ;;  %v2694_v32 = vsub.f32 1.0, %v3736_v34 }
0x1e7e   :  { %v2695_v46 = vsub.f32 1.0, %v3738_v60  ;;  %v2713_v54 = vmul.f32 %v3738_v60, %v2709_v27 }
0x1ece   :  { %v2677_v24 = vpop.permute.xlu1 %2676  ;;  %v2675_v61 = vpop.permute.xlu0 %2674 }
0x1ecf   :  { %v2681_v62 = vmul.f32 %v3738_v60, %v2677_v24  ;;  %v2680_v3 = vmul.f32 %v3736_v34, %v2675_v61  ;;  %v2712_v61 = vmul.f32 %v3736_v34, %v2708_v17 }
0x1ed1   :  { %2686 = vrot.lane.b32.xlu1 %v2681_v62, %s3779_s26  ;;  %2684 = vrot.lane.b32.xlu0 %v2680_v3, %s3779_s26 }
0x1ee1   :  { %v2806_v4 = vpop.permute.xlu1 %2805 }
0x1ee2   :  { %v2810_v15 = vadd.f32 %v2806_v4, %v4179_v30 }
0x1ee3   :  { %v2804_v40 = vpop.permute.xlu0 %2803 }
0x1ee4   :  { %3739 = vtanh.f32 %v2810_v15  ;;  %v2809_v5 = vadd.f32 %v2804_v40, %v4177_v28 }
0x1ee6   :  { %3741 = vtanh.f32 %v2809_v5 }
0x1eee   :  { %v3740_v6 = vpop.eup %3739 }
0x1eef   :  { %2819 = vrot.lane.b32.xlu1 %v3740_v6, %s3782_s6 }
0x1ef0   :  { %v3742_v7 = vpop.eup %3741 }
0x1ef1   :  { %2817 = vrot.lane.b32.xlu0 %v3742_v7, %s3782_s6 }
0x1f43   :  { %v2687_v9 = vpop.permute.xlu1 %2686  ;;  %v2685_v2 = vpop.permute.xlu0 %2684 }
0x1f44   :  { %v2691_v47 = vadd.f32 %v2687_v9, %v4179_v30  ;;  %v2690_v14 = vadd.f32 %v2685_v2, %v4177_v28 }
0x1f46   :  { %3743 = vtanh.f32 %v2691_v47 }
0x1f47   :  { %3745 = vtanh.f32 %v2690_v14 }
0x1f50   :  { %v3744_v0 = vpop.eup %3743 }
0x1f51   :  { %v3746_v16 = vpop.eup %3745  ;;  %2700 = vrot.lane.b32.xlu1 %v3744_v0, %s3782_s6 }
0x1f52   :  { %2698 = vrot.lane.b32.xlu0 %v3746_v16, %s3782_s6 }
0x1f61   :  { %v2820_v29 = vpop.permute.xlu1 %2819 }
0x1f62   :  { %v2824_v21 = vmul.f32 %v2820_v29, %v2814_v25 }
0x1f63   :  { %v2818_v18 = vpop.permute.xlu0 %2817 }
0x1f64   :  { %v4613_v33 = vadd.f32 %v2832_v19, %v2824_v21  ;;  %v2823_v43 = vmul.f32 %v2818_v18, %v2813_v51 }
0x1f66   :  { %v4615_v56 = vadd.f32 %v2831_v35, %v2823_v43  ;;  %v2952_v23 = vpack.c.bf16 %v4613_v33, %v4613_v33 }
0x1f68   :  { %v2951_v42 = vpack.c.bf16 %v4615_v56, %v4615_v56  ;;  %v2956_v20 = vunpack.c.l.b16 %v2952_v23 }
0x1f6a   :  { %v2955_v41 = vunpack.c.l.b16 %v2951_v42 }
0x1f6c   :  { %v2957_v22 = vrot.slane %v2955_v41, 1 }
0x1f6e   :  { %v2958_v44 = vsel %vm1429_vm12, %v2956_v20, %v2957_v22 }
0x1f6f   :  { %v2959_v45 = vpack.c.b16 %v2958_v44, %v2958_v44 }
0x1f71   :  { %2960 = vrot.lane.b32.xlu0 %v2959_v45, %s3781_s7 }
0x1fc3   :  { %v2701_v36 = vpop.permute.xlu1 %2700 }
0x1fc4   :  { %v2705_v39 = vmul.f32 %v2701_v36, %v2695_v46  ;;  %v2699_v24 = vpop.permute.xlu0 %2698 }
0x1fc5   :  { %v2704_v62 = vmul.f32 %v2699_v24, %v2694_v32 }
0x1fc6   :  { %v4625_v3 = vadd.f32 %v2713_v54, %v2705_v39 }
0x1fc7   :  { %v4627_v4 = vadd.f32 %v2712_v61, %v2704_v62 }
0x1fc8   :  { %v2836_v15 = vpack.c.bf16 %v4625_v3, %v4625_v3  ;;  %v4634_v49 = vsel %vm236_vm7, %v4568_v38, %v4625_v3 }
0x1fc9   :  { %v2835_v52 = vpack.c.bf16 %v4627_v4, %v4627_v4  ;;  %v4641_v34 = vsel %vm236_vm7, %v4575_v48, %v4627_v4 }
0x1fca   :  { %v2840_v60 = vunpack.c.l.b16 %v2836_v15 }
0x1fcb   :  { %v2839_v40 = vunpack.c.l.b16 %v2835_v52 }
0x1fcc   :  { %v2842_v5 = vrot.slane %v2840_v60, 5 }
0x1fcd   :  { %v2841_v6 = vrot.slane %v2839_v40, 6 }
0x1fcf   :  { %v2843_v7 = vsel %vm1429_vm12, %v2842_v5, %v2841_v6 }
0x1fd0   :  { %v2844_v9 = vpack.c.b16 %v2843_v7, %v2843_v7 }
0x1fd2   :  { %2845 = vrot.lane.b32.xlu1 %v2844_v9, %s3782_s6 }
0x1fe3   :  { %v2961_v2 = vpop.permute.xlu0 %2960 }
0x1fe4   :  { %3466 = vmatmul.mubr.msk.bf16.vlgmr.msra.gmra.mrb[40].mxu1 %vm262_vm8, %v2961_v2 }
0x2044   :  { %v2846_v38 = vpop.permute.xlu1 %2845 }
0x2045   :  { %3460 = vmatmul.mubr.msk.bf16.vlgmr.msra.gmra.mrb[56].mxu0 %vm262_vm8, %v2846_v38 }
0x20b7   :  { %v2999_v47 = vpop.f32.mrb[40].mxu1 }
0x20b8   :  { %v3000_v14 = vadd.f32 %v4436_v37, %v2999_v47  ;;  %v3467_v48 = vpop.f32.mrb[41].mxu1 }
0x20b9   :  { %v3002_v0 = vpop.f32.mrb[42].mxu1 }
0x20ba   :  { %v3006_v16 = vrot.slane %v3000_v14, 1  ;;  %3007 = vrot.lane.b32.xlu0 %v3000_v14, %s3777_s5  ;;  %v3468_v25 = vpop.f32.mrb[43].mxu1 }
0x20bc   :  { %3009 = vrot.lane.b32.xlu1 %v3006_v16, %s3777_s5 }
0x20be   :  { %3027 = vrot.lane.b32.xlu0 %v3000_v14, %s3778_s2 }
0x20c0   :  { %3029 = vrot.lane.b32.xlu1 %v3006_v16, %s3778_s2 }
0x2118   :  { %v2884_v26 = vpop.f32.mrb[56].mxu0 }
0x2119   :  { %v2885_v29 = vadd.f32 %v4460_v8, %v2884_v26  ;;  %v3461_v19 = vpop.f32.mrb[57].mxu0 }
0x211a   :  { %v2887_v21 = vpop.f32.mrb[58].mxu0 }
0x211b   :  { %v2891_v51 = vrot.slane %v2885_v29, 1  ;;  %v2892_v31 = vrot.slane %v2885_v29, 2  ;;  %v3462_v37 = vpop.f32.mrb[59].mxu0 }
0x211c   :  { %v3061_v37 = vrot.slane %v4615_v56, 1 }
0x211d   :  { %2911 = vrot.lane.b32.xlu1 %v2892_v31, %s3783_s24  ;;  %2909 = vrot.lane.b32.xlu0 %v2891_v51, %s3783_s24  ;;  %v2895_v54 = vadd.f32 %v2891_v51, %v4177_v28  ;;  %v2896_v39 = vadd.f32 %v2892_v31, %v4179_v30 }
0x211f   :  { %v3235_v24 = vmul.f32 -1.442695, %v2895_v54  ;;  %v3236_v61 = vmul.f32 -1.442695, %v2896_v39 }
0x212c   :  { %v3008_v18 = vpop.permute.xlu0 %3007 }
0x212d   :  { %v3013_v35 = vadd.f32 %v3008_v18, %v4177_v28 }
0x212e   :  { %v3010_v43 = vpop.permute.xlu1 %3009 }
0x212f   :  { %v3238_v23 = vmul.f32 -1.442695, %v3013_v35  ;;  %v3014_v42 = vadd.f32 %v3010_v43, %v4179_v30 }
0x2130   :  { %v3028_v46 = vpop.permute.xlu0 %3027 }
0x2131   :  { %3747 = vpow2.f32 %v3238_v23  ;;  %v3239_v41 = vmul.f32 -1.442695, %v3014_v42  ;;  %v3062_v42 = vrot.slane %v4613_v33, 1 }
0x2132   :  { %v3030_v32 = vpop.permute.xlu1 %3029 }
0x2133   :  { %3749 = vpow2.f32 %v3239_v41 }
0x213b   :  { %v3748_v8 = vpop.eup %3747 }
0x213c   :  { %v3021_v20 = vadd.f32 1.0, %v3748_v8 }
0x213d   :  { %v3750_v22 = vpop.eup %3749 }
0x213e   :  { %3751 = vrcp.f32 %v3021_v20  ;;  %v3022_v44 = vadd.f32 1.0, %v3750_v22 }
0x2140   :  { %3753 = vrcp.f32 %v3022_v44 }
0x2141   :  { %3755 = vpow2.f32 %v3235_v24 }
0x2142   :  { %3757 = vpow2.f32 %v3236_v61 }
0x2148   :  { %v3752_v45 = vpop.eup %3751 }
0x2149   :  { %v3033_v27 = vmul.f32 %v3752_v45, %v3028_v46  ;;  %v3047_v31 = vsub.f32 1.0, %v3752_v45  ;;  %v3065_v35 = vmul.f32 %v3752_v45, %v3061_v37 }
0x214a   :  { %v3754_v36 = vpop.eup %3753 }
0x214b   :  { %v3034_v17 = vmul.f32 %v3754_v36, %v3030_v32  ;;  %3037 = vrot.lane.b32.xlu0 %v3033_v27, %s3779_s26  ;;  %v3756_v62 = vpop.eup %3755  ;;  %v3048_v23 = vsub.f32 1.0, %v3754_v36 }
0x214c   :  { %v3758_v15 = vpop.eup %3757  ;;  %v2903_v52 = vadd.f32 1.0, %v3756_v62 }
0x214d   :  { %3039 = vrot.lane.b32.xlu1 %v3034_v17, %s3779_s26  ;;  %v2904_v60 = vadd.f32 1.0, %v3758_v15 }
0x214e   :  { %3759 = vrcp.f32 %v2903_v52 }
0x214f   :  { %3761 = vrcp.f32 %v2904_v60 }
0x2158   :  { %v4661_v40 = vpop.eup %3759 }
0x2159   :  { %v4663_v5 = vpop.eup %3761  ;;  %v2929_v54 = vsub.f32 1.0, %v4661_v40 }
0x218f   :  { %v2912_v6 = vpop.permute.xlu1 %2911  ;;  %v2910_v7 = vpop.permute.xlu0 %2909 }
0x2190   :  { %v2916_v9 = vmul.f32 %v4663_v5, %v2912_v6  ;;  %v2915_v2 = vmul.f32 %v4661_v40, %v2910_v7 }
0x2192   :  { %2921 = vrot.lane.b32.xlu1 %v2916_v9, %s3779_s26  ;;  %2919 = vrot.lane.b32.xlu0 %v2915_v2, %s3779_s26 }
0x21bd   :  { %v3038_v38 = vpop.permute.xlu0 %3037 }
0x21be   :  { %v3043_v47 = vadd.f32 %v3038_v38, %v4177_v28 }
0x21bf   :  { %v3040_v14 = vpop.permute.xlu1 %3039 }
0x21c0   :  { %3763 = vtanh.f32 %v3043_v47  ;;  %v3044_v48 = vadd.f32 %v3040_v14, %v4179_v30 }
0x21c2   :  { %3765 = vtanh.f32 %v3044_v48 }
0x21ca   :  { %v3764_v0 = vpop.eup %3763 }
0x21cb   :  { %3051 = vrot.lane.b32.xlu0 %v3764_v0, %s3782_s6 }
0x21cc   :  { %v3766_v16 = vpop.eup %3765 }
0x21cd   :  { %3053 = vrot.lane.b32.xlu1 %v3766_v16, %s3782_s6 }
0x2204   :  { %v2922_v25 = vpop.permute.xlu1 %2921  ;;  %v2920_v26 = vpop.permute.xlu0 %2919 }
0x2205   :  { %v2926_v29 = vadd.f32 %v2922_v25, %v4179_v30  ;;  %v2925_v19 = vadd.f32 %v2920_v26, %v4177_v28  ;;  %v3066_v28 = vmul.f32 %v3754_v36, %v3062_v42 }
0x2207   :  { %3767 = vtanh.f32 %v2926_v29 }
0x2208   :  { %3769 = vtanh.f32 %v2925_v19 }
0x2211   :  { %v3768_v21 = vpop.eup %3767 }
0x2212   :  { %v3770_v51 = vpop.eup %3769  ;;  %2935 = vrot.lane.b32.xlu1 %v3768_v21, %s3782_s6 }
0x2213   :  { %2933 = vrot.lane.b32.xlu0 %v3770_v51, %s3782_s6 }
0x223d   :  { %v3052_v18 = vpop.permute.xlu0 %3051 }
0x223e   :  { %v3057_v43 = vmul.f32 %v3052_v18, %v3047_v31 }
0x223f   :  { %v3054_v30 = vpop.permute.xlu1 %3053 }
0x2240   :  { %v3067_v41 = vadd.f32 %v3065_v35, %v3057_v43  ;;  %v3058_v8 = vmul.f32 %v3054_v30, %v3048_v23 }
0x2242   :  { %v3084_v20 = vsel %vm369_vm11, %v3067_v41, %v4615_v56  ;;  %v3068_v22 = vadd.f32 %v3066_v28, %v3058_v8 }
0x2243   :  { %v3086_v44 = vsel %vm214_vm4, %v3084_v20, %v4547_v11 }
0x2244   :  { %v3088_v46 = vsel %vm3073_vm13, %v3086_v44, %v4477_v1  ;;  %v3085_v45 = vsel %vm369_vm11, %v3068_v22, %v4613_v33 }
0x2245   :  { %v3090_v27 = vsel %vm84_vm0, %v3088_v46, %v4387_v55  ;;  %v3087_v36 = vsel %vm214_vm4, %v3085_v45, %v4545_v10 }
0x2246   :  { %v3089_v32 = vsel %vm3073_vm13, %v3087_v36, %v4475_v63  ;;  %v3092_v56 = vsel %vm249_vm5, %v3090_v27, %v4313_v50  ;;  %v2930_v50 = vsub.f32 1.0, %v4663_v5 }
0x2247   :  { %v3091_v11 = vsel %vm84_vm0, %v3089_v32, %v4389_v58  ;;  %v3094_v1 = vsel %vm236_vm7, %v3092_v56, %v4255_v57  ;;  %v2944_v58 = vrot.slane %v4625_v3, 7 }
0x2248   :  { %v3093_v33 = vsel %vm249_vm5, %v3091_v11, %v4315_v53  ;;  %v3096_v10 = vsel %vm223_vm6, %v3094_v1, %v4201_v13  ;;  %v2943_v53 = vrot.slane %v4627_v4, 7 }
0x2249   :  { %v3095_v55 = vsel %vm236_vm7, %v3093_v33, %v4257_v59  ;;  %v2948_v59 = vmul.f32 %v4663_v5, %v2944_v58 }
0x224a   :  { %v3097_v63 = vsel %vm223_vm6, %v3095_v55, %v4199_v12  ;;  %v2947_v13 = vmul.f32 %v4661_v40, %v2943_v53 }
0x224b   :  { %v3514_v17 = vpack.i.bf16 %v3097_v63, %v3096_v10 }
0x224d   :  { %3515 = vrot.lane.b32.xlu1 %v3514_v17, %s3784_s16 }
0x2284   :  { %v2936_v57 = vpop.permute.xlu1 %2935 }
0x2285   :  { %v2940_v39 = vmul.f32 %v2936_v57, %v2930_v50  ;;  %v2934_v24 = vpop.permute.xlu0 %2933 }
0x2286   :  { %v2939_v61 = vmul.f32 %v2934_v24, %v2929_v54 }
0x2287   :  { %v2950_v12 = vadd.f32 %v2948_v59, %v2940_v39 }
0x2288   :  { %v2949_v62 = vadd.f32 %v2947_v13, %v2939_v61 }
0x2289   :  { %v3083_v15 = vsel %vm223_vm6, %v4634_v49, %v2950_v12 }
0x228a   :  { %v3082_v3 = vsel %vm223_vm6, %v4641_v34, %v2949_v62 }
0x228b   :  { %v3509_v52 = vpack.i.bf16 %v3083_v15, %v3082_v3 }
0x228d   :  { %3510 = vrot.lane.b32.xlu0 %v3509_v52, %s3782_s6 }
0x22bf   :  { %v3516_v60 = vpop.permute.xlu1 %3515 }
0x22c0   :  { %v3518_v6 = vunpack.i.h.bf16 %v3516_v60  ;;  %v3517_v5 = vunpack.i.l.bf16 %v3516_v60 }
0x22ff   :  { %v3511_v4 = vpop.permute.xlu0 %3510 }
0x2300   :  { %v3513_v7 = vunpack.i.h.bf16 %v3511_v4  ;;  %v3512_v9 = vunpack.i.l.bf16 %v3511_v4 }
0x2302   :  { %v3115_v40 = vsel %vm262_vm8, %v3513_v7, %v3518_v6  ;;  %v3114_v2 = vsel %vm262_vm8, %v3512_v9, %v3517_v5 }
0x2303   :  { %v3117_v38 = vpack.c.bf16 %v3115_v40, %v3115_v40  ;;  %v3116_v47 = vpack.c.bf16 %v3114_v2, %v3114_v2 }
0x2305   :  { %3120 = vst.msk [vmem:[%s4745_s19 + $0x4] sm:$0xf] %vm3118_vm14, %v3117_v38  ;;  %3119 = vst.msk [vmem:[%s4745_s19] sm:$0xf] %vm3118_vm14, %v3116_v47 }

// kernel: run.5
= control target key start
LH: loop header
LB: loop body
LE: loop exit
PB: predicated region body
PF: predicated region fallthrough
CT: control target
= control target key end

     0   :  { %vm65_vm0 = vcmask 1041408   ;;  %v5340_v2 = vmov 0.0   ;;  %vm87_vm1 = vcmask 1044480   ;;  %s5341_s29 = smov 24   ;;  %s5343_s30 = smov 16   ;;  %vm5344_vm2 = vmmov 0   ;;  %s6632_s0 = inlined_call_operand.vmem [shape: f32[2,6,8], index: 0, kind: input, shape index: {}]   ;;  %s6633_s1 = inlined_call_operand.vmem [shape: bf16[32,64], index: 1, kind: input, shape index: {}]   ;;  %s6634_s3 = inlined_call_operand.vmem [shape: bf16[192,16], index: 3, kind: input, shape index: {}]   ;;  %s6635_s2 = inlined_call_operand.vmem [shape: f32[1,64], index: 2, kind: input, shape index: {}]   ;;  %s6636_s4 = inlined_call_operand.vmem [shape: f32[1,16], index: 4, kind: input, shape index: {}]   ;;  %s6637_s5 = inlined_call_operand.vmem [shape: bf16[48,8], index: 5, kind: input, shape index: {}]   ;;  %s6638_s7 = inlined_call_operand.vmem [shape: bf16[4,8,16], index: 7, kind: input, shape index: {}]   ;;  %s6639_s6 = inlined_call_operand.vmem [shape: f32[1,8], index: 6, kind: input, shape index: {}]   ;;  %s6640_s8 = inlined_call_operand.vmem [shape: f32[4,1,16], index: 8, kind: input, shape index: {}]   ;;  %s6641_s9 = inlined_call_operand.vmem [shape: bf16[8,96], index: 9, kind: input, shape index: {}]   ;;  %s6642_s11 = inlined_call_operand.vmem [shape: bf16[16,48], index: 11, kind: input, shape index: {}]   ;;  %s6643_s13 = inlined_call_operand.vmem [shape: bf16[16,48], index: 13, kind: input, shape index: {}]   ;;  %s6644_s14 = inlined_call_operand.vmem [shape: f32[1,48], index: 14, kind: input, shape index: {}]   ;;  %s6645_s10 = inlined_call_operand.vmem [shape: f32[1,96], index: 10, kind: input, shape index: {}]   ;;  %s6646_s12 = inlined_call_operand.vmem [shape: f32[1,48], index: 12, kind: input, shape index: {}]   ;;  %s6647_s15 = inlined_call_operand.vmem [shape: bf16[32,8], index: 15, kind: input, shape index: {}]   ;;  %s6648_s16 = inlined_call_operand.vmem [shape: f32[1,8], index: 16, kind: input, shape index: {}]   ;;  %s6649_s17 = inlined_call_operand.vmem [shape: f32[2,6,8], index: 17, kind: output, shape index: {}]  }
   0x1   :  { %6652 = sst [smem:[#allocation2_spill]] %s6632_s0  ;;  %4905 = vmatprep.subr.bf16.mxu0 %v5340_v2  ;;  %v89_v5 = vrot.slane %v5340_v2, 3  ;;  %s5342_s0 = smov 8   ;;  %4909 = vmatprep.mubr.msk.bf16.mxu0 %vm5344_vm2, %v5340_v2  ;;  %v5345_v21 = vmov 1966171168   ;;  %v125_v23 = vlaneseq  ;;  %vm99_vm3 = vcmask 64512  }
   0x2   :  { %6653 = sst [smem:[#allocation3_spill]] %s6633_s1  ;;  %s6654_s26 = sld [smem:[#allocation2_spill]]  ;;  %v123_v22 = vunpack.c.l.s4 %v5345_v21  ;;  %vm102_vm4 = vcmask 130048   ;;  %vm105_vm5 = vcmask 195584   ;;  %vm263_vm6 = vcmask 261120   ;;  %v5075_v63 = vld [vmem:[%s6634_s3] sm:$0xff]  }
   0x3   :  { %s6655_s1 = sld [smem:[#allocation3_spill]]  ;;  %v5474_v28 = vshrl.u32 %v125_v23, 7  ;;  %v5346_v62 = vmov 0   ;;  %vm389_vm7 = vcmask 1040384   ;;  %vm392_vm8 = vcmask 1046528   ;;  %s5348_s18 = smov 64  }
   0x4   :  { %v124_v27 = vunpack.c.0.s8 %v123_v22  ;;  %692 = vmatprep.subr.bf16.mxu1 %v5346_v62  ;;  %vm427_vm9 = vcmask 523264   ;;  %vm1003_vm10 = vcmask 392192   ;;  %vm1314_vm11 = vcmask 1043456   ;;  %s5351_s19 = smov 48   ;;  %s5352_s21 = smov 112  }
   0x5   :  { %693 = vmatpush1.bf16.msra.mxu1 %v5075_v63  ;;  %s5353_s22 = smov 96   ;;  %vm3128_vm12 = vcmask 1041409   ;;  %vm4408_vm13 = vcmask 1042432   ;;  %vm4743_vm14 = vcmask 62464  }
   0x6   :  { %v5480_v36 = vsub.s32 %v124_v27, %v5474_v28  ;;  %694 = vmatprep.subr.bf16.mxu1 %v5346_v62 }
   0x8   :  { %v5448_v0 = vld [vmem:[%s6654_s26] sm:$0x3f]  ;;  %v5453_v1 = vld [vmem:[%s6654_s26 + $0x8] sm:$0x3f] }
   0x9   :  { %v61_v3 = vrot.slane %v5448_v0, 6  ;;  %v62_v4 = vrot.slane %v5453_v1, 6  ;;  %v5073_v18 = vld [vmem:[%s6655_s1] sm:$0xff]   ;;  %v5074_v19 = vld [vmem:[%s6655_s1 + $0x8] sm:$0xff]  }
   0xa   :  { %4906 = vmatpush3.bf16.msra.mxu0 %v5073_v18 }
   0xb   :  { %v66_v6 = vsel %vm65_vm0, 0.0, %v61_v3  ;;  %v67_v7 = vsel %vm65_vm0, 0.0, %v62_v4  ;;  %4907 = vmatprep.subr.bf16.mxu0 %v5340_v2  ;;  %v5076_v3 = vld [vmem:[%s6634_s3 + $0x8] sm:$0xff]   ;;  %v5077_v4 = vld [vmem:[%s6634_s3 + $0x10] sm:$0xff]  }
   0xc   :  { %v70_v8 = vrot.slane %v66_v6, 1  ;;  %v71_v9 = vrot.slane %v67_v7, 1  ;;  %v88_v10 = vrot.slane %v66_v6, 3  ;;  %v78_v11 = vrot.slane %v66_v6, 2  ;;  %695 = vmatpush1.bf16.msra.mxu1 %v5076_v3 }
   0xd   :  { %v79_v12 = vrot.slane %v67_v7, 2  ;;  %v91_v13 = vrot.slane %v67_v7, 3  ;;  %696 = vmatprep.subr.bf16.mxu1 %v5346_v62 }
   0xe   :  { %v5048_v14 = vpack.i.bf16 %v71_v9, %v70_v8  ;;  %v90_v15 = vsel %vm87_vm1, %v88_v10, %v89_v5  ;;  %4908 = vmatpush3.bf16.msra.mxu0 %v5074_v19  ;;  %v5081_v8 = vld [vmem:[%s6634_s3 + $0x30] sm:$0xff]   ;;  %v5347_v9 = vmov 1983009808  }
   0xf   :  { %93 = vrot.lane.b32.xlu1 %v90_v15, %s5341_s29  ;;  %v5053_v16 = vpack.i.bf16 %v79_v12, %v78_v11  ;;  %v92_v17 = vsel %vm87_vm1, %v91_v13, %v89_v5  ;;  %4913 = vmatprep.subr.bf16.mxu0 %v5340_v2  ;;  %v5078_v5 = vld [vmem:[%s6634_s3 + $0x18] sm:$0xff]   ;;  %v170_v10 = vunpack.c.l.s4 %v5347_v9  ;;  %v4750_v13 = vld [vmem:[%s6635_s2] ss:$0 sm:$0xff] }
  0x10   :  { %5049 = vrot.lane.b32.xlu0 %v5048_v14, %s5342_s0  ;;  %697 = vmatpush1.bf16.msra.mxu1 %v5077_v4  ;;  %v168_v14 = vcombine.high %v4750_v13, %v4750_v13  ;;  %v5083_v4 = vld [vmem:[%s6634_s3 + $0x40] sm:$0xff]   ;;  %s5350_s0 = smov 120  }
  0x11   :  { %698 = vmatprep.subr.bf16.mxu1 %v5346_v62  ;;  %v171_v11 = vunpack.c.0.s8 %v170_v10  ;;  %v5084_v10 = vld [vmem:[%s6634_s3 + $0x48] sm:$0xff]  }
  0x13   :  { %95 = vrot.lane.b32.xlu1 %v92_v17, %s5341_s29  ;;  %v5527_v12 = vsub.s32 %v171_v11, %v5474_v28 }
  0x14   :  { %5054 = vrot.lane.b32.xlu0 %v5053_v16, %s5343_s30  ;;  %699 = vmatpush1.bf16.msra.mxu1 %v5078_v5 }
  0x15   :  { %700 = vmatprep.subr.bf16.mxu1 %v5346_v62  ;;  %v175_v15 = vrot.slane %v4750_v13, %v5527_v12  ;;  %v182_v16 = vrot.slane %v168_v14, %v5527_v12 }
  0x17   :  { %v183_v17 = vcombine.high %v175_v15, %v175_v15  ;;  %v237_v19 = vcombine.low %v182_v16, %v175_v15 }
  0x19   :  { %v236_v18 = vcombine.low %v175_v15, %v183_v17  ;;  %v251_v21 = vrot.slane %v237_v19, %v5527_v12  ;;  %v253_v22 = vcombine.low %v183_v17, %v182_v16  ;;  %v5085_v16 = vld [vmem:[%s6634_s3 + $0x50] sm:$0xff]  }
  0x81   :  { %v94_v20 = vpop.permute.xlu1 %93 }
  0x82   :  { %v5050_v24 = vpop.permute.xlu0 %5049 }
  0x83   :  { %v5052_v25 = vunpack.i.h.bf16 %v5050_v24  ;;  %v5051_v26 = vunpack.i.l.bf16 %v5050_v24  ;;  %v260_v24 = vrot.slane %v253_v22, %v5527_v12 }
  0x85   :  { %v96_v32 = vpop.permute.xlu1 %95  ;;  %v100_v33 = vsel %vm99_vm3, %v66_v6, %v5051_v26  ;;  %v101_v34 = vsel %vm99_vm3, %v67_v7, %v5052_v25  ;;  %v5079_v6 = vld [vmem:[%s6634_s3 + $0x20] sm:$0xff]   ;;  %v5080_v7 = vld [vmem:[%s6634_s3 + $0x28] sm:$0xff]  }
  0x86   :  { %v5055_v29 = vpop.permute.xlu0 %5054  ;;  %701 = vmatpush1.bf16.msra.mxu1 %v5079_v6 }
  0x87   :  { %v5057_v30 = vunpack.i.h.bf16 %v5055_v29  ;;  %v5056_v31 = vunpack.i.l.bf16 %v5055_v29  ;;  %702 = vmatprep.subr.bf16.mxu1 %v5346_v62 }
  0x89   :  { %v103_v35 = vsel %vm102_vm4, %v100_v33, %v5056_v31  ;;  %v104_v37 = vsel %vm102_vm4, %v101_v34, %v5057_v30 }
  0x8a   :  { %v106_v38 = vsel %vm105_vm5, %v103_v35, %v94_v20  ;;  %v107_v39 = vsel %vm105_vm5, %v104_v37, %v96_v32  ;;  %703 = vmatpush1.bf16.msra.mxu1 %v5080_v7  ;;  %v244_v20 = vrot.slane %v236_v18, %v5527_v12  ;;  %v5086_v18 = vld [vmem:[%s6634_s3 + $0x58] sm:$0xff]  }
  0x8b   :  { %v112_v40 = vpack.c.bf16 %v106_v38, %v106_v38  ;;  %v113_v41 = vpack.c.bf16 %v107_v39, %v107_v39  ;;  %704 = vmatprep.subr.bf16.mxu1 %v5346_v62 }
  0x8c   :  { %v252_v23 = vcombine.low %v244_v20, %v251_v21 }
  0x8d   :  { %v128_v42 = vrot.slane %v112_v40, %v5480_v36  ;;  %v151_v43 = vrot.slane %v113_v41, %v5480_v36 }
  0x8e   :  { %705 = vmatpush1.bf16.msra.mxu1 %v5081_v8 }
  0x8f   :  { %v129_v44 = vcombine.high %v128_v42, %v128_v42  ;;  %v136_v45 = vrot.slane %v128_v42, %v5480_v36  ;;  %v152_v46 = vcombine.high %v151_v43, %v151_v43  ;;  %v159_v47 = vrot.slane %v151_v43, %v5480_v36  ;;  %706 = vmatprep.subr.bf16.mxu1 %v5346_v62 }
  0x91   :  { %v143_v48 = vrot.slane %v129_v44, %v5480_v36  ;;  %v144_v49 = vcombine.high %v136_v45, %v136_v45  ;;  %v166_v50 = vrot.slane %v152_v46, %v5480_v36  ;;  %v167_v51 = vcombine.high %v159_v47, %v159_v47 }
  0x93   :  { %v184_v52 = vcombine.low %v136_v45, %v143_v48  ;;  %v185_v53 = vcombine.low %v144_v49, %v159_v47  ;;  %v186_v54 = vcombine.low %v166_v50, %v167_v51 }
  0x95   :  { %v200_v55 = vrot.slane %v185_v53, %v5480_v36  ;;  %v193_v56 = vrot.slane %v184_v52, %v5480_v36  ;;  %v207_v57 = vrot.slane %v186_v54, %v5480_v36 }
  0x97   :  { %v208_v58 = vcombine.low %v193_v56, %v200_v55  ;;  %v222_v60 = vrot.slane %v207_v57, %v5480_v36 }
  0x99   :  { %v215_v59 = vrot.slane %v208_v58, %v5480_v36 }
  0x9b   :  { %v223_v61 = vcombine.low %v215_v59, %v222_v60 }
  0x9d   :  { %4910 = vmatmul.mubr.msk.bf16.vlgmr.msra.gmra.mrb[0].mxu0 %vm263_vm6, %v223_v61  ;;  %v5082_v61 = vld [vmem:[%s6634_s3 + $0x38] sm:$0xff]  }
  0x9e   :  { %4919 = vmatprep.mubr.msk.bf16.mxu0 %vm5344_vm2, %v5340_v2  ;;  %707 = vmatpush1.bf16.msra.mxu1 %v5082_v61 }
  0x9f   :  { %708 = vmatprep.subr.bf16.mxu1 %v5346_v62 }
  0xa2   :  { %709 = vmatpush1.bf16.msra.mxu1 %v5083_v4 }
  0xa3   :  { %710 = vmatprep.subr.bf16.mxu1 %v5346_v62 }
  0xa6   :  { %711 = vmatpush1.bf16.msra.mxu1 %v5084_v10 }
  0xa7   :  { %712 = vmatprep.subr.bf16.mxu1 %v5346_v62 }
  0xaa   :  { %713 = vmatpush1.bf16.msra.mxu1 %v5085_v16 }
  0xab   :  { %714 = vmatprep.subr.bf16.mxu1 %v5346_v62 }
  0xae   :  { %715 = vmatpush1.bf16.msra.mxu1 %v5086_v18 }
  0xaf   :  { %4947 = vmatprep.subr.bf16.mxu1 %v5340_v2 }
 0x170   :  { %v301_v25 = vpop.f32.mrb[0].mxu0 }
 0x171   :  { %v302_v26 = vadd.f32 %v301_v25, %v252_v23  ;;  %v4911_v27 = vpop.f32.mrb[1].mxu0 }
 0x172   :  { %v304_v29 = vpop.f32.mrb[2].mxu0 }
 0x173   :  { %v310_v30 = vcombine.high %v302_v26, %v302_v26  ;;  %v317_v31 = vrot.slane %v302_v26, %v5527_v12  ;;  %v305_v32 = vadd.f32 %v304_v29, %v260_v24  ;;  %v4912_v33 = vpop.f32.mrb[3].mxu0 }
 0x175   :  { %v324_v34 = vrot.slane %v310_v30, %v5527_v12  ;;  %v325_v35 = vcombine.high %v317_v31, %v317_v31  ;;  %v333_v37 = vrot.slane %v305_v32, %v5527_v12  ;;  %v341_v38 = vmax.f32 %v317_v31, 0.0 }
 0x177   :  { %v326_v39 = vcombine.high %v324_v34, %v324_v34  ;;  %v342_v40 = vmax.f32 %v325_v35, 0.0  ;;  %v343_v41 = vmax.f32 %v324_v34, 0.0  ;;  %v334_v42 = vcombine.high %v333_v37, %v333_v37 }
 0x178   :  { %v345_v45 = vmax.f32 %v333_v37, 0.0 }
 0x179   :  { %v344_v43 = vmax.f32 %v326_v39, 0.0  ;;  %v353_v44 = vcombine.low %v341_v38, %v342_v40  ;;  %v346_v46 = vmax.f32 %v334_v42, 0.0  ;;  %v367_v48 = vrot.slane %v343_v41, %v5527_v12 }
 0x17b   :  { %v360_v47 = vrot.slane %v353_v44, %v5527_v12  ;;  %v369_v49 = vcombine.low %v344_v43, %v345_v45  ;;  %v383_v52 = vrot.slane %v346_v46, %v5527_v12 }
 0x17d   :  { %v368_v50 = vcombine.low %v360_v47, %v367_v48  ;;  %v376_v51 = vrot.slane %v369_v49, %v5527_v12 }
 0x17f   :  { %v385_v53 = vrot.slane %v368_v50, 7  ;;  %v384_v54 = vcombine.low %v376_v51, %v383_v52 }
 0x181   :  { %v390_v55 = vsel %vm389_vm7, -inf, %v385_v53  ;;  %v386_v56 = vrot.slane %v384_v54, 7 }
 0x182   :  { %v393_v57 = vsel %vm392_vm8, %v390_v55, -inf  ;;  %v4754_v55 = vld [vmem:[%s6636_s4] ss:$0 sm:$0xff]  ;;  %s5349_s4 = smov 32  }
 0x183   :  { %v391_v58 = vsel %vm389_vm7, -inf, %v386_v56  ;;  %v397_v59 = vrot.slane %v393_v57, 1  ;;  %v516_v56 = vcombine.high %v4754_v55, %v4754_v55 }
 0x184   :  { %v394_v60 = vsel %vm392_vm8, %v391_v58, -inf }
 0x185   :  { %v398_v63 = vrot.slane %v394_v60, 1  ;;  %v401_v3 = vmax.f32 %v393_v57, %v397_v59  ;;  %v523_v57 = vrot.slane %v4754_v55, %v5527_v12  ;;  %v530_v58 = vrot.slane %v516_v56, %v5527_v12 }
 0x187   :  { %v402_v5 = vmax.f32 %v394_v60, %v398_v63  ;;  %v405_v6 = vrot.slane %v401_v3, 7  ;;  %v531_v59 = vcombine.high %v523_v57, %v523_v57  ;;  %v663_v61 = vcombine.low %v530_v58, %v523_v57 }
 0x189   :  { %v406_v7 = vrot.slane %v402_v5, 7  ;;  %v409_v8 = vsel %vm389_vm7, 0.0, %v405_v6  ;;  %v662_v60 = vcombine.low %v523_v57, %v531_v59  ;;  %v677_v3 = vrot.slane %v663_v61, %v5527_v12 }
 0x18a   :  { %v411_v9 = vsel %vm392_vm8, %v409_v8, 0.0  ;;  %v679_v4 = vcombine.low %v531_v59, %v530_v58 }
 0x18b   :  { %v410_v11 = vsel %vm389_vm7, 0.0, %v406_v7  ;;  %v415_v14 = vrot.slane %v411_v9, 1  ;;  %v423_v22 = vrot.slane %v411_v9, 2  ;;  %v670_v63 = vrot.slane %v662_v60, %v5527_v12 }
 0x18c   :  { %v412_v13 = vsel %vm392_vm8, %v410_v11, 0.0  ;;  %v686_v6 = vrot.slane %v679_v4, %v5527_v12 }
 0x18d   :  { %v416_v15 = vrot.slane %v412_v13, 1  ;;  %v424_v23 = vrot.slane %v412_v13, 2  ;;  %v678_v5 = vcombine.low %v670_v63, %v677_v3 }
 0x18f   :  { %v5058_v17 = vpack.i.bf16 %v416_v15, %v415_v14 }
 0x191   :  { %5059 = vrot.lane.b32.xlu0 %v5058_v17, %s5348_s18 }
 0x203   :  { %v5060_v19 = vpop.permute.xlu0 %5059 }
 0x204   :  { %v5062_v20 = vunpack.i.h.bf16 %v5060_v19  ;;  %v5061_v21 = vunpack.i.l.bf16 %v5060_v19 }
 0x206   :  { %v428_v24 = vsel %vm427_vm9, %v411_v9, %v5061_v21  ;;  %v429_v25 = vsel %vm427_vm9, %v412_v13, %v5062_v20 }
 0x207   :  { %v4755_v26 = vpack.c.bf16 %v423_v22, %v428_v24  ;;  %v4756_v27 = vpack.c.bf16 %v424_v23, %v429_v25 }
 0x209   :  { %v475_v29 = vrot.slane %v4755_v26, %v5480_v36  ;;  %v499_v30 = vrot.slane %v4756_v27, %v5480_v36 }
 0x20b   :  { %v476_v31 = vcombine.high %v475_v29, %v475_v29  ;;  %v483_v32 = vrot.slane %v475_v29, %v5480_v36  ;;  %v500_v33 = vcombine.high %v499_v30, %v499_v30  ;;  %v507_v34 = vrot.slane %v499_v30, %v5480_v36 }
 0x20d   :  { %v490_v35 = vrot.slane %v476_v31, %v5480_v36  ;;  %v491_v37 = vcombine.high %v483_v32, %v483_v32  ;;  %v514_v38 = vrot.slane %v500_v33, %v5480_v36  ;;  %v515_v39 = vcombine.high %v507_v34, %v507_v34 }
 0x20f   :  { %v532_v40 = vcombine.low %v483_v32, %v490_v35  ;;  %v533_v41 = vcombine.low %v491_v37, %v507_v34  ;;  %v534_v42 = vcombine.low %v514_v38, %v515_v39 }
 0x211   :  { %v541_v43 = vrot.slane %v532_v40, %v5480_v36  ;;  %v548_v44 = vrot.slane %v533_v41, %v5480_v36  ;;  %v555_v45 = vrot.slane %v534_v42, %v5480_v36 }
 0x213   :  { %v557_v46 = vcombine.high %v541_v43, %v548_v44  ;;  %v558_v47 = vcombine.high %v555_v45, %v555_v45  ;;  %v556_v48 = vcombine.low %v541_v43, %v548_v44  ;;  %v579_v52 = vrot.slane %v555_v45, %v5480_v36 }
 0x215   :  { %v572_v49 = vrot.slane %v557_v46, %v5480_v36  ;;  %v586_v50 = vrot.slane %v558_v47, %v5480_v36  ;;  %v565_v51 = vrot.slane %v556_v48, %v5480_v36  ;;  %v5087_v46 = vld [vmem:[%s6637_s5] sm:$0xff]   ;;  %v5088_v48 = vld [vmem:[%s6637_s5 + $0x8] sm:$0xff]  }
 0x216   :  { %4914 = vmatpush3.bf16.msra.mxu0 %v5087_v46 }
 0x217   :  { %v588_v53 = vcombine.low %v572_v49, %v586_v50  ;;  %v587_v54 = vcombine.low %v565_v51, %v579_v52  ;;  %4915 = vmatprep.subr.bf16.mxu0 %v5340_v2  ;;  %v5089_v50 = vld [vmem:[%s6637_s5 + $0x10] sm:$0xff]  }
 0x219   :  { %4769 = vmatprep.mubr.msk.bf16.mxu1 %vm427_vm9, %v588_v53 }
 0x21a   :  { %725 = vmatmul.mubr.bf16.vlgmr.msra.gmra.mrb[0].mxu1 %v587_v54  ;;  %4916 = vmatpush3.bf16.msra.mxu0 %v5088_v48 }
 0x21b   :  { %4949 = vmatprep.mubr.msk.bf16.mxu1 %vm5344_vm2, %v5340_v2  ;;  %4917 = vmatprep.subr.bf16.mxu0 %v5340_v2 }
 0x21e   :  { %4918 = vmatpush3.bf16.msra.mxu0 %v5089_v50 }
 0x21f   :  { %4923 = vmatprep.subr.bf16.mxu0 %v5340_v2 }
 0x2ed   :  { %v726_v7 = vpop.f32.mrb[0].mxu1 }
 0x2ee   :  { %v727_v8 = vadd.f32 %v726_v7, %v678_v5  ;;  %v728_v9 = vpop.f32.mrb[1].mxu1 }
 0x2ef   :  { %v729_v10 = vpop.f32.mrb[2].mxu1 }
 0x2f0   :  { %v735_v11 = vcombine.high %v727_v8, %v727_v8  ;;  %v742_v13 = vrot.slane %v727_v8, %v5527_v12  ;;  %v730_v14 = vadd.f32 %v729_v10, %v686_v6  ;;  %v731_v15 = vpop.f32.mrb[3].mxu1 }
 0x2f2   :  { %v749_v16 = vrot.slane %v735_v11, %v5527_v12  ;;  %v750_v17 = vcombine.high %v742_v13, %v742_v13  ;;  %v758_v18 = vrot.slane %v730_v14, %v5527_v12  ;;  %v766_v19 = vmax.f32 %v742_v13, 0.0 }
 0x2f4   :  { %v751_v20 = vcombine.high %v749_v16, %v749_v16  ;;  %v767_v21 = vmax.f32 %v750_v17, 0.0  ;;  %v768_v22 = vmax.f32 %v749_v16, 0.0  ;;  %v759_v23 = vcombine.high %v758_v18, %v758_v18 }
 0x2f5   :  { %v770_v26 = vmax.f32 %v758_v18, 0.0 }
 0x2f6   :  { %v769_v24 = vmax.f32 %v751_v20, 0.0  ;;  %v778_v25 = vcombine.low %v766_v19, %v767_v21  ;;  %v771_v27 = vmax.f32 %v759_v23, 0.0  ;;  %v792_v30 = vrot.slane %v768_v22, %v5527_v12  ;;  %v1125_v23 = vld [vmem:[%s6638_s7] sm:$0xf] }
 0x2f8   :  { %v785_v29 = vrot.slane %v778_v25, %v5527_v12  ;;  %v794_v31 = vcombine.low %v769_v24, %v770_v26  ;;  %v808_v33 = vrot.slane %v771_v27, %v5527_v12  ;;  %v1316_v24 = vsel %vm1314_vm11, %v1125_v23, 0  ;;  %v4770_v25 = vld [vmem:[%s6639_s6] ss:$0 sm:$0xff] }
 0x2f9   :  { %v902_v26 = vcombine.high %v4770_v25, %v4770_v25  ;;  %v909_v27 = vrot.slane %v4770_v25, %v5527_v12 }
 0x2fa   :  { %v801_v32 = vrot.slane %v794_v31, %v5527_v12  ;;  %v793_v34 = vcombine.low %v785_v29, %v792_v30 }
 0x2fb   :  { %v916_v29 = vrot.slane %v902_v26, %v5527_v12  ;;  %v917_v30 = vcombine.high %v909_v27, %v909_v27 }
 0x2fc   :  { %v809_v35 = vcombine.low %v801_v32, %v808_v33  ;;  %v810_v37 = vrot.slane %v793_v34, 7 }
 0x2fd   :  { %v976_v31 = vcombine.low %v909_v27, %v917_v30  ;;  %v977_v32 = vcombine.low %v916_v29, %v909_v27 }
 0x2fe   :  { %v811_v38 = vrot.slane %v809_v35, 7  ;;  %v814_v39 = vsel %vm389_vm7, 0.0, %v810_v37  ;;  %v993_v35 = vcombine.low %v917_v30, %v916_v29 }
 0x2ff   :  { %v816_v40 = vsel %vm392_vm8, %v814_v39, 0.0  ;;  %v984_v33 = vrot.slane %v976_v31, %v5527_v12  ;;  %v991_v34 = vrot.slane %v977_v32, %v5527_v12  ;;  %v1088_v39 = vrot.slane %v5448_v0, %v5527_v12 }
 0x300   :  { %v828_v41 = vrot.slane %v816_v40, 2  ;;  %v815_v42 = vsel %vm389_vm7, 0.0, %v811_v38  ;;  %v820_v44 = vrot.slane %v816_v40, 1  ;;  %v1081_v38 = vcombine.high %v5448_v0, %v5448_v0 }
 0x301   :  { %v817_v43 = vsel %vm392_vm8, %v815_v42, 0.0  ;;  %v992_v37 = vcombine.low %v984_v33, %v991_v34  ;;  %v1104_v42 = vrot.slane %v5453_v1, %v5527_v12  ;;  %v1096_v50 = vcombine.high %v1088_v39, %v1088_v39 }
 0x302   :  { %830 = vrot.lane.b32.xlu0 %v828_v41, %s5349_s4  ;;  %v821_v45 = vrot.slane %v817_v43, 1  ;;  %v829_v49 = vrot.slane %v817_v43, 2  ;;  %v1095_v46 = vrot.slane %v1081_v38, %v5527_v12 }
 0x304   :  { %v5063_v47 = vpack.i.bf16 %v821_v45, %v820_v44  ;;  %v1097_v45 = vcombine.high %v5453_v1, %v5453_v1 }
 0x306   :  { %5064 = vrot.lane.b32.xlu1 %v5063_v47, %s5343_s30 }
 0x30a   :  { %832 = vrot.lane.b32.xlu1 %v829_v49, %s5349_s4 }
 0x374   :  { %v831_v54 = vpop.permute.xlu0 %830 }
 0x378   :  { %v5065_v51 = vpop.permute.xlu1 %5064 }
 0x379   :  { %v5067_v52 = vunpack.i.h.bf16 %v5065_v51  ;;  %v5066_v53 = vunpack.i.l.bf16 %v5065_v51 }
 0x37b   :  { %v836_v55 = vsel %vm102_vm4, %v816_v40, %v5066_v53  ;;  %v837_v56 = vsel %vm102_vm4, %v817_v43, %v5067_v52  ;;  %v1000_v40 = vrot.slane %v993_v35, %v5527_v12  ;;  %v1112_v52 = vcombine.high %v1104_v42, %v1104_v42 }
 0x37c   :  { %v838_v57 = vsel %vm263_vm6, %v836_v55, %v831_v54  ;;  %v833_v58 = vpop.permute.xlu1 %832 }
 0x37d   :  { %v846_v59 = vpack.c.bf16 %v838_v57, %v838_v57  ;;  %v839_v60 = vsel %vm263_vm6, %v837_v56, %v833_v58  ;;  %v1111_v56 = vrot.slane %v1097_v45, %v5527_v12 }
 0x37e   :  { %v847_v61 = vpack.c.bf16 %v839_v60, %v839_v60 }
 0x37f   :  { %v862_v63 = vrot.slane %v846_v59, %v5480_v36 }
 0x380   :  { %v885_v3 = vrot.slane %v847_v61, %v5480_v36 }
 0x381   :  { %v863_v4 = vcombine.high %v862_v63, %v862_v63  ;;  %v870_v5 = vrot.slane %v862_v63, %v5480_v36 }
 0x382   :  { %v886_v6 = vcombine.high %v885_v3, %v885_v3  ;;  %v893_v7 = vrot.slane %v885_v3, %v5480_v36 }
 0x383   :  { %v877_v8 = vrot.slane %v863_v4, %v5480_v36  ;;  %v878_v9 = vcombine.high %v870_v5, %v870_v5 }
 0x384   :  { %v900_v10 = vrot.slane %v886_v6, %v5480_v36  ;;  %v901_v11 = vcombine.high %v893_v7, %v893_v7 }
 0x385   :  { %v918_v13 = vcombine.low %v870_v5, %v877_v8  ;;  %v919_v14 = vcombine.low %v878_v9, %v893_v7 }
 0x386   :  { %v920_v15 = vcombine.low %v900_v10, %v901_v11 }
 0x387   :  { %v927_v16 = vrot.slane %v918_v13, %v5480_v36  ;;  %v934_v17 = vrot.slane %v919_v14, %v5480_v36 }
 0x388   :  { %v941_v18 = vrot.slane %v920_v15, %v5480_v36 }
 0x389   :  { %v942_v19 = vcombine.low %v927_v16, %v934_v17 }
 0x38a   :  { %v956_v20 = vrot.slane %v941_v18, %v5480_v36 }
 0x38b   :  { %v949_v21 = vrot.slane %v942_v19, %v5480_v36 }
 0x38d   :  { %v957_v22 = vcombine.low %v949_v21, %v956_v20 }
 0x38f   :  { %4920 = vmatmul.mubr.msk.bf16.vlgmr.msra.gmra.mrb[4].mxu0 %vm1003_vm10, %v957_v22 }
 0x390   :  { %4925 = vmatprep.mubr.msk.bf16.mxu0 %vm5344_vm2, %v5340_v2  ;;  %4924 = vmatpush3.bf16.msra.mxu0 %v1316_v24 }
 0x391   :  { %4929 = vmatprep.subr.bf16.mxu0 %v5340_v2 }
 0x462   :  { %v1041_v41 = vpop.f32.mrb[4].mxu0 }
 0x463   :  { %v1042_v43 = vadd.f32 %v1041_v41, %v992_v37  ;;  %v4921_v44 = vpop.f32.mrb[5].mxu0  ;;  %v4775_v37 = vld [vmem:[%s6640_s8] ss:$0 sm:$0xff] }
 0x464   :  { %v1044_v47 = vpop.f32.mrb[6].mxu0  ;;  %v1228_v38 = vcombine.high %v4775_v37, %v4775_v37 }
 0x465   :  { %v1050_v48 = vcombine.high %v1042_v43, %v1042_v43  ;;  %v1057_v49 = vrot.slane %v1042_v43, %v5527_v12  ;;  %v1045_v51 = vadd.f32 %v1044_v47, %v1000_v40  ;;  %v4922_v0 = vpop.f32.mrb[7].mxu0 }
 0x466   :  { %v1242_v40 = vrot.slane %v1228_v38, %v5527_v12 }
 0x467   :  { %v1064_v53 = vrot.slane %v1050_v48, %v5527_v12  ;;  %v1065_v54 = vcombine.high %v1057_v49, %v1057_v49  ;;  %v1073_v55 = vrot.slane %v1045_v51, %v5527_v12  ;;  %v5668_v57 = vadd.f32 %v1088_v39, %v1057_v49 }
 0x468   :  { %v1235_v39 = vrot.slane %v4775_v37, %v5527_v12 }
 0x469   :  { %v1066_v1 = vcombine.high %v1064_v53, %v1064_v53  ;;  %v5670_v58 = vadd.f32 %v1096_v50, %v1065_v54  ;;  %v5672_v59 = vadd.f32 %v1095_v46, %v1064_v53  ;;  %v1074_v60 = vcombine.high %v1073_v55, %v1073_v55 }
 0x46a   :  { %v5678_v3 = vadd.f32 %v1112_v52, %v1073_v55  ;;  %v1243_v41 = vcombine.high %v1235_v39, %v1235_v39  ;;  %v1285_v43 = vcombine.low %v1242_v40, %v1235_v39 }
 0x46b   :  { %v1139_v61 = vcombine.low %v5668_v57, %v5670_v58  ;;  %v5676_v63 = vadd.f32 %v1104_v42, %v1066_v1  ;;  %v5680_v4 = vadd.f32 %v1111_v56, %v1074_v60  ;;  %v1153_v6 = vrot.slane %v5672_v59, %v5527_v12 }
 0x46c   :  { %v1284_v42 = vcombine.low %v1235_v39, %v1243_v41  ;;  %v1299_v45 = vrot.slane %v1285_v43, %v5527_v12  ;;  %v1301_v46 = vcombine.low %v1243_v41, %v1242_v40  ;;  %v1126_v39 = vld [vmem:[%s6638_s7 + $0x4] sm:$0xf] }
 0x46d   :  { %v1146_v5 = vrot.slane %v1139_v61, %v5527_v12  ;;  %v1155_v7 = vcombine.low %v5676_v63, %v5678_v3  ;;  %v1169_v10 = vrot.slane %v5680_v4, %v5527_v12  ;;  %v1688_v40 = vsel %vm1314_vm11, %v1126_v39, 0 }
 0x46e   :  { %v1292_v44 = vrot.slane %v1284_v42, %v5527_v12  ;;  %v1308_v48 = vrot.slane %v1301_v46, %v5527_v12 }
 0x46f   :  { %v1154_v8 = vcombine.low %v1146_v5, %v1153_v6  ;;  %v1162_v9 = vrot.slane %v1155_v7, %v5527_v12 }
 0x470   :  { %v1300_v47 = vcombine.low %v1292_v44, %v1299_v45 }
 0x471   :  { %v1173_v11 = vpack.c.bf16 %v1154_v8, %v1154_v8  ;;  %v1170_v13 = vcombine.low %v1162_v9, %v1169_v10 }
 0x473   :  { %v1188_v14 = vrot.slane %v1173_v11, %v5480_v36  ;;  %v1174_v15 = vpack.c.bf16 %v1170_v13, %v1170_v13 }
 0x475   :  { %v1189_v16 = vcombine.high %v1188_v14, %v1188_v14  ;;  %v1196_v17 = vrot.slane %v1188_v14, %v5480_v36  ;;  %v1211_v18 = vrot.slane %v1174_v15, %v5480_v36 }
 0x477   :  { %v1203_v19 = vrot.slane %v1189_v16, %v5480_v36  ;;  %v1204_v20 = vcombine.high %v1196_v17, %v1196_v17  ;;  %v1212_v21 = vcombine.high %v1211_v18, %v1211_v18  ;;  %v1219_v22 = vrot.slane %v1211_v18, %v5480_v36 }
 0x479   :  { %v1244_v23 = vcombine.low %v1196_v17, %v1203_v19  ;;  %v1226_v24 = vrot.slane %v1212_v21, %v5480_v36  ;;  %v1227_v25 = vcombine.high %v1219_v22, %v1219_v22  ;;  %v1245_v26 = vcombine.low %v1204_v20, %v1219_v22 }
 0x47b   :  { %v1246_v27 = vcombine.low %v1226_v24, %v1227_v25  ;;  %v1253_v29 = vrot.slane %v1244_v23, %v5480_v36  ;;  %v1260_v30 = vrot.slane %v1245_v26, %v5480_v36 }
 0x47d   :  { %v1267_v31 = vrot.slane %v1246_v27, %v5480_v36  ;;  %v1268_v32 = vcombine.low %v1253_v29, %v1260_v30 }
 0x47f   :  { %v1275_v33 = vrot.slane %v1268_v32, %v5480_v36  ;;  %v1282_v34 = vrot.slane %v1267_v31, %v5480_v36 }
 0x481   :  { %v1283_v35 = vcombine.low %v1275_v33, %v1282_v34 }
 0x483   :  { %4926 = vmatmul.mubr.msk.bf16.vlgmr.msra.gmra.mrb[8].mxu0 %vm99_vm3, %v1283_v35 }
 0x484   :  { %4931 = vmatprep.mubr.msk.bf16.mxu0 %vm5344_vm2, %v5340_v2  ;;  %4930 = vmatpush3.bf16.msra.mxu0 %v1688_v40 }
 0x485   :  { %4935 = vmatprep.subr.bf16.mxu0 %v5340_v2 }
 0x556   :  { %v1352_v49 = vpop.f32.mrb[8].mxu0 }
 0x557   :  { %v1353_v50 = vadd.f32 %v1352_v49, %v1300_v47  ;;  %v4927_v51 = vpop.f32.mrb[9].mxu0 }
 0x558   :  { %v1355_v0 = vpop.f32.mrb[10].mxu0 }
 0x559   :  { %v1361_v52 = vcombine.high %v1353_v50, %v1353_v50  ;;  %v5713_v53 = vrot.slane %v1353_v50, %v5527_v12  ;;  %v1356_v54 = vadd.f32 %v1355_v0, %v1308_v48  ;;  %v4928_v55 = vpop.f32.mrb[11].mxu0 }
 0x55b   :  { %v5716_v56 = vrot.slane %v1361_v52, %v5527_v12  ;;  %v5720_v1 = vcombine.high %v5713_v53, %v5713_v53  ;;  %v4777_v60 = vmul.f32 -1.442695, %v5713_v53  ;;  %v5724_v61 = vrot.slane %v1356_v54, %v5527_v12 }
 0x55c   :  { %v1392_v48 = vmax.f32 %v5713_v53, 0.0 }
 0x55d   :  { %v5728_v5 = vcombine.high %v5716_v56, %v5716_v56  ;;  %5096 = vpow2.f32 %v4777_v60  ;;  %v4778_v6 = vmul.f32 -1.442695, %v5720_v1  ;;  %v4779_v7 = vmul.f32 -1.442695, %v5716_v56 }
 0x55e   :  { %v4781_v9 = vmul.f32 -1.442695, %v5724_v61  ;;  %v5736_v10 = vcombine.high %v5724_v61, %v5724_v61  ;;  %v1393_v45 = vmax.f32 %v5720_v1, 0.0  ;;  %v1394_v60 = vmax.f32 %v5716_v56, 0.0 }
 0x55f   :  { %5098 = vpow2.f32 %v4778_v6  ;;  %v4780_v8 = vmul.f32 -1.442695, %v5728_v5  ;;  %v1395_v53 = vmax.f32 %v5728_v5, 0.0 }
 0x560   :  { %5100 = vpow2.f32 %v4779_v7  ;;  %v4782_v13 = vmul.f32 -1.442695, %v5736_v10 }
 0x561   :  { %5102 = vpow2.f32 %v4780_v8 }
 0x562   :  { %5104 = vpow2.f32 %v4781_v9 }
 0x567   :  { %v5097_v11 = vpop.eup %5096 }
 0x568   :  { %v1416_v14 = vadd.f32 1.0, %v5097_v11 }
 0x569   :  { %v5099_v15 = vpop.eup %5098 }
 0x56a   :  { %v1417_v16 = vadd.f32 1.0, %v5099_v15  ;;  %5106 = vrcp.f32 %v1416_v14  ;;  %v5101_v17 = vpop.eup %5100 }
 0x56b   :  { %5108 = vpow2.f32 %v4782_v13  ;;  %v5103_v18 = vpop.eup %5102  ;;  %v1418_v19 = vadd.f32 1.0, %v5101_v17 }
 0x56c   :  { %5110 = vrcp.f32 %v1417_v16  ;;  %v5105_v20 = vpop.eup %5104  ;;  %v1419_v21 = vadd.f32 1.0, %v5103_v18 }
 0x56d   :  { %5112 = vrcp.f32 %v1418_v19  ;;  %v1420_v22 = vadd.f32 1.0, %v5105_v20 }
 0x56e   :  { %5114 = vrcp.f32 %v1419_v21 }
 0x56f   :  { %5116 = vrcp.f32 %v1420_v22 }
 0x574   :  { %v5107_v23 = vpop.eup %5106 }
 0x575   :  { %v5109_v24 = vpop.eup %5108  ;;  %1440 = vrot.lane.b32.xlu0 %v5107_v23, %s5350_s0  ;;  %v1464_v26 = vsub.f32 1.0, %v5107_v23 }
 0x576   :  { %v5111_v25 = vpop.eup %5110  ;;  %v1421_v27 = vadd.f32 1.0, %v5109_v24 }
 0x577   :  { %1442 = vrot.lane.b32.xlu1 %v5111_v25, %s5350_s0  ;;  %v1465_v29 = vsub.f32 1.0, %v5111_v25  ;;  %v5113_v30 = vpop.eup %5112 }
 0x578   :  { %5118 = vrcp.f32 %v1421_v27  ;;  %v5115_v31 = vpop.eup %5114  ;;  %v1466_v33 = vsub.f32 1.0, %v5113_v30 }
 0x579   :  { %1476 = vrot.lane.b32.xlu0 %v1464_v26, %s5350_s0  ;;  %v5117_v32 = vpop.eup %5116  ;;  %v1467_v34 = vsub.f32 1.0, %v5115_v31 }
 0x57a   :  { %v1468_v35 = vsub.f32 1.0, %v5117_v32 }
 0x57b   :  { %1478 = vrot.lane.b32.xlu1 %v1465_v29, %s5350_s0 }
 0x57d   :  { %1444 = vrot.lane.b32.xlu0 %v5113_v30, %s5350_s0 }
 0x57f   :  { %1446 = vrot.lane.b32.xlu1 %v5115_v31, %s5350_s0 }
 0x581   :  { %1448 = vrot.lane.b32.xlu0 %v5117_v32, %s5350_s0 }
 0x582   :  { %v5119_v37 = vpop.eup %5118 }
 0x583   :  { %1480 = vrot.lane.b32.xlu1 %v1466_v33, %s5350_s0  ;;  %v1469_v38 = vsub.f32 1.0, %v5119_v37 }
 0x585   :  { %1482 = vrot.lane.b32.xlu0 %v1467_v34, %s5350_s0 }
 0x587   :  { %1484 = vrot.lane.b32.xlu1 %v1468_v35, %s5350_s0 }
 0x589   :  { %1450 = vrot.lane.b32.xlu0 %v5119_v37, %s5350_s0 }
 0x58b   :  { %1486 = vrot.lane.b32.xlu1 %v1469_v38, %s5350_s0 }
 0x5e7   :  { %v1441_v41 = vpop.permute.xlu0 %1440 }
 0x5e8   :  { %v1458_v0 = vmul.f32 %v1441_v41, %v1392_v48  ;;  %v4783_v48 = vld [vmem:[%s6640_s8 + $0x1] ss:$0 sm:$0xff] }
 0x5e9   :  { %v1443_v42 = vpop.permute.xlu1 %1442 }
 0x5ea   :  { %v1459_v49 = vmul.f32 %v1443_v42, %v1393_v45 }
 0x5eb   :  { %v1477_v43 = vpop.permute.xlu0 %1476 }
 0x5ec   :  { %v1494_v50 = vmul.f32 %v1477_v43, %v5668_v57  ;;  %v1396_v57 = vmax.f32 %v5724_v61, 0.0  ;;  %v1397_v61 = vmax.f32 %v5736_v10, 0.0 }
 0x5ed   :  { %v1479_v44 = vpop.permute.xlu1 %1478 }
 0x5ee   :  { %v1495_v46 = vmul.f32 %v1479_v44, %v5670_v58  ;;  %v5762_v55 = vadd.f32 %v1494_v50, %v1458_v0  ;;  %v1608_v50 = vrot.slane %v4783_v48, %v5527_v12 }
 0x5ef   :  { %v1445_v47 = vpop.permute.xlu0 %1444 }
 0x5f0   :  { %v5760_v52 = vadd.f32 %v1495_v46, %v1459_v49  ;;  %v1460_v58 = vmul.f32 %v1445_v47, %v1394_v60  ;;  %v1601_v49 = vcombine.high %v4783_v48, %v4783_v48  ;;  %v1616_v0 = vcombine.high %v1608_v50, %v1608_v50 }
 0x5f1   :  { %v1447_v51 = vpop.permute.xlu1 %1446 }
 0x5f2   :  { %v1512_v1 = vcombine.low %v5762_v55, %v5760_v52  ;;  %v1461_v13 = vmul.f32 %v1447_v51, %v1395_v53  ;;  %v1615_v51 = vrot.slane %v1601_v49, %v5527_v12 }
 0x5f3   :  { %v1449_v54 = vpop.permute.xlu0 %1448 }
 0x5f4   :  { %v1519_v56 = vrot.slane %v1512_v1, %v5527_v12  ;;  %v1462_v15 = vmul.f32 %v1449_v54, %v1396_v57  ;;  %v1657_v54 = vcombine.low %v1608_v50, %v1616_v0  ;;  %v1658_v60 = vcombine.low %v1615_v51, %v1608_v50  ;;  %v1127_v50 = vld [vmem:[%s6638_s7 + $0x8] sm:$0xf] }
 0x5f5   :  { %v1481_v6 = vpop.permute.xlu1 %1480 }
 0x5f6   :  { %v1496_v7 = vmul.f32 %v1481_v6, %v5672_v59  ;;  %v1665_v6 = vrot.slane %v1657_v54, %v5527_v12  ;;  %v1672_v1 = vrot.slane %v1658_v60, %v5527_v12 }
 0x5f7   :  { %v1483_v8 = vpop.permute.xlu0 %1482 }
 0x5f8   :  { %v5770_v9 = vadd.f32 %v1496_v7, %v1460_v58  ;;  %v1497_v11 = vmul.f32 %v1483_v8, %v5676_v63  ;;  %v1674_v58 = vcombine.low %v1616_v0, %v1615_v51  ;;  %v1673_v7 = vcombine.low %v1665_v6, %v1672_v1 }
 0x5f9   :  { %v1485_v14 = vpop.permute.xlu1 %1484  ;;  %v2060_v51 = vsel %vm1314_vm11, %v1127_v50, 0 }
 0x5fa   :  { %v1526_v16 = vrot.slane %v5770_v9, %v5527_v12  ;;  %v1498_v17 = vmul.f32 %v1485_v14, %v5678_v3  ;;  %v5777_v5 = vadd.f32 %v1497_v11, %v1461_v13  ;;  %v1681_v53 = vrot.slane %v1674_v58, %v5527_v12 }
 0x5fb   :  { %v1451_v59 = vpop.permute.xlu0 %1450 }
 0x5fc   :  { %v1527_v18 = vcombine.low %v1519_v56, %v1526_v16  ;;  %v5779_v19 = vadd.f32 %v1498_v17, %v1462_v15  ;;  %v1463_v22 = vmul.f32 %v1451_v59, %v1397_v61 }
 0x5fd   :  { %v1487_v20 = vpop.permute.xlu1 %1486 }
 0x5fe   :  { %v1546_v63 = vpack.c.bf16 %v1527_v18, %v1527_v18  ;;  %v1528_v21 = vcombine.low %v5777_v5, %v5779_v19  ;;  %v1499_v23 = vmul.f32 %v1487_v20, %v5680_v4 }
 0x600   :  { %v1561_v24 = vrot.slane %v1546_v63, %v5480_v36  ;;  %v5786_v25 = vadd.f32 %v1499_v23, %v1463_v22  ;;  %v1535_v26 = vrot.slane %v1528_v21, %v5527_v12 }
 0x602   :  { %v1562_v3 = vcombine.high %v1561_v24, %v1561_v24  ;;  %v1542_v27 = vrot.slane %v5786_v25, %v5527_v12  ;;  %v1569_v10 = vrot.slane %v1561_v24, %v5480_v36 }
 0x604   :  { %v1543_v29 = vcombine.low %v1535_v26, %v1542_v27  ;;  %v1576_v30 = vrot.slane %v1562_v3, %v5480_v36  ;;  %v1577_v33 = vcombine.high %v1569_v10, %v1569_v10 }
 0x606   :  { %v1547_v31 = vpack.c.bf16 %v1543_v29, %v1543_v29  ;;  %v1617_v4 = vcombine.low %v1569_v10, %v1576_v30 }
 0x608   :  { %v1584_v32 = vrot.slane %v1547_v31, %v5480_v36  ;;  %v1626_v40 = vrot.slane %v1617_v4, %v5480_v36 }
 0x60a   :  { %v1585_v34 = vcombine.high %v1584_v32, %v1584_v32  ;;  %v1592_v35 = vrot.slane %v1584_v32, %v5480_v36 }
 0x60c   :  { %v1599_v37 = vrot.slane %v1585_v34, %v5480_v36  ;;  %v1600_v38 = vcombine.high %v1592_v35, %v1592_v35  ;;  %v1618_v39 = vcombine.low %v1577_v33, %v1592_v35 }
 0x60e   :  { %v1619_v41 = vcombine.low %v1599_v37, %v1600_v38  ;;  %v1633_v42 = vrot.slane %v1618_v39, %v5480_v36 }
 0x610   :  { %v1640_v43 = vrot.slane %v1619_v41, %v5480_v36  ;;  %v1641_v44 = vcombine.low %v1626_v40, %v1633_v42 }
 0x612   :  { %v1648_v45 = vrot.slane %v1641_v44, %v5480_v36  ;;  %v1655_v46 = vrot.slane %v1640_v43, %v5480_v36 }
 0x614   :  { %v1656_v47 = vcombine.low %v1648_v45, %v1655_v46 }
 0x616   :  { %4932 = vmatmul.mubr.msk.bf16.vlgmr.msra.gmra.mrb[12].mxu0 %vm99_vm3, %v1656_v47 }
 0x617   :  { %4937 = vmatprep.mubr.msk.bf16.mxu0 %vm5344_vm2, %v5340_v2  ;;  %4936 = vmatpush3.bf16.msra.mxu0 %v2060_v51 }
 0x618   :  { %4941 = vmatprep.subr.bf16.mxu0 %v5340_v2 }
 0x6e9   :  { %v1724_v8 = vpop.f32.mrb[12].mxu0 }
 0x6ea   :  { %v1725_v57 = vadd.f32 %v1724_v8, %v1673_v7  ;;  %v4933_v11 = vpop.f32.mrb[13].mxu0 }
 0x6eb   :  { %v1727_v13 = vpop.f32.mrb[14].mxu0 }
 0x6ec   :  { %v1733_v14 = vcombine.high %v1725_v57, %v1725_v57  ;;  %v5813_v56 = vrot.slane %v1725_v57, %v5527_v12  ;;  %v1728_v15 = vadd.f32 %v1727_v13, %v1681_v53  ;;  %v4934_v16 = vpop.f32.mrb[15].mxu0 }
 0x6ee   :  { %v5816_v17 = vrot.slane %v1733_v14, %v5527_v12  ;;  %v5820_v59 = vcombine.high %v5813_v56, %v5813_v56  ;;  %v4785_v18 = vmul.f32 -1.442695, %v5813_v56  ;;  %v5824_v61 = vrot.slane %v1728_v15, %v5527_v12 }
 0x6ef   :  { %v1764_v53 = vmax.f32 %v5813_v56, 0.0 }
 0x6f0   :  { %v5828_v20 = vcombine.high %v5816_v17, %v5816_v17  ;;  %5120 = vpow2.f32 %v4785_v18  ;;  %v4786_v63 = vmul.f32 -1.442695, %v5820_v59  ;;  %v4787_v21 = vmul.f32 -1.442695, %v5816_v17 }
 0x6f1   :  { %v4789_v23 = vmul.f32 -1.442695, %v5824_v61  ;;  %v5836_v24 = vcombine.high %v5824_v61, %v5824_v61  ;;  %v1765_v1 = vmax.f32 %v5820_v59, 0.0  ;;  %v1766_v18 = vmax.f32 %v5816_v17, 0.0 }
 0x6f2   :  { %5122 = vpow2.f32 %v4786_v63  ;;  %v4788_v22 = vmul.f32 -1.442695, %v5828_v20  ;;  %v1767_v56 = vmax.f32 %v5828_v20, 0.0 }
 0x6f3   :  { %5124 = vpow2.f32 %v4787_v21  ;;  %v4790_v26 = vmul.f32 -1.442695, %v5836_v24 }
 0x6f4   :  { %5126 = vpow2.f32 %v4788_v22 }
 0x6f5   :  { %5128 = vpow2.f32 %v4789_v23 }
 0x6fa   :  { %v5121_v3 = vpop.eup %5120 }
 0x6fb   :  { %v1788_v27 = vadd.f32 1.0, %v5121_v3 }
 0x6fc   :  { %v5123_v29 = vpop.eup %5122 }
 0x6fd   :  { %v1789_v10 = vadd.f32 1.0, %v5123_v29  ;;  %5130 = vrcp.f32 %v1788_v27  ;;  %v5125_v30 = vpop.eup %5124 }
 0x6fe   :  { %5132 = vpow2.f32 %v4790_v26  ;;  %v5127_v31 = vpop.eup %5126  ;;  %v1790_v32 = vadd.f32 1.0, %v5125_v30 }
 0x6ff   :  { %5134 = vrcp.f32 %v1789_v10  ;;  %v5129_v33 = vpop.eup %5128  ;;  %v1791_v4 = vadd.f32 1.0, %v5127_v31 }
 0x700   :  { %5136 = vrcp.f32 %v1790_v32  ;;  %v1792_v34 = vadd.f32 1.0, %v5129_v33 }
 0x701   :  { %5138 = vrcp.f32 %v1791_v4 }
 0x702   :  { %5140 = vrcp.f32 %v1792_v34 }
 0x707   :  { %v5131_v35 = vpop.eup %5130 }
 0x708   :  { %v5133_v37 = vpop.eup %5132  ;;  %1812 = vrot.lane.b32.xlu0 %v5131_v35, %s5350_s0  ;;  %v1836_v39 = vsub.f32 1.0, %v5131_v35 }
 0x709   :  { %v5135_v38 = vpop.eup %5134  ;;  %v1793_v40 = vadd.f32 1.0, %v5133_v37 }
 0x70a   :  { %1814 = vrot.lane.b32.xlu1 %v5135_v38, %s5350_s0  ;;  %v1837_v41 = vsub.f32 1.0, %v5135_v38  ;;  %v5137_v42 = vpop.eup %5136 }
 0x70b   :  { %5142 = vrcp.f32 %v1793_v40  ;;  %v5139_v43 = vpop.eup %5138  ;;  %v1838_v45 = vsub.f32 1.0, %v5137_v42 }
 0x70c   :  { %1848 = vrot.lane.b32.xlu0 %v1836_v39, %s5350_s0  ;;  %v5141_v44 = vpop.eup %5140  ;;  %v1839_v46 = vsub.f32 1.0, %v5139_v43 }
 0x70d   :  { %v1840_v47 = vsub.f32 1.0, %v5141_v44 }
 0x70e   :  { %1850 = vrot.lane.b32.xlu1 %v1837_v41, %s5350_s0 }
 0x710   :  { %1816 = vrot.lane.b32.xlu0 %v5137_v42, %s5350_s0 }
 0x712   :  { %1818 = vrot.lane.b32.xlu1 %v5139_v43, %s5350_s0 }
 0x714   :  { %1820 = vrot.lane.b32.xlu0 %v5141_v44, %s5350_s0 }
 0x715   :  { %v5143_v48 = vpop.eup %5142 }
 0x716   :  { %1852 = vrot.lane.b32.xlu1 %v1838_v45, %s5350_s0  ;;  %v1841_v49 = vsub.f32 1.0, %v5143_v48 }
 0x718   :  { %1854 = vrot.lane.b32.xlu0 %v1839_v46, %s5350_s0 }
 0x71a   :  { %1856 = vrot.lane.b32.xlu1 %v1840_v47, %s5350_s0 }
 0x71c   :  { %1822 = vrot.lane.b32.xlu0 %v5143_v48, %s5350_s0 }
 0x71e   :  { %1858 = vrot.lane.b32.xlu1 %v1841_v49, %s5350_s0 }
 0x77a   :  { %v1813_v0 = vpop.permute.xlu0 %1812 }
 0x77b   :  { %v1830_v13 = vmul.f32 %v1813_v0, %v1764_v53  ;;  %v4791_v53 = vld [vmem:[%s6640_s8 + $0x2] ss:$0 sm:$0xff] }
 0x77c   :  { %v1815_v54 = vpop.permute.xlu1 %1814 }
 0x77d   :  { %v1831_v8 = vmul.f32 %v1815_v54, %v1765_v1 }
 0x77e   :  { %v1849_v60 = vpop.permute.xlu0 %1848 }
 0x77f   :  { %v1866_v57 = vmul.f32 %v1849_v60, %v5762_v55  ;;  %v1768_v55 = vmax.f32 %v5824_v61, 0.0  ;;  %v1769_v61 = vmax.f32 %v5836_v24, 0.0 }
 0x780   :  { %v1851_v6 = vpop.permute.xlu1 %1850 }
 0x781   :  { %v1867_v58 = vmul.f32 %v1851_v6, %v5760_v52  ;;  %v5862_v16 = vadd.f32 %v1866_v57, %v1830_v13  ;;  %v1980_v57 = vrot.slane %v4791_v53, %v5527_v12 }
 0x782   :  { %v1817_v7 = vpop.permute.xlu0 %1816 }
 0x783   :  { %v5860_v14 = vadd.f32 %v1867_v58, %v1831_v8  ;;  %v1832_v52 = vmul.f32 %v1817_v7, %v1766_v18  ;;  %v1973_v8 = vcombine.high %v4791_v53, %v4791_v53  ;;  %v1988_v13 = vcombine.high %v1980_v57, %v1980_v57 }
 0x784   :  { %v1819_v11 = vpop.permute.xlu1 %1818 }
 0x785   :  { %v1884_v59 = vcombine.low %v5862_v16, %v5860_v14  ;;  %v1833_v26 = vmul.f32 %v1819_v11, %v1767_v56  ;;  %v1987_v11 = vrot.slane %v1973_v8, %v5527_v12 }
 0x786   :  { %v1821_v15 = vpop.permute.xlu0 %1820 }
 0x787   :  { %v1891_v17 = vrot.slane %v1884_v59, %v5527_v12  ;;  %v1834_v29 = vmul.f32 %v1821_v15, %v1768_v55  ;;  %v2029_v15 = vcombine.low %v1980_v57, %v1988_v13  ;;  %v2030_v18 = vcombine.low %v1987_v11, %v1980_v57  ;;  %v1128_v57 = vld [vmem:[%s6638_s7 + $0xc] sm:$0xf] }
 0x788   :  { %v1853_v63 = vpop.permute.xlu1 %1852 }
 0x789   :  { %v1868_v21 = vmul.f32 %v1853_v63, %v5770_v9  ;;  %v2037_v63 = vrot.slane %v2029_v15, %v5527_v12  ;;  %v2044_v59 = vrot.slane %v2030_v18, %v5527_v12 }
 0x78a   :  { %v1855_v22 = vpop.permute.xlu0 %1854 }
 0x78b   :  { %v5870_v23 = vadd.f32 %v1868_v21, %v1832_v52  ;;  %v1869_v3 = vmul.f32 %v1855_v22, %v5777_v5  ;;  %v2046_v52 = vcombine.low %v1988_v13, %v1987_v11  ;;  %v2045_v21 = vcombine.low %v2037_v63, %v2044_v59 }
 0x78c   :  { %v1857_v27 = vpop.permute.xlu1 %1856  ;;  %v2432_v11 = vsel %vm1314_vm11, %v1128_v57, 0 }
 0x78d   :  { %v1898_v10 = vrot.slane %v5870_v23, %v5527_v12  ;;  %v1870_v30 = vmul.f32 %v1857_v27, %v5779_v19  ;;  %v5877_v20 = vadd.f32 %v1869_v3, %v1833_v26  ;;  %v2053_v56 = vrot.slane %v2046_v52, %v5527_v12 }
 0x78e   :  { %v1823_v9 = vpop.permute.xlu0 %1822 }
 0x78f   :  { %v1899_v31 = vcombine.low %v1891_v17, %v1898_v10  ;;  %v5879_v32 = vadd.f32 %v1870_v30, %v1834_v29  ;;  %v1835_v34 = vmul.f32 %v1823_v9, %v1769_v61 }
 0x790   :  { %v1859_v33 = vpop.permute.xlu1 %1858 }
 0x791   :  { %v1918_v5 = vpack.c.bf16 %v1899_v31, %v1899_v31  ;;  %v1900_v4 = vcombine.low %v5877_v20, %v5879_v32  ;;  %v1871_v35 = vmul.f32 %v1859_v33, %v5786_v25 }
 0x793   :  { %v1933_v37 = vrot.slane %v1918_v5, %v5480_v36  ;;  %v5886_v38 = vadd.f32 %v1871_v35, %v1835_v34  ;;  %v1907_v39 = vrot.slane %v1900_v4, %v5527_v12 }
 0x795   :  { %v1934_v19 = vcombine.high %v1933_v37, %v1933_v37  ;;  %v1914_v40 = vrot.slane %v5886_v38, %v5527_v12  ;;  %v1941_v24 = vrot.slane %v1933_v37, %v5480_v36 }
 0x797   :  { %v1915_v41 = vcombine.low %v1907_v39, %v1914_v40  ;;  %v1948_v42 = vrot.slane %v1934_v19, %v5480_v36  ;;  %v1949_v45 = vcombine.high %v1941_v24, %v1941_v24 }
 0x799   :  { %v1919_v43 = vpack.c.bf16 %v1915_v41, %v1915_v41  ;;  %v1989_v25 = vcombine.low %v1941_v24, %v1948_v42 }
 0x79b   :  { %v1956_v44 = vrot.slane %v1919_v43, %v5480_v36  ;;  %v1998_v51 = vrot.slane %v1989_v25, %v5480_v36 }
 0x79d   :  { %v1957_v46 = vcombine.high %v1956_v44, %v1956_v44  ;;  %v1964_v47 = vrot.slane %v1956_v44, %v5480_v36 }
 0x79f   :  { %v1971_v48 = vrot.slane %v1957_v46, %v5480_v36  ;;  %v1972_v49 = vcombine.high %v1964_v47, %v1964_v47  ;;  %v1990_v50 = vcombine.low %v1949_v45, %v1964_v47 }
 0x7a1   :  { %v1991_v0 = vcombine.low %v1971_v48, %v1972_v49  ;;  %v2005_v54 = vrot.slane %v1990_v50, %v5480_v36 }
 0x7a3   :  { %v2012_v60 = vrot.slane %v1991_v0, %v5480_v36  ;;  %v2013_v6 = vcombine.low %v1998_v51, %v2005_v54 }
 0x7a5   :  { %v2020_v1 = vrot.slane %v2013_v6, %v5480_v36  ;;  %v2027_v58 = vrot.slane %v2012_v60, %v5480_v36 }
 0x7a7   :  { %v2028_v7 = vcombine.low %v2020_v1, %v2027_v58 }
 0x7a9   :  { %4938 = vmatmul.mubr.msk.bf16.vlgmr.msra.gmra.mrb[16].mxu0 %vm99_vm3, %v2028_v7 }
 0x7aa   :  { %4943 = vmatprep.mubr.msk.bf16.mxu0 %vm5344_vm2, %v5340_v2  ;;  %4942 = vmatpush3.bf16.msra.mxu0 %v2432_v11 }
 0x7ab   :  { %4953 = vmatprep.subr.bf16.mxu0 %v5340_v2 }
 0x87c   :  { %v2096_v22 = vpop.f32.mrb[16].mxu0 }
 0x87d   :  { %v2097_v55 = vadd.f32 %v2096_v22, %v2045_v21  ;;  %v4939_v3 = vpop.f32.mrb[17].mxu0 }
 0x87e   :  { %v2099_v26 = vpop.f32.mrb[18].mxu0 }
 0x87f   :  { %v2105_v27 = vcombine.high %v2097_v55, %v2097_v55  ;;  %v5913_v17 = vrot.slane %v2097_v55, %v5527_v12  ;;  %v2100_v29 = vadd.f32 %v2099_v26, %v2053_v56  ;;  %v4940_v10 = vpop.f32.mrb[19].mxu0 }
 0x881   :  { %v5916_v30 = vrot.slane %v2105_v27, %v5527_v12  ;;  %v5920_v9 = vcombine.high %v5913_v17, %v5913_v17  ;;  %v4793_v31 = vmul.f32 -1.442695, %v5913_v17  ;;  %v5924_v61 = vrot.slane %v2100_v29, %v5527_v12 }
 0x882   :  { %v2136_v56 = vmax.f32 %v5913_v17, 0.0 }
 0x883   :  { %v5928_v33 = vcombine.high %v5916_v30, %v5916_v30  ;;  %5144 = vpow2.f32 %v4793_v31  ;;  %v4794_v5 = vmul.f32 -1.442695, %v5920_v9  ;;  %v4795_v4 = vmul.f32 -1.442695, %v5916_v30 }
 0x884   :  { %v4797_v35 = vmul.f32 -1.442695, %v5924_v61  ;;  %v5936_v37 = vcombine.high %v5924_v61, %v5924_v61  ;;  %v2137_v59 = vmax.f32 %v5920_v9, 0.0  ;;  %v2138_v31 = vmax.f32 %v5916_v30, 0.0 }
 0x885   :  { %5146 = vpow2.f32 %v4794_v5  ;;  %v4796_v34 = vmul.f32 -1.442695, %v5928_v33  ;;  %v2139_v17 = vmax.f32 %v5928_v33, 0.0 }
 0x886   :  { %5148 = vpow2.f32 %v4795_v4  ;;  %v4798_v39 = vmul.f32 -1.442695, %v5936_v37 }
 0x887   :  { %5150 = vpow2.f32 %v4796_v34 }
 0x888   :  { %5152 = vpow2.f32 %v4797_v35 }
 0x88d   :  { %v5145_v19 = vpop.eup %5144 }
 0x88e   :  { %v2160_v40 = vadd.f32 1.0, %v5145_v19 }
 0x88f   :  { %v5147_v41 = vpop.eup %5146 }
 0x890   :  { %v2161_v24 = vadd.f32 1.0, %v5147_v41  ;;  %5154 = vrcp.f32 %v2160_v40  ;;  %v5149_v42 = vpop.eup %5148 }
 0x891   :  { %5156 = vpow2.f32 %v4798_v39  ;;  %v5151_v43 = vpop.eup %5150  ;;  %v2162_v44 = vadd.f32 1.0, %v5149_v42 }
 0x892   :  { %5158 = vrcp.f32 %v2161_v24  ;;  %v5153_v45 = vpop.eup %5152  ;;  %v2163_v25 = vadd.f32 1.0, %v5151_v43 }
 0x893   :  { %5160 = vrcp.f32 %v2162_v44  ;;  %v2164_v46 = vadd.f32 1.0, %v5153_v45 }
 0x894   :  { %5162 = vrcp.f32 %v2163_v25 }
 0x895   :  { %5164 = vrcp.f32 %v2164_v46 }
 0x89a   :  { %v5155_v47 = vpop.eup %5154 }
 0x89b   :  { %v5157_v48 = vpop.eup %5156  ;;  %2184 = vrot.lane.b32.xlu0 %v5155_v47, %s5350_s0  ;;  %v2208_v50 = vsub.f32 1.0, %v5155_v47 }
 0x89c   :  { %v5159_v49 = vpop.eup %5158  ;;  %v2165_v51 = vadd.f32 1.0, %v5157_v48 }
 0x89d   :  { %2186 = vrot.lane.b32.xlu1 %v5159_v49, %s5350_s0  ;;  %v2209_v0 = vsub.f32 1.0, %v5159_v49  ;;  %v5161_v54 = vpop.eup %5160 }
 0x89e   :  { %5166 = vrcp.f32 %v2165_v51  ;;  %v5163_v60 = vpop.eup %5162  ;;  %v2210_v1 = vsub.f32 1.0, %v5161_v54 }
 0x89f   :  { %2220 = vrot.lane.b32.xlu0 %v2208_v50, %s5350_s0  ;;  %v5165_v6 = vpop.eup %5164  ;;  %v2211_v58 = vsub.f32 1.0, %v5163_v60 }
 0x8a0   :  { %v2212_v7 = vsub.f32 1.0, %v5165_v6 }
 0x8a1   :  { %2222 = vrot.lane.b32.xlu1 %v2209_v0, %s5350_s0 }
 0x8a3   :  { %2188 = vrot.lane.b32.xlu0 %v5161_v54, %s5350_s0 }
 0x8a5   :  { %2190 = vrot.lane.b32.xlu1 %v5163_v60, %s5350_s0 }
 0x8a7   :  { %2192 = vrot.lane.b32.xlu0 %v5165_v6, %s5350_s0 }
 0x8a8   :  { %v5167_v53 = vpop.eup %5166 }
 0x8a9   :  { %2224 = vrot.lane.b32.xlu1 %v2210_v1, %s5350_s0  ;;  %v2213_v8 = vsub.f32 1.0, %v5167_v53 }
 0x8ab   :  { %2226 = vrot.lane.b32.xlu0 %v2211_v58, %s5350_s0 }
 0x8ad   :  { %2228 = vrot.lane.b32.xlu1 %v2212_v7, %s5350_s0 }
 0x8af   :  { %2194 = vrot.lane.b32.xlu0 %v5167_v53, %s5350_s0 }
 0x8b1   :  { %2230 = vrot.lane.b32.xlu1 %v2213_v8, %s5350_s0 }
 0x90d   :  { %v2185_v13 = vpop.permute.xlu0 %2184 }
 0x90e   :  { %v2202_v26 = vmul.f32 %v2185_v13, %v2136_v56  ;;  %v4799_v56 = vld [vmem:[%s6640_s8 + $0x3] ss:$0 sm:$0xff] }
 0x90f   :  { %v2187_v15 = vpop.permute.xlu1 %2186 }
 0x910   :  { %v2203_v22 = vmul.f32 %v2187_v15, %v2137_v59 }
 0x911   :  { %v2221_v18 = vpop.permute.xlu0 %2220 }
 0x912   :  { %v2238_v55 = vmul.f32 %v2221_v18, %v5862_v16  ;;  %v2140_v16 = vmax.f32 %v5924_v61, 0.0  ;;  %v2141_v61 = vmax.f32 %v5936_v37, 0.0 }
 0x913   :  { %v2223_v63 = vpop.permute.xlu1 %2222 }
 0x914   :  { %v2239_v52 = vmul.f32 %v2223_v63, %v5860_v14  ;;  %v5962_v10 = vadd.f32 %v2238_v55, %v2202_v26  ;;  %v2352_v55 = vrot.slane %v4799_v56, %v5527_v12 }
 0x915   :  { %v2189_v21 = vpop.permute.xlu0 %2188 }
 0x916   :  { %v5960_v27 = vadd.f32 %v2239_v52, %v2203_v22  ;;  %v2204_v14 = vmul.f32 %v2189_v21, %v2138_v31  ;;  %v2345_v22 = vcombine.high %v4799_v56, %v4799_v56  ;;  %v2360_v26 = vcombine.high %v2352_v55, %v2352_v55 }
 0x917   :  { %v2191_v3 = vpop.permute.xlu1 %2190 }
 0x918   :  { %v2256_v9 = vcombine.low %v5962_v10, %v5960_v27  ;;  %v2205_v39 = vmul.f32 %v2191_v3, %v2139_v17  ;;  %v2359_v3 = vrot.slane %v2345_v22, %v5527_v12 }
 0x919   :  { %v2193_v29 = vpop.permute.xlu0 %2192 }
 0x91a   :  { %v2263_v30 = vrot.slane %v2256_v9, %v5527_v12  ;;  %v2206_v41 = vmul.f32 %v2193_v29, %v2140_v16  ;;  %v2401_v29 = vcombine.low %v2352_v55, %v2360_v26  ;;  %v2402_v31 = vcombine.low %v2359_v3, %v2352_v55  ;;  %v2628_v55 = vld [vmem:[%s6641_s9] sm:$0xf] }
 0x91b   :  { %v2225_v5 = vpop.permute.xlu1 %2224 }
 0x91c   :  { %v2240_v4 = vmul.f32 %v2225_v5, %v5870_v23  ;;  %v2409_v5 = vrot.slane %v2401_v29, %v5527_v12  ;;  %v2416_v9 = vrot.slane %v2402_v31, %v5527_v12 }
 0x91d   :  { %v2227_v34 = vpop.permute.xlu0 %2226 }
 0x91e   :  { %v5970_v35 = vadd.f32 %v2240_v4, %v2204_v14  ;;  %v2241_v19 = vmul.f32 %v2227_v34, %v5877_v20  ;;  %v2418_v14 = vcombine.low %v2360_v26, %v2359_v3  ;;  %v2417_v4 = vcombine.low %v2409_v5, %v2416_v9  ;;  %v6058_v26 = vld [vmem:[%s6642_s11] sm:$0xff]  }
 0x91f   :  { %v2229_v40 = vpop.permute.xlu1 %2228  ;;  %v2812_v3 = vsel %vm1314_vm11, %v2628_v55, 0 }
 0x920   :  { %v2270_v24 = vrot.slane %v5970_v35, %v5527_v12  ;;  %v2242_v42 = vmul.f32 %v2229_v40, %v5879_v32  ;;  %v5977_v33 = vadd.f32 %v2241_v19, %v2205_v39  ;;  %v2425_v17 = vrot.slane %v2418_v14, %v5527_v12  ;;  %4948 = vmatpush3.bf16.msra.mxu1 %v2812_v3 }
 0x921   :  { %v2195_v23 = vpop.permute.xlu0 %2194  ;;  %4959 = vmatprep.subr.bf16.mxu1 %v5340_v2 }
 0x922   :  { %v2271_v43 = vcombine.low %v2263_v30, %v2270_v24  ;;  %v5979_v44 = vadd.f32 %v2242_v42, %v2206_v41  ;;  %v2207_v46 = vmul.f32 %v2195_v23, %v2141_v61 }
 0x923   :  { %v2231_v45 = vpop.permute.xlu1 %2230 }
 0x924   :  { %v2290_v20 = vpack.c.bf16 %v2271_v43, %v2271_v43  ;;  %v2272_v25 = vcombine.low %v5977_v33, %v5979_v44  ;;  %v2243_v47 = vmul.f32 %v2231_v45, %v5886_v38 }
 0x926   :  { %v2305_v48 = vrot.slane %v2290_v20, %v5480_v36  ;;  %v5986_v49 = vadd.f32 %v2243_v47, %v2207_v46  ;;  %v2279_v50 = vrot.slane %v2272_v25, %v5527_v12 }
 0x928   :  { %v2306_v32 = vcombine.high %v2305_v48, %v2305_v48  ;;  %v2286_v51 = vrot.slane %v5986_v49, %v5527_v12  ;;  %v2313_v37 = vrot.slane %v2305_v48, %v5480_v36 }
 0x92a   :  { %v2287_v0 = vcombine.low %v2279_v50, %v2286_v51  ;;  %v2320_v54 = vrot.slane %v2306_v32, %v5480_v36  ;;  %v2321_v1 = vcombine.high %v2313_v37, %v2313_v37 }
 0x92c   :  { %v2291_v60 = vpack.c.bf16 %v2287_v0, %v2287_v0  ;;  %v2361_v38 = vcombine.low %v2313_v37, %v2320_v54 }
 0x92e   :  { %v2328_v6 = vrot.slane %v2291_v60, %v5480_v36  ;;  %v2370_v11 = vrot.slane %v2361_v38, %v5480_v36 }
 0x930   :  { %v2329_v58 = vcombine.high %v2328_v6, %v2328_v6  ;;  %v2336_v7 = vrot.slane %v2328_v6, %v5480_v36 }
 0x932   :  { %v2343_v53 = vrot.slane %v2329_v58, %v5480_v36  ;;  %v2344_v8 = vcombine.high %v2336_v7, %v2336_v7  ;;  %v2362_v57 = vcombine.low %v2321_v1, %v2336_v7 }
 0x934   :  { %v2363_v13 = vcombine.low %v2343_v53, %v2344_v8  ;;  %v2377_v15 = vrot.slane %v2362_v57, %v5480_v36 }
 0x936   :  { %v2384_v18 = vrot.slane %v2363_v13, %v5480_v36  ;;  %v2385_v63 = vcombine.low %v2370_v11, %v2377_v15 }
 0x938   :  { %v2392_v59 = vrot.slane %v2385_v63, %v5480_v36  ;;  %v2399_v52 = vrot.slane %v2384_v18, %v5480_v36 }
 0x93a   :  { %v2400_v21 = vcombine.low %v2392_v59, %v2399_v52 }
 0x93c   :  { %4944 = vmatmul.mubr.msk.bf16.vlgmr.msra.gmra.mrb[20].mxu0 %vm99_vm3, %v2400_v21 }
 0x93d   :  { %4955 = vmatprep.mubr.msk.bf16.mxu0 %vm5344_vm2, %v5340_v2  ;;  %4954 = vmatpush3.bf16.msra.mxu0 %v6058_v26 }
 0x93e   :  { %4965 = vmatprep.subr.bf16.mxu0 %v5340_v2 }
 0x944   :  { %4956 = vmatmul.mubr.bf16.vlgmr.msra.gmra.mrb[24].mxu0 %v5346_v62 }
 0x945   :  { %4966 = vmatpush3.bf16.msra.mxu0 %v6058_v26  ;;  %4967 = vmatprep.mubr.msk.bf16.mxu0 %vm5344_vm2, %v5340_v2 }
 0x946   :  { %4977 = vmatprep.subr.bf16.mxu0 %v5340_v2 }
 0xa0f   :  { %v2468_v34 = vpop.f32.mrb[20].mxu0 }
 0xa10   :  { %v2469_v16 = vadd.f32 %v2468_v34, %v2417_v4  ;;  %v4945_v19 = vpop.f32.mrb[21].mxu0 }
 0xa11   :  { %v2471_v39 = vpop.f32.mrb[22].mxu0 }
 0xa12   :  { %v2477_v40 = vcombine.high %v2469_v16, %v2469_v16  ;;  %v6013_v30 = vrot.slane %v2469_v16, %v5527_v12  ;;  %v2472_v41 = vadd.f32 %v2471_v39, %v2425_v17  ;;  %v4946_v24 = vpop.f32.mrb[23].mxu0 }
 0xa14   :  { %v6016_v42 = vrot.slane %v2477_v40, %v5527_v12  ;;  %v6020_v23 = vcombine.high %v6013_v30, %v6013_v30  ;;  %v4801_v43 = vmul.f32 -1.442695, %v6013_v30  ;;  %v6024_v61 = vrot.slane %v2472_v41, %v5527_v12 }
 0xa15   :  { %v2508_v9 = vmax.f32 %v6013_v30, 0.0 }
 0xa16   :  { %v6028_v45 = vcombine.high %v6016_v42, %v6016_v42  ;;  %5168 = vpow2.f32 %v4801_v43  ;;  %v4802_v20 = vmul.f32 -1.442695, %v6020_v23  ;;  %v4803_v25 = vmul.f32 -1.442695, %v6016_v42 }
 0xa17   :  { %v4805_v47 = vmul.f32 -1.442695, %v6024_v61  ;;  %v6036_v48 = vcombine.high %v6024_v61, %v6024_v61  ;;  %v2509_v14 = vmax.f32 %v6020_v23, 0.0 }
 0xa18   :  { %5170 = vpow2.f32 %v4802_v20  ;;  %v4804_v46 = vmul.f32 -1.442695, %v6028_v45  ;;  %v2511_v23 = vmax.f32 %v6028_v45, 0.0 }
 0xa19   :  { %5172 = vpow2.f32 %v4803_v25  ;;  %v4806_v50 = vmul.f32 -1.442695, %v6036_v48  ;;  %v2510_v25 = vmax.f32 %v6016_v42, 0.0  ;;  %v2513_v45 = vmax.f32 %v6036_v48, 0.0 }
 0xa1a   :  { %5174 = vpow2.f32 %v4804_v46 }
 0xa1b   :  { %5176 = vpow2.f32 %v4805_v47 }
 0xa20   :  { %v5169_v32 = vpop.eup %5168 }
 0xa21   :  { %v2532_v51 = vadd.f32 1.0, %v5169_v32  ;;  %v2512_v32 = vmax.f32 %v6024_v61, 0.0 }
 0xa22   :  { %v5171_v0 = vpop.eup %5170 }
 0xa23   :  { %v2533_v37 = vadd.f32 1.0, %v5171_v0  ;;  %5178 = vrcp.f32 %v2532_v51  ;;  %v5173_v54 = vpop.eup %5172 }
 0xa24   :  { %5180 = vpow2.f32 %v4806_v50  ;;  %v5175_v60 = vpop.eup %5174  ;;  %v2534_v6 = vadd.f32 1.0, %v5173_v54 }
 0xa25   :  { %5182 = vrcp.f32 %v2533_v37  ;;  %v5177_v1 = vpop.eup %5176  ;;  %v2535_v38 = vadd.f32 1.0, %v5175_v60 }
 0xa26   :  { %5184 = vrcp.f32 %v2534_v6  ;;  %v2536_v58 = vadd.f32 1.0, %v5177_v1 }
 0xa27   :  { %5186 = vrcp.f32 %v2535_v38 }
 0xa28   :  { %5188 = vrcp.f32 %v2536_v58 }
 0xa2d   :  { %v5179_v7 = vpop.eup %5178 }
 0xa2e   :  { %v5181_v53 = vpop.eup %5180  ;;  %2556 = vrot.lane.b32.xlu0 %v5179_v7, %s5350_s0  ;;  %v2580_v57 = vsub.f32 1.0, %v5179_v7 }
 0xa2f   :  { %v5183_v8 = vpop.eup %5182  ;;  %v2537_v11 = vadd.f32 1.0, %v5181_v53 }
 0xa30   :  { %2558 = vrot.lane.b32.xlu1 %v5183_v8, %s5350_s0  ;;  %v2581_v13 = vsub.f32 1.0, %v5183_v8  ;;  %v5185_v15 = vpop.eup %5184 }
 0xa31   :  { %5190 = vrcp.f32 %v2537_v11  ;;  %v5187_v18 = vpop.eup %5186  ;;  %v2582_v59 = vsub.f32 1.0, %v5185_v15 }
 0xa32   :  { %2592 = vrot.lane.b32.xlu0 %v2580_v57, %s5350_s0  ;;  %v5189_v63 = vpop.eup %5188  ;;  %v2583_v52 = vsub.f32 1.0, %v5187_v18 }
 0xa33   :  { %v2584_v21 = vsub.f32 1.0, %v5189_v63 }
 0xa34   :  { %2594 = vrot.lane.b32.xlu1 %v2581_v13, %s5350_s0 }
 0xa36   :  { %2560 = vrot.lane.b32.xlu0 %v5185_v15, %s5350_s0 }
 0xa38   :  { %2562 = vrot.lane.b32.xlu1 %v5187_v18, %s5350_s0 }
 0xa3a   :  { %2564 = vrot.lane.b32.xlu0 %v5189_v63, %s5350_s0 }
 0xa3b   :  { %v5191_v56 = vpop.eup %5190 }
 0xa3c   :  { %2596 = vrot.lane.b32.xlu1 %v2582_v59, %s5350_s0  ;;  %v2585_v22 = vsub.f32 1.0, %v5191_v56 }
 0xa3e   :  { %2598 = vrot.lane.b32.xlu0 %v2583_v52, %s5350_s0 }
 0xa40   :  { %2600 = vrot.lane.b32.xlu1 %v2584_v21, %s5350_s0 }
 0xa42   :  { %2566 = vrot.lane.b32.xlu0 %v5191_v56, %s5350_s0 }
 0xa44   :  { %2602 = vrot.lane.b32.xlu1 %v2585_v22, %s5350_s0 }
 0xaa0   :  { %v2557_v29 = vpop.permute.xlu0 %2556 }
 0xaa1   :  { %v2574_v34 = vmul.f32 %v2557_v29, %v2508_v9 }
 0xaa2   :  { %v2559_v31 = vpop.permute.xlu1 %2558 }
 0xaa3   :  { %v2575_v16 = vmul.f32 %v2559_v31, %v2509_v14 }
 0xaa4   :  { %v2593_v5 = vpop.permute.xlu0 %2592 }
 0xaa5   :  { %v2610_v4 = vmul.f32 %v2593_v5, %v5962_v10 }
 0xaa6   :  { %v2595_v17 = vpop.permute.xlu1 %2594 }
 0xaa7   :  { %v2611_v19 = vmul.f32 %v2595_v17, %v5960_v27  ;;  %v2616_v40 = vadd.f32 %v2610_v4, %v2574_v34  ;;  %v6098_v34 = vld [vmem:[%s6643_s13] sm:$0xff]  }
 0xaa8   :  { %v2561_v39 = vpop.permute.xlu0 %2560 }
 0xaa9   :  { %v2617_v41 = vadd.f32 %v2611_v19, %v2575_v16  ;;  %v2576_v47 = vmul.f32 %v2561_v39, %v2510_v25  ;;  %v6110_v19 = vpop.f32.mrb[24].mxu0 }
 0xaaa   :  { %v2563_v24 = vpop.permute.xlu1 %2562  ;;  %v4957_v39 = vpop.f32.mrb[25].mxu0 }
 0xaab   :  { %v2635_v43 = vcombine.low %v2616_v40, %v2617_v41  ;;  %v2577_v51 = vmul.f32 %v2563_v24, %v2511_v23  ;;  %v2940_v40 = vpop.f32.mrb[26].mxu0 }
 0xaac   :  { %v2565_v20 = vpop.permute.xlu0 %2564  ;;  %v4958_v41 = vpop.f32.mrb[27].mxu0 }
 0xaad   :  { %v2642_v37 = vrot.slane %v2635_v43, %v5527_v12  ;;  %v2578_v54 = vmul.f32 %v2565_v20, %v2512_v32 }
 0xaae   :  { %v2597_v46 = vpop.permute.xlu1 %2596 }
 0xaaf   :  { %v2612_v30 = vmul.f32 %v2597_v46, %v5970_v35 }
 0xab0   :  { %v2599_v10 = vpop.permute.xlu0 %2598 }
 0xab1   :  { %v2618_v50 = vadd.f32 %v2612_v30, %v2576_v47  ;;  %v2613_v27 = vmul.f32 %v2599_v10, %v5977_v33 }
 0xab2   :  { %v2601_v0 = vpop.permute.xlu1 %2600 }
 0xab3   :  { %v2649_v60 = vrot.slane %v2618_v50, %v5527_v12  ;;  %v2614_v42 = vmul.f32 %v2601_v0, %v5979_v44  ;;  %v2619_v35 = vadd.f32 %v2613_v27, %v2577_v51  ;;  %v4807_v27 = vld [vmem:[%s6645_s10] ss:$0 sm:$0xff] }
 0xab4   :  { %v2567_v6 = vpop.permute.xlu0 %2566  ;;  %v2725_v51 = vcombine.high %v4807_v27, %v4807_v27  ;;  %v2732_v0 = vrot.slane %v4807_v27, %v5527_v12 }
 0xab5   :  { %v2650_v1 = vcombine.low %v2642_v37, %v2649_v60  ;;  %v2620_v38 = vadd.f32 %v2614_v42, %v2578_v54  ;;  %v2579_v53 = vmul.f32 %v2567_v6, %v2513_v45 }
 0xab6   :  { %v2603_v58 = vpop.permute.xlu1 %2602  ;;  %v2739_v37 = vrot.slane %v2725_v51, %v5527_v12  ;;  %v2740_v54 = vcombine.high %v2732_v0, %v2732_v0 }
 0xab7   :  { %v2669_v61 = vpack.c.bf16 %v2650_v1, %v2650_v1  ;;  %v2651_v7 = vcombine.low %v2619_v35, %v2620_v38  ;;  %v2615_v33 = vmul.f32 %v2603_v58, %v5986_v49 }
 0xab8   :  { %v2781_v60 = vcombine.low %v2732_v0, %v2740_v54  ;;  %v2782_v42 = vcombine.low %v2739_v37, %v2732_v0  ;;  %v2798_v6 = vcombine.low %v2740_v54, %v2739_v37 }
 0xab9   :  { %v2685_v8 = vrot.slane %v2669_v61, %v5480_v36  ;;  %v2621_v57 = vadd.f32 %v2615_v33, %v2579_v53  ;;  %v2658_v13 = vrot.slane %v2651_v7, %v5527_v12 }
 0xaba   :  { %v2789_v1 = vrot.slane %v2781_v60, %v5527_v12  ;;  %v2796_v35 = vrot.slane %v2782_v42, %v5527_v12  ;;  %v2805_v38 = vrot.slane %v2798_v6, %v5527_v12 }
 0xabb   :  { %v2686_v11 = vcombine.high %v2685_v8, %v2685_v8  ;;  %v2665_v44 = vrot.slane %v2621_v57, %v5527_v12  ;;  %v2693_v18 = vrot.slane %v2685_v8, %v5480_v36 }
 0xabc   :  { %v2797_v45 = vcombine.low %v2789_v1, %v2796_v35 }
 0xabd   :  { %v2666_v15 = vcombine.low %v2658_v13, %v2665_v44  ;;  %v2700_v63 = vrot.slane %v2686_v11, %v5480_v36  ;;  %v2701_v52 = vcombine.high %v2693_v18, %v2693_v18 }
 0xabf   :  { %v2670_v48 = vpack.c.bf16 %v2666_v15, %v2666_v15  ;;  %v2741_v21 = vcombine.low %v2693_v18, %v2700_v63 }
 0xac1   :  { %v2708_v59 = vrot.slane %v2670_v48, %v5480_v36  ;;  %v2750_v29 = vrot.slane %v2741_v21, %v5480_v36 }
 0xac3   :  { %v2709_v56 = vcombine.high %v2708_v59, %v2708_v59  ;;  %v2716_v49 = vrot.slane %v2708_v59, %v5480_v36 }
 0xac5   :  { %v2723_v22 = vrot.slane %v2709_v56, %v5480_v36  ;;  %v2724_v55 = vcombine.high %v2716_v49, %v2716_v49  ;;  %v2742_v3 = vcombine.low %v2701_v52, %v2716_v49 }
 0xac7   :  { %v2743_v31 = vcombine.low %v2723_v22, %v2724_v55  ;;  %v2757_v5 = vrot.slane %v2742_v3, %v5480_v36 }
 0xac9   :  { %v2764_v9 = vrot.slane %v2743_v31, %v5480_v36  ;;  %v2765_v14 = vcombine.low %v2750_v29, %v2757_v5 }
 0xacb   :  { %v2772_v4 = vrot.slane %v2765_v14, %v5480_v36  ;;  %v2779_v17 = vrot.slane %v2764_v9, %v5480_v36  ;;  %v6150_v14 = vld [vmem:[%s6646_s12] ss:$0 sm:$0xff] }
 0xacd   :  { %v2780_v16 = vcombine.low %v2772_v4, %v2779_v17  ;;  %v2938_v4 = vadd.f32 %v6150_v14, %v6110_v19 }
 0xacf   :  { %4950 = vmatmul.mubr.msk.bf16.vlgmr.msra.gmra.mrb[4].mxu1 %vm99_vm3, %v2780_v16  ;;  %v2950_v39 = vrot.slane %v2938_v4, %v5527_v12 }
 0xad0   :  { %4960 = vmatpush3.bf16.msra.mxu1 %v6098_v34  ;;  %4961 = vmatprep.mubr.msk.bf16.mxu1 %vm5344_vm2, %v5340_v2 }
 0xad1   :  { %4971 = vmatprep.subr.bf16.mxu1 %v5340_v2  ;;  %v2951_v40 = vrot.slane %v2950_v39, 1 }
 0xad7   :  { %4962 = vmatmul.mubr.bf16.vlgmr.msra.gmra.mrb[8].mxu1 %v5346_v62  ;;  %v6115_v62 = vld [vmem:[%s6644_s14] ss:$0 sm:$0xff] }
 0xad8   :  { %4972 = vmatpush3.bf16.msra.mxu1 %v6098_v34  ;;  %4973 = vmatprep.mubr.msk.bf16.mxu1 %vm5344_vm2, %v5340_v2 }
 0xad9   :  { %4983 = vmatprep.subr.bf16.mxu1 %v5340_v2 }
 0xba2   :  { %v2848_v24 = vpop.f32.mrb[4].mxu1 }
 0xba3   :  { %v4951_v43 = vpop.f32.mrb[5].mxu1  ;;  %v2849_v61 = vadd.f32 %v2848_v24, %v2797_v45 }
 0xba4   :  { %v2851_v20 = vpop.f32.mrb[6].mxu1 }
 0xba5   :  { %v4952_v25 = vpop.f32.mrb[7].mxu1  ;;  %v2852_v58 = vadd.f32 %v2851_v20, %v2805_v38  ;;  %v2857_v53 = vcombine.high %v2849_v61, %v2849_v61  ;;  %v6160_v41 = vrot.slane %v2849_v61, %v5527_v12 }
 0xba7   :  { %v6132_v7 = vrot.slane %v2852_v58, %v5527_v12  ;;  %v6139_v57 = vrot.slane %v2857_v53, %v5527_v12  ;;  %v2954_v24 = vadd.f32 %v2950_v39, %v6160_v41 }
 0xba9   :  { %v6136_v33 = vcombine.high %v6132_v7, %v6132_v7  ;;  %v6164_v19 = vcombine.high %v6139_v57, %v6139_v57  ;;  %v4811_v20 = vmul.f32 -1.442695, %v2954_v24 }
 0xbaa   :  { %v3050_v46 = vpop.f32.mrb[8].mxu1 }
 0xbab   :  { %v3051_v47 = vadd.f32 %v6115_v62, %v3050_v46  ;;  %v4963_v30 = vpop.f32.mrb[9].mxu1  ;;  %v2955_v43 = vadd.f32 %v2951_v40, %v6164_v19 }
 0xbac   :  { %v3053_v23 = vpop.f32.mrb[10].mxu1 }
 0xbad   :  { %v3063_v10 = vrot.slane %v3051_v47, %v5527_v12  ;;  %v4964_v32 = vpop.f32.mrb[11].mxu1  ;;  %v4812_v25 = vmul.f32 -1.442695, %v2955_v43 }
 0xbaf   :  { %3067 = vrot.lane.b32.xlu1 %v3063_v10, %s5351_s19  ;;  %v3064_v50 = vrot.slane %v3063_v10, 7 }
 0xbb1   :  { %3065 = vrot.lane.b32.xlu0 %v3064_v50, %s5351_s19 }
 0xbb3   :  { %3087 = vrot.lane.b32.xlu1 %v3063_v10, %s5343_s30 }
 0xbb5   :  { %3085 = vrot.lane.b32.xlu0 %v3064_v50, %s5343_s30 }
 0xc21   :  { %v3068_v8 = vpop.permute.xlu1 %3067 }
 0xc22   :  { %v3072_v11 = vadd.f32 %v3068_v8, %v6136_v33 }
 0xc23   :  { %v3066_v13 = vpop.permute.xlu0 %3065 }
 0xc24   :  { %v4816_v44 = vmul.f32 -1.442695, %v3072_v11  ;;  %v3071_v15 = vadd.f32 %v3066_v13, %v6139_v57 }
 0xc25   :  { %v3088_v56 = vpop.permute.xlu1 %3087 }
 0xc26   :  { %5192 = vpow2.f32 %v4816_v44  ;;  %v4815_v18 = vmul.f32 -1.442695, %v3071_v15 }
 0xc27   :  { %v3086_v55 = vpop.permute.xlu0 %3085 }
 0xc28   :  { %5194 = vpow2.f32 %v4815_v18 }
 0xc30   :  { %v5193_v63 = vpop.eup %5192 }
 0xc31   :  { %v3080_v48 = vadd.f32 1.0, %v5193_v63 }
 0xc32   :  { %v5195_v59 = vpop.eup %5194 }
 0xc33   :  { %5196 = vrcp.f32 %v3080_v48  ;;  %v3079_v52 = vadd.f32 1.0, %v5195_v59 }
 0xc35   :  { %5198 = vrcp.f32 %v3079_v52 }
 0xc3d   :  { %v5197_v21 = vpop.eup %5196 }
 0xc3e   :  { %v3092_v49 = vmul.f32 %v5197_v21, %v3088_v56  ;;  %v3106_v10 = vsub.f32 1.0, %v5197_v21  ;;  %v3118_v50 = vmul.f32 0.0, %v5197_v21 }
 0xc3f   :  { %v5199_v22 = vpop.eup %5198 }
 0xc40   :  { %v3091_v3 = vmul.f32 %v5199_v22, %v3086_v55  ;;  %3097 = vrot.lane.b32.xlu1 %v3092_v49, %s5349_s4  ;;  %v3105_v51 = vsub.f32 1.0, %v5199_v22  ;;  %v3117_v54 = vmul.f32 0.0, %v5199_v22 }
 0xc42   :  { %3095 = vrot.lane.b32.xlu0 %v3091_v3, %s5349_s4 }
 0xcb2   :  { %v3098_v29 = vpop.permute.xlu1 %3097 }
 0xcb3   :  { %v3102_v31 = vadd.f32 %v3098_v29, %v6136_v33 }
 0xcb4   :  { %v3096_v5 = vpop.permute.xlu0 %3095 }
 0xcb5   :  { %5200 = vtanh.f32 %v3102_v31  ;;  %v3101_v9 = vadd.f32 %v3096_v5, %v6139_v57 }
 0xcb7   :  { %5202 = vtanh.f32 %v3101_v9 }
 0xcb8   :  { %5204 = vpow2.f32 %v4811_v20 }
 0xcb9   :  { %5206 = vpow2.f32 %v4812_v25 }
 0xcbf   :  { %v5201_v17 = vpop.eup %5200 }
 0xcc0   :  { %3111 = vrot.lane.b32.xlu1 %v5201_v17, %s5352_s21 }
 0xcc1   :  { %v5203_v16 = vpop.eup %5202 }
 0xcc2   :  { %3109 = vrot.lane.b32.xlu0 %v5203_v16, %s5352_s21  ;;  %v5205_v46 = vpop.eup %5204 }
 0xcc3   :  { %v5207_v47 = vpop.eup %5206  ;;  %v2962_v30 = vadd.f32 1.0, %v5205_v46 }
 0xcc4   :  { %2968 = vrot.lane.b32.xlu1 %v2950_v39, %s5353_s22  ;;  %v2963_v23 = vadd.f32 1.0, %v5207_v47 }
 0xcc5   :  { %5208 = vrcp.f32 %v2962_v30 }
 0xcc6   :  { %2970 = vrot.lane.b32.xlu0 %v2951_v40, %s5353_s22  ;;  %5210 = vrcp.f32 %v2963_v23 }
 0xccf   :  { %v5209_v42 = vpop.eup %5208 }
 0xcd0   :  { %v5211_v38 = vpop.eup %5210  ;;  %v2988_v49 = vsub.f32 1.0, %v5209_v42  ;;  %v3000_v55 = vmul.f32 0.0, %v5209_v42 }
 0xcd1   :  { %v2989_v29 = vsub.f32 1.0, %v5211_v38  ;;  %v3001_v9 = vmul.f32 0.0, %v5211_v38 }
 0xd32   :  { %v3112_v32 = vpop.permute.xlu1 %3111 }
 0xd33   :  { %v3116_v27 = vmul.f32 %v3112_v32, %v3106_v10 }
 0xd34   :  { %v3110_v0 = vpop.permute.xlu0 %3109 }
 0xd35   :  { %v6168_v37 = vadd.f32 %v3118_v50, %v3116_v27  ;;  %v3115_v60 = vmul.f32 %v3110_v0, %v3105_v51 }
 0xd36   :  { %v2969_v6 = vpop.permute.xlu1 %2968 }
 0xd37   :  { %v6170_v1 = vadd.f32 %v3117_v54, %v3115_v60  ;;  %v2974_v35 = vmul.f32 %v5209_v42, %v2969_v6  ;;  %v3244_v58 = vpack.c.bf16 %v6168_v37, %v6168_v37 }
 0xd38   :  { %v2971_v45 = vpop.permute.xlu0 %2970 }
 0xd39   :  { %v3243_v61 = vpack.c.bf16 %v6170_v1, %v6170_v1  ;;  %v2975_v53 = vmul.f32 %v5211_v38, %v2971_v45  ;;  %2978 = vrot.lane.b32.xlu1 %v2974_v35, %s5349_s4  ;;  %v3248_v11 = vunpack.c.l.b16 %v3244_v58 }
 0xd3b   :  { %v3247_v8 = vunpack.c.l.b16 %v3243_v61  ;;  %2980 = vrot.lane.b32.xlu0 %v2975_v53, %s5349_s4  ;;  %v4823_v61 = vrot.slane %v6170_v1, 9 }
 0xd3d   :  { %v3249_v13 = vrot.slane %v3247_v8, 1 }
 0xd3f   :  { %v3250_v44 = vsel %vm3128_vm12, %v3248_v11, %v3249_v13 }
 0xd40   :  { %v3251_v15 = vpack.c.b16 %v3250_v44, %v3250_v44  ;;  %v4824_v44 = vrot.slane %v6168_v37, 9 }
 0xd42   :  { %3252 = vrot.lane.b32.xlu0 %v3251_v15, %s5348_s18 }
 0xdab   :  { %v2979_v18 = vpop.permute.xlu1 %2978 }
 0xdac   :  { %v2984_v63 = vadd.f32 %v2979_v18, %v6160_v41 }
 0xdad   :  { %v2981_v48 = vpop.permute.xlu0 %2980 }
 0xdae   :  { %5212 = vtanh.f32 %v2984_v63  ;;  %v2985_v59 = vadd.f32 %v2981_v48, %v6164_v19 }
 0xdb0   :  { %5214 = vtanh.f32 %v2985_v59 }
 0xdb4   :  { %v3253_v52 = vpop.permute.xlu0 %3252 }
 0xdb5   :  { %4974 = vmatmul.mubr.msk.bf16.vlgmr.msra.gmra.mrb[12].mxu1 %vm102_vm4, %v3253_v52 }
 0xdb6   :  { %4984 = vmatpush3.bf16.msra.mxu1 %v6098_v34  ;;  %4985 = vmatprep.mubr.msk.bf16.mxu1 %vm5344_vm2, %v5340_v2 }
 0xdb7   :  { %4995 = vmatprep.subr.bf16.mxu1 %v5340_v2 }
 0xdb8   :  { %v5213_v21 = vpop.eup %5212 }
 0xdb9   :  { %2992 = vrot.lane.b32.xlu0 %v5213_v21, %s5352_s21 }
 0xdba   :  { %v5215_v56 = vpop.eup %5214 }
 0xdbb   :  { %2994 = vrot.lane.b32.xlu1 %v5215_v56, %s5352_s21 }
 0xe2b   :  { %v2993_v22 = vpop.permute.xlu0 %2992 }
 0xe2c   :  { %v2998_v3 = vmul.f32 %v2993_v22, %v2988_v49 }
 0xe2d   :  { %v2995_v31 = vpop.permute.xlu1 %2994 }
 0xe2e   :  { %v6189_v5 = vadd.f32 %v3000_v55, %v2998_v3  ;;  %v2999_v4 = vmul.f32 %v2995_v31, %v2989_v29 }
 0xe30   :  { %v6191_v17 = vadd.f32 %v3001_v9, %v2999_v4  ;;  %v3121_v16 = vpack.c.bf16 %v6189_v5, %v6189_v5 }
 0xe32   :  { %v3122_v39 = vpack.c.bf16 %v6191_v17, %v6191_v17  ;;  %v3125_v24 = vunpack.c.l.b16 %v3121_v16 }
 0xe34   :  { %v3126_v40 = vunpack.c.l.b16 %v3122_v39 }
 0xe36   :  { %v3127_v43 = vrot.slane %v3126_v40, 7 }
 0xe38   :  { %v3129_v20 = vsel %vm3128_vm12, %v3127_v43, %v3125_v24 }
 0xe39   :  { %v3130_v25 = vpack.c.b16 %v3129_v20, %v3129_v20 }
 0xe3b   :  { %3131 = vrot.lane.b32.xlu1 %v3130_v25, %s5352_s21 }
 0xe88   :  { %v3291_v46 = vpop.f32.mrb[12].mxu1 }
 0xe89   :  { %v3292_v47 = vadd.f32 %v6115_v62, %v3291_v46  ;;  %v4975_v30 = vpop.f32.mrb[13].mxu1 }
 0xe8a   :  { %v3294_v23 = vpop.f32.mrb[14].mxu1 }
 0xe8b   :  { %v3304_v10 = vrot.slane %v3292_v47, %v5527_v12  ;;  %v4976_v32 = vpop.f32.mrb[15].mxu1 }
 0xe8d   :  { %3306 = vrot.lane.b32.xlu1 %v3304_v10, %s5351_s19  ;;  %v3305_v50 = vrot.slane %v3304_v10, 1 }
 0xe8f   :  { %3308 = vrot.lane.b32.xlu0 %v3305_v50, %s5351_s19 }
 0xe91   :  { %3326 = vrot.lane.b32.xlu1 %v3304_v10, %s5343_s30 }
 0xe93   :  { %3328 = vrot.lane.b32.xlu0 %v3305_v50, %s5343_s30 }
 0xead   :  { %v3132_v27 = vpop.permute.xlu1 %3131 }
 0xeae   :  { %4968 = vmatmul.mubr.msk.bf16.vlgmr.msra.gmra.mrb[28].mxu0 %vm102_vm4, %v3132_v27 }
 0xeaf   :  { %4978 = vmatpush3.bf16.msra.mxu0 %v6058_v26  ;;  %4979 = vmatprep.mubr.msk.bf16.mxu0 %vm5344_vm2, %v5340_v2 }
 0xeb0   :  { %4989 = vmatprep.subr.bf16.mxu0 %v5340_v2 }
 0xeff   :  { %v3307_v51 = vpop.permute.xlu1 %3306 }
 0xf00   :  { %v3312_v0 = vadd.f32 %v3307_v51, %v6139_v57 }
 0xf01   :  { %v3309_v54 = vpop.permute.xlu0 %3308 }
 0xf02   :  { %v4821_v60 = vmul.f32 -1.442695, %v3312_v0  ;;  %v3313_v42 = vadd.f32 %v3309_v54, %v6136_v33 }
 0xf03   :  { %v3327_v8 = vpop.permute.xlu1 %3326 }
 0xf04   :  { %5216 = vpow2.f32 %v4821_v60  ;;  %v4822_v6 = vmul.f32 -1.442695, %v3313_v42 }
 0xf05   :  { %v3329_v18 = vpop.permute.xlu0 %3328 }
 0xf06   :  { %5218 = vpow2.f32 %v4822_v6 }
 0xf0e   :  { %v5217_v35 = vpop.eup %5216 }
 0xf0f   :  { %v3320_v38 = vadd.f32 1.0, %v5217_v35 }
 0xf10   :  { %v5219_v45 = vpop.eup %5218 }
 0xf11   :  { %5220 = vrcp.f32 %v3320_v38  ;;  %v3321_v58 = vadd.f32 1.0, %v5219_v45 }
 0xf13   :  { %5222 = vrcp.f32 %v3321_v58 }
 0xf1b   :  { %v5221_v53 = vpop.eup %5220 }
 0xf1c   :  { %v3332_v11 = vmul.f32 %v5221_v53, %v3327_v8  ;;  %v3366_v13 = vmul.f32 %v5221_v53, %v4823_v61  ;;  %v3346_v51 = vsub.f32 1.0, %v5221_v53 }
 0xf1d   :  { %v5223_v15 = vpop.eup %5222 }
 0xf1e   :  { %v3333_v63 = vmul.f32 %v5223_v15, %v3329_v18  ;;  %3336 = vrot.lane.b32.xlu1 %v3332_v11, %s5349_s4  ;;  %v3367_v48 = vmul.f32 %v5223_v15, %v4824_v44  ;;  %v3347_v60 = vsub.f32 1.0, %v5223_v15 }
 0xf20   :  { %3338 = vrot.lane.b32.xlu0 %v3333_v63, %s5349_s4 }
 0xf81   :  { %v3170_v59 = vpop.f32.mrb[28].mxu0 }
 0xf82   :  { %v3171_v52 = vadd.f32 %v6150_v14, %v3170_v59  ;;  %v4969_v21 = vpop.f32.mrb[29].mxu0 }
 0xf83   :  { %v3173_v56 = vpop.f32.mrb[30].mxu0 }
 0xf84   :  { %v3183_v49 = vrot.slane %v3171_v52, %v5527_v12  ;;  %v4970_v22 = vpop.f32.mrb[31].mxu0  ;;  %v3236_v56 = vrot.slane %v6191_v17, 7 }
 0xf86   :  { %3203 = vrot.lane.b32.xlu1 %v3183_v49, %s5353_s22  ;;  %v3184_v55 = vrot.slane %v3183_v49, 7  ;;  %v3188_v39 = vadd.f32 %v3183_v49, %v6164_v19 }
 0xf88   :  { %3201 = vrot.lane.b32.xlu0 %v3184_v55, %s5353_s22  ;;  %v3187_v40 = vadd.f32 %v3184_v55, %v6160_v41  ;;  %v4819_v24 = vmul.f32 -1.442695, %v3188_v39 }
 0xf8a   :  { %v4818_v43 = vmul.f32 -1.442695, %v3187_v40 }
 0xf90   :  { %v3337_v3 = vpop.permute.xlu1 %3336 }
 0xf91   :  { %v3342_v29 = vadd.f32 %v3337_v3, %v6139_v57 }
 0xf92   :  { %v3339_v31 = vpop.permute.xlu0 %3338 }
 0xf93   :  { %5224 = vtanh.f32 %v3342_v29  ;;  %v3343_v9 = vadd.f32 %v3339_v31, %v6136_v33  ;;  %v3235_v29 = vrot.slane %v6189_v5, 7 }
 0xf95   :  { %5226 = vtanh.f32 %v3343_v9 }
 0xf96   :  { %5228 = vpow2.f32 %v4819_v24 }
 0xf97   :  { %5230 = vpow2.f32 %v4818_v43 }
 0xf9d   :  { %v5225_v4 = vpop.eup %5224 }
 0xf9e   :  { %3350 = vrot.lane.b32.xlu1 %v5225_v4, %s5352_s21 }
 0xf9f   :  { %v5227_v16 = vpop.eup %5226 }
 0xfa0   :  { %3352 = vrot.lane.b32.xlu0 %v5227_v16, %s5352_s21  ;;  %v5229_v20 = vpop.eup %5228 }
 0xfa1   :  { %v5231_v25 = vpop.eup %5230  ;;  %v3196_v46 = vadd.f32 1.0, %v5229_v20 }
 0xfa2   :  { %v3195_v47 = vadd.f32 1.0, %v5231_v25 }
 0xfa3   :  { %5232 = vrcp.f32 %v3196_v46 }
 0xfa4   :  { %5234 = vrcp.f32 %v3195_v47 }
 0xfad   :  { %v5233_v30 = vpop.eup %5232 }
 0xfae   :  { %v5235_v32 = vpop.eup %5234  ;;  %v3222_v21 = vsub.f32 1.0, %v5233_v30  ;;  %v3240_v22 = vmul.f32 %v5233_v30, %v3236_v56 }
 0xfaf   :  { %v3221_v3 = vsub.f32 1.0, %v5235_v32  ;;  %v3239_v4 = vmul.f32 %v5235_v32, %v3235_v29 }
 0xff8   :  { %v3204_v23 = vpop.permute.xlu1 %3203 }
 0xff9   :  { %v3208_v10 = vmul.f32 %v5233_v30, %v3204_v23 }
 0xffa   :  { %v3202_v50 = vpop.permute.xlu0 %3201 }
 0xffb   :  { %v3207_v27 = vmul.f32 %v5235_v32, %v3202_v50  ;;  %3213 = vrot.lane.b32.xlu1 %v3208_v10, %s5349_s4 }
 0xffd   :  { %3211 = vrot.lane.b32.xlu0 %v3207_v27, %s5349_s4 }
0x1010   :  { %v3351_v0 = vpop.permute.xlu1 %3350 }
0x1011   :  { %v3356_v54 = vmul.f32 %v3351_v0, %v3346_v51 }
0x1012   :  { %v3353_v42 = vpop.permute.xlu0 %3352 }
0x1013   :  { %v6228_v6 = vadd.f32 %v3366_v13, %v3356_v54  ;;  %v3357_v35 = vmul.f32 %v3353_v42, %v3347_v60  ;;  %v6273_v42 = vcombine.high %v6160_v41, %v6160_v41 }
0x1015   :  { %v6230_v38 = vadd.f32 %v3367_v48, %v3357_v35  ;;  %v3493_v45 = vpack.c.bf16 %v6228_v6, %v6228_v6 }
0x1017   :  { %v3494_v58 = vpack.c.bf16 %v6230_v38, %v6230_v38  ;;  %v3497_v8 = vunpack.c.l.b16 %v3493_v45 }
0x1019   :  { %v3498_v61 = vunpack.c.l.b16 %v3494_v58 }
0x101b   :  { %v3499_v11 = vrot.slane %v3498_v61, 7 }
0x101d   :  { %v3500_v53 = vsel %vm3128_vm12, %v3499_v11, %v3497_v8 }
0x101e   :  { %v3501_v44 = vpack.c.b16 %v3500_v53, %v3500_v53 }
0x1020   :  { %3502 = vrot.lane.b32.xlu0 %v3501_v44, %s5348_s18  ;;  %v3611_v44 = vrot.slane %v6230_v38, 7 }
0x106d   :  { %v3214_v15 = vpop.permute.xlu1 %3213 }
0x106e   :  { %v3218_v13 = vadd.f32 %v3214_v15, %v6164_v19 }
0x106f   :  { %v3212_v18 = vpop.permute.xlu0 %3211 }
0x1070   :  { %5236 = vtanh.f32 %v3218_v13  ;;  %v3217_v63 = vadd.f32 %v3212_v18, %v6160_v41 }
0x1072   :  { %5238 = vtanh.f32 %v3217_v63 }
0x107a   :  { %v5237_v48 = vpop.eup %5236 }
0x107b   :  { %3227 = vrot.lane.b32.xlu0 %v5237_v48, %s5352_s21  ;;  %v3610_v48 = vrot.slane %v6228_v6, 7 }
0x107c   :  { %v5239_v59 = vpop.eup %5238 }
0x107d   :  { %3225 = vrot.lane.b32.xlu1 %v5239_v59, %s5352_s21 }
0x1092   :  { %v3503_v52 = vpop.permute.xlu0 %3502 }
0x1093   :  { %4986 = vmatmul.mubr.msk.bf16.vlgmr.msra.gmra.mrb[16].mxu1 %vm102_vm4, %v3503_v52 }
0x1094   :  { %4996 = vmatpush3.bf16.msra.mxu1 %v6098_v34  ;;  %4997 = vmatprep.mubr.msk.bf16.mxu1 %vm5344_vm2, %v5340_v2 }
0x1095   :  { %5007 = vmatprep.subr.bf16.mxu1 %v5340_v2 }
0x10ed   :  { %v3228_v49 = vpop.permute.xlu0 %3227 }
0x10ee   :  { %v3232_v55 = vmul.f32 %v3228_v49, %v3222_v21 }
0x10ef   :  { %v3226_v31 = vpop.permute.xlu1 %3225 }
0x10f0   :  { %v6249_v9 = vadd.f32 %v3240_v22, %v3232_v55  ;;  %v3231_v16 = vmul.f32 %v3226_v31, %v3221_v3 }
0x10f2   :  { %v6251_v39 = vadd.f32 %v3239_v4, %v3231_v16  ;;  %v3371_v40 = vpack.c.bf16 %v6249_v9, %v6249_v9 }
0x10f4   :  { %v3370_v24 = vpack.c.bf16 %v6251_v39, %v6251_v39  ;;  %v3375_v20 = vunpack.c.l.b16 %v3371_v40 }
0x10f6   :  { %v3374_v43 = vunpack.c.l.b16 %v3370_v24 }
0x10f8   :  { %v3376_v25 = vrot.slane %v3374_v43, 1 }
0x10fa   :  { %v3377_v46 = vsel %vm3128_vm12, %v3375_v20, %v3376_v25 }
0x10fb   :  { %v3378_v47 = vpack.c.b16 %v3377_v46, %v3377_v46 }
0x10fd   :  { %3379 = vrot.lane.b32.xlu1 %v3378_v47, %s5352_s21 }
0x1166   :  { %v3541_v30 = vpop.f32.mrb[16].mxu1 }
0x1167   :  { %v3542_v23 = vadd.f32 %v6115_v62, %v3541_v30  ;;  %v4987_v10 = vpop.f32.mrb[17].mxu1 }
0x1168   :  { %v3544_v32 = vpop.f32.mrb[18].mxu1 }
0x1169   :  { %v3554_v50 = vrot.slane %v3542_v23, %v5527_v12  ;;  %v4988_v27 = vpop.f32.mrb[19].mxu1 }
0x116b   :  { %3558 = vrot.lane.b32.xlu1 %v3554_v50, %s5351_s19  ;;  %v3555_v51 = vrot.slane %v3554_v50, 7 }
0x116d   :  { %3556 = vrot.lane.b32.xlu0 %v3555_v51, %s5351_s19 }
0x116f   :  { %3578 = vrot.lane.b32.xlu1 %v3554_v50, %s5343_s30  ;;  %v3380_v0 = vpop.permute.xlu1 %3379 }
0x1170   :  { %4980 = vmatmul.mubr.msk.bf16.vlgmr.msra.gmra.mrb[32].mxu0 %vm102_vm4, %v3380_v0 }
0x1171   :  { %3576 = vrot.lane.b32.xlu0 %v3555_v51, %s5343_s30  ;;  %4990 = vmatpush3.bf16.msra.mxu0 %v6058_v26 }
0x1172   :  { %4991 = vmatprep.mubr.msk.bf16.mxu0 %vm5344_vm2, %v5340_v2  ;;  %5001 = vmatprep.subr.bf16.mxu0 %v5340_v2 }
0x11dd   :  { %v3559_v54 = vpop.permute.xlu1 %3558 }
0x11de   :  { %v3563_v60 = vadd.f32 %v3559_v54, %v6132_v7 }
0x11df   :  { %v3557_v35 = vpop.permute.xlu0 %3556 }
0x11e0   :  { %v4832_v45 = vmul.f32 -1.442695, %v3563_v60  ;;  %v3562_v58 = vadd.f32 %v3557_v35, %v6273_v42 }
0x11e1   :  { %v3579_v13 = vpop.permute.xlu1 %3578 }
0x11e2   :  { %5240 = vpow2.f32 %v4832_v45  ;;  %v4831_v61 = vmul.f32 -1.442695, %v3562_v58 }
0x11e3   :  { %v3577_v52 = vpop.permute.xlu0 %3576 }
0x11e4   :  { %5242 = vpow2.f32 %v4831_v61 }
0x11ec   :  { %v5241_v26 = vpop.eup %5240 }
0x11ed   :  { %v3571_v8 = vadd.f32 1.0, %v5241_v26 }
0x11ee   :  { %v5243_v11 = vpop.eup %5242 }
0x11ef   :  { %5244 = vrcp.f32 %v3571_v8  ;;  %v3570_v53 = vadd.f32 1.0, %v5243_v11 }
0x11f1   :  { %5246 = vrcp.f32 %v3570_v53 }
0x11f9   :  { %v5245_v15 = vpop.eup %5244 }
0x11fa   :  { %v3583_v18 = vmul.f32 %v5245_v15, %v3579_v13  ;;  %v3615_v63 = vmul.f32 %v5245_v15, %v3611_v44  ;;  %v3597_v58 = vsub.f32 1.0, %v5245_v15 }
0x11fb   :  { %v5247_v59 = vpop.eup %5246 }
0x11fc   :  { %v3582_v21 = vmul.f32 %v5247_v59, %v3577_v52  ;;  %3588 = vrot.lane.b32.xlu1 %v3583_v18, %s5349_s4  ;;  %v3614_v56 = vmul.f32 %v5247_v59, %v3610_v48  ;;  %v3596_v8 = vsub.f32 1.0, %v5247_v59 }
0x11fe   :  { %3586 = vrot.lane.b32.xlu0 %v3582_v21, %s5349_s4 }
0x1243   :  { %v3418_v49 = vpop.f32.mrb[32].mxu0 }
0x1244   :  { %v3419_v22 = vadd.f32 %v6150_v14, %v3418_v49  ;;  %v4981_v55 = vpop.f32.mrb[33].mxu0 }
0x1245   :  { %v3421_v3 = vpop.f32.mrb[34].mxu0 }
0x1246   :  { %v3431_v29 = vrot.slane %v3419_v22, %v5527_v12  ;;  %v4982_v31 = vpop.f32.mrb[35].mxu0 }
0x1248   :  { %3449 = vrot.lane.b32.xlu1 %v3431_v29, %s5353_s22  ;;  %v3432_v4 = vrot.slane %v3431_v29, 1  ;;  %v3435_v46 = vadd.f32 %v3431_v29, %v6273_v42 }
0x124a   :  { %3451 = vrot.lane.b32.xlu0 %v3432_v4, %s5353_s22  ;;  %v3436_v47 = vadd.f32 %v3432_v4, %v6132_v7  ;;  %v4826_v30 = vmul.f32 -1.442695, %v3435_v46 }
0x124c   :  { %v4827_v23 = vmul.f32 -1.442695, %v3436_v47  ;;  %v6314_v47 = vsub.s32 0, %v5474_v28 }
0x126e   :  { %v3589_v16 = vpop.permute.xlu1 %3588 }
0x126f   :  { %v3593_v40 = vadd.f32 %v3589_v16, %v6132_v7  ;;  %v4828_v16 = vrot.slane %v6251_v39, 9 }
0x1270   :  { %v3587_v24 = vpop.permute.xlu0 %3586 }
0x1271   :  { %5248 = vtanh.f32 %v3593_v40  ;;  %v3592_v43 = vadd.f32 %v3587_v24, %v6273_v42 }
0x1273   :  { %5250 = vtanh.f32 %v3592_v43 }
0x1274   :  { %5252 = vpow2.f32 %v4826_v30 }
0x1275   :  { %5254 = vpow2.f32 %v4827_v23 }
0x127b   :  { %v5249_v20 = vpop.eup %5248 }
0x127c   :  { %3602 = vrot.lane.b32.xlu1 %v5249_v20, %s5352_s21 }
0x127d   :  { %v5251_v25 = vpop.eup %5250 }
0x127e   :  { %3600 = vrot.lane.b32.xlu0 %v5251_v25, %s5352_s21  ;;  %v5253_v10 = vpop.eup %5252  ;;  %v4829_v25 = vrot.slane %v6249_v9, 9 }
0x127f   :  { %v5255_v32 = vpop.eup %5254  ;;  %v3443_v50 = vadd.f32 1.0, %v5253_v10 }
0x1280   :  { %v3444_v27 = vadd.f32 1.0, %v5255_v32 }
0x1281   :  { %5256 = vrcp.f32 %v3443_v50  ;;  %v4404_v50 = vsel %vm389_vm7, %v6189_v5, %v6251_v39 }
0x1282   :  { %5258 = vrcp.f32 %v3444_v27 }
0x128b   :  { %v5257_v51 = vpop.eup %5256 }
0x128c   :  { %v5259_v60 = vpop.eup %5258  ;;  %v3469_v4 = vsub.f32 1.0, %v5257_v51  ;;  %v3489_v24 = vmul.f32 %v5257_v51, %v4828_v16 }
0x128d   :  { %v3470_v20 = vsub.f32 1.0, %v5259_v60 }
0x12ba   :  { %v3450_v0 = vpop.permute.xlu1 %3449 }
0x12bb   :  { %v3455_v54 = vmul.f32 %v5257_v51, %v3450_v0 }
0x12bc   :  { %v3452_v35 = vpop.permute.xlu0 %3451 }
0x12bd   :  { %v3456_v45 = vmul.f32 %v5259_v60, %v3452_v35  ;;  %3459 = vrot.lane.b32.xlu1 %v3455_v54, %s5349_s4 }
0x12bf   :  { %3461 = vrot.lane.b32.xlu0 %v3456_v45, %s5349_s4 }
0x12ee   :  { %v3603_v61 = vpop.permute.xlu1 %3602 }
0x12ef   :  { %v3607_v26 = vmul.f32 %v3603_v61, %v3597_v58 }
0x12f0   :  { %v3601_v11 = vpop.permute.xlu0 %3600 }
0x12f1   :  { %v6292_v53 = vadd.f32 %v3615_v63, %v3607_v26  ;;  %v3606_v44 = vmul.f32 %v3601_v11, %v3596_v8  ;;  %v6346_v8 = vld [vmem:[%s6642_s11] sm:$0xff]  }
0x12f3   :  { %v6294_v13 = vadd.f32 %v3614_v56, %v3606_v44  ;;  %v3740_v18 = vpack.c.bf16 %v6292_v53, %v6292_v53  ;;  %v4840_v16 = vrot.slane %v6292_v53, 9 }
0x12f5   :  { %v3739_v48 = vpack.c.bf16 %v6294_v13, %v6294_v13  ;;  %v3744_v21 = vunpack.c.l.b16 %v3740_v18 }
0x12f7   :  { %v3743_v52 = vunpack.c.l.b16 %v3739_v48 }
0x12f9   :  { %v3745_v49 = vrot.slane %v3743_v52, 1 }
0x12fb   :  { %v3746_v15 = vsel %vm3128_vm12, %v3744_v21, %v3745_v49 }
0x12fc   :  { %v3747_v22 = vpack.c.b16 %v3746_v15, %v3746_v15 }
0x12fe   :  { %3748 = vrot.lane.b32.xlu0 %v3747_v22, %s5348_s18 }
0x132f   :  { %v3460_v59 = vpop.permute.xlu1 %3459 }
0x1330   :  { %v3465_v63 = vadd.f32 %v3460_v59, %v6273_v42 }
0x1331   :  { %v3462_v55 = vpop.permute.xlu0 %3461 }
0x1332   :  { %5260 = vtanh.f32 %v3465_v63  ;;  %v3466_v56 = vadd.f32 %v3462_v55, %v6132_v7 }
0x1334   :  { %5262 = vtanh.f32 %v3466_v56 }
0x133c   :  { %v5261_v3 = vpop.eup %5260 }
0x133d   :  { %3473 = vrot.lane.b32.xlu0 %v5261_v3, %s5352_s21 }
0x133e   :  { %v5263_v29 = vpop.eup %5262 }
0x133f   :  { %3475 = vrot.lane.b32.xlu1 %v5263_v29, %s5352_s21  ;;  %v4839_v29 = vrot.slane %v6294_v13, 9 }
0x1370   :  { %v3749_v31 = vpop.permute.xlu0 %3748 }
0x1371   :  { %4998 = vmatmul.mubr.msk.bf16.vlgmr.msra.gmra.mrb[20].mxu1 %vm102_vm4, %v3749_v31 }
0x1372   :  { %5008 = vmatpush3.bf16.msra.mxu1 %v6098_v34  ;;  %5009 = vmatprep.mubr.msk.bf16.mxu1 %vm5344_vm2, %v5340_v2  ;;  %v3490_v34 = vmul.f32 %v5259_v60, %v4829_v25  ;;  %v4405_v60 = vsel %vm389_vm7, %v6191_v17, %v6249_v9 }
0x1373   :  { %5019 = vmatprep.subr.bf16.mxu1 %v5340_v2 }
0x13af   :  { %v3474_v40 = vpop.permute.xlu0 %3473 }
0x13b0   :  { %v3479_v43 = vmul.f32 %v3474_v40, %v3469_v4 }
0x13b1   :  { %v3476_v46 = vpop.permute.xlu1 %3475 }
0x13b2   :  { %v6316_v30 = vadd.f32 %v3489_v24, %v3479_v43  ;;  %v3480_v23 = vmul.f32 %v3476_v46, %v3470_v20 }
0x13b4   :  { %v4365_v10 = vrot.slane %v6316_v30, %v6314_v47  ;;  %v6320_v32 = vadd.f32 %v3490_v34, %v3480_v23  ;;  %v3618_v27 = vpack.c.bf16 %v6316_v30, %v6316_v30 }
0x13b6   :  { %v6328_v51 = vsel %vm65_vm0, %v4404_v50, %v4365_v10  ;;  %v3619_v0 = vpack.c.bf16 %v6320_v32, %v6320_v32  ;;  %v4369_v54 = vrot.slane %v6320_v32, %v6314_v47  ;;  %v3622_v5 = vunpack.c.l.b16 %v3618_v27 }
0x13b8   :  { %v3623_v35 = vunpack.c.l.b16 %v3619_v0  ;;  %v6338_v45 = vsel %vm65_vm0, %v4405_v60, %v4369_v54 }
0x13ba   :  { %v3624_v39 = vrot.slane %v3623_v35, 7 }
0x13bc   :  { %v3625_v58 = vsel %vm3128_vm12, %v3624_v39, %v3622_v5 }
0x13bd   :  { %v3626_v61 = vpack.c.b16 %v3625_v58, %v3625_v58 }
0x13bf   :  { %3627 = vrot.lane.b32.xlu1 %v3626_v61, %s5352_s21 }
0x1431   :  { %v3628_v26 = vpop.permute.xlu1 %3627 }
0x1432   :  { %4992 = vmatmul.mubr.msk.bf16.vlgmr.msra.gmra.mrb[36].mxu0 %vm102_vm4, %v3628_v26 }
0x1433   :  { %5002 = vmatpush3.bf16.msra.mxu0 %v6346_v8  ;;  %5003 = vmatprep.mubr.msk.bf16.mxu0 %vm5344_vm2, %v5340_v2 }
0x1434   :  { %5013 = vmatprep.subr.bf16.mxu0 %v5340_v2 }
0x1444   :  { %v3787_v17 = vpop.f32.mrb[20].mxu1 }
0x1445   :  { %v3788_v9 = vadd.f32 %v6115_v62, %v3787_v17  ;;  %v4999_v11 = vpop.f32.mrb[21].mxu1 }
0x1446   :  { %v3790_v44 = vpop.f32.mrb[22].mxu1 }
0x1447   :  { %v3800_v18 = vrot.slane %v3788_v9, %v5527_v12  ;;  %v5000_v48 = vpop.f32.mrb[23].mxu1 }
0x1449   :  { %v3801_v52 = vrot.slane %v3800_v18, 1  ;;  %3802 = vrot.lane.b32.xlu1 %v3800_v18, %s5351_s19 }
0x144b   :  { %3804 = vrot.lane.b32.xlu0 %v3801_v52, %s5351_s19 }
0x144d   :  { %3822 = vrot.lane.b32.xlu1 %v3800_v18, %s5343_s30 }
0x144f   :  { %3824 = vrot.lane.b32.xlu0 %v3801_v52, %s5343_s30 }
0x14bb   :  { %v3803_v21 = vpop.permute.xlu1 %3802 }
0x14bc   :  { %v3808_v49 = vadd.f32 %v3803_v21, %v6273_v42 }
0x14bd   :  { %v3805_v15 = vpop.permute.xlu0 %3804 }
0x14be   :  { %v4837_v22 = vmul.f32 -1.442695, %v3808_v49  ;;  %v3809_v62 = vadd.f32 %v3805_v15, %v6132_v7 }
0x14bf   :  { %v3823_v50 = vpop.permute.xlu1 %3822 }
0x14c0   :  { %5264 = vpow2.f32 %v4837_v22  ;;  %v4838_v59 = vmul.f32 -1.442695, %v3809_v62 }
0x14c1   :  { %v3825_v0 = vpop.permute.xlu0 %3824 }
0x14c2   :  { %5266 = vpow2.f32 %v4838_v59 }
0x14ca   :  { %v5265_v63 = vpop.eup %5264 }
0x14cb   :  { %v3816_v55 = vadd.f32 1.0, %v5265_v63 }
0x14cc   :  { %v5267_v56 = vpop.eup %5266 }
0x14cd   :  { %5268 = vrcp.f32 %v3816_v55  ;;  %v3817_v3 = vadd.f32 1.0, %v5267_v56 }
0x14cf   :  { %5270 = vrcp.f32 %v3817_v3 }
0x14d7   :  { %v5269_v31 = vpop.eup %5268 }
0x14d8   :  { %v6361_v4 = vmul.f32 %v5269_v31, %v4839_v29  ;;  %v3828_v27 = vmul.f32 %v5269_v31, %v3823_v50  ;;  %v3842_v29 = vsub.f32 1.0, %v5269_v31 }
0x14d9   :  { %v6364_v40 = vpop.eup %5270 }
0x14da   :  { %v6367_v24 = vmul.f32 %v6364_v40, %v4840_v16  ;;  %v3829_v54 = vmul.f32 %v6364_v40, %v3825_v0 }
0x1505   :  { %v3666_v43 = vpop.f32.mrb[36].mxu0 }
0x1506   :  { %v3667_v20 = vadd.f32 %v6150_v14, %v3666_v43  ;;  %v4993_v25 = vpop.f32.mrb[37].mxu0 }
0x1507   :  { %v3669_v46 = vpop.f32.mrb[38].mxu0  ;;  %v3843_v25 = vsub.f32 1.0, %v6364_v40 }
0x1508   :  { %v3679_v34 = vrot.slane %v3667_v20, %v5527_v12  ;;  %v4994_v23 = vpop.f32.mrb[39].mxu0 }
0x150a   :  { %v3680_v10 = vrot.slane %v3679_v34, 7  ;;  %3699 = vrot.lane.b32.xlu1 %v3679_v34, %s5353_s22  ;;  %v3684_v14 = vadd.f32 %v3679_v34, %v6132_v7 }
0x150c   :  { %3697 = vrot.lane.b32.xlu0 %v3680_v10, %s5353_s22  ;;  %v3683_v60 = vadd.f32 %v3680_v10, %v6273_v42  ;;  %v4835_v35 = vmul.f32 -1.442695, %v3684_v14 }
0x150e   :  { %3832 = vrot.lane.b32.xlu1 %v3828_v27, %s5349_s4  ;;  %v4834_v5 = vmul.f32 -1.442695, %v3683_v60  ;;  %5272 = vpow2.f32 %v4835_v35 }
0x1510   :  { %3834 = vrot.lane.b32.xlu0 %v3829_v54, %s5349_s4  ;;  %5274 = vpow2.f32 %v4834_v5  ;;  %v3732_v54 = vrot.slane %v6320_v32, 7  ;;  %v3731_v5 = vrot.slane %v6316_v30, 7 }
0x1518   :  { %v5273_v39 = vpop.eup %5272 }
0x1519   :  { %v3692_v61 = vadd.f32 1.0, %v5273_v39 }
0x151a   :  { %v5275_v58 = vpop.eup %5274 }
0x151b   :  { %v3691_v26 = vadd.f32 1.0, %v5275_v58  ;;  %5276 = vrcp.f32 %v3692_v61  ;;  %v6404_v58 = vsub.s32 1, %v5474_v28 }
0x151d   :  { %5278 = vrcp.f32 %v3691_v26 }
0x1525   :  { %v5277_v17 = vpop.eup %5276 }
0x1527   :  { %v5279_v44 = vpop.eup %5278 }
0x1528   :  { %v3717_v35 = vsub.f32 1.0, %v5279_v44  ;;  %v3735_v26 = vmul.f32 %v5279_v44, %v3731_v5 }
0x157c   :  { %v3700_v9 = vpop.permute.xlu1 %3699 }
0x157d   :  { %v3704_v11 = vmul.f32 %v5277_v17, %v3700_v9 }
0x157e   :  { %v3698_v18 = vpop.permute.xlu0 %3697 }
0x157f   :  { %v3703_v48 = vmul.f32 %v5279_v44, %v3698_v18  ;;  %3709 = vrot.lane.b32.xlu1 %v3704_v11, %s5349_s4 }
0x1580   :  { %v3833_v52 = vpop.permute.xlu1 %3832 }
0x1581   :  { %v3838_v21 = vadd.f32 %v3833_v52, %v6273_v42  ;;  %3707 = vrot.lane.b32.xlu0 %v3703_v48, %s5349_s4 }
0x1582   :  { %v3835_v49 = vpop.permute.xlu0 %3834 }
0x1583   :  { %5280 = vtanh.f32 %v3838_v21  ;;  %v3839_v15 = vadd.f32 %v3835_v49, %v6132_v7 }
0x1585   :  { %5282 = vtanh.f32 %v3839_v15 }
0x158d   :  { %v5281_v22 = vpop.eup %5280 }
0x158e   :  { %3846 = vrot.lane.b32.xlu1 %v5281_v22, %s5352_s21  ;;  %v5337_v22 = vld [vmem:[%s6643_s13] sm:$0xff]  }
0x158f   :  { %v5283_v62 = vpop.eup %5282 }
0x1590   :  { %3848 = vrot.lane.b32.xlu0 %v5283_v62, %s5352_s21 }
0x15f1   :  { %v3710_v59 = vpop.permute.xlu1 %3709 }
0x15f2   :  { %v3714_v63 = vadd.f32 %v3710_v59, %v6132_v7  ;;  %v6442_v59 = vld [vmem:[%s6644_s14] ss:$0 sm:$0xff] }
0x15f3   :  { %v3708_v55 = vpop.permute.xlu0 %3707 }
0x15f4   :  { %5284 = vtanh.f32 %v3714_v63  ;;  %v3713_v56 = vadd.f32 %v3708_v55, %v6273_v42 }
0x15f6   :  { %5286 = vtanh.f32 %v3713_v56 }
0x15fe   :  { %v5285_v3 = vpop.eup %5284 }
0x15ff   :  { %3723 = vrot.lane.b32.xlu1 %v5285_v3, %s5352_s21 }
0x1600   :  { %v5287_v16 = vpop.eup %5286  ;;  %v3847_v43 = vpop.permute.xlu1 %3846 }
0x1601   :  { %v3852_v20 = vmul.f32 %v3847_v43, %v3842_v29  ;;  %3721 = vrot.lane.b32.xlu0 %v5287_v16, %s5352_s21  ;;  %v6453_v43 = vld [vmem:[%s6646_s12] ss:$0 sm:$0xff]  ;;  %s5354_s12 = smov 80  }
0x1602   :  { %v3849_v46 = vpop.permute.xlu0 %3848 }
0x1603   :  { %v6390_v34 = vadd.f32 %v6361_v4, %v3852_v20  ;;  %v3853_v7 = vmul.f32 %v3849_v46, %v3843_v25  ;;  %v3718_v4 = vsub.f32 1.0, %v5277_v17 }
0x1605   :  { %v6393_v23 = vadd.f32 %v6367_v24, %v3853_v7  ;;  %v3989_v42 = vpack.c.bf16 %v6390_v34, %v6390_v34  ;;  %v3736_v24 = vmul.f32 %v5277_v17, %v3732_v54 }
0x1607   :  { %v3990_v31 = vpack.c.bf16 %v6393_v23, %v6393_v23  ;;  %v3993_v50 = vunpack.c.l.b16 %v3989_v42 }
0x1609   :  { %v3994_v10 = vunpack.c.l.b16 %v3990_v31 }
0x160b   :  { %v3995_v27 = vrot.slane %v3994_v10, 7 }
0x160d   :  { %v3996_v0 = vsel %vm3128_vm12, %v3995_v27, %v3993_v50 }
0x160e   :  { %v3997_v40 = vpack.c.b16 %v3996_v0, %v3996_v0 }
0x1610   :  { %3998 = vrot.lane.b32.xlu0 %v3997_v40, %s5348_s18 }
0x1671   :  { %v3724_v14 = vpop.permute.xlu1 %3723 }
0x1672   :  { %v3728_v60 = vmul.f32 %v3724_v14, %v3718_v4 }
0x1673   :  { %v3722_v39 = vpop.permute.xlu0 %3721 }
0x1674   :  { %v6406_v61 = vadd.f32 %v3736_v24, %v3728_v60  ;;  %v3727_v9 = vmul.f32 %v3722_v39, %v3717_v35  ;;  %v4107_v35 = vrot.slane %v6393_v23, 7 }
0x1676   :  { %v4379_v11 = vrot.slane %v6406_v61, %v6404_v58  ;;  %v6410_v18 = vadd.f32 %v3735_v26, %v3727_v9  ;;  %v3867_v32 = vpack.c.bf16 %v6406_v61, %v6406_v61  ;;  %v4106_v26 = vrot.slane %v6390_v34, 7 }
0x1678   :  { %v6416_v30 = vsel %vm4408_vm13, %v6338_v45, %v4379_v11  ;;  %v3866_v28 = vpack.c.bf16 %v6410_v18, %v6410_v18  ;;  %v4375_v17 = vrot.slane %v6410_v18, %v6404_v58  ;;  %v3871_v52 = vunpack.c.l.b16 %v3867_v32 }
0x167a   :  { %v3870_v44 = vunpack.c.l.b16 %v3866_v28  ;;  %v6424_v48 = vsel %vm4408_vm13, %v6328_v51, %v4375_v17 }
0x167c   :  { %v3872_v21 = vrot.slane %v3870_v44, 1 }
0x167e   :  { %v3873_v49 = vsel %vm3128_vm12, %v3871_v52, %v3872_v21 }
0x167f   :  { %v3874_v15 = vpack.c.b16 %v3873_v49, %v3873_v49 }
0x1681   :  { %3875 = vrot.lane.b32.xlu1 %v3874_v15, %s5352_s21 }
0x1682   :  { %v3999_v45 = vpop.permute.xlu0 %3998 }
0x1683   :  { %5010 = vmatmul.mubr.msk.bf16.vlgmr.msra.gmra.mrb[24].mxu1 %vm102_vm4, %v3999_v45 }
0x1684   :  { %5020 = vmatpush3.bf16.msra.mxu1 %v5337_v22  ;;  %5021 = vmatprep.mubr.msk.bf16.mxu1 %vm5344_vm2, %v5340_v2 }
0x16f3   :  { %v3876_v51 = vpop.permute.xlu1 %3875 }
0x16f4   :  { %5004 = vmatmul.mubr.msk.bf16.vlgmr.msra.gmra.mrb[40].mxu0 %vm102_vm4, %v3876_v51 }
0x16f5   :  { %5014 = vmatpush3.bf16.msra.mxu0 %v6346_v8  ;;  %5015 = vmatprep.mubr.msk.bf16.mxu0 %vm5344_vm2, %v5340_v2 }
0x16f6   :  { %5025 = vmatprep.subr.bf16.mxu0 %v5340_v2 }
0x1756   :  { %v4037_v62 = vpop.f32.mrb[24].mxu1 }
0x1757   :  { %v4038_v63 = vadd.f32 %v6442_v59, %v4037_v62  ;;  %v5011_v55 = vpop.f32.mrb[25].mxu1 }
0x1758   :  { %v4040_v56 = vpop.f32.mrb[26].mxu1 }
0x1759   :  { %v4050_v3 = vrot.slane %v4038_v63, %v5527_v12  ;;  %v5012_v29 = vpop.f32.mrb[27].mxu1 }
0x175b   :  { %v4051_v16 = vrot.slane %v4050_v3, 7  ;;  %4054 = vrot.lane.b32.xlu1 %v4050_v3, %s5351_s19 }
0x175d   :  { %4052 = vrot.lane.b32.xlu0 %v4051_v16, %s5351_s19 }
0x175f   :  { %4074 = vrot.lane.b32.xlu1 %v4050_v3, %s5343_s30 }
0x1761   :  { %4072 = vrot.lane.b32.xlu0 %v4051_v16, %s5343_s30 }
0x17c7   :  { %v3914_v8 = vpop.f32.mrb[40].mxu0 }
0x17c8   :  { %v3915_v20 = vadd.f32 %v6453_v43, %v3914_v8  ;;  %v5005_v25 = vpop.f32.mrb[41].mxu0 }
0x17c9   :  { %v3917_v46 = vpop.f32.mrb[42].mxu0 }
0x17ca   :  { %v3927_v7 = vrot.slane %v3915_v20, %v5527_v12  ;;  %v5006_v42 = vpop.f32.mrb[43].mxu0 }
0x17cc   :  { %v3928_v31 = vrot.slane %v3927_v7, 1  ;;  %3945 = vrot.lane.b32.xlu1 %v3927_v7, %s5353_s22  ;;  %v3931_v52 = vadd.f32 %v3927_v7, %v6139_v57 }
0x17cd   :  { %v4055_v10 = vpop.permute.xlu1 %4054 }
0x17ce   :  { %v4059_v50 = vadd.f32 %v4055_v10, %v6164_v19  ;;  %3947 = vrot.lane.b32.xlu0 %v3928_v31, %s5353_s22  ;;  %v3932_v21 = vadd.f32 %v3928_v31, %v6136_v33  ;;  %v4842_v49 = vmul.f32 -1.442695, %v3931_v52 }
0x17cf   :  { %v4053_v27 = vpop.permute.xlu0 %4052 }
0x17d0   :  { %v4848_v0 = vmul.f32 -1.442695, %v4059_v50  ;;  %v4058_v40 = vadd.f32 %v4053_v27, %v6160_v41  ;;  %v4843_v15 = vmul.f32 -1.442695, %v3932_v21 }
0x17d1   :  { %v4075_v39 = vpop.permute.xlu1 %4074 }
0x17d2   :  { %v4847_v4 = vmul.f32 -1.442695, %v4058_v40  ;;  %5288 = vpow2.f32 %v4848_v0 }
0x17d3   :  { %v4073_v32 = vpop.permute.xlu0 %4072 }
0x17d4   :  { %5290 = vpow2.f32 %v4847_v4 }
0x17dc   :  { %v5289_v54 = vpop.eup %5288 }
0x17dd   :  { %v4067_v24 = vadd.f32 1.0, %v5289_v54 }
0x17de   :  { %v5291_v14 = vpop.eup %5290 }
0x17df   :  { %v4066_v60 = vadd.f32 1.0, %v5291_v14  ;;  %5292 = vrcp.f32 %v4067_v24 }
0x17e1   :  { %5294 = vrcp.f32 %v4066_v60 }
0x17e2   :  { %5296 = vpow2.f32 %v4842_v49 }
0x17e3   :  { %5298 = vpow2.f32 %v4843_v15 }
0x17e9   :  { %v5293_v5 = vpop.eup %5292 }
0x17ea   :  { %v4079_v11 = vmul.f32 %v5293_v5, %v4075_v39  ;;  %v4111_v28 = vmul.f32 %v5293_v5, %v4107_v35  ;;  %v4093_v4 = vsub.f32 1.0, %v5293_v5 }
0x17eb   :  { %v5295_v9 = vpop.eup %5294 }
0x17ec   :  { %v4078_v17 = vmul.f32 %v5295_v9, %v4073_v32  ;;  %v4110_v44 = vmul.f32 %v5295_v9, %v4106_v26  ;;  %4084 = vrot.lane.b32.xlu1 %v4079_v11, %s5349_s4  ;;  %v5297_v45 = vpop.eup %5296  ;;  %v4092_v14 = vsub.f32 1.0, %v5295_v9 }
0x17ed   :  { %v5299_v22 = vpop.eup %5298  ;;  %v3939_v51 = vadd.f32 1.0, %v5297_v45 }
0x17ee   :  { %4082 = vrot.lane.b32.xlu0 %v4078_v17, %s5349_s4  ;;  %v3940_v62 = vadd.f32 1.0, %v5299_v22 }
0x17ef   :  { %5300 = vrcp.f32 %v3939_v51  ;;  %v4845_v51 = vrot.slane %v6406_v61, 9 }
0x17f0   :  { %5302 = vrcp.f32 %v3940_v62 }
0x17f9   :  { %v5301_v63 = vpop.eup %5300 }
0x17fa   :  { %v5303_v3 = vpop.eup %5302  ;;  %v3965_v9 = vsub.f32 1.0, %v5301_v63 }
0x17fb   :  { %v3966_v22 = vsub.f32 1.0, %v5303_v3 }
0x183e   :  { %v3946_v55 = vpop.permute.xlu1 %3945 }
0x183f   :  { %v3951_v56 = vmul.f32 %v5301_v63, %v3946_v55 }
0x1840   :  { %v3948_v29 = vpop.permute.xlu0 %3947 }
0x1841   :  { %v3952_v16 = vmul.f32 %v5303_v3, %v3948_v29  ;;  %3955 = vrot.lane.b32.xlu1 %v3951_v56, %s5349_s4  ;;  %v3986_v56 = vmul.f32 %v5303_v3, %v4845_v51 }
0x1843   :  { %3957 = vrot.lane.b32.xlu0 %v3952_v16, %s5349_s4 }
0x185e   :  { %v4085_v8 = vpop.permute.xlu1 %4084 }
0x185f   :  { %v4089_v20 = vadd.f32 %v4085_v8, %v6164_v19 }
0x1860   :  { %v4083_v25 = vpop.permute.xlu0 %4082 }
0x1861   :  { %v4088_v46 = vadd.f32 %v4083_v25, %v6160_v41  ;;  %5304 = vtanh.f32 %v4089_v20 }
0x1863   :  { %5306 = vtanh.f32 %v4088_v46 }
0x186b   :  { %v5305_v7 = vpop.eup %5304 }
0x186c   :  { %4098 = vrot.lane.b32.xlu1 %v5305_v7, %s5352_s21 }
0x186d   :  { %v5307_v42 = vpop.eup %5306 }
0x186e   :  { %4096 = vrot.lane.b32.xlu0 %v5307_v42, %s5352_s21 }
0x18b3   :  { %v3956_v31 = vpop.permute.xlu1 %3955 }
0x18b4   :  { %v3961_v10 = vadd.f32 %v3956_v31, %v6139_v57 }
0x18b5   :  { %v3958_v50 = vpop.permute.xlu0 %3957 }
0x18b6   :  { %5308 = vtanh.f32 %v3961_v10  ;;  %v3962_v27 = vadd.f32 %v3958_v50, %v6136_v33 }
0x18b8   :  { %5310 = vtanh.f32 %v3962_v27 }
0x18c0   :  { %v5309_v0 = vpop.eup %5308 }
0x18c1   :  { %3969 = vrot.lane.b32.xlu1 %v5309_v0, %s5352_s21 }
0x18c2   :  { %v5311_v40 = vpop.eup %5310 }
0x18c3   :  { %3971 = vrot.lane.b32.xlu0 %v5311_v40, %s5352_s21 }
0x18de   :  { %v4099_v54 = vpop.permute.xlu1 %4098 }
0x18df   :  { %v4103_v24 = vmul.f32 %v4099_v54, %v4093_v4 }
0x18e0   :  { %v4097_v60 = vpop.permute.xlu0 %4096 }
0x18e1   :  { %v4102_v35 = vmul.f32 %v4097_v60, %v4092_v14  ;;  %v6477_v39 = vadd.f32 %v4111_v28, %v4103_v24  ;;  %v4844_v28 = vrot.slane %v6410_v18, 9 }
0x18e3   :  { %v6479_v26 = vadd.f32 %v4110_v44, %v4102_v35  ;;  %v4236_v11 = vpack.c.bf16 %v6477_v39, %v6477_v39  ;;  %v3985_v44 = vmul.f32 %v5301_v63, %v4844_v28 }
0x18e5   :  { %v4235_v32 = vpack.c.bf16 %v6479_v26, %v6479_v26  ;;  %v4240_v52 = vunpack.c.l.b16 %v4236_v11 }
0x18e7   :  { %v4239_v17 = vunpack.c.l.b16 %v4235_v32 }
0x18e9   :  { %v4241_v21 = vrot.slane %v4239_v17, 1 }
0x18eb   :  { %v4242_v5 = vsel %vm3128_vm12, %v4240_v52, %v4241_v21 }
0x18ec   :  { %v4243_v49 = vpack.c.b16 %v4242_v5, %v4242_v5 }
0x18ee   :  { %4244 = vrot.lane.b32.xlu0 %v4243_v49, %s5348_s18 }
0x1933   :  { %v3970_v15 = vpop.permute.xlu1 %3969 }
0x1934   :  { %v3975_v45 = vmul.f32 %v3970_v15, %v3965_v9 }
0x1935   :  { %v3972_v62 = vpop.permute.xlu0 %3971 }
0x1936   :  { %v6489_v55 = vadd.f32 %v3985_v44, %v3975_v45  ;;  %v3976_v29 = vmul.f32 %v3972_v62, %v3966_v22 }
0x1938   :  { %v4385_v16 = vrot.slane %v6489_v55, %v6314_v47  ;;  %v6493_v8 = vadd.f32 %v3986_v56, %v3976_v29  ;;  %v4114_v20 = vpack.c.bf16 %v6489_v55, %v6489_v55 }
0x193a   :  { %v4115_v18 = vpack.c.bf16 %v6493_v8, %v6493_v8  ;;  %v4389_v63 = vrot.slane %v6493_v8, %v6314_v47  ;;  %v6503_v61 = vsel %vm1314_vm11, %v6424_v48, %v4385_v16  ;;  %v4118_v46 = vunpack.c.l.b16 %v4114_v20 }
0x193c   :  { %v4119_v3 = vunpack.c.l.b16 %v4115_v18  ;;  %v6507_v25 = vsel %vm1314_vm11, %v6416_v30, %v4389_v63 }
0x193e   :  { %v4120_v7 = vrot.slane %v4119_v3, 7 }
0x1940   :  { %v4121_v42 = vsel %vm3128_vm12, %v4120_v7, %v4118_v46 }
0x1941   :  { %v4122_v31 = vpack.c.b16 %v4121_v42, %v4121_v42 }
0x1943   :  { %4123 = vrot.lane.b32.xlu1 %v4122_v31, %s5352_s21 }
0x1960   :  { %v4245_v10 = vpop.permute.xlu0 %4244 }
0x1961   :  { %5022 = vmatmul.mubr.msk.bf16.vlgmr.msra.gmra.mrb[28].mxu1 %vm102_vm4, %v4245_v10 }
0x19b5   :  { %v4124_v50 = vpop.permute.xlu1 %4123 }
0x19b6   :  { %5016 = vmatmul.mubr.msk.bf16.vlgmr.msra.gmra.mrb[44].mxu0 %vm102_vm4, %v4124_v50 }
0x19b7   :  { %5029 = vmatprep.mubr.msk.bf16.mxu0 %vm5344_vm2, %v5340_v2 }
0x1a34   :  { %v4283_v48 = vpop.f32.mrb[28].mxu1 }
0x1a35   :  { %v4284_v30 = vadd.f32 %v6442_v59, %v4283_v48  ;;  %v5023_v27 = vpop.f32.mrb[29].mxu1 }
0x1a36   :  { %v4286_v0 = vpop.f32.mrb[30].mxu1 }
0x1a37   :  { %v4296_v40 = vrot.slane %v4284_v30, %v5527_v12  ;;  %v5024_v4 = vpop.f32.mrb[31].mxu1 }
0x1a39   :  { %v4297_v54 = vrot.slane %v4296_v40, 1  ;;  %4298 = vrot.lane.b32.xlu0 %v4296_v40, %s5351_s19 }
0x1a3b   :  { %4300 = vrot.lane.b32.xlu1 %v4297_v54, %s5351_s19 }
0x1a3d   :  { %4318 = vrot.lane.b32.xlu0 %v4296_v40, %s5343_s30 }
0x1a41   :  { %4320 = vrot.lane.b32.xlu0 %v4297_v54, %s5343_s30 }
0x1a89   :  { %v4162_v14 = vpop.f32.mrb[44].mxu0 }
0x1a8a   :  { %v4163_v24 = vadd.f32 %v6453_v43, %v4162_v14  ;;  %v5017_v60 = vpop.f32.mrb[45].mxu0 }
0x1a8b   :  { %v4165_v35 = vpop.f32.mrb[46].mxu0 }
0x1a8c   :  { %v4175_v59 = vrot.slane %v4163_v24, %v5527_v12  ;;  %v5018_v11 = vpop.f32.mrb[47].mxu0 }
0x1a8e   :  { %v4176_v32 = vrot.slane %v4175_v59, 7  ;;  %v4180_v20 = vadd.f32 %v4175_v59, %v6136_v33 }
0x1a90   :  { %4193 = vrot.lane.b32.xlu1 %v4176_v32, %s5353_s22  ;;  %v4179_v16 = vadd.f32 %v4176_v32, %v6139_v57  ;;  %v4851_v63 = vmul.f32 -1.442695, %v4180_v20  ;;  %v4442_v20 = vrot.slane %v6230_v38, %v6314_v47 }
0x1a92   :  { %v4850_v18 = vmul.f32 -1.442695, %v4179_v16  ;;  %v4422_v16 = vrot.slane %v6393_v23, %v6314_v47  ;;  %v4452_v23 = vrot.slane %v6168_v37, %v6404_v58 }
0x1a94   :  { %4195 = vrot.lane.b32.xlu1 %v4175_v59, %s5353_s22 }
0x1aab   :  { %v4299_v17 = vpop.permute.xlu0 %4298 }
0x1aac   :  { %v4304_v52 = vadd.f32 %v4299_v17, %v6160_v41  ;;  %v4855_v17 = vrot.slane %v6479_v26, 9 }
0x1aad   :  { %v4301_v21 = vpop.permute.xlu1 %4300 }
0x1aae   :  { %v4853_v5 = vmul.f32 -1.442695, %v4304_v52  ;;  %v4305_v49 = vadd.f32 %v4301_v21, %v6164_v19 }
0x1aaf   :  { %v4319_v45 = vpop.permute.xlu0 %4318 }
0x1ab0   :  { %5312 = vpow2.f32 %v4853_v5  ;;  %v4854_v9 = vmul.f32 -1.442695, %v4305_v49 }
0x1ab2   :  { %5314 = vpow2.f32 %v4854_v9 }
0x1ab3   :  { %v4321_v56 = vpop.permute.xlu0 %4320 }
0x1aba   :  { %v5313_v43 = vpop.eup %5312 }
0x1abb   :  { %v4312_v28 = vadd.f32 1.0, %v5313_v43 }
0x1abc   :  { %v5315_v15 = vpop.eup %5314 }
0x1abd   :  { %5316 = vrcp.f32 %v4312_v28  ;;  %v4313_v44 = vadd.f32 1.0, %v5315_v15  ;;  %v4428_v28 = vrot.slane %v6294_v13, %v6404_v58 }
0x1abf   :  { %5318 = vrcp.f32 %v4313_v44 }
0x1ac0   :  { %5320 = vpow2.f32 %v4850_v18 }
0x1ac1   :  { %5322 = vpow2.f32 %v4851_v63 }
0x1ac7   :  { %v5317_v22 = vpop.eup %5316 }
0x1ac8   :  { %v4324_v51 = vmul.f32 %v5317_v22, %v4319_v45  ;;  %v4358_v21 = vmul.f32 %v5317_v22, %v4855_v17 }
0x1ac9   :  { %v5319_v62 = vpop.eup %5318 }
0x1aca   :  { %4328 = vrot.lane.b32.xlu0 %v4324_v51, %s5349_s4  ;;  %v4325_v29 = vmul.f32 %v5319_v62, %v4321_v56  ;;  %v5321_v3 = vpop.eup %5320  ;;  %v4339_v9 = vsub.f32 1.0, %v5319_v62  ;;  %v4448_v56 = vrot.slane %v6170_v1, %v6404_v58 }
0x1acb   :  { %v4187_v46 = vadd.f32 1.0, %v5321_v3  ;;  %v5323_v7 = vpop.eup %5322  ;;  %v4227_v3 = vrot.slane %v6489_v55, 7 }
0x1acc   :  { %v4188_v42 = vadd.f32 1.0, %v5323_v7 }
0x1acd   :  { %5324 = vrcp.f32 %v4187_v46 }
0x1ace   :  { %4330 = vrot.lane.b32.xlu0 %v4325_v29, %s5349_s4  ;;  %5326 = vrcp.f32 %v4188_v42 }
0x1ad7   :  { %v6531_v31 = vpop.eup %5324 }
0x1ad8   :  { %v6535_v48 = vpop.eup %5326  ;;  %v4231_v38 = vmul.f32 %v6531_v31, %v4227_v3 }
0x1ad9   :  { %v4214_v42 = vsub.f32 1.0, %v6535_v48 }
0x1b02   :  { %v4194_v10 = vpop.permute.xlu1 %4193 }
0x1b03   :  { %v4199_v50 = vmul.f32 %v6531_v31, %v4194_v10  ;;  %v4228_v10 = vrot.slane %v6493_v8, 7  ;;  %v5094_v8 = vld [vmem:[%s6647_s15] sm:$0xff]  }
0x1b04   :  { %5026 = vmatpush3.bf16.msra.mxu0 %v5094_v8 }
0x1b05   :  { %4203 = vrot.lane.b32.xlu1 %v4199_v50, %s5349_s4  ;;  %5027 = vmatprep.subr.bf16.mxu0 %v5340_v2 }
0x1b06   :  { %v4196_v30 = vpop.permute.xlu1 %4195 }
0x1b07   :  { %v4200_v27 = vmul.f32 %v6535_v48, %v4196_v30  ;;  %v4232_v30 = vmul.f32 %v6535_v48, %v4228_v10  ;;  %v5095_v48 = vld [vmem:[%s6647_s15 + $0x8] sm:$0xff]  }
0x1b08   :  { %5028 = vmatpush3.bf16.msra.mxu0 %v5095_v48 }
0x1b09   :  { %4205 = vrot.lane.b32.xlu1 %v4200_v27, %s5349_s4 }
0x1b3c   :  { %v4329_v0 = vpop.permute.xlu0 %4328 }
0x1b3d   :  { %v4334_v40 = vadd.f32 %v4329_v0, %v6160_v41 }
0x1b3f   :  { %5328 = vtanh.f32 %v4334_v40 }
0x1b40   :  { %v4331_v4 = vpop.permute.xlu0 %4330 }
0x1b41   :  { %v4335_v54 = vadd.f32 %v4331_v4, %v6164_v19  ;;  %v4338_v19 = vsub.f32 1.0, %v5317_v22  ;;  %v4438_v22 = vrot.slane %v6228_v6, %v6314_v47 }
0x1b43   :  { %5330 = vtanh.f32 %v4335_v54 }
0x1b49   :  { %v5329_v14 = vpop.eup %5328 }
0x1b4a   :  { %4342 = vrot.lane.b32.xlu0 %v5329_v14, %s5352_s21 }
0x1b4d   :  { %v5331_v24 = vpop.eup %5330 }
0x1b4e   :  { %4344 = vrot.lane.b32.xlu0 %v5331_v24, %s5352_s21 }
0x1b77   :  { %v4204_v60 = vpop.permute.xlu1 %4203 }
0x1b78   :  { %v4209_v35 = vadd.f32 %v4204_v60, %v6139_v57  ;;  %v4856_v57 = vrot.slane %v6477_v39, 9 }
0x1b7a   :  { %5332 = vtanh.f32 %v4209_v35  ;;  %v4359_v44 = vmul.f32 %v5319_v62, %v4856_v57 }
0x1b7b   :  { %v4206_v59 = vpop.permute.xlu1 %4205 }
0x1b7c   :  { %v4210_v11 = vadd.f32 %v4206_v59, %v6136_v33  ;;  %v4418_v33 = vrot.slane %v6390_v34, %v6314_v47 }
0x1b7e   :  { %5334 = vtanh.f32 %v4210_v11 }
0x1b84   :  { %v5333_v41 = vpop.eup %5332 }
0x1b85   :  { %4217 = vrot.lane.b32.xlu1 %v5333_v41, %s5352_s21 }
0x1b88   :  { %v5335_v32 = vpop.eup %5334 }
0x1b89   :  { %4219 = vrot.lane.b32.xlu1 %v5335_v32, %s5352_s21 }
0x1bbc   :  { %v4343_v52 = vpop.permute.xlu0 %4342 }
0x1bbd   :  { %v4348_v5 = vmul.f32 %v4343_v52, %v4338_v19 }
0x1bbf   :  { %v4360_v49 = vadd.f32 %v4358_v21, %v4348_v5 }
0x1bc0   :  { %v4345_v43 = vpop.permute.xlu0 %4344 }
0x1bc1   :  { %v4455_v15 = vsel %vm389_vm7, %v4360_v49, %v6479_v26  ;;  %v4349_v45 = vmul.f32 %v4345_v43, %v4339_v9  ;;  %v4432_v26 = vrot.slane %v6292_v53, %v6404_v58 }
0x1bc2   :  { %v4457_v51 = vsel %vm65_vm0, %v4455_v15, %v4418_v33 }
0x1bc3   :  { %v4361_v29 = vadd.f32 %v4359_v44, %v4349_v45  ;;  %v4459_v34 = vsel %vm4408_vm13, %v4457_v51, %v4428_v28 }
0x1bc4   :  { %v4461_v13 = vsel %vm1314_vm11, %v4459_v34, %v4438_v22 }
0x1bc5   :  { %v4456_v62 = vsel %vm389_vm7, %v4361_v29, %v6477_v39  ;;  %v4463_v6 = vsel %vm87_vm1, %v4461_v13, %v4448_v56  ;;  %v4213_v39 = vsub.f32 1.0, %v6531_v31  ;;  %v4857_v56 = vld [vmem:[%s6648_s16] ss:$0 sm:$0xff] }
0x1bc6   :  { %v4458_v1 = vsel %vm65_vm0, %v4456_v62, %v4422_v16  ;;  %4475 = vrot.lane.b32.xlu1 %v4463_v6, %s5354_s12  ;;  %v4543_v29 = vcombine.high %v4857_v56, %v4857_v56  ;;  %v4550_v34 = vrot.slane %v4857_v56, %v5527_v12 }
0x1bc7   :  { %v4460_v18 = vsel %vm4408_vm13, %v4458_v1, %v4432_v26 }
0x1bc8   :  { %v4462_v63 = vsel %vm1314_vm11, %v4460_v18, %v4442_v20  ;;  %v4557_v16 = vrot.slane %v4543_v29, %v5527_v12  ;;  %v4558_v13 = vcombine.high %v4550_v34, %v4550_v34 }
0x1bc9   :  { %v4464_v53 = vsel %vm87_vm1, %v4462_v63, %v4452_v23 }
0x1bca   :  { %v4611_v26 = vcombine.low %v4550_v34, %v4558_v13  ;;  %v4612_v62 = vcombine.low %v4557_v16, %v4550_v34 }
0x1bcc   :  { %v4619_v6 = vrot.slane %v4611_v26, %v5527_v12  ;;  %v4626_v20 = vrot.slane %v4612_v62, %v5527_v12 }
0x1bce   :  { %v4627_v1 = vcombine.low %v4619_v6, %v4626_v20 }
0x1bf7   :  { %v4218_v46 = vpop.permute.xlu1 %4217 }
0x1bf8   :  { %v4223_v47 = vmul.f32 %v4218_v46, %v4213_v39 }
0x1bfa   :  { %v4233_v7 = vadd.f32 %v4231_v38, %v4223_v47 }
0x1bfb   :  { %v4220_v37 = vpop.permute.xlu1 %4219 }
0x1bfc   :  { %v4397_v50 = vrot.slane %v4233_v7, %v6404_v58  ;;  %v4224_v27 = vmul.f32 %v4220_v37, %v4214_v42 }
0x1bfe   :  { %v4234_v0 = vadd.f32 %v4232_v30, %v4224_v27  ;;  %v4413_v40 = vsel %vm87_vm1, %v6503_v61, %v4397_v50 }
0x1c00   :  { %v4401_v55 = vrot.slane %v4234_v0, %v6404_v58 }
0x1c02   :  { %v4414_v31 = vsel %vm87_vm1, %v6507_v25, %v4401_v55 }
0x1c03   :  { %v5068_v4 = vpack.i.bf16 %v4414_v31, %v4413_v40 }
0x1c05   :  { %5069 = vrot.lane.b32.xlu0 %v5068_v4, %s5352_s21 }
0x1c09   :  { %4477 = vrot.lane.b32.xlu0 %v4464_v53, %s5354_s12 }
0x1c38   :  { %v4476_v54 = vpop.permute.xlu1 %4475 }
0x1c77   :  { %v5070_v58 = vpop.permute.xlu0 %5069 }
0x1c78   :  { %v5071_v61 = vunpack.i.l.bf16 %v5070_v58  ;;  %v5072_v25 = vunpack.i.h.bf16 %v5070_v58 }
0x1c7a   :  { %v4481_v14 = vsel %vm102_vm4, %v5071_v61, %v4476_v54 }
0x1c7b   :  { %v4487_v24 = vpack.c.bf16 %v4481_v14, %v4481_v14  ;;  %v4478_v60 = vpop.permute.xlu0 %4477 }
0x1c7c   :  { %v4482_v35 = vsel %vm102_vm4, %v5072_v25, %v4478_v60 }
0x1c7d   :  { %v4503_v59 = vrot.slane %v4487_v24, %v5480_v36  ;;  %v4488_v11 = vpack.c.bf16 %v4482_v35, %v4482_v35 }
0x1c7f   :  { %v4504_v41 = vcombine.high %v4503_v59, %v4503_v59  ;;  %v4511_v32 = vrot.slane %v4503_v59, %v5480_v36  ;;  %v4526_v19 = vrot.slane %v4488_v11, %v5480_v36 }
0x1c81   :  { %v4518_v2 = vrot.slane %v4504_v41, %v5480_v36  ;;  %v4519_v17 = vcombine.high %v4511_v32, %v4511_v32  ;;  %v4527_v52 = vcombine.high %v4526_v19, %v4526_v19  ;;  %v4534_v21 = vrot.slane %v4526_v19, %v5480_v36 }
0x1c83   :  { %v4559_v5 = vcombine.low %v4511_v32, %v4518_v2  ;;  %v4541_v49 = vrot.slane %v4527_v52, %v5480_v36  ;;  %v4542_v9 = vcombine.high %v4534_v21, %v4534_v21  ;;  %v4560_v57 = vcombine.low %v4519_v17, %v4534_v21 }
0x1c85   :  { %v4561_v33 = vcombine.low %v4541_v49, %v4542_v9  ;;  %v4568_v43 = vrot.slane %v4559_v5, %v5480_v36  ;;  %v4575_v28 = vrot.slane %v4560_v57, %v5480_v36 }
0x1c87   :  { %v4582_v15 = vrot.slane %v4561_v33, %v5480_v36  ;;  %v4583_v44 = vcombine.low %v4568_v43, %v4575_v28 }
0x1c89   :  { %v4590_v45 = vrot.slane %v4583_v44, %v5480_v36  ;;  %v4597_v22 = vrot.slane %v4582_v15, %v5480_v36  ;;  %v4628_v36 = vcombine.low %v4558_v13, %v4557_v16 }
0x1c8b   :  { %v4598_v51 = vcombine.low %v4590_v45, %v4597_v22  ;;  %v4635_v23 = vrot.slane %v4628_v36, %v5527_v12 }
0x1c8d   :  { %5030 = vmatmul.mubr.msk.bf16.vlgmr.msra.gmra.mrb[48].mxu0 %vm263_vm6, %v4598_v51 }
0x1d60   :  { %v4675_v18 = vpop.f32.mrb[48].mxu0 }
0x1d61   :  { %v4676_v63 = vadd.f32 %v4675_v18, %v4627_v1  ;;  %v5031_v53 = vpop.f32.mrb[49].mxu0 }
0x1d62   :  { %v4678_v39 = vpop.f32.mrb[50].mxu0 }
0x1d63   :  { %v4684_v3 = vcombine.high %v4676_v63, %v4676_v63  ;;  %v4691_v46 = vrot.slane %v4676_v63, %v5527_v12  ;;  %v4679_v38 = vadd.f32 %v4678_v39, %v4635_v23  ;;  %v5032_v47 = vpop.f32.mrb[51].mxu0 }
0x1d65   :  { %v4698_v7 = vrot.slane %v4684_v3, %v5527_v12  ;;  %v4699_v42 = vcombine.high %v4691_v46, %v4691_v46  ;;  %v4707_v10 = vrot.slane %v4679_v38, %v5527_v12 }
0x1d67   :  { %v4709_v37 = vcombine.low %v4691_v46, %v4699_v42  ;;  %v4700_v50 = vcombine.high %v4698_v7, %v4698_v7  ;;  %v4708_v30 = vcombine.high %v4707_v10, %v4707_v10  ;;  %v4723_v0 = vrot.slane %v4698_v7, %v5527_v12 }
0x1d69   :  { %v4716_v27 = vrot.slane %v4709_v37, %v5527_v12  ;;  %v4725_v40 = vcombine.low %v4700_v50, %v4707_v10  ;;  %v4739_v4 = vrot.slane %v4708_v30, %v5527_v12 }
0x1d6b   :  { %v4724_v55 = vcombine.low %v4716_v27, %v4723_v0  ;;  %v4732_v31 = vrot.slane %v4725_v40, %v5527_v12 }
0x1d6d   :  { %4744 = vst.msk [vmem:[%s6649_s17] sm:$0x3f] %vm4743_vm14, %v4724_v55  ;;  %v4740_v8 = vcombine.low %v4732_v31, %v4739_v4 }
0x1d6f   :  { %4745 = vst.msk [vmem:[%s6649_s17 + $0x8] sm:$0x3f] %vm4743_vm14, %v4740_v8 }

</bundles_post_ra>
